<compile_context>
chip_gen: v6e
topology: v6e:2x2x1
jax: 0.10.0
libtpu: 0.0.40
codegen_flags: <defaults>
</compile_context>

<pallas_src>
import math

import numpy as np
import jax
import jax.numpy as jnp
from jax import lax
from jax.experimental import pallas as pl
from jax.experimental.pallas import tpu as pltpu

# ------------------------- scaled, self-consistent config ----------------------
BATCH = 8                         # also the baseline-transformer sequence length
SIG_LEN = 64                      # original 2000 (signal length == baseline d_model)
NFFT = 32                         # original 512
WIN_LEN = 16                      # original nperseg=64
NOVERLAP = 7                      # original 32
HOP = WIN_LEN - NOVERLAP          # 9
F_KEEP = 8                        # original 205 kept bins
T_FRAMES = 1 + SIG_LEN // HOP     # 8 frames (center=True, reflect pad)
NHEAD = 4
NUM_LAYERS = 2                    # original 4
DIM_FF = 64                       # original 512
D = SIG_LEN                       # d_model of every branch
SEQ = BATCH                       # token count of every branch
HD = D // NHEAD
SCALE = 1.0 / math.sqrt(HD)
LN_EPS = 1e-5
NBRANCH = 3                       # baseline, row, column

assert BATCH == F_KEEP == T_FRAMES == SEQ, "cat(dim=1) requires equal leading dims"
assert BATCH * T_FRAMES == D and D % NHEAD == 0
assert DIM_FF == D, "uniform (D,D) weight slab requires dim_feedforward == d_model"

# ------------------------- packed-slab index bookkeeping ------------------------
L = NUM_LAYERS
# matrix slab (NBRANCH, NW, D, D)
IDX_PRE_IN_W = 0
IDX_PRE_OUT_W = 1
ENC_W_BASE = 2                    # per layer (+6*l): [WQ, WK, WV, WO, W1, W2]
DEC_W_BASE = 2 + 6 * L            # per layer (+10*l): [SAQ,SAK,SAV,SAO, CAQ,CAK,CAV,CAO, W1, W2]
IDX_OUT_W = 2 + 6 * L + 10 * L    # post_w (or identity) folded with fc_w block
NW = IDX_OUT_W + 1

# vector slab (NBRANCH, NV, 1, D)
IDX_PRE_IN_B = 0
IDX_PRE_OUT_B = 1
ENC_V_BASE = 2                    # per layer (+10*l): [BQ,BK,BV,BO,B1,B2,LN1G,LN1B,LN2G,LN2B]
DEC_V_BASE = 2 + 10 * L           # per layer (+16*l):
                                  # [SABQ,SABK,SABV,SABO, CABQ,CABK,CABV,CABO, B1,B2,
                                  #  LN1G,LN1B,LN2G,LN2B,LN3G,LN3B]
IDX_ENC_NORM_G = 2 + 10 * L + 16 * L
IDX_ENC_NORM_B = IDX_ENC_NORM_G + 1
IDX_DEC_NORM_G = IDX_ENC_NORM_G + 2
IDX_DEC_NORM_B = IDX_ENC_NORM_G + 3
IDX_OUT_B = IDX_ENC_NORM_G + 4
NV = IDX_OUT_B + 1


def enc_w(l, j):
    return ENC_W_BASE + 6 * l + j


def dec_w(l, j):
    return DEC_W_BASE + 10 * l + j


def enc_v(l, j):
    return ENC_V_BASE + 10 * l + j


def dec_v(l, j):
    return DEC_V_BASE + 16 * l + j


# ------------------- host-side folded STFT / DFT constant slab -------------------
def _make_dft_slab():
    """Fold reflect-pad + framing + (rect window padded to NFFT) + DFT of the kept bins
    into per-branch (SIG_LEN, F*T) matrices so row/col tokens are plain matmuls of x.

    slab[1] = (re, im) with columns ordered f*T + t   (row-token branch)
    slab[2] = (re, im) with columns ordered t*F + f   (col-token branch)
    slab[0] is unused (baseline branch uses x directly)."""
    assert F_KEEP * T_FRAMES == SIG_LEN
    Ls = SIG_LEN
    pad = NFFT // 2
    # reflect-pad source index for every padded position (matches torch/np 'reflect')
    j = np.arange(Ls + 2 * pad)
    k = j - pad
    src = np.where(k < 0, -k, np.where(k >= Ls, 2 * (Ls - 1) - k, k))
    # rectangular window of WIN_LEN centered inside NFFT (torch.stft default window)
    lpad = (NFFT - WIN_LEN) // 2
    win = np.zeros((NFFT,), np.float64)
    win[lpad:lpad + WIN_LEN] = 1.0
    n = np.arange(NFFT, dtype=np.float64)
    f = np.arange(F_KEEP, dtype=np.float64)
    ang = 2.0 * np.pi * np.outer(f, n) / NFFT
    dre = np.cos(ang) * win[None, :]              # (F, NFFT)
    dim = -np.sin(ang) * win[None, :]             # (F, NFFT)
    # gather matrix: frame t, tap n  ->  original sample index
    G = np.zeros((T_FRAMES, NFFT, Ls), np.float64)
    for t in range(T_FRAMES):
        for nn in range(NFFT):
            G[t, nn, src[t * HOP + nn]] += 1.0
    cre = np.einsum("fn,tnl->ftl", dre, G)        # re[b,f,t] = sum_l x[b,l]*cre[f,t,l]
    cim = np.einsum("fn,tnl->ftl", dim, G)
    row_re = np.transpose(cre, (2, 0, 1)).reshape(Ls, F_KEEP * T_FRAMES)
    row_im = np.transpose(cim, (2, 0, 1)).reshape(Ls, F_KEEP * T_FRAMES)
    col_re = np.transpose(cre, (2, 1, 0)).reshape(Ls, T_FRAMES * F_KEEP)
    col_im = np.transpose(cim, (2, 1, 0)).reshape(Ls, T_FRAMES * F_KEEP)
    slab = np.zeros((NBRANCH, 2, Ls, SIG_LEN), np.float32)
    slab[1, 0], slab[1, 1] = row_re, row_im
    slab[2, 0], slab[2, 1] = col_re, col_im
    return jnp.asarray(slab)


_DFT_SLAB = _make_dft_slab()


# --------------------------------- fused kernel ----------------------------------
def _fused_kernel(x_ref, dft_ref, w_ref, v_ref, out_ref, src_scr, tgt_scr):
    """One grid step == one whole nn.Transformer branch (token build, encoder stack,
    decoder stack, final norms, folded post+fc projection), fully resident in VMEM."""
    f32 = jnp.float32
    branch = pl.program_id(0)

    def W(i):                      # (D, D) weight matrix i of this branch
        return w_ref[0, i]

    def V(i):                      # (1, D) bias / LN vector i of this branch
        return v_ref[0, i]

    def layernorm(y, g, b):
        mu = jnp.mean(y, axis=-1, keepdims=True)
        var = jnp.mean(jnp.square(y - mu), axis=-1, keepdims=True)   # biased (PyTorch)
        return (y - mu) * lax.rsqrt(var + LN_EPS) * g + b

    def mha(q_in, kv_in, wi, vi):
        # wi/vi: base slab index of [WQ, WK, WV, WO] / [BQ, BK, BV, BO]
        q = jnp.dot(q_in, W(wi + 0), preferred_element_type=f32) + V(vi + 0)
        k = jnp.dot(kv_in, W(wi + 1), preferred_element_type=f32) + V(vi + 1)
        v = jnp.dot(kv_in, W(wi + 2), preferred_element_type=f32) + V(vi + 2)
        wo = W(wi + 3)
        acc = None
        for h in range(NHEAD):
            sl = slice(h * HD, (h + 1) * HD)
            s = SCALE * lax.dot_general(q[:, sl], k[:, sl],
                                        (((1,), (1,)), ((), ())),
                                        preferred_element_type=f32)
            s = s - jnp.max(s, axis=-1, keepdims=True)
            p = jnp.exp(s)
            p = p / jnp.sum(p, axis=-1, keepdims=True)        # exact divide (review)
            ctx = jnp.dot(p, v[:, sl], preferred_element_type=f32)
            contrib = jnp.dot(ctx, wo[sl, :], preferred_element_type=f32)
            acc = contrib if acc is None else acc + contrib
        return acc + V(vi + 3)

    def ff(y, w1i, b1i, w2i, b2i):
        h1 = jnp.maximum(jnp.dot(y, W(w1i), preferred_element_type=f32) + V(b1i), 0.0)
        return jnp.dot(h1, W(w2i), preferred_element_type=f32) + V(b2i)

    xv = x_ref[...]                                              # (SEQ, D)

    # ----- token build, gated per branch (pl.when) -----
    @pl.when(branch == 0)
    def _():
        # baseline: src = fc_in(x), tgt = fc_out(x)   (both applied BEFORE the transformer)
        src_scr[...] = jnp.dot(xv, W(IDX_PRE_IN_W), preferred_element_type=f32) + V(IDX_PRE_IN_B)
        tgt_scr[...] = jnp.dot(xv, W(IDX_PRE_OUT_W), preferred_element_type=f32) + V(IDX_PRE_OUT_B)

    @pl.when(branch != 0)
    def _():
        # row/col branches: |STFT| magnitude via folded DFT matmuls, then relayout
        # (B, o*8+i) -> (o, b*8+i)  (o = freq for row branch, frame for col branch).
        re = jnp.dot(xv, dft_ref[0, 0], preferred_element_type=f32)
        im = jnp.dot(xv, dft_ref[0, 1], preferred_element_type=f32)
        mag = jnp.sqrt(re * re + im * im)                        # (BATCH, SIG_LEN)
        for o in range(SEQ):
            for b in range(BATCH):
                src_scr[o:o + 1, b * 8:(b + 1) * 8] = mag[b:b + 1, o * 8:(o + 1) * 8]
        tgt_scr[...] = src_scr[...]                              # transformer(tokens, tokens)

    src = src_scr[...]
    tgt = tgt_scr[...]

    # ----- encoder stack -----
    mem = src
    for l in range(NUM_LAYERS):
        a = mha(mem, mem, enc_w(l, 0), enc_v(l, 0))
        mem = layernorm(mem + a, V(enc_v(l, 6)), V(enc_v(l, 7)))
        fo = ff(mem, enc_w(l, 4), enc_v(l, 4), enc_w(l, 5), enc_v(l, 5))
        mem = layernorm(mem + fo, V(enc_v(l, 8)), V(enc_v(l, 9)))
    mem = layernorm(mem, V(IDX_ENC_NORM_G), V(IDX_ENC_NORM_B))   # encoder final norm

    # ----- decoder stack -----
    y = tgt
    for l in range(NUM_LAYERS):
        a = mha(y, y, dec_w(l, 0), dec_v(l, 0))                  # self-attn
        y = layernorm(y + a, V(dec_v(l, 10)), V(dec_v(l, 11)))
        c = mha(y, mem, dec_w(l, 4), dec_v(l, 4))                # cross-attn
        y = layernorm(y + c, V(dec_v(l, 12)), V(dec_v(l, 13)))
        fo = ff(y, dec_w(l, 8), dec_v(l, 8), dec_w(l, 9), dec_v(l, 9))
        y = layernorm(y + fo, V(dec_v(l, 14)), V(dec_v(l, 15)))
    y = layernorm(y, V(IDX_DEC_NORM_G), V(IDX_DEC_NORM_B))       # decoder final norm

    # ----- folded (post_w @ fc_w_block) projection: this branch's partial fc output -----
    out_ref[0] = jnp.dot(y, W(IDX_OUT_W), preferred_element_type=f32) + V(IDX_OUT_B)


# ----------------------------------- wrapper -------------------------------------
def multi_combination_forward(x, params):
    partial = pl.pallas_call(
        _fused_kernel,
        grid=(NBRANCH,),
        in_specs=[
            pl.BlockSpec((BATCH, SIG_LEN), lambda b: (0, 0)),                 # x (shared)
            pl.BlockSpec((1, 2, SIG_LEN, SIG_LEN), lambda b: (b, 0, 0, 0)),   # DFT slab
            pl.BlockSpec((1, NW, D, D), lambda b: (b, 0, 0, 0)),              # matrix slab
            pl.BlockSpec((1, NV, 1, D), lambda b: (b, 0, 0, 0)),              # vector slab
        ],
        out_specs=pl.BlockSpec((1, BATCH, SIG_LEN), lambda b: (b, 0, 0)),
        out_shape=jax.ShapeDtypeStruct((NBRANCH, BATCH, SIG_LEN), jnp.float32),
        scratch_shapes=[pltpu.VMEM((SEQ, D), jnp.float32),    # src tokens
                        pltpu.VMEM((SEQ, D), jnp.float32)],   # tgt tokens
        compiler_params=pltpu.CompilerParams(dimension_semantics=("parallel",)),
    )(x, _DFT_SLAB, params["w"], params["v"])
    # fc(cat([baseline, row, col], dim=1)) == sum of the per-branch partials (+ bias,
    # already folded into branch 0's partial) — a single tiny XLA reduce.
    return jnp.sum(partial, axis=0)


# -------------------------------- parameter init ---------------------------------
def init_params(key):
    kit = iter(jax.random.split(key, 512))

    def nrm(shape, scale=0.05):
        return scale * jax.random.normal(next(kit), shape, jnp.float32)

    def zeros(shape):
        return jnp.zeros(shape, jnp.float32)

    def ones(shape):
        return jnp.ones(shape, jnp.float32)

    # final combining fc (6000->2000 in the original; 3D->SIG_LEN here) and the
    # per-branch post projections it gets folded with.
    fc_w = nrm((3 * SIG_LEN, SIG_LEN))
    fc_b = nrm((1, SIG_LEN))
    post_w = {1: nrm((D, SIG_LEN)), 2: nrm((D, SIG_LEN))}   # row/col fc_out
    post_b = {1: nrm((1, SIG_LEN)), 2: nrm((1, SIG_LEN))}

    w_all, v_all = [], []
    for k in range(NBRANCH):
        Wl = [None] * NW
        Vl = [None] * NV
        # baseline-only fc_in / fc_out (applied before its transformer); never read
        # for branches 1/2 (pl.when-gated), so keep zeros there.
        if k == 0:
            Wl[IDX_PRE_IN_W], Vl[IDX_PRE_IN_B] = nrm((D, D)), nrm((1, D))
            Wl[IDX_PRE_OUT_W], Vl[IDX_PRE_OUT_B] = nrm((D, D)), nrm((1, D))
        else:
            Wl[IDX_PRE_IN_W], Vl[IDX_PRE_IN_B] = zeros((D, D)), zeros((1, D))
            Wl[IDX_PRE_OUT_W], Vl[IDX_PRE_OUT_B] = zeros((D, D)), zeros((1, D))
        for l in range(NUM_LAYERS):
            # encoder layer: WQ WK WV WO W1 W2 ; BQ BK BV BO B1 B2 LN1 LN2
            for j in range(4):
                Wl[enc_w(l, j)] = nrm((D, D))
                Vl[enc_v(l, j)] = nrm((1, D))
            Wl[enc_w(l, 4)], Vl[enc_v(l, 4)] = nrm((D, DIM_FF)), nrm((1, DIM_FF))
            Wl[enc_w(l, 5)], Vl[enc_v(l, 5)] = nrm((DIM_FF, D)), nrm((1, D))
            Vl[enc_v(l, 6)], Vl[enc_v(l, 7)] = ones((1, D)), zeros((1, D))
            Vl[enc_v(l, 8)], Vl[enc_v(l, 9)] = ones((1, D)), zeros((1, D))
            # decoder layer: SA(QKVO) CA(QKVO) W1 W2 ; biases + 3 LayerNorms
            for j in range(8):
                Wl[dec_w(l, j)] = nrm((D, D))
                Vl[dec_v(l, j)] = nrm((1, D))
            Wl[dec_w(l, 8)], Vl[dec_v(l, 8)] = nrm((D, DIM_FF)), nrm((1, DIM_FF))
            Wl[dec_w(l, 9)], Vl[dec_v(l, 9)] = nrm((DIM_FF, D)), nrm((1, D))
            for j in (10, 12, 14):
                Vl[dec_v(l, j)] = ones((1, D))
            for j in (11, 13, 15):
                Vl[dec_v(l, j)] = zeros((1, D))
        # final encoder/decoder norms of nn.Transformer
        Vl[IDX_ENC_NORM_G], Vl[IDX_ENC_NORM_B] = ones((1, D)), zeros((1, D))
        Vl[IDX_DEC_NORM_G], Vl[IDX_DEC_NORM_B] = ones((1, D)), zeros((1, D))
        # fold the branch post projection into the combining fc (review item 4):
        #   contribution_k = y_k @ (post_w_k @ fc_w_k) + (post_b_k @ fc_w_k)
        fc_blk = fc_w[k * SIG_LEN:(k + 1) * SIG_LEN, :]
        if k == 0:          # baseline has no post projection; add fc bias exactly once
            Wl[IDX_OUT_W], Vl[IDX_OUT_B] = fc_blk, fc_b
        else:
            Wl[IDX_OUT_W] = post_w[k] @ fc_blk
            Vl[IDX_OUT_B] = post_b[k] @ fc_blk
        w_all.append(jnp.stack(Wl))                       # (NW, D, D)
        v_all.append(jnp.stack(Vl))                       # (NV, 1, D)

    return {"w": jnp.stack(w_all),                        # (NBRANCH, NW, D, D)
            "v": jnp.stack(v_all)}                        # (NBRANCH, NV, 1, D)


# ------------------------------------- main --------------------------------------
if __name__ == "__main__":
    key = jax.random.PRNGKey(0)
    kx, kp = jax.random.split(key)
    x = jax.random.normal(kx, (BATCH, SIG_LEN), dtype=jnp.float32)
    params = init_params(kp)

    fwd = jax.jit(multi_combination_forward)
    out = fwd(x, params)
    jax.block_until_ready(out)
    assert out.shape == (BATCH, SIG_LEN) and out.dtype == jnp.float32
    assert bool(jnp.all(jnp.isfinite(out)))
    print("KERNEL_OK")
</pallas_src>

<mosaic_0001>
module attributes {stable_mosaic.version = 11 : i64} {
  func.func @_fused_kernel(%arg0: i32, %arg1: memref<8x64xf32, #tpu.memory_space<vmem>>, %arg2: memref<1x2x64x64xf32, #tpu.memory_space<vmem>>, %arg3: memref<1x35x64x64xf32, #tpu.memory_space<vmem>>, %arg4: memref<1x59x1x64xf32, #tpu.memory_space<vmem>>, %arg5: memref<1x8x64xf32, #tpu.memory_space<vmem>>, %arg6: memref<8x64xf32, #tpu.memory_space<vmem>>, %arg7: memref<8x64xf32, #tpu.memory_space<vmem>>) attributes {dimension_semantics = [#tpu.dimension_semantics<parallel>], iteration_bounds = array<i64: 3>, scalar_prefetch = 0 : i64, scratch_operands = 2 : i64, tpu.core_type = #tpu.core_type<tc>, window_params = [{pipeline_mode = #tpu.pipeline_mode<synchronous>, transform_indices = @transform_0, window_bounds = array<i64: 8, 64>}, {transform_indices = @transform_1, window_bounds = array<i64: 1, 2, 64, 64>}, {transform_indices = @transform_2, window_bounds = array<i64: 1, 35, 64, 64>}, {transform_indices = @transform_3, window_bounds = array<i64: 1, 59, 1, 64>}, {transform_indices = @transform_4, window_bounds = array<i64: 1, 8, 64>}]} {
    %c0 = arith.constant 0 : index
    %c0_0 = arith.constant 0 : index
    %0 = vector.load %arg1[%c0, %c0_0] : memref<8x64xf32, #tpu.memory_space<vmem>>, vector<8x64xf32>
    %c0_i32 = arith.constant 0 : i32
    %1 = arith.cmpi eq, %arg0, %c0_i32 : i32
    %2 = arith.extui %1 : i1 to i32
    %c0_i32_1 = arith.constant 0 : i32
    %3 = arith.cmpi ne, %2, %c0_i32_1 : i32
    scf.if %3 {
      %c0_548 = arith.constant 0 : index
      %c0_549 = arith.constant 0 : index
      %c0_550 = arith.constant 0 : index
      %c0_551 = arith.constant 0 : index
      %1017 = vector.load %arg3[%c0_548, %c0_549, %c0_550, %c0_551] : memref<1x35x64x64xf32, #tpu.memory_space<vmem>>, vector<1x1x64x64xf32>
      %1018 = vector.shape_cast %1017 : vector<1x1x64x64xf32> to vector<64x64xf32>
      %cst_552 = arith.constant dense<0.000000e+00> : vector<8x64xf32>
      %1019 = tpu.matmul %0, %1018, %cst_552 {dimension_numbers = #tpu.dot_dimension_numbers<[1], [0], [0], [1], [0, 0, 1, 1], [], []>} : vector<8x64xf32>, vector<64x64xf32>, vector<8x64xf32> -> vector<8x64xf32>
      %c0_553 = arith.constant 0 : index
      %c0_554 = arith.constant 0 : index
      %c0_555 = arith.constant 0 : index
      %c0_556 = arith.constant 0 : index
      %1020 = vector.load %arg4[%c0_553, %c0_554, %c0_555, %c0_556] : memref<1x59x1x64xf32, #tpu.memory_space<vmem>>, vector<1x1x1x64xf32>
      %1021 = vector.shape_cast %1020 : vector<1x1x1x64xf32> to vector<1x64xf32>
      %1022 = vector.broadcast %1021 : vector<1x64xf32> to vector<8x64xf32>
      %1023 = arith.addf %1019, %1022 : vector<8x64xf32>
      %c0_557 = arith.constant 0 : index
      %c0_558 = arith.constant 0 : index
      %1024 = vector.load %arg6[%c0_557, %c0_558] : memref<8x64xf32, #tpu.memory_space<vmem>>, vector<8x64xf32>
      tpu.vector_store %arg6[%c0_557, %c0_558], %1023 {strides = array<i32>} : memref<8x64xf32, #tpu.memory_space<vmem>>, vector<8x64xf32>,
      %c0_559 = arith.constant 0 : index
      %c1 = arith.constant 1 : index
      %c0_560 = arith.constant 0 : index
      %c0_561 = arith.constant 0 : index
      %1025 = vector.load %arg3[%c0_559, %c1, %c0_560, %c0_561] : memref<1x35x64x64xf32, #tpu.memory_space<vmem>>, vector<1x1x64x64xf32>
      %1026 = vector.shape_cast %1025 : vector<1x1x64x64xf32> to vector<64x64xf32>
      %cst_562 = arith.constant dense<0.000000e+00> : vector<8x64xf32>
      %1027 = tpu.matmul %0, %1026, %cst_562 {dimension_numbers = #tpu.dot_dimension_numbers<[1], [0], [0], [1], [0, 0, 1, 1], [], []>} : vector<8x64xf32>, vector<64x64xf32>, vector<8x64xf32> -> vector<8x64xf32>
      %c0_563 = arith.constant 0 : index
      %c1_564 = arith.constant 1 : index
      %c0_565 = arith.constant 0 : index
      %c0_566 = arith.constant 0 : index
      %1028 = vector.load %arg4[%c0_563, %c1_564, %c0_565, %c0_566] : memref<1x59x1x64xf32, #tpu.memory_space<vmem>>, vector<1x1x1x64xf32>
      %1029 = vector.shape_cast %1028 : vector<1x1x1x64xf32> to vector<1x64xf32>
      %1030 = vector.broadcast %1029 : vector<1x64xf32> to vector<8x64xf32>
      %1031 = arith.addf %1027, %1030 : vector<8x64xf32>
      %c0_567 = arith.constant 0 : index
      %c0_568 = arith.constant 0 : index
      %1032 = vector.load %arg7[%c0_567, %c0_568] : memref<8x64xf32, #tpu.memory_space<vmem>>, vector<8x64xf32>
      tpu.vector_store %arg7[%c0_567, %c0_568], %1031 {strides = array<i32>} : memref<8x64xf32, #tpu.memory_space<vmem>>, vector<8x64xf32>,
    } else {
    }
    %c0_i32_2 = arith.constant 0 : i32
    %4 = arith.cmpi ne, %arg0, %c0_i32_2 : i32
    %5 = arith.extui %4 : i1 to i32
    %c0_i32_3 = arith.constant 0 : i32
    %6 = arith.cmpi ne, %5, %c0_i32_3 : i32
    scf.if %6 {
      %c0_548 = arith.constant 0 : index
      %c0_549 = arith.constant 0 : index
      %c0_550 = arith.constant 0 : index
      %c0_551 = arith.constant 0 : index
      %1017 = vector.load %arg2[%c0_548, %c0_549, %c0_550, %c0_551] : memref<1x2x64x64xf32, #tpu.memory_space<vmem>>, vector<1x1x64x64xf32>
      %1018 = vector.shape_cast %1017 : vector<1x1x64x64xf32> to vector<64x64xf32>
      %cst_552 = arith.constant dense<0.000000e+00> : vector<8x64xf32>
      %1019 = tpu.matmul %0, %1018, %cst_552 {dimension_numbers = #tpu.dot_dimension_numbers<[1], [0], [0], [1], [0, 0, 1, 1], [], []>} : vector<8x64xf32>, vector<64x64xf32>, vector<8x64xf32> -> vector<8x64xf32>
      %c0_553 = arith.constant 0 : index
      %c1 = arith.constant 1 : index
      %c0_554 = arith.constant 0 : index
      %c0_555 = arith.constant 0 : index
      %1020 = vector.load %arg2[%c0_553, %c1, %c0_554, %c0_555] : memref<1x2x64x64xf32, #tpu.memory_space<vmem>>, vector<1x1x64x64xf32>
      %1021 = vector.shape_cast %1020 : vector<1x1x64x64xf32> to vector<64x64xf32>
      %cst_556 = arith.constant dense<0.000000e+00> : vector<8x64xf32>
      %1022 = tpu.matmul %0, %1021, %cst_556 {dimension_numbers = #tpu.dot_dimension_numbers<[1], [0], [0], [1], [0, 0, 1, 1], [], []>} : vector<8x64xf32>, vector<64x64xf32>, vector<8x64xf32> -> vector<8x64xf32>
      %1023 = arith.mulf %1019, %1019 : vector<8x64xf32>
      %1024 = arith.mulf %1022, %1022 : vector<8x64xf32>
      %1025 = arith.addf %1023, %1024 : vector<8x64xf32>
      %1026 = math.sqrt %1025 : vector<8x64xf32>
      %1027 = vector.extract_strided_slice %1026 {offsets = [0, 0], sizes = [1, 8], strides = [1, 1]} : vector<8x64xf32> to vector<1x8xf32>
      %c0_557 = arith.constant 0 : index
      %c0_558 = arith.constant 0 : index
      %1028 = vector.load %arg6[%c0_557, %c0_558] : memref<8x64xf32, #tpu.memory_space<vmem>>, vector<1x8xf32>
      tpu.vector_store %arg6[%c0_557, %c0_558], %1027 {strides = array<i32>} : memref<8x64xf32, #tpu.memory_space<vmem>>, vector<1x8xf32>,
      %1029 = vector.extract_strided_slice %1026 {offsets = [1, 0], sizes = [1, 8], strides = [1, 1]} : vector<8x64xf32> to vector<1x8xf32>
      %c0_559 = arith.constant 0 : index
      %c8_560 = arith.constant 8 : index
      %1030 = vector.load %arg6[%c0_559, %c8_560] : memref<8x64xf32, #tpu.memory_space<vmem>>, vector<1x8xf32>
      tpu.vector_store %arg6[%c0_559, %c8_560], %1029 {strides = array<i32>} : memref<8x64xf32, #tpu.memory_space<vmem>>, vector<1x8xf32>,
      %1031 = vector.extract_strided_slice %1026 {offsets = [2, 0], sizes = [1, 8], strides = [1, 1]} : vector<8x64xf32> to vector<1x8xf32>
      %c0_561 = arith.constant 0 : index
      %c16_562 = arith.constant 16 : index
      %1032 = vector.load %arg6[%c0_561, %c16_562] : memref<8x64xf32, #tpu.memory_space<vmem>>, vector<1x8xf32>
      tpu.vector_store %arg6[%c0_561, %c16_562], %1031 {strides = array<i32>} : memref<8x64xf32, #tpu.memory_space<vmem>>, vector<1x8xf32>,
      %1033 = vector.extract_strided_slice %1026 {offsets = [3, 0], sizes = [1, 8], strides = [1, 1]} : vector<8x64xf32> to vector<1x8xf32>
      %c0_563 = arith.constant 0 : index
      %c24_564 = arith.constant 24 : index
      %1034 = vector.load %arg6[%c0_563, %c24_564] : memref<8x64xf32, #tpu.memory_space<vmem>>, vector<1x8xf32>
      tpu.vector_store %arg6[%c0_563, %c24_564], %1033 {strides = array<i32>} : memref<8x64xf32, #tpu.memory_space<vmem>>, vector<1x8xf32>,
      %1035 = vector.extract_strided_slice %1026 {offsets = [4, 0], sizes = [1, 8], strides = [1, 1]} : vector<8x64xf32> to vector<1x8xf32>
      %c0_565 = arith.constant 0 : index
      %c32_566 = arith.constant 32 : index
      %1036 = vector.load %arg6[%c0_565, %c32_566] : memref<8x64xf32, #tpu.memory_space<vmem>>, vector<1x8xf32>
      tpu.vector_store %arg6[%c0_565, %c32_566], %1035 {strides = array<i32>} : memref<8x64xf32, #tpu.memory_space<vmem>>, vector<1x8xf32>,
      %1037 = vector.extract_strided_slice %1026 {offsets = [5, 0], sizes = [1, 8], strides = [1, 1]} : vector<8x64xf32> to vector<1x8xf32>
      %c0_567 = arith.constant 0 : index
      %c40_568 = arith.constant 40 : index
      %1038 = vector.load %arg6[%c0_567, %c40_568] : memref<8x64xf32, #tpu.memory_space<vmem>>, vector<1x8xf32>
      tpu.vector_store %arg6[%c0_567, %c40_568], %1037 {strides = array<i32>} : memref<8x64xf32, #tpu.memory_space<vmem>>, vector<1x8xf32>,
      %1039 = vector.extract_strided_slice %1026 {offsets = [6, 0], sizes = [1, 8], strides = [1, 1]} : vector<8x64xf32> to vector<1x8xf32>
      %c0_569 = arith.constant 0 : index
      %c48_570 = arith.constant 48 : index
      %1040 = vector.load %arg6[%c0_569, %c48_570] : memref<8x64xf32, #tpu.memory_space<vmem>>, vector<1x8xf32>
      tpu.vector_store %arg6[%c0_569, %c48_570], %1039 {strides = array<i32>} : memref<8x64xf32, #tpu.memory_space<vmem>>, vector<1x8xf32>,
      %1041 = vector.extract_strided_slice %1026 {offsets = [7, 0], sizes = [1, 8], strides = [1, 1]} : vector<8x64xf32> to vector<1x8xf32>
      %c0_571 = arith.constant 0 : index
      %c56_572 = arith.constant 56 : index
      %1042 = vector.load %arg6[%c0_571, %c56_572] : memref<8x64xf32, #tpu.memory_space<vmem>>, vector<1x8xf32>
      tpu.vector_store %arg6[%c0_571, %c56_572], %1041 {strides = array<i32>} : memref<8x64xf32, #tpu.memory_space<vmem>>, vector<1x8xf32>,
      %1043 = vector.extract_strided_slice %1026 {offsets = [0, 8], sizes = [1, 8], strides = [1, 1]} : vector<8x64xf32> to vector<1x8xf32>
      %c1_573 = arith.constant 1 : index
      %c0_574 = arith.constant 0 : index
      %1044 = vector.load %arg6[%c1_573, %c0_574] : memref<8x64xf32, #tpu.memory_space<vmem>>, vector<1x8xf32>
      tpu.vector_store %arg6[%c1_573, %c0_574], %1043 {strides = array<i32>} : memref<8x64xf32, #tpu.memory_space<vmem>>, vector<1x8xf32>,
      %1045 = vector.extract_strided_slice %1026 {offsets = [1, 8], sizes = [1, 8], strides = [1, 1]} : vector<8x64xf32> to vector<1x8xf32>
      %c1_575 = arith.constant 1 : index
      %c8_576 = arith.constant 8 : index
      %1046 = vector.load %arg6[%c1_575, %c8_576] : memref<8x64xf32, #tpu.memory_space<vmem>>, vector<1x8xf32>
      tpu.vector_store %arg6[%c1_575, %c8_576], %1045 {strides = array<i32>} : memref<8x64xf32, #tpu.memory_space<vmem>>, vector<1x8xf32>,
      %1047 = vector.extract_strided_slice %1026 {offsets = [2, 8], sizes = [1, 8], strides = [1, 1]} : vector<8x64xf32> to vector<1x8xf32>
      %c1_577 = arith.constant 1 : index
      %c16_578 = arith.constant 16 : index
      %1048 = vector.load %arg6[%c1_577, %c16_578] : memref<8x64xf32, #tpu.memory_space<vmem>>, vector<1x8xf32>
      tpu.vector_store %arg6[%c1_577, %c16_578], %1047 {strides = array<i32>} : memref<8x64xf32, #tpu.memory_space<vmem>>, vector<1x8xf32>,
      %1049 = vector.extract_strided_slice %1026 {offsets = [3, 8], sizes = [1, 8], strides = [1, 1]} : vector<8x64xf32> to vector<1x8xf32>
      %c1_579 = arith.constant 1 : index
      %c24_580 = arith.constant 24 : index
      %1050 = vector.load %arg6[%c1_579, %c24_580] : memref<8x64xf32, #tpu.memory_space<vmem>>, vector<1x8xf32>
      tpu.vector_store %arg6[%c1_579, %c24_580], %1049 {strides = array<i32>} : memref<8x64xf32, #tpu.memory_space<vmem>>, vector<1x8xf32>,
      %1051 = vector.extract_strided_slice %1026 {offsets = [4, 8], sizes = [1, 8], strides = [1, 1]} : vector<8x64xf32> to vector<1x8xf32>
      %c1_581 = arith.constant 1 : index
      %c32_582 = arith.constant 32 : index
      %1052 = vector.load %arg6[%c1_581, %c32_582] : memref<8x64xf32, #tpu.memory_space<vmem>>, vector<1x8xf32>
      tpu.vector_store %arg6[%c1_581, %c32_582], %1051 {strides = array<i32>} : memref<8x64xf32, #tpu.memory_space<vmem>>, vector<1x8xf32>,
      %1053 = vector.extract_strided_slice %1026 {offsets = [5, 8], sizes = [1, 8], strides = [1, 1]} : vector<8x64xf32> to vector<1x8xf32>
      %c1_583 = arith.constant 1 : index
      %c40_584 = arith.constant 40 : index
      %1054 = vector.load %arg6[%c1_583, %c40_584] : memref<8x64xf32, #tpu.memory_space<vmem>>, vector<1x8xf32>
      tpu.vector_store %arg6[%c1_583, %c40_584], %1053 {strides = array<i32>} : memref<8x64xf32, #tpu.memory_space<vmem>>, vector<1x8xf32>,
      %1055 = vector.extract_strided_slice %1026 {offsets = [6, 8], sizes = [1, 8], strides = [1, 1]} : vector<8x64xf32> to vector<1x8xf32>
      %c1_585 = arith.constant 1 : index
      %c48_586 = arith.constant 48 : index
      %1056 = vector.load %arg6[%c1_585, %c48_586] : memref<8x64xf32, #tpu.memory_space<vmem>>, vector<1x8xf32>
      tpu.vector_store %arg6[%c1_585, %c48_586], %1055 {strides = array<i32>} : memref<8x64xf32, #tpu.memory_space<vmem>>, vector<1x8xf32>,
      %1057 = vector.extract_strided_slice %1026 {offsets = [7, 8], sizes = [1, 8], strides = [1, 1]} : vector<8x64xf32> to vector<1x8xf32>
      %c1_587 = arith.constant 1 : index
      %c56_588 = arith.constant 56 : index
      %1058 = vector.load %arg6[%c1_587, %c56_588] : memref<8x64xf32, #tpu.memory_space<vmem>>, vector<1x8xf32>
      tpu.vector_store %arg6[%c1_587, %c56_588], %1057 {strides = array<i32>} : memref<8x64xf32, #tpu.memory_space<vmem>>, vector<1x8xf32>,
      %1059 = vector.extract_strided_slice %1026 {offsets = [0, 16], sizes = [1, 8], strides = [1, 1]} : vector<8x64xf32> to vector<1x8xf32>
      %c2_589 = arith.constant 2 : index
      %c0_590 = arith.constant 0 : index
      %1060 = vector.load %arg6[%c2_589, %c0_590] : memref<8x64xf32, #tpu.memory_space<vmem>>, vector<1x8xf32>
      tpu.vector_store %arg6[%c2_589, %c0_590], %1059 {strides = array<i32>} : memref<8x64xf32, #tpu.memory_space<vmem>>, vector<1x8xf32>,
      %1061 = vector.extract_strided_slice %1026 {offsets = [1, 16], sizes = [1, 8], strides = [1, 1]} : vector<8x64xf32> to vector<1x8xf32>
      %c2_591 = arith.constant 2 : index
      %c8_592 = arith.constant 8 : index
      %1062 = vector.load %arg6[%c2_591, %c8_592] : memref<8x64xf32, #tpu.memory_space<vmem>>, vector<1x8xf32>
      tpu.vector_store %arg6[%c2_591, %c8_592], %1061 {strides = array<i32>} : memref<8x64xf32, #tpu.memory_space<vmem>>, vector<1x8xf32>,
      %1063 = vector.extract_strided_slice %1026 {offsets = [2, 16], sizes = [1, 8], strides = [1, 1]} : vector<8x64xf32> to vector<1x8xf32>
      %c2_593 = arith.constant 2 : index
      %c16_594 = arith.constant 16 : index
      %1064 = vector.load %arg6[%c2_593, %c16_594] : memref<8x64xf32, #tpu.memory_space<vmem>>, vector<1x8xf32>
      tpu.vector_store %arg6[%c2_593, %c16_594], %1063 {strides = array<i32>} : memref<8x64xf32, #tpu.memory_space<vmem>>, vector<1x8xf32>,
      %1065 = vector.extract_strided_slice %1026 {offsets = [3, 16], sizes = [1, 8], strides = [1, 1]} : vector<8x64xf32> to vector<1x8xf32>
      %c2_595 = arith.constant 2 : index
      %c24_596 = arith.constant 24 : index
      %1066 = vector.load %arg6[%c2_595, %c24_596] : memref<8x64xf32, #tpu.memory_space<vmem>>, vector<1x8xf32>
      tpu.vector_store %arg6[%c2_595, %c24_596], %1065 {strides = array<i32>} : memref<8x64xf32, #tpu.memory_space<vmem>>, vector<1x8xf32>,
      %1067 = vector.extract_strided_slice %1026 {offsets = [4, 16], sizes = [1, 8], strides = [1, 1]} : vector<8x64xf32> to vector<1x8xf32>
      %c2_597 = arith.constant 2 : index
      %c32_598 = arith.constant 32 : index
      %1068 = vector.load %arg6[%c2_597, %c32_598] : memref<8x64xf32, #tpu.memory_space<vmem>>, vector<1x8xf32>
      tpu.vector_store %arg6[%c2_597, %c32_598], %1067 {strides = array<i32>} : memref<8x64xf32, #tpu.memory_space<vmem>>, vector<1x8xf32>,
      %1069 = vector.extract_strided_slice %1026 {offsets = [5, 16], sizes = [1, 8], strides = [1, 1]} : vector<8x64xf32> to vector<1x8xf32>
      %c2_599 = arith.constant 2 : index
      %c40_600 = arith.constant 40 : index
      %1070 = vector.load %arg6[%c2_599, %c40_600] : memref<8x64xf32, #tpu.memory_space<vmem>>, vector<1x8xf32>
      tpu.vector_store %arg6[%c2_599, %c40_600], %1069 {strides = array<i32>} : memref<8x64xf32, #tpu.memory_space<vmem>>, vector<1x8xf32>,
      %1071 = vector.extract_strided_slice %1026 {offsets = [6, 16], sizes = [1, 8], strides = [1, 1]} : vector<8x64xf32> to vector<1x8xf32>
      %c2_601 = arith.constant 2 : index
      %c48_602 = arith.constant 48 : index
      %1072 = vector.load %arg6[%c2_601, %c48_602] : memref<8x64xf32, #tpu.memory_space<vmem>>, vector<1x8xf32>
      tpu.vector_store %arg6[%c2_601, %c48_602], %1071 {strides = array<i32>} : memref<8x64xf32, #tpu.memory_space<vmem>>, vector<1x8xf32>,
      %1073 = vector.extract_strided_slice %1026 {offsets = [7, 16], sizes = [1, 8], strides = [1, 1]} : vector<8x64xf32> to vector<1x8xf32>
      %c2_603 = arith.constant 2 : index
      %c56_604 = arith.constant 56 : index
      %1074 = vector.load %arg6[%c2_603, %c56_604] : memref<8x64xf32, #tpu.memory_space<vmem>>, vector<1x8xf32>
      tpu.vector_store %arg6[%c2_603, %c56_604], %1073 {strides = array<i32>} : memref<8x64xf32, #tpu.memory_space<vmem>>, vector<1x8xf32>,
      %1075 = vector.extract_strided_slice %1026 {offsets = [0, 24], sizes = [1, 8], strides = [1, 1]} : vector<8x64xf32> to vector<1x8xf32>
      %c3_605 = arith.constant 3 : index
      %c0_606 = arith.constant 0 : index
      %1076 = vector.load %arg6[%c3_605, %c0_606] : memref<8x64xf32, #tpu.memory_space<vmem>>, vector<1x8xf32>
      tpu.vector_store %arg6[%c3_605, %c0_606], %1075 {strides = array<i32>} : memref<8x64xf32, #tpu.memory_space<vmem>>, vector<1x8xf32>,
      %1077 = vector.extract_strided_slice %1026 {offsets = [1, 24], sizes = [1, 8], strides = [1, 1]} : vector<8x64xf32> to vector<1x8xf32>
      %c3_607 = arith.constant 3 : index
      %c8_608 = arith.constant 8 : index
      %1078 = vector.load %arg6[%c3_607, %c8_608] : memref<8x64xf32, #tpu.memory_space<vmem>>, vector<1x8xf32>
      tpu.vector_store %arg6[%c3_607, %c8_608], %1077 {strides = array<i32>} : memref<8x64xf32, #tpu.memory_space<vmem>>, vector<1x8xf32>,
      %1079 = vector.extract_strided_slice %1026 {offsets = [2, 24], sizes = [1, 8], strides = [1, 1]} : vector<8x64xf32> to vector<1x8xf32>
      %c3_609 = arith.constant 3 : index
      %c16_610 = arith.constant 16 : index
      %1080 = vector.load %arg6[%c3_609, %c16_610] : memref<8x64xf32, #tpu.memory_space<vmem>>, vector<1x8xf32>
      tpu.vector_store %arg6[%c3_609, %c16_610], %1079 {strides = array<i32>} : memref<8x64xf32, #tpu.memory_space<vmem>>, vector<1x8xf32>,
      %1081 = vector.extract_strided_slice %1026 {offsets = [3, 24], sizes = [1, 8], strides = [1, 1]} : vector<8x64xf32> to vector<1x8xf32>
      %c3_611 = arith.constant 3 : index
      %c24_612 = arith.constant 24 : index
      %1082 = vector.load %arg6[%c3_611, %c24_612] : memref<8x64xf32, #tpu.memory_space<vmem>>, vector<1x8xf32>
      tpu.vector_store %arg6[%c3_611, %c24_612], %1081 {strides = array<i32>} : memref<8x64xf32, #tpu.memory_space<vmem>>, vector<1x8xf32>,
      %1083 = vector.extract_strided_slice %1026 {offsets = [4, 24], sizes = [1, 8], strides = [1, 1]} : vector<8x64xf32> to vector<1x8xf32>
      %c3_613 = arith.constant 3 : index
      %c32_614 = arith.constant 32 : index
      %1084 = vector.load %arg6[%c3_613, %c32_614] : memref<8x64xf32, #tpu.memory_space<vmem>>, vector<1x8xf32>
      tpu.vector_store %arg6[%c3_613, %c32_614], %1083 {strides = array<i32>} : memref<8x64xf32, #tpu.memory_space<vmem>>, vector<1x8xf32>,
      %1085 = vector.extract_strided_slice %1026 {offsets = [5, 24], sizes = [1, 8], strides = [1, 1]} : vector<8x64xf32> to vector<1x8xf32>
      %c3_615 = arith.constant 3 : index
      %c40_616 = arith.constant 40 : index
      %1086 = vector.load %arg6[%c3_615, %c40_616] : memref<8x64xf32, #tpu.memory_space<vmem>>, vector<1x8xf32>
      tpu.vector_store %arg6[%c3_615, %c40_616], %1085 {strides = array<i32>} : memref<8x64xf32, #tpu.memory_space<vmem>>, vector<1x8xf32>,
      %1087 = vector.extract_strided_slice %1026 {offsets = [6, 24], sizes = [1, 8], strides = [1, 1]} : vector<8x64xf32> to vector<1x8xf32>
      %c3_617 = arith.constant 3 : index
      %c48_618 = arith.constant 48 : index
      %1088 = vector.load %arg6[%c3_617, %c48_618] : memref<8x64xf32, #tpu.memory_space<vmem>>, vector<1x8xf32>
      tpu.vector_store %arg6[%c3_617, %c48_618], %1087 {strides = array<i32>} : memref<8x64xf32, #tpu.memory_space<vmem>>, vector<1x8xf32>,
      %1089 = vector.extract_strided_slice %1026 {offsets = [7, 24], sizes = [1, 8], strides = [1, 1]} : vector<8x64xf32> to vector<1x8xf32>
      %c3_619 = arith.constant 3 : index
      %c56_620 = arith.constant 56 : index
      %1090 = vector.load %arg6[%c3_619, %c56_620] : memref<8x64xf32, #tpu.memory_space<vmem>>, vector<1x8xf32>
      tpu.vector_store %arg6[%c3_619, %c56_620], %1089 {strides = array<i32>} : memref<8x64xf32, #tpu.memory_space<vmem>>, vector<1x8xf32>,
      %1091 = vector.extract_strided_slice %1026 {offsets = [0, 32], sizes = [1, 8], strides = [1, 1]} : vector<8x64xf32> to vector<1x8xf32>
      %c4_621 = arith.constant 4 : index
      %c0_622 = arith.constant 0 : index
      %1092 = vector.load %arg6[%c4_621, %c0_622] : memref<8x64xf32, #tpu.memory_space<vmem>>, vector<1x8xf32>
      tpu.vector_store %arg6[%c4_621, %c0_622], %1091 {strides = array<i32>} : memref<8x64xf32, #tpu.memory_space<vmem>>, vector<1x8xf32>,
      %1093 = vector.extract_strided_slice %1026 {offsets = [1, 32], sizes = [1, 8], strides = [1, 1]} : vector<8x64xf32> to vector<1x8xf32>
      %c4_623 = arith.constant 4 : index
      %c8_624 = arith.constant 8 : index
      %1094 = vector.load %arg6[%c4_623, %c8_624] : memref<8x64xf32, #tpu.memory_space<vmem>>, vector<1x8xf32>
      tpu.vector_store %arg6[%c4_623, %c8_624], %1093 {strides = array<i32>} : memref<8x64xf32, #tpu.memory_space<vmem>>, vector<1x8xf32>,
      %1095 = vector.extract_strided_slice %1026 {offsets = [2, 32], sizes = [1, 8], strides = [1, 1]} : vector<8x64xf32> to vector<1x8xf32>
      %c4_625 = arith.constant 4 : index
      %c16_626 = arith.constant 16 : index
      %1096 = vector.load %arg6[%c4_625, %c16_626] : memref<8x64xf32, #tpu.memory_space<vmem>>, vector<1x8xf32>
      tpu.vector_store %arg6[%c4_625, %c16_626], %1095 {strides = array<i32>} : memref<8x64xf32, #tpu.memory_space<vmem>>, vector<1x8xf32>,
      %1097 = vector.extract_strided_slice %1026 {offsets = [3, 32], sizes = [1, 8], strides = [1, 1]} : vector<8x64xf32> to vector<1x8xf32>
      %c4_627 = arith.constant 4 : index
      %c24_628 = arith.constant 24 : index
      %1098 = vector.load %arg6[%c4_627, %c24_628] : memref<8x64xf32, #tpu.memory_space<vmem>>, vector<1x8xf32>
      tpu.vector_store %arg6[%c4_627, %c24_628], %1097 {strides = array<i32>} : memref<8x64xf32, #tpu.memory_space<vmem>>, vector<1x8xf32>,
      %1099 = vector.extract_strided_slice %1026 {offsets = [4, 32], sizes = [1, 8], strides = [1, 1]} : vector<8x64xf32> to vector<1x8xf32>
      %c4_629 = arith.constant 4 : index
      %c32_630 = arith.constant 32 : index
      %1100 = vector.load %arg6[%c4_629, %c32_630] : memref<8x64xf32, #tpu.memory_space<vmem>>, vector<1x8xf32>
      tpu.vector_store %arg6[%c4_629, %c32_630], %1099 {strides = array<i32>} : memref<8x64xf32, #tpu.memory_space<vmem>>, vector<1x8xf32>,
      %1101 = vector.extract_strided_slice %1026 {offsets = [5, 32], sizes = [1, 8], strides = [1, 1]} : vector<8x64xf32> to vector<1x8xf32>
      %c4_631 = arith.constant 4 : index
      %c40_632 = arith.constant 40 : index
      %1102 = vector.load %arg6[%c4_631, %c40_632] : memref<8x64xf32, #tpu.memory_space<vmem>>, vector<1x8xf32>
      tpu.vector_store %arg6[%c4_631, %c40_632], %1101 {strides = array<i32>} : memref<8x64xf32, #tpu.memory_space<vmem>>, vector<1x8xf32>,
      %1103 = vector.extract_strided_slice %1026 {offsets = [6, 32], sizes = [1, 8], strides = [1, 1]} : vector<8x64xf32> to vector<1x8xf32>
      %c4_633 = arith.constant 4 : index
      %c48_634 = arith.constant 48 : index
      %1104 = vector.load %arg6[%c4_633, %c48_634] : memref<8x64xf32, #tpu.memory_space<vmem>>, vector<1x8xf32>
      tpu.vector_store %arg6[%c4_633, %c48_634], %1103 {strides = array<i32>} : memref<8x64xf32, #tpu.memory_space<vmem>>, vector<1x8xf32>,
      %1105 = vector.extract_strided_slice %1026 {offsets = [7, 32], sizes = [1, 8], strides = [1, 1]} : vector<8x64xf32> to vector<1x8xf32>
      %c4_635 = arith.constant 4 : index
      %c56_636 = arith.constant 56 : index
      %1106 = vector.load %arg6[%c4_635, %c56_636] : memref<8x64xf32, #tpu.memory_space<vmem>>, vector<1x8xf32>
      tpu.vector_store %arg6[%c4_635, %c56_636], %1105 {strides = array<i32>} : memref<8x64xf32, #tpu.memory_space<vmem>>, vector<1x8xf32>,
      %1107 = vector.extract_strided_slice %1026 {offsets = [0, 40], sizes = [1, 8], strides = [1, 1]} : vector<8x64xf32> to vector<1x8xf32>
      %c5_637 = arith.constant 5 : index
      %c0_638 = arith.constant 0 : index
      %1108 = vector.load %arg6[%c5_637, %c0_638] : memref<8x64xf32, #tpu.memory_space<vmem>>, vector<1x8xf32>
      tpu.vector_store %arg6[%c5_637, %c0_638], %1107 {strides = array<i32>} : memref<8x64xf32, #tpu.memory_space<vmem>>, vector<1x8xf32>,
      %1109 = vector.extract_strided_slice %1026 {offsets = [1, 40], sizes = [1, 8], strides = [1, 1]} : vector<8x64xf32> to vector<1x8xf32>
      %c5_639 = arith.constant 5 : index
      %c8_640 = arith.constant 8 : index
      %1110 = vector.load %arg6[%c5_639, %c8_640] : memref<8x64xf32, #tpu.memory_space<vmem>>, vector<1x8xf32>
      tpu.vector_store %arg6[%c5_639, %c8_640], %1109 {strides = array<i32>} : memref<8x64xf32, #tpu.memory_space<vmem>>, vector<1x8xf32>,
      %1111 = vector.extract_strided_slice %1026 {offsets = [2, 40], sizes = [1, 8], strides = [1, 1]} : vector<8x64xf32> to vector<1x8xf32>
      %c5_641 = arith.constant 5 : index
      %c16_642 = arith.constant 16 : index
      %1112 = vector.load %arg6[%c5_641, %c16_642] : memref<8x64xf32, #tpu.memory_space<vmem>>, vector<1x8xf32>
      tpu.vector_store %arg6[%c5_641, %c16_642], %1111 {strides = array<i32>} : memref<8x64xf32, #tpu.memory_space<vmem>>, vector<1x8xf32>,
      %1113 = vector.extract_strided_slice %1026 {offsets = [3, 40], sizes = [1, 8], strides = [1, 1]} : vector<8x64xf32> to vector<1x8xf32>
      %c5_643 = arith.constant 5 : index
      %c24_644 = arith.constant 24 : index
      %1114 = vector.load %arg6[%c5_643, %c24_644] : memref<8x64xf32, #tpu.memory_space<vmem>>, vector<1x8xf32>
      tpu.vector_store %arg6[%c5_643, %c24_644], %1113 {strides = array<i32>} : memref<8x64xf32, #tpu.memory_space<vmem>>, vector<1x8xf32>,
      %1115 = vector.extract_strided_slice %1026 {offsets = [4, 40], sizes = [1, 8], strides = [1, 1]} : vector<8x64xf32> to vector<1x8xf32>
      %c5_645 = arith.constant 5 : index
      %c32_646 = arith.constant 32 : index
      %1116 = vector.load %arg6[%c5_645, %c32_646] : memref<8x64xf32, #tpu.memory_space<vmem>>, vector<1x8xf32>
      tpu.vector_store %arg6[%c5_645, %c32_646], %1115 {strides = array<i32>} : memref<8x64xf32, #tpu.memory_space<vmem>>, vector<1x8xf32>,
      %1117 = vector.extract_strided_slice %1026 {offsets = [5, 40], sizes = [1, 8], strides = [1, 1]} : vector<8x64xf32> to vector<1x8xf32>
      %c5_647 = arith.constant 5 : index
      %c40_648 = arith.constant 40 : index
      %1118 = vector.load %arg6[%c5_647, %c40_648] : memref<8x64xf32, #tpu.memory_space<vmem>>, vector<1x8xf32>
      tpu.vector_store %arg6[%c5_647, %c40_648], %1117 {strides = array<i32>} : memref<8x64xf32, #tpu.memory_space<vmem>>, vector<1x8xf32>,
      %1119 = vector.extract_strided_slice %1026 {offsets = [6, 40], sizes = [1, 8], strides = [1, 1]} : vector<8x64xf32> to vector<1x8xf32>
      %c5_649 = arith.constant 5 : index
      %c48_650 = arith.constant 48 : index
      %1120 = vector.load %arg6[%c5_649, %c48_650] : memref<8x64xf32, #tpu.memory_space<vmem>>, vector<1x8xf32>
      tpu.vector_store %arg6[%c5_649, %c48_650], %1119 {strides = array<i32>} : memref<8x64xf32, #tpu.memory_space<vmem>>, vector<1x8xf32>,
      %1121 = vector.extract_strided_slice %1026 {offsets = [7, 40], sizes = [1, 8], strides = [1, 1]} : vector<8x64xf32> to vector<1x8xf32>
      %c5_651 = arith.constant 5 : index
      %c56_652 = arith.constant 56 : index
      %1122 = vector.load %arg6[%c5_651, %c56_652] : memref<8x64xf32, #tpu.memory_space<vmem>>, vector<1x8xf32>
      tpu.vector_store %arg6[%c5_651, %c56_652], %1121 {strides = array<i32>} : memref<8x64xf32, #tpu.memory_space<vmem>>, vector<1x8xf32>,
      %1123 = vector.extract_strided_slice %1026 {offsets = [0, 48], sizes = [1, 8], strides = [1, 1]} : vector<8x64xf32> to vector<1x8xf32>
      %c6_653 = arith.constant 6 : index
      %c0_654 = arith.constant 0 : index
      %1124 = vector.load %arg6[%c6_653, %c0_654] : memref<8x64xf32, #tpu.memory_space<vmem>>, vector<1x8xf32>
      tpu.vector_store %arg6[%c6_653, %c0_654], %1123 {strides = array<i32>} : memref<8x64xf32, #tpu.memory_space<vmem>>, vector<1x8xf32>,
      %1125 = vector.extract_strided_slice %1026 {offsets = [1, 48], sizes = [1, 8], strides = [1, 1]} : vector<8x64xf32> to vector<1x8xf32>
      %c6_655 = arith.constant 6 : index
      %c8_656 = arith.constant 8 : index
      %1126 = vector.load %arg6[%c6_655, %c8_656] : memref<8x64xf32, #tpu.memory_space<vmem>>, vector<1x8xf32>
      tpu.vector_store %arg6[%c6_655, %c8_656], %1125 {strides = array<i32>} : memref<8x64xf32, #tpu.memory_space<vmem>>, vector<1x8xf32>,
      %1127 = vector.extract_strided_slice %1026 {offsets = [2, 48], sizes = [1, 8], strides = [1, 1]} : vector<8x64xf32> to vector<1x8xf32>
      %c6_657 = arith.constant 6 : index
      %c16_658 = arith.constant 16 : index
      %1128 = vector.load %arg6[%c6_657, %c16_658] : memref<8x64xf32, #tpu.memory_space<vmem>>, vector<1x8xf32>
      tpu.vector_store %arg6[%c6_657, %c16_658], %1127 {strides = array<i32>} : memref<8x64xf32, #tpu.memory_space<vmem>>, vector<1x8xf32>,
      %1129 = vector.extract_strided_slice %1026 {offsets = [3, 48], sizes = [1, 8], strides = [1, 1]} : vector<8x64xf32> to vector<1x8xf32>
      %c6_659 = arith.constant 6 : index
      %c24_660 = arith.constant 24 : index
      %1130 = vector.load %arg6[%c6_659, %c24_660] : memref<8x64xf32, #tpu.memory_space<vmem>>, vector<1x8xf32>
      tpu.vector_store %arg6[%c6_659, %c24_660], %1129 {strides = array<i32>} : memref<8x64xf32, #tpu.memory_space<vmem>>, vector<1x8xf32>,
      %1131 = vector.extract_strided_slice %1026 {offsets = [4, 48], sizes = [1, 8], strides = [1, 1]} : vector<8x64xf32> to vector<1x8xf32>
      %c6_661 = arith.constant 6 : index
      %c32_662 = arith.constant 32 : index
      %1132 = vector.load %arg6[%c6_661, %c32_662] : memref<8x64xf32, #tpu.memory_space<vmem>>, vector<1x8xf32>
      tpu.vector_store %arg6[%c6_661, %c32_662], %1131 {strides = array<i32>} : memref<8x64xf32, #tpu.memory_space<vmem>>, vector<1x8xf32>,
      %1133 = vector.extract_strided_slice %1026 {offsets = [5, 48], sizes = [1, 8], strides = [1, 1]} : vector<8x64xf32> to vector<1x8xf32>
      %c6_663 = arith.constant 6 : index
      %c40_664 = arith.constant 40 : index
      %1134 = vector.load %arg6[%c6_663, %c40_664] : memref<8x64xf32, #tpu.memory_space<vmem>>, vector<1x8xf32>
      tpu.vector_store %arg6[%c6_663, %c40_664], %1133 {strides = array<i32>} : memref<8x64xf32, #tpu.memory_space<vmem>>, vector<1x8xf32>,
      %1135 = vector.extract_strided_slice %1026 {offsets = [6, 48], sizes = [1, 8], strides = [1, 1]} : vector<8x64xf32> to vector<1x8xf32>
      %c6_665 = arith.constant 6 : index
      %c48_666 = arith.constant 48 : index
      %1136 = vector.load %arg6[%c6_665, %c48_666] : memref<8x64xf32, #tpu.memory_space<vmem>>, vector<1x8xf32>
      tpu.vector_store %arg6[%c6_665, %c48_666], %1135 {strides = array<i32>} : memref<8x64xf32, #tpu.memory_space<vmem>>, vector<1x8xf32>,
      %1137 = vector.extract_strided_slice %1026 {offsets = [7, 48], sizes = [1, 8], strides = [1, 1]} : vector<8x64xf32> to vector<1x8xf32>
      %c6_667 = arith.constant 6 : index
      %c56_668 = arith.constant 56 : index
      %1138 = vector.load %arg6[%c6_667, %c56_668] : memref<8x64xf32, #tpu.memory_space<vmem>>, vector<1x8xf32>
      tpu.vector_store %arg6[%c6_667, %c56_668], %1137 {strides = array<i32>} : memref<8x64xf32, #tpu.memory_space<vmem>>, vector<1x8xf32>,
      %1139 = vector.extract_strided_slice %1026 {offsets = [0, 56], sizes = [1, 8], strides = [1, 1]} : vector<8x64xf32> to vector<1x8xf32>
      %c7_669 = arith.constant 7 : index
      %c0_670 = arith.constant 0 : index
      %1140 = vector.load %arg6[%c7_669, %c0_670] : memref<8x64xf32, #tpu.memory_space<vmem>>, vector<1x8xf32>
      tpu.vector_store %arg6[%c7_669, %c0_670], %1139 {strides = array<i32>} : memref<8x64xf32, #tpu.memory_space<vmem>>, vector<1x8xf32>,
      %1141 = vector.extract_strided_slice %1026 {offsets = [1, 56], sizes = [1, 8], strides = [1, 1]} : vector<8x64xf32> to vector<1x8xf32>
      %c7_671 = arith.constant 7 : index
      %c8_672 = arith.constant 8 : index
      %1142 = vector.load %arg6[%c7_671, %c8_672] : memref<8x64xf32, #tpu.memory_space<vmem>>, vector<1x8xf32>
      tpu.vector_store %arg6[%c7_671, %c8_672], %1141 {strides = array<i32>} : memref<8x64xf32, #tpu.memory_space<vmem>>, vector<1x8xf32>,
      %1143 = vector.extract_strided_slice %1026 {offsets = [2, 56], sizes = [1, 8], strides = [1, 1]} : vector<8x64xf32> to vector<1x8xf32>
      %c7_673 = arith.constant 7 : index
      %c16_674 = arith.constant 16 : index
      %1144 = vector.load %arg6[%c7_673, %c16_674] : memref<8x64xf32, #tpu.memory_space<vmem>>, vector<1x8xf32>
      tpu.vector_store %arg6[%c7_673, %c16_674], %1143 {strides = array<i32>} : memref<8x64xf32, #tpu.memory_space<vmem>>, vector<1x8xf32>,
      %1145 = vector.extract_strided_slice %1026 {offsets = [3, 56], sizes = [1, 8], strides = [1, 1]} : vector<8x64xf32> to vector<1x8xf32>
      %c7_675 = arith.constant 7 : index
      %c24_676 = arith.constant 24 : index
      %1146 = vector.load %arg6[%c7_675, %c24_676] : memref<8x64xf32, #tpu.memory_space<vmem>>, vector<1x8xf32>
      tpu.vector_store %arg6[%c7_675, %c24_676], %1145 {strides = array<i32>} : memref<8x64xf32, #tpu.memory_space<vmem>>, vector<1x8xf32>,
      %1147 = vector.extract_strided_slice %1026 {offsets = [4, 56], sizes = [1, 8], strides = [1, 1]} : vector<8x64xf32> to vector<1x8xf32>
      %c7_677 = arith.constant 7 : index
      %c32_678 = arith.constant 32 : index
      %1148 = vector.load %arg6[%c7_677, %c32_678] : memref<8x64xf32, #tpu.memory_space<vmem>>, vector<1x8xf32>
      tpu.vector_store %arg6[%c7_677, %c32_678], %1147 {strides = array<i32>} : memref<8x64xf32, #tpu.memory_space<vmem>>, vector<1x8xf32>,
      %1149 = vector.extract_strided_slice %1026 {offsets = [5, 56], sizes = [1, 8], strides = [1, 1]} : vector<8x64xf32> to vector<1x8xf32>
      %c7_679 = arith.constant 7 : index
      %c40_680 = arith.constant 40 : index
      %1150 = vector.load %arg6[%c7_679, %c40_680] : memref<8x64xf32, #tpu.memory_space<vmem>>, vector<1x8xf32>
      tpu.vector_store %arg6[%c7_679, %c40_680], %1149 {strides = array<i32>} : memref<8x64xf32, #tpu.memory_space<vmem>>, vector<1x8xf32>,
      %1151 = vector.extract_strided_slice %1026 {offsets = [6, 56], sizes = [1, 8], strides = [1, 1]} : vector<8x64xf32> to vector<1x8xf32>
      %c7_681 = arith.constant 7 : index
      %c48_682 = arith.constant 48 : index
      %1152 = vector.load %arg6[%c7_681, %c48_682] : memref<8x64xf32, #tpu.memory_space<vmem>>, vector<1x8xf32>
      tpu.vector_store %arg6[%c7_681, %c48_682], %1151 {strides = array<i32>} : memref<8x64xf32, #tpu.memory_space<vmem>>, vector<1x8xf32>,
      %1153 = vector.extract_strided_slice %1026 {offsets = [7, 56], sizes = [1, 8], strides = [1, 1]} : vector<8x64xf32> to vector<1x8xf32>
      %c7_683 = arith.constant 7 : index
      %c56_684 = arith.constant 56 : index
      %1154 = vector.load %arg6[%c7_683, %c56_684] : memref<8x64xf32, #tpu.memory_space<vmem>>, vector<1x8xf32>
      tpu.vector_store %arg6[%c7_683, %c56_684], %1153 {strides = array<i32>} : memref<8x64xf32, #tpu.memory_space<vmem>>, vector<1x8xf32>,
      %c0_685 = arith.constant 0 : index
      %c0_686 = arith.constant 0 : index
      %1155 = vector.load %arg6[%c0_685, %c0_686] : memref<8x64xf32, #tpu.memory_space<vmem>>, vector<8x64xf32>
      %c0_687 = arith.constant 0 : index
      %c0_688 = arith.constant 0 : index
      %1156 = vector.load %arg7[%c0_687, %c0_688] : memref<8x64xf32, #tpu.memory_space<vmem>>, vector<8x64xf32>
      tpu.vector_store %arg7[%c0_687, %c0_688], %1155 {strides = array<i32>} : memref<8x64xf32, #tpu.memory_space<vmem>>, vector<8x64xf32>,
    } else {
    }
    %c0_4 = arith.constant 0 : index
    %c0_5 = arith.constant 0 : index
    %7 = vector.load %arg6[%c0_4, %c0_5] : memref<8x64xf32, #tpu.memory_space<vmem>>, vector<8x64xf32>
    %c0_6 = arith.constant 0 : index
    %c0_7 = arith.constant 0 : index
    %8 = vector.load %arg7[%c0_6, %c0_7] : memref<8x64xf32, #tpu.memory_space<vmem>>, vector<8x64xf32>
    %c0_8 = arith.constant 0 : index
    %c2 = arith.constant 2 : index
    %c0_9 = arith.constant 0 : index
    %c0_10 = arith.constant 0 : index
    %9 = vector.load %arg3[%c0_8, %c2, %c0_9, %c0_10] : memref<1x35x64x64xf32, #tpu.memory_space<vmem>>, vector<1x1x64x64xf32>
    %10 = vector.shape_cast %9 : vector<1x1x64x64xf32> to vector<64x64xf32>
    %cst = arith.constant dense<0.000000e+00> : vector<8x64xf32>
    %11 = tpu.matmul %7, %10, %cst {dimension_numbers = #tpu.dot_dimension_numbers<[1], [0], [0], [1], [0, 0, 1, 1], [], []>} : vector<8x64xf32>, vector<64x64xf32>, vector<8x64xf32> -> vector<8x64xf32>
    %c0_11 = arith.constant 0 : index
    %c2_12 = arith.constant 2 : index
    %c0_13 = arith.constant 0 : index
    %c0_14 = arith.constant 0 : index
    %12 = vector.load %arg4[%c0_11, %c2_12, %c0_13, %c0_14] : memref<1x59x1x64xf32, #tpu.memory_space<vmem>>, vector<1x1x1x64xf32>
    %13 = vector.shape_cast %12 : vector<1x1x1x64xf32> to vector<1x64xf32>
    %14 = vector.broadcast %13 : vector<1x64xf32> to vector<8x64xf32>
    %15 = arith.addf %11, %14 : vector<8x64xf32>
    %c0_15 = arith.constant 0 : index
    %c3 = arith.constant 3 : index
    %c0_16 = arith.constant 0 : index
    %c0_17 = arith.constant 0 : index
    %16 = vector.load %arg3[%c0_15, %c3, %c0_16, %c0_17] : memref<1x35x64x64xf32, #tpu.memory_space<vmem>>, vector<1x1x64x64xf32>
    %17 = vector.shape_cast %16 : vector<1x1x64x64xf32> to vector<64x64xf32>
    %cst_18 = arith.constant dense<0.000000e+00> : vector<8x64xf32>
    %18 = tpu.matmul %7, %17, %cst_18 {dimension_numbers = #tpu.dot_dimension_numbers<[1], [0], [0], [1], [0, 0, 1, 1], [], []>} : vector<8x64xf32>, vector<64x64xf32>, vector<8x64xf32> -> vector<8x64xf32>
    %c0_19 = arith.constant 0 : index
    %c3_20 = arith.constant 3 : index
    %c0_21 = arith.constant 0 : index
    %c0_22 = arith.constant 0 : index
    %19 = vector.load %arg4[%c0_19, %c3_20, %c0_21, %c0_22] : memref<1x59x1x64xf32, #tpu.memory_space<vmem>>, vector<1x1x1x64xf32>
    %20 = vector.shape_cast %19 : vector<1x1x1x64xf32> to vector<1x64xf32>
    %21 = vector.broadcast %20 : vector<1x64xf32> to vector<8x64xf32>
    %22 = arith.addf %18, %21 : vector<8x64xf32>
    %c0_23 = arith.constant 0 : index
    %c4 = arith.constant 4 : index
    %c0_24 = arith.constant 0 : index
    %c0_25 = arith.constant 0 : index
    %23 = vector.load %arg3[%c0_23, %c4, %c0_24, %c0_25] : memref<1x35x64x64xf32, #tpu.memory_space<vmem>>, vector<1x1x64x64xf32>
    %24 = vector.shape_cast %23 : vector<1x1x64x64xf32> to vector<64x64xf32>
    %cst_26 = arith.constant dense<0.000000e+00> : vector<8x64xf32>
    %25 = tpu.matmul %7, %24, %cst_26 {dimension_numbers = #tpu.dot_dimension_numbers<[1], [0], [0], [1], [0, 0, 1, 1], [], []>} : vector<8x64xf32>, vector<64x64xf32>, vector<8x64xf32> -> vector<8x64xf32>
    %c0_27 = arith.constant 0 : index
    %c4_28 = arith.constant 4 : index
    %c0_29 = arith.constant 0 : index
    %c0_30 = arith.constant 0 : index
    %26 = vector.load %arg4[%c0_27, %c4_28, %c0_29, %c0_30] : memref<1x59x1x64xf32, #tpu.memory_space<vmem>>, vector<1x1x1x64xf32>
    %27 = vector.shape_cast %26 : vector<1x1x1x64xf32> to vector<1x64xf32>
    %28 = vector.broadcast %27 : vector<1x64xf32> to vector<8x64xf32>
    %29 = arith.addf %25, %28 : vector<8x64xf32>
    %c0_31 = arith.constant 0 : index
    %c5 = arith.constant 5 : index
    %c0_32 = arith.constant 0 : index
    %c0_33 = arith.constant 0 : index
    %30 = vector.load %arg3[%c0_31, %c5, %c0_32, %c0_33] : memref<1x35x64x64xf32, #tpu.memory_space<vmem>>, vector<1x1x64x64xf32>
    %31 = vector.shape_cast %30 : vector<1x1x64x64xf32> to vector<64x64xf32>
    %32 = vector.extract_strided_slice %15 {offsets = [0, 0], sizes = [8, 16], strides = [1, 1]} : vector<8x64xf32> to vector<8x16xf32>
    %33 = vector.extract_strided_slice %22 {offsets = [0, 0], sizes = [8, 16], strides = [1, 1]} : vector<8x64xf32> to vector<8x16xf32>
    %cst_34 = arith.constant dense<0.000000e+00> : vector<8x8xf32>
    %34 = tpu.matmul %32, %33, %cst_34 {dimension_numbers = #tpu.dot_dimension_numbers<[1], [1], [0], [0], [0, 0, 1, 0], [], []>} : vector<8x16xf32>, vector<8x16xf32>, vector<8x8xf32> -> vector<8x8xf32>
    %cst_35 = arith.constant 2.500000e-01 : f32
    %35 = vector.broadcast %cst_35 : f32 to vector<8x8xf32>
    %36 = arith.mulf %35, %34 : vector<8x8xf32>
    %cst_36 = arith.constant dense<0xFF800000> : vector<8xf32>
    %37 = vector.multi_reduction <maximumf>, %36, %cst_36 [1] : vector<8x8xf32> to vector<8xf32>
    %38 = vector.shape_cast %37 : vector<8xf32> to vector<8x1xf32>
    %39 = vector.broadcast %38 : vector<8x1xf32> to vector<8x8xf32>
    %40 = arith.subf %36, %39 : vector<8x8xf32>
    %41 = math.exp %40 : vector<8x8xf32>
    %cst_37 = arith.constant dense<0.000000e+00> : vector<8xf32>
    %42 = vector.multi_reduction <add>, %41, %cst_37 [1] : vector<8x8xf32> to vector<8xf32>
    %43 = vector.shape_cast %42 : vector<8xf32> to vector<8x1xf32>
    %44 = vector.broadcast %43 : vector<8x1xf32> to vector<8x8xf32>
    %45 = arith.divf %41, %44 : vector<8x8xf32>
    %46 = vector.extract_strided_slice %29 {offsets = [0, 0], sizes = [8, 16], strides = [1, 1]} : vector<8x64xf32> to vector<8x16xf32>
    %cst_38 = arith.constant dense<0.000000e+00> : vector<8x16xf32>
    %47 = tpu.matmul %45, %46, %cst_38 {dimension_numbers = #tpu.dot_dimension_numbers<[1], [0], [0], [1], [0, 0, 1, 1], [], []>} : vector<8x8xf32>, vector<8x16xf32>, vector<8x16xf32> -> vector<8x16xf32>
    %48 = vector.extract_strided_slice %31 {offsets = [0, 0], sizes = [16, 64], strides = [1, 1]} : vector<64x64xf32> to vector<16x64xf32>
    %cst_39 = arith.constant dense<0.000000e+00> : vector<8x64xf32>
    %49 = tpu.matmul %47, %48, %cst_39 {dimension_numbers = #tpu.dot_dimension_numbers<[1], [0], [0], [1], [0, 0, 1, 1], [], []>} : vector<8x16xf32>, vector<16x64xf32>, vector<8x64xf32> -> vector<8x64xf32>
    %50 = vector.extract_strided_slice %15 {offsets = [0, 16], sizes = [8, 16], strides = [1, 1]} : vector<8x64xf32> to vector<8x16xf32>
    %51 = vector.extract_strided_slice %22 {offsets = [0, 16], sizes = [8, 16], strides = [1, 1]} : vector<8x64xf32> to vector<8x16xf32>
    %cst_40 = arith.constant dense<0.000000e+00> : vector<8x8xf32>
    %52 = tpu.matmul %50, %51, %cst_40 {dimension_numbers = #tpu.dot_dimension_numbers<[1], [1], [0], [0], [0, 0, 1, 0], [], []>} : vector<8x16xf32>, vector<8x16xf32>, vector<8x8xf32> -> vector<8x8xf32>
    %cst_41 = arith.constant 2.500000e-01 : f32
    %53 = vector.broadcast %cst_41 : f32 to vector<8x8xf32>
    %54 = arith.mulf %53, %52 : vector<8x8xf32>
    %cst_42 = arith.constant dense<0xFF800000> : vector<8xf32>
    %55 = vector.multi_reduction <maximumf>, %54, %cst_42 [1] : vector<8x8xf32> to vector<8xf32>
    %56 = vector.shape_cast %55 : vector<8xf32> to vector<8x1xf32>
    %57 = vector.broadcast %56 : vector<8x1xf32> to vector<8x8xf32>
    %58 = arith.subf %54, %57 : vector<8x8xf32>
    %59 = math.exp %58 : vector<8x8xf32>
    %cst_43 = arith.constant dense<0.000000e+00> : vector<8xf32>
    %60 = vector.multi_reduction <add>, %59, %cst_43 [1] : vector<8x8xf32> to vector<8xf32>
    %61 = vector.shape_cast %60 : vector<8xf32> to vector<8x1xf32>
    %62 = vector.broadcast %61 : vector<8x1xf32> to vector<8x8xf32>
    %63 = arith.divf %59, %62 : vector<8x8xf32>
    %64 = vector.extract_strided_slice %29 {offsets = [0, 16], sizes = [8, 16], strides = [1, 1]} : vector<8x64xf32> to vector<8x16xf32>
    %cst_44 = arith.constant dense<0.000000e+00> : vector<8x16xf32>
    %65 = tpu.matmul %63, %64, %cst_44 {dimension_numbers = #tpu.dot_dimension_numbers<[1], [0], [0], [1], [0, 0, 1, 1], [], []>} : vector<8x8xf32>, vector<8x16xf32>, vector<8x16xf32> -> vector<8x16xf32>
    %66 = vector.extract_strided_slice %31 {offsets = [16, 0], sizes = [16, 64], strides = [1, 1]} : vector<64x64xf32> to vector<16x64xf32>
    %cst_45 = arith.constant dense<0.000000e+00> : vector<8x64xf32>
    %67 = tpu.matmul %65, %66, %cst_45 {dimension_numbers = #tpu.dot_dimension_numbers<[1], [0], [0], [1], [0, 0, 1, 1], [], []>} : vector<8x16xf32>, vector<16x64xf32>, vector<8x64xf32> -> vector<8x64xf32>
    %68 = arith.addf %49, %67 : vector<8x64xf32>
    %69 = vector.extract_strided_slice %15 {offsets = [0, 32], sizes = [8, 16], strides = [1, 1]} : vector<8x64xf32> to vector<8x16xf32>
    %70 = vector.extract_strided_slice %22 {offsets = [0, 32], sizes = [8, 16], strides = [1, 1]} : vector<8x64xf32> to vector<8x16xf32>
    %cst_46 = arith.constant dense<0.000000e+00> : vector<8x8xf32>
    %71 = tpu.matmul %69, %70, %cst_46 {dimension_numbers = #tpu.dot_dimension_numbers<[1], [1], [0], [0], [0, 0, 1, 0], [], []>} : vector<8x16xf32>, vector<8x16xf32>, vector<8x8xf32> -> vector<8x8xf32>
    %cst_47 = arith.constant 2.500000e-01 : f32
    %72 = vector.broadcast %cst_47 : f32 to vector<8x8xf32>
    %73 = arith.mulf %72, %71 : vector<8x8xf32>
    %cst_48 = arith.constant dense<0xFF800000> : vector<8xf32>
    %74 = vector.multi_reduction <maximumf>, %73, %cst_48 [1] : vector<8x8xf32> to vector<8xf32>
    %75 = vector.shape_cast %74 : vector<8xf32> to vector<8x1xf32>
    %76 = vector.broadcast %75 : vector<8x1xf32> to vector<8x8xf32>
    %77 = arith.subf %73, %76 : vector<8x8xf32>
    %78 = math.exp %77 : vector<8x8xf32>
    %cst_49 = arith.constant dense<0.000000e+00> : vector<8xf32>
    %79 = vector.multi_reduction <add>, %78, %cst_49 [1] : vector<8x8xf32> to vector<8xf32>
    %80 = vector.shape_cast %79 : vector<8xf32> to vector<8x1xf32>
    %81 = vector.broadcast %80 : vector<8x1xf32> to vector<8x8xf32>
    %82 = arith.divf %78, %81 : vector<8x8xf32>
    %83 = vector.extract_strided_slice %29 {offsets = [0, 32], sizes = [8, 16], strides = [1, 1]} : vector<8x64xf32> to vector<8x16xf32>
    %cst_50 = arith.constant dense<0.000000e+00> : vector<8x16xf32>
    %84 = tpu.matmul %82, %83, %cst_50 {dimension_numbers = #tpu.dot_dimension_numbers<[1], [0], [0], [1], [0, 0, 1, 1], [], []>} : vector<8x8xf32>, vector<8x16xf32>, vector<8x16xf32> -> vector<8x16xf32>
    %85 = vector.extract_strided_slice %31 {offsets = [32, 0], sizes = [16, 64], strides = [1, 1]} : vector<64x64xf32> to vector<16x64xf32>
    %cst_51 = arith.constant dense<0.000000e+00> : vector<8x64xf32>
    %86 = tpu.matmul %84, %85, %cst_51 {dimension_numbers = #tpu.dot_dimension_numbers<[1], [0], [0], [1], [0, 0, 1, 1], [], []>} : vector<8x16xf32>, vector<16x64xf32>, vector<8x64xf32> -> vector<8x64xf32>
    %87 = arith.addf %68, %86 : vector<8x64xf32>
    %88 = vector.extract_strided_slice %15 {offsets = [0, 48], sizes = [8, 16], strides = [1, 1]} : vector<8x64xf32> to vector<8x16xf32>
    %89 = vector.extract_strided_slice %22 {offsets = [0, 48], sizes = [8, 16], strides = [1, 1]} : vector<8x64xf32> to vector<8x16xf32>
    %cst_52 = arith.constant dense<0.000000e+00> : vector<8x8xf32>
    %90 = tpu.matmul %88, %89, %cst_52 {dimension_numbers = #tpu.dot_dimension_numbers<[1], [1], [0], [0], [0, 0, 1, 0], [], []>} : vector<8x16xf32>, vector<8x16xf32>, vector<8x8xf32> -> vector<8x8xf32>
    %cst_53 = arith.constant 2.500000e-01 : f32
    %91 = vector.broadcast %cst_53 : f32 to vector<8x8xf32>
    %92 = arith.mulf %91, %90 : vector<8x8xf32>
    %cst_54 = arith.constant dense<0xFF800000> : vector<8xf32>
    %93 = vector.multi_reduction <maximumf>, %92, %cst_54 [1] : vector<8x8xf32> to vector<8xf32>
    %94 = vector.shape_cast %93 : vector<8xf32> to vector<8x1xf32>
    %95 = vector.broadcast %94 : vector<8x1xf32> to vector<8x8xf32>
    %96 = arith.subf %92, %95 : vector<8x8xf32>
    %97 = math.exp %96 : vector<8x8xf32>
    %cst_55 = arith.constant dense<0.000000e+00> : vector<8xf32>
    %98 = vector.multi_reduction <add>, %97, %cst_55 [1] : vector<8x8xf32> to vector<8xf32>
    %99 = vector.shape_cast %98 : vector<8xf32> to vector<8x1xf32>
    %100 = vector.broadcast %99 : vector<8x1xf32> to vector<8x8xf32>
    %101 = arith.divf %97, %100 : vector<8x8xf32>
    %102 = vector.extract_strided_slice %29 {offsets = [0, 48], sizes = [8, 16], strides = [1, 1]} : vector<8x64xf32> to vector<8x16xf32>
    %cst_56 = arith.constant dense<0.000000e+00> : vector<8x16xf32>
    %103 = tpu.matmul %101, %102, %cst_56 {dimension_numbers = #tpu.dot_dimension_numbers<[1], [0], [0], [1], [0, 0, 1, 1], [], []>} : vector<8x8xf32>, vector<8x16xf32>, vector<8x16xf32> -> vector<8x16xf32>
    %104 = vector.extract_strided_slice %31 {offsets = [48, 0], sizes = [16, 64], strides = [1, 1]} : vector<64x64xf32> to vector<16x64xf32>
    %cst_57 = arith.constant dense<0.000000e+00> : vector<8x64xf32>
    %105 = tpu.matmul %103, %104, %cst_57 {dimension_numbers = #tpu.dot_dimension_numbers<[1], [0], [0], [1], [0, 0, 1, 1], [], []>} : vector<8x16xf32>, vector<16x64xf32>, vector<8x64xf32> -> vector<8x64xf32>
    %106 = arith.addf %87, %105 : vector<8x64xf32>
    %c0_58 = arith.constant 0 : index
    %c5_59 = arith.constant 5 : index
    %c0_60 = arith.constant 0 : index
    %c0_61 = arith.constant 0 : index
    %107 = vector.load %arg4[%c0_58, %c5_59, %c0_60, %c0_61] : memref<1x59x1x64xf32, #tpu.memory_space<vmem>>, vector<1x1x1x64xf32>
    %108 = vector.shape_cast %107 : vector<1x1x1x64xf32> to vector<1x64xf32>
    %109 = vector.broadcast %108 : vector<1x64xf32> to vector<8x64xf32>
    %110 = arith.addf %106, %109 : vector<8x64xf32>
    %111 = arith.addf %7, %110 : vector<8x64xf32>
    %c0_62 = arith.constant 0 : index
    %c8 = arith.constant 8 : index
    %c0_63 = arith.constant 0 : index
    %c0_64 = arith.constant 0 : index
    %112 = vector.load %arg4[%c0_62, %c8, %c0_63, %c0_64] : memref<1x59x1x64xf32, #tpu.memory_space<vmem>>, vector<1x1x1x64xf32>
    %113 = vector.shape_cast %112 : vector<1x1x1x64xf32> to vector<1x64xf32>
    %c0_65 = arith.constant 0 : index
    %c9 = arith.constant 9 : index
    %c0_66 = arith.constant 0 : index
    %c0_67 = arith.constant 0 : index
    %114 = vector.load %arg4[%c0_65, %c9, %c0_66, %c0_67] : memref<1x59x1x64xf32, #tpu.memory_space<vmem>>, vector<1x1x1x64xf32>
    %115 = vector.shape_cast %114 : vector<1x1x1x64xf32> to vector<1x64xf32>
    %cst_68 = arith.constant dense<0.000000e+00> : vector<8xf32>
    %116 = vector.multi_reduction <add>, %111, %cst_68 [1] : vector<8x64xf32> to vector<8xf32>
    %117 = vector.shape_cast %116 : vector<8xf32> to vector<8x1xf32>
    %cst_69 = arith.constant 6.400000e+01 : f32
    %118 = vector.broadcast %cst_69 : f32 to vector<8x1xf32>
    %119 = arith.divf %117, %118 : vector<8x1xf32>
    %120 = vector.broadcast %119 : vector<8x1xf32> to vector<8x64xf32>
    %121 = arith.subf %111, %120 : vector<8x64xf32>
    %122 = arith.mulf %121, %121 : vector<8x64xf32>
    %cst_70 = arith.constant dense<0.000000e+00> : vector<8xf32>
    %123 = vector.multi_reduction <add>, %122, %cst_70 [1] : vector<8x64xf32> to vector<8xf32>
    %124 = vector.shape_cast %123 : vector<8xf32> to vector<8x1xf32>
    %cst_71 = arith.constant 6.400000e+01 : f32
    %125 = vector.broadcast %cst_71 : f32 to vector<8x1xf32>
    %126 = arith.divf %124, %125 : vector<8x1xf32>
    %127 = vector.broadcast %119 : vector<8x1xf32> to vector<8x64xf32>
    %128 = arith.subf %111, %127 : vector<8x64xf32>
    %cst_72 = arith.constant 9.99999974E-6 : f32
    %129 = vector.broadcast %cst_72 : f32 to vector<8x1xf32>
    %130 = arith.addf %126, %129 : vector<8x1xf32>
    %131 = math.rsqrt %130 : vector<8x1xf32>
    %132 = vector.broadcast %131 : vector<8x1xf32> to vector<8x64xf32>
    %133 = arith.mulf %128, %132 : vector<8x64xf32>
    %134 = vector.broadcast %113 : vector<1x64xf32> to vector<8x64xf32>
    %135 = arith.mulf %133, %134 : vector<8x64xf32>
    %136 = vector.broadcast %115 : vector<1x64xf32> to vector<8x64xf32>
    %137 = arith.addf %135, %136 : vector<8x64xf32>
    %c0_73 = arith.constant 0 : index
    %c6 = arith.constant 6 : index
    %c0_74 = arith.constant 0 : index
    %c0_75 = arith.constant 0 : index
    %138 = vector.load %arg3[%c0_73, %c6, %c0_74, %c0_75] : memref<1x35x64x64xf32, #tpu.memory_space<vmem>>, vector<1x1x64x64xf32>
    %139 = vector.shape_cast %138 : vector<1x1x64x64xf32> to vector<64x64xf32>
    %cst_76 = arith.constant dense<0.000000e+00> : vector<8x64xf32>
    %140 = tpu.matmul %137, %139, %cst_76 {dimension_numbers = #tpu.dot_dimension_numbers<[1], [0], [0], [1], [0, 0, 1, 1], [], []>} : vector<8x64xf32>, vector<64x64xf32>, vector<8x64xf32> -> vector<8x64xf32>
    %c0_77 = arith.constant 0 : index
    %c6_78 = arith.constant 6 : index
    %c0_79 = arith.constant 0 : index
    %c0_80 = arith.constant 0 : index
    %141 = vector.load %arg4[%c0_77, %c6_78, %c0_79, %c0_80] : memref<1x59x1x64xf32, #tpu.memory_space<vmem>>, vector<1x1x1x64xf32>
    %142 = vector.shape_cast %141 : vector<1x1x1x64xf32> to vector<1x64xf32>
    %143 = vector.broadcast %142 : vector<1x64xf32> to vector<8x64xf32>
    %144 = arith.addf %140, %143 : vector<8x64xf32>
    %cst_81 = arith.constant 0.000000e+00 : f32
    %145 = vector.broadcast %cst_81 : f32 to vector<8x64xf32>
    %146 = arith.maximumf %144, %145 : vector<8x64xf32>
    %c0_82 = arith.constant 0 : index
    %c7 = arith.constant 7 : index
    %c0_83 = arith.constant 0 : index
    %c0_84 = arith.constant 0 : index
    %147 = vector.load %arg3[%c0_82, %c7, %c0_83, %c0_84] : memref<1x35x64x64xf32, #tpu.memory_space<vmem>>, vector<1x1x64x64xf32>
    %148 = vector.shape_cast %147 : vector<1x1x64x64xf32> to vector<64x64xf32>
    %cst_85 = arith.constant dense<0.000000e+00> : vector<8x64xf32>
    %149 = tpu.matmul %146, %148, %cst_85 {dimension_numbers = #tpu.dot_dimension_numbers<[1], [0], [0], [1], [0, 0, 1, 1], [], []>} : vector<8x64xf32>, vector<64x64xf32>, vector<8x64xf32> -> vector<8x64xf32>
    %c0_86 = arith.constant 0 : index
    %c7_87 = arith.constant 7 : index
    %c0_88 = arith.constant 0 : index
    %c0_89 = arith.constant 0 : index
    %150 = vector.load %arg4[%c0_86, %c7_87, %c0_88, %c0_89] : memref<1x59x1x64xf32, #tpu.memory_space<vmem>>, vector<1x1x1x64xf32>
    %151 = vector.shape_cast %150 : vector<1x1x1x64xf32> to vector<1x64xf32>
    %152 = vector.broadcast %151 : vector<1x64xf32> to vector<8x64xf32>
    %153 = arith.addf %149, %152 : vector<8x64xf32>
    %154 = arith.addf %137, %153 : vector<8x64xf32>
    %c0_90 = arith.constant 0 : index
    %c10 = arith.constant 10 : index
    %c0_91 = arith.constant 0 : index
    %c0_92 = arith.constant 0 : index
    %155 = vector.load %arg4[%c0_90, %c10, %c0_91, %c0_92] : memref<1x59x1x64xf32, #tpu.memory_space<vmem>>, vector<1x1x1x64xf32>
    %156 = vector.shape_cast %155 : vector<1x1x1x64xf32> to vector<1x64xf32>
    %c0_93 = arith.constant 0 : index
    %c11 = arith.constant 11 : index
    %c0_94 = arith.constant 0 : index
    %c0_95 = arith.constant 0 : index
    %157 = vector.load %arg4[%c0_93, %c11, %c0_94, %c0_95] : memref<1x59x1x64xf32, #tpu.memory_space<vmem>>, vector<1x1x1x64xf32>
    %158 = vector.shape_cast %157 : vector<1x1x1x64xf32> to vector<1x64xf32>
    %cst_96 = arith.constant dense<0.000000e+00> : vector<8xf32>
    %159 = vector.multi_reduction <add>, %154, %cst_96 [1] : vector<8x64xf32> to vector<8xf32>
    %160 = vector.shape_cast %159 : vector<8xf32> to vector<8x1xf32>
    %cst_97 = arith.constant 6.400000e+01 : f32
    %161 = vector.broadcast %cst_97 : f32 to vector<8x1xf32>
    %162 = arith.divf %160, %161 : vector<8x1xf32>
    %163 = vector.broadcast %162 : vector<8x1xf32> to vector<8x64xf32>
    %164 = arith.subf %154, %163 : vector<8x64xf32>
    %165 = arith.mulf %164, %164 : vector<8x64xf32>
    %cst_98 = arith.constant dense<0.000000e+00> : vector<8xf32>
    %166 = vector.multi_reduction <add>, %165, %cst_98 [1] : vector<8x64xf32> to vector<8xf32>
    %167 = vector.shape_cast %166 : vector<8xf32> to vector<8x1xf32>
    %cst_99 = arith.constant 6.400000e+01 : f32
    %168 = vector.broadcast %cst_99 : f32 to vector<8x1xf32>
    %169 = arith.divf %167, %168 : vector<8x1xf32>
    %170 = vector.broadcast %162 : vector<8x1xf32> to vector<8x64xf32>
    %171 = arith.subf %154, %170 : vector<8x64xf32>
    %cst_100 = arith.constant 9.99999974E-6 : f32
    %172 = vector.broadcast %cst_100 : f32 to vector<8x1xf32>
    %173 = arith.addf %169, %172 : vector<8x1xf32>
    %174 = math.rsqrt %173 : vector<8x1xf32>
    %175 = vector.broadcast %174 : vector<8x1xf32> to vector<8x64xf32>
    %176 = arith.mulf %171, %175 : vector<8x64xf32>
    %177 = vector.broadcast %156 : vector<1x64xf32> to vector<8x64xf32>
    %178 = arith.mulf %176, %177 : vector<8x64xf32>
    %179 = vector.broadcast %158 : vector<1x64xf32> to vector<8x64xf32>
    %180 = arith.addf %178, %179 : vector<8x64xf32>
    %c0_101 = arith.constant 0 : index
    %c8_102 = arith.constant 8 : index
    %c0_103 = arith.constant 0 : index
    %c0_104 = arith.constant 0 : index
    %181 = vector.load %arg3[%c0_101, %c8_102, %c0_103, %c0_104] : memref<1x35x64x64xf32, #tpu.memory_space<vmem>>, vector<1x1x64x64xf32>
    %182 = vector.shape_cast %181 : vector<1x1x64x64xf32> to vector<64x64xf32>
    %cst_105 = arith.constant dense<0.000000e+00> : vector<8x64xf32>
    %183 = tpu.matmul %180, %182, %cst_105 {dimension_numbers = #tpu.dot_dimension_numbers<[1], [0], [0], [1], [0, 0, 1, 1], [], []>} : vector<8x64xf32>, vector<64x64xf32>, vector<8x64xf32> -> vector<8x64xf32>
    %c0_106 = arith.constant 0 : index
    %c12 = arith.constant 12 : index
    %c0_107 = arith.constant 0 : index
    %c0_108 = arith.constant 0 : index
    %184 = vector.load %arg4[%c0_106, %c12, %c0_107, %c0_108] : memref<1x59x1x64xf32, #tpu.memory_space<vmem>>, vector<1x1x1x64xf32>
    %185 = vector.shape_cast %184 : vector<1x1x1x64xf32> to vector<1x64xf32>
    %186 = vector.broadcast %185 : vector<1x64xf32> to vector<8x64xf32>
    %187 = arith.addf %183, %186 : vector<8x64xf32>
    %c0_109 = arith.constant 0 : index
    %c9_110 = arith.constant 9 : index
    %c0_111 = arith.constant 0 : index
    %c0_112 = arith.constant 0 : index
    %188 = vector.load %arg3[%c0_109, %c9_110, %c0_111, %c0_112] : memref<1x35x64x64xf32, #tpu.memory_space<vmem>>, vector<1x1x64x64xf32>
    %189 = vector.shape_cast %188 : vector<1x1x64x64xf32> to vector<64x64xf32>
    %cst_113 = arith.constant dense<0.000000e+00> : vector<8x64xf32>
    %190 = tpu.matmul %180, %189, %cst_113 {dimension_numbers = #tpu.dot_dimension_numbers<[1], [0], [0], [1], [0, 0, 1, 1], [], []>} : vector<8x64xf32>, vector<64x64xf32>, vector<8x64xf32> -> vector<8x64xf32>
    %c0_114 = arith.constant 0 : index
    %c13 = arith.constant 13 : index
    %c0_115 = arith.constant 0 : index
    %c0_116 = arith.constant 0 : index
    %191 = vector.load %arg4[%c0_114, %c13, %c0_115, %c0_116] : memref<1x59x1x64xf32, #tpu.memory_space<vmem>>, vector<1x1x1x64xf32>
    %192 = vector.shape_cast %191 : vector<1x1x1x64xf32> to vector<1x64xf32>
    %193 = vector.broadcast %192 : vector<1x64xf32> to vector<8x64xf32>
    %194 = arith.addf %190, %193 : vector<8x64xf32>
    %c0_117 = arith.constant 0 : index
    %c10_118 = arith.constant 10 : index
    %c0_119 = arith.constant 0 : index
    %c0_120 = arith.constant 0 : index
    %195 = vector.load %arg3[%c0_117, %c10_118, %c0_119, %c0_120] : memref<1x35x64x64xf32, #tpu.memory_space<vmem>>, vector<1x1x64x64xf32>
    %196 = vector.shape_cast %195 : vector<1x1x64x64xf32> to vector<64x64xf32>
    %cst_121 = arith.constant dense<0.000000e+00> : vector<8x64xf32>
    %197 = tpu.matmul %180, %196, %cst_121 {dimension_numbers = #tpu.dot_dimension_numbers<[1], [0], [0], [1], [0, 0, 1, 1], [], []>} : vector<8x64xf32>, vector<64x64xf32>, vector<8x64xf32> -> vector<8x64xf32>
    %c0_122 = arith.constant 0 : index
    %c14 = arith.constant 14 : index
    %c0_123 = arith.constant 0 : index
    %c0_124 = arith.constant 0 : index
    %198 = vector.load %arg4[%c0_122, %c14, %c0_123, %c0_124] : memref<1x59x1x64xf32, #tpu.memory_space<vmem>>, vector<1x1x1x64xf32>
    %199 = vector.shape_cast %198 : vector<1x1x1x64xf32> to vector<1x64xf32>
    %200 = vector.broadcast %199 : vector<1x64xf32> to vector<8x64xf32>
    %201 = arith.addf %197, %200 : vector<8x64xf32>
    %c0_125 = arith.constant 0 : index
    %c11_126 = arith.constant 11 : index
    %c0_127 = arith.constant 0 : index
    %c0_128 = arith.constant 0 : index
    %202 = vector.load %arg3[%c0_125, %c11_126, %c0_127, %c0_128] : memref<1x35x64x64xf32, #tpu.memory_space<vmem>>, vector<1x1x64x64xf32>
    %203 = vector.shape_cast %202 : vector<1x1x64x64xf32> to vector<64x64xf32>
    %204 = vector.extract_strided_slice %187 {offsets = [0, 0], sizes = [8, 16], strides = [1, 1]} : vector<8x64xf32> to vector<8x16xf32>
    %205 = vector.extract_strided_slice %194 {offsets = [0, 0], sizes = [8, 16], strides = [1, 1]} : vector<8x64xf32> to vector<8x16xf32>
    %cst_129 = arith.constant dense<0.000000e+00> : vector<8x8xf32>
    %206 = tpu.matmul %204, %205, %cst_129 {dimension_numbers = #tpu.dot_dimension_numbers<[1], [1], [0], [0], [0, 0, 1, 0], [], []>} : vector<8x16xf32>, vector<8x16xf32>, vector<8x8xf32> -> vector<8x8xf32>
    %cst_130 = arith.constant 2.500000e-01 : f32
    %207 = vector.broadcast %cst_130 : f32 to vector<8x8xf32>
    %208 = arith.mulf %207, %206 : vector<8x8xf32>
    %cst_131 = arith.constant dense<0xFF800000> : vector<8xf32>
    %209 = vector.multi_reduction <maximumf>, %208, %cst_131 [1] : vector<8x8xf32> to vector<8xf32>
    %210 = vector.shape_cast %209 : vector<8xf32> to vector<8x1xf32>
    %211 = vector.broadcast %210 : vector<8x1xf32> to vector<8x8xf32>
    %212 = arith.subf %208, %211 : vector<8x8xf32>
    %213 = math.exp %212 : vector<8x8xf32>
    %cst_132 = arith.constant dense<0.000000e+00> : vector<8xf32>
    %214 = vector.multi_reduction <add>, %213, %cst_132 [1] : vector<8x8xf32> to vector<8xf32>
    %215 = vector.shape_cast %214 : vector<8xf32> to vector<8x1xf32>
    %216 = vector.broadcast %215 : vector<8x1xf32> to vector<8x8xf32>
    %217 = arith.divf %213, %216 : vector<8x8xf32>
    %218 = vector.extract_strided_slice %201 {offsets = [0, 0], sizes = [8, 16], strides = [1, 1]} : vector<8x64xf32> to vector<8x16xf32>
    %cst_133 = arith.constant dense<0.000000e+00> : vector<8x16xf32>
    %219 = tpu.matmul %217, %218, %cst_133 {dimension_numbers = #tpu.dot_dimension_numbers<[1], [0], [0], [1], [0, 0, 1, 1], [], []>} : vector<8x8xf32>, vector<8x16xf32>, vector<8x16xf32> -> vector<8x16xf32>
    %220 = vector.extract_strided_slice %203 {offsets = [0, 0], sizes = [16, 64], strides = [1, 1]} : vector<64x64xf32> to vector<16x64xf32>
    %cst_134 = arith.constant dense<0.000000e+00> : vector<8x64xf32>
    %221 = tpu.matmul %219, %220, %cst_134 {dimension_numbers = #tpu.dot_dimension_numbers<[1], [0], [0], [1], [0, 0, 1, 1], [], []>} : vector<8x16xf32>, vector<16x64xf32>, vector<8x64xf32> -> vector<8x64xf32>
    %222 = vector.extract_strided_slice %187 {offsets = [0, 16], sizes = [8, 16], strides = [1, 1]} : vector<8x64xf32> to vector<8x16xf32>
    %223 = vector.extract_strided_slice %194 {offsets = [0, 16], sizes = [8, 16], strides = [1, 1]} : vector<8x64xf32> to vector<8x16xf32>
    %cst_135 = arith.constant dense<0.000000e+00> : vector<8x8xf32>
    %224 = tpu.matmul %222, %223, %cst_135 {dimension_numbers = #tpu.dot_dimension_numbers<[1], [1], [0], [0], [0, 0, 1, 0], [], []>} : vector<8x16xf32>, vector<8x16xf32>, vector<8x8xf32> -> vector<8x8xf32>
    %cst_136 = arith.constant 2.500000e-01 : f32
    %225 = vector.broadcast %cst_136 : f32 to vector<8x8xf32>
    %226 = arith.mulf %225, %224 : vector<8x8xf32>
    %cst_137 = arith.constant dense<0xFF800000> : vector<8xf32>
    %227 = vector.multi_reduction <maximumf>, %226, %cst_137 [1] : vector<8x8xf32> to vector<8xf32>
    %228 = vector.shape_cast %227 : vector<8xf32> to vector<8x1xf32>
    %229 = vector.broadcast %228 : vector<8x1xf32> to vector<8x8xf32>
    %230 = arith.subf %226, %229 : vector<8x8xf32>
    %231 = math.exp %230 : vector<8x8xf32>
    %cst_138 = arith.constant dense<0.000000e+00> : vector<8xf32>
    %232 = vector.multi_reduction <add>, %231, %cst_138 [1] : vector<8x8xf32> to vector<8xf32>
    %233 = vector.shape_cast %232 : vector<8xf32> to vector<8x1xf32>
    %234 = vector.broadcast %233 : vector<8x1xf32> to vector<8x8xf32>
    %235 = arith.divf %231, %234 : vector<8x8xf32>
    %236 = vector.extract_strided_slice %201 {offsets = [0, 16], sizes = [8, 16], strides = [1, 1]} : vector<8x64xf32> to vector<8x16xf32>
    %cst_139 = arith.constant dense<0.000000e+00> : vector<8x16xf32>
    %237 = tpu.matmul %235, %236, %cst_139 {dimension_numbers = #tpu.dot_dimension_numbers<[1], [0], [0], [1], [0, 0, 1, 1], [], []>} : vector<8x8xf32>, vector<8x16xf32>, vector<8x16xf32> -> vector<8x16xf32>
    %238 = vector.extract_strided_slice %203 {offsets = [16, 0], sizes = [16, 64], strides = [1, 1]} : vector<64x64xf32> to vector<16x64xf32>
    %cst_140 = arith.constant dense<0.000000e+00> : vector<8x64xf32>
    %239 = tpu.matmul %237, %238, %cst_140 {dimension_numbers = #tpu.dot_dimension_numbers<[1], [0], [0], [1], [0, 0, 1, 1], [], []>} : vector<8x16xf32>, vector<16x64xf32>, vector<8x64xf32> -> vector<8x64xf32>
    %240 = arith.addf %221, %239 : vector<8x64xf32>
    %241 = vector.extract_strided_slice %187 {offsets = [0, 32], sizes = [8, 16], strides = [1, 1]} : vector<8x64xf32> to vector<8x16xf32>
    %242 = vector.extract_strided_slice %194 {offsets = [0, 32], sizes = [8, 16], strides = [1, 1]} : vector<8x64xf32> to vector<8x16xf32>
    %cst_141 = arith.constant dense<0.000000e+00> : vector<8x8xf32>
    %243 = tpu.matmul %241, %242, %cst_141 {dimension_numbers = #tpu.dot_dimension_numbers<[1], [1], [0], [0], [0, 0, 1, 0], [], []>} : vector<8x16xf32>, vector<8x16xf32>, vector<8x8xf32> -> vector<8x8xf32>
    %cst_142 = arith.constant 2.500000e-01 : f32
    %244 = vector.broadcast %cst_142 : f32 to vector<8x8xf32>
    %245 = arith.mulf %244, %243 : vector<8x8xf32>
    %cst_143 = arith.constant dense<0xFF800000> : vector<8xf32>
    %246 = vector.multi_reduction <maximumf>, %245, %cst_143 [1] : vector<8x8xf32> to vector<8xf32>
    %247 = vector.shape_cast %246 : vector<8xf32> to vector<8x1xf32>
    %248 = vector.broadcast %247 : vector<8x1xf32> to vector<8x8xf32>
    %249 = arith.subf %245, %248 : vector<8x8xf32>
    %250 = math.exp %249 : vector<8x8xf32>
    %cst_144 = arith.constant dense<0.000000e+00> : vector<8xf32>
    %251 = vector.multi_reduction <add>, %250, %cst_144 [1] : vector<8x8xf32> to vector<8xf32>
    %252 = vector.shape_cast %251 : vector<8xf32> to vector<8x1xf32>
    %253 = vector.broadcast %252 : vector<8x1xf32> to vector<8x8xf32>
    %254 = arith.divf %250, %253 : vector<8x8xf32>
    %255 = vector.extract_strided_slice %201 {offsets = [0, 32], sizes = [8, 16], strides = [1, 1]} : vector<8x64xf32> to vector<8x16xf32>
    %cst_145 = arith.constant dense<0.000000e+00> : vector<8x16xf32>
    %256 = tpu.matmul %254, %255, %cst_145 {dimension_numbers = #tpu.dot_dimension_numbers<[1], [0], [0], [1], [0, 0, 1, 1], [], []>} : vector<8x8xf32>, vector<8x16xf32>, vector<8x16xf32> -> vector<8x16xf32>
    %257 = vector.extract_strided_slice %203 {offsets = [32, 0], sizes = [16, 64], strides = [1, 1]} : vector<64x64xf32> to vector<16x64xf32>
    %cst_146 = arith.constant dense<0.000000e+00> : vector<8x64xf32>
    %258 = tpu.matmul %256, %257, %cst_146 {dimension_numbers = #tpu.dot_dimension_numbers<[1], [0], [0], [1], [0, 0, 1, 1], [], []>} : vector<8x16xf32>, vector<16x64xf32>, vector<8x64xf32> -> vector<8x64xf32>
    %259 = arith.addf %240, %258 : vector<8x64xf32>
    %260 = vector.extract_strided_slice %187 {offsets = [0, 48], sizes = [8, 16], strides = [1, 1]} : vector<8x64xf32> to vector<8x16xf32>
    %261 = vector.extract_strided_slice %194 {offsets = [0, 48], sizes = [8, 16], strides = [1, 1]} : vector<8x64xf32> to vector<8x16xf32>
    %cst_147 = arith.constant dense<0.000000e+00> : vector<8x8xf32>
    %262 = tpu.matmul %260, %261, %cst_147 {dimension_numbers = #tpu.dot_dimension_numbers<[1], [1], [0], [0], [0, 0, 1, 0], [], []>} : vector<8x16xf32>, vector<8x16xf32>, vector<8x8xf32> -> vector<8x8xf32>
    %cst_148 = arith.constant 2.500000e-01 : f32
    %263 = vector.broadcast %cst_148 : f32 to vector<8x8xf32>
    %264 = arith.mulf %263, %262 : vector<8x8xf32>
    %cst_149 = arith.constant dense<0xFF800000> : vector<8xf32>
    %265 = vector.multi_reduction <maximumf>, %264, %cst_149 [1] : vector<8x8xf32> to vector<8xf32>
    %266 = vector.shape_cast %265 : vector<8xf32> to vector<8x1xf32>
    %267 = vector.broadcast %266 : vector<8x1xf32> to vector<8x8xf32>
    %268 = arith.subf %264, %267 : vector<8x8xf32>
    %269 = math.exp %268 : vector<8x8xf32>
    %cst_150 = arith.constant dense<0.000000e+00> : vector<8xf32>
    %270 = vector.multi_reduction <add>, %269, %cst_150 [1] : vector<8x8xf32> to vector<8xf32>
    %271 = vector.shape_cast %270 : vector<8xf32> to vector<8x1xf32>
    %272 = vector.broadcast %271 : vector<8x1xf32> to vector<8x8xf32>
    %273 = arith.divf %269, %272 : vector<8x8xf32>
    %274 = vector.extract_strided_slice %201 {offsets = [0, 48], sizes = [8, 16], strides = [1, 1]} : vector<8x64xf32> to vector<8x16xf32>
    %cst_151 = arith.constant dense<0.000000e+00> : vector<8x16xf32>
    %275 = tpu.matmul %273, %274, %cst_151 {dimension_numbers = #tpu.dot_dimension_numbers<[1], [0], [0], [1], [0, 0, 1, 1], [], []>} : vector<8x8xf32>, vector<8x16xf32>, vector<8x16xf32> -> vector<8x16xf32>
    %276 = vector.extract_strided_slice %203 {offsets = [48, 0], sizes = [16, 64], strides = [1, 1]} : vector<64x64xf32> to vector<16x64xf32>
    %cst_152 = arith.constant dense<0.000000e+00> : vector<8x64xf32>
    %277 = tpu.matmul %275, %276, %cst_152 {dimension_numbers = #tpu.dot_dimension_numbers<[1], [0], [0], [1], [0, 0, 1, 1], [], []>} : vector<8x16xf32>, vector<16x64xf32>, vector<8x64xf32> -> vector<8x64xf32>
    %278 = arith.addf %259, %277 : vector<8x64xf32>
    %c0_153 = arith.constant 0 : index
    %c15 = arith.constant 15 : index
    %c0_154 = arith.constant 0 : index
    %c0_155 = arith.constant 0 : index
    %279 = vector.load %arg4[%c0_153, %c15, %c0_154, %c0_155] : memref<1x59x1x64xf32, #tpu.memory_space<vmem>>, vector<1x1x1x64xf32>
    %280 = vector.shape_cast %279 : vector<1x1x1x64xf32> to vector<1x64xf32>
    %281 = vector.broadcast %280 : vector<1x64xf32> to vector<8x64xf32>
    %282 = arith.addf %278, %281 : vector<8x64xf32>
    %283 = arith.addf %180, %282 : vector<8x64xf32>
    %c0_156 = arith.constant 0 : index
    %c18 = arith.constant 18 : index
    %c0_157 = arith.constant 0 : index
    %c0_158 = arith.constant 0 : index
    %284 = vector.load %arg4[%c0_156, %c18, %c0_157, %c0_158] : memref<1x59x1x64xf32, #tpu.memory_space<vmem>>, vector<1x1x1x64xf32>
    %285 = vector.shape_cast %284 : vector<1x1x1x64xf32> to vector<1x64xf32>
    %c0_159 = arith.constant 0 : index
    %c19 = arith.constant 19 : index
    %c0_160 = arith.constant 0 : index
    %c0_161 = arith.constant 0 : index
    %286 = vector.load %arg4[%c0_159, %c19, %c0_160, %c0_161] : memref<1x59x1x64xf32, #tpu.memory_space<vmem>>, vector<1x1x1x64xf32>
    %287 = vector.shape_cast %286 : vector<1x1x1x64xf32> to vector<1x64xf32>
    %cst_162 = arith.constant dense<0.000000e+00> : vector<8xf32>
    %288 = vector.multi_reduction <add>, %283, %cst_162 [1] : vector<8x64xf32> to vector<8xf32>
    %289 = vector.shape_cast %288 : vector<8xf32> to vector<8x1xf32>
    %cst_163 = arith.constant 6.400000e+01 : f32
    %290 = vector.broadcast %cst_163 : f32 to vector<8x1xf32>
    %291 = arith.divf %289, %290 : vector<8x1xf32>
    %292 = vector.broadcast %291 : vector<8x1xf32> to vector<8x64xf32>
    %293 = arith.subf %283, %292 : vector<8x64xf32>
    %294 = arith.mulf %293, %293 : vector<8x64xf32>
    %cst_164 = arith.constant dense<0.000000e+00> : vector<8xf32>
    %295 = vector.multi_reduction <add>, %294, %cst_164 [1] : vector<8x64xf32> to vector<8xf32>
    %296 = vector.shape_cast %295 : vector<8xf32> to vector<8x1xf32>
    %cst_165 = arith.constant 6.400000e+01 : f32
    %297 = vector.broadcast %cst_165 : f32 to vector<8x1xf32>
    %298 = arith.divf %296, %297 : vector<8x1xf32>
    %299 = vector.broadcast %291 : vector<8x1xf32> to vector<8x64xf32>
    %300 = arith.subf %283, %299 : vector<8x64xf32>
    %cst_166 = arith.constant 9.99999974E-6 : f32
    %301 = vector.broadcast %cst_166 : f32 to vector<8x1xf32>
    %302 = arith.addf %298, %301 : vector<8x1xf32>
    %303 = math.rsqrt %302 : vector<8x1xf32>
    %304 = vector.broadcast %303 : vector<8x1xf32> to vector<8x64xf32>
    %305 = arith.mulf %300, %304 : vector<8x64xf32>
    %306 = vector.broadcast %285 : vector<1x64xf32> to vector<8x64xf32>
    %307 = arith.mulf %305, %306 : vector<8x64xf32>
    %308 = vector.broadcast %287 : vector<1x64xf32> to vector<8x64xf32>
    %309 = arith.addf %307, %308 : vector<8x64xf32>
    %c0_167 = arith.constant 0 : index
    %c12_168 = arith.constant 12 : index
    %c0_169 = arith.constant 0 : index
    %c0_170 = arith.constant 0 : index
    %310 = vector.load %arg3[%c0_167, %c12_168, %c0_169, %c0_170] : memref<1x35x64x64xf32, #tpu.memory_space<vmem>>, vector<1x1x64x64xf32>
    %311 = vector.shape_cast %310 : vector<1x1x64x64xf32> to vector<64x64xf32>
    %cst_171 = arith.constant dense<0.000000e+00> : vector<8x64xf32>
    %312 = tpu.matmul %309, %311, %cst_171 {dimension_numbers = #tpu.dot_dimension_numbers<[1], [0], [0], [1], [0, 0, 1, 1], [], []>} : vector<8x64xf32>, vector<64x64xf32>, vector<8x64xf32> -> vector<8x64xf32>
    %c0_172 = arith.constant 0 : index
    %c16 = arith.constant 16 : index
    %c0_173 = arith.constant 0 : index
    %c0_174 = arith.constant 0 : index
    %313 = vector.load %arg4[%c0_172, %c16, %c0_173, %c0_174] : memref<1x59x1x64xf32, #tpu.memory_space<vmem>>, vector<1x1x1x64xf32>
    %314 = vector.shape_cast %313 : vector<1x1x1x64xf32> to vector<1x64xf32>
    %315 = vector.broadcast %314 : vector<1x64xf32> to vector<8x64xf32>
    %316 = arith.addf %312, %315 : vector<8x64xf32>
    %cst_175 = arith.constant 0.000000e+00 : f32
    %317 = vector.broadcast %cst_175 : f32 to vector<8x64xf32>
    %318 = arith.maximumf %316, %317 : vector<8x64xf32>
    %c0_176 = arith.constant 0 : index
    %c13_177 = arith.constant 13 : index
    %c0_178 = arith.constant 0 : index
    %c0_179 = arith.constant 0 : index
    %319 = vector.load %arg3[%c0_176, %c13_177, %c0_178, %c0_179] : memref<1x35x64x64xf32, #tpu.memory_space<vmem>>, vector<1x1x64x64xf32>
    %320 = vector.shape_cast %319 : vector<1x1x64x64xf32> to vector<64x64xf32>
    %cst_180 = arith.constant dense<0.000000e+00> : vector<8x64xf32>
    %321 = tpu.matmul %318, %320, %cst_180 {dimension_numbers = #tpu.dot_dimension_numbers<[1], [0], [0], [1], [0, 0, 1, 1], [], []>} : vector<8x64xf32>, vector<64x64xf32>, vector<8x64xf32> -> vector<8x64xf32>
    %c0_181 = arith.constant 0 : index
    %c17 = arith.constant 17 : index
    %c0_182 = arith.constant 0 : index
    %c0_183 = arith.constant 0 : index
    %322 = vector.load %arg4[%c0_181, %c17, %c0_182, %c0_183] : memref<1x59x1x64xf32, #tpu.memory_space<vmem>>, vector<1x1x1x64xf32>
    %323 = vector.shape_cast %322 : vector<1x1x1x64xf32> to vector<1x64xf32>
    %324 = vector.broadcast %323 : vector<1x64xf32> to vector<8x64xf32>
    %325 = arith.addf %321, %324 : vector<8x64xf32>
    %326 = arith.addf %309, %325 : vector<8x64xf32>
    %c0_184 = arith.constant 0 : index
    %c20 = arith.constant 20 : index
    %c0_185 = arith.constant 0 : index
    %c0_186 = arith.constant 0 : index
    %327 = vector.load %arg4[%c0_184, %c20, %c0_185, %c0_186] : memref<1x59x1x64xf32, #tpu.memory_space<vmem>>, vector<1x1x1x64xf32>
    %328 = vector.shape_cast %327 : vector<1x1x1x64xf32> to vector<1x64xf32>
    %c0_187 = arith.constant 0 : index
    %c21 = arith.constant 21 : index
    %c0_188 = arith.constant 0 : index
    %c0_189 = arith.constant 0 : index
    %329 = vector.load %arg4[%c0_187, %c21, %c0_188, %c0_189] : memref<1x59x1x64xf32, #tpu.memory_space<vmem>>, vector<1x1x1x64xf32>
    %330 = vector.shape_cast %329 : vector<1x1x1x64xf32> to vector<1x64xf32>
    %cst_190 = arith.constant dense<0.000000e+00> : vector<8xf32>
    %331 = vector.multi_reduction <add>, %326, %cst_190 [1] : vector<8x64xf32> to vector<8xf32>
    %332 = vector.shape_cast %331 : vector<8xf32> to vector<8x1xf32>
    %cst_191 = arith.constant 6.400000e+01 : f32
    %333 = vector.broadcast %cst_191 : f32 to vector<8x1xf32>
    %334 = arith.divf %332, %333 : vector<8x1xf32>
    %335 = vector.broadcast %334 : vector<8x1xf32> to vector<8x64xf32>
    %336 = arith.subf %326, %335 : vector<8x64xf32>
    %337 = arith.mulf %336, %336 : vector<8x64xf32>
    %cst_192 = arith.constant dense<0.000000e+00> : vector<8xf32>
    %338 = vector.multi_reduction <add>, %337, %cst_192 [1] : vector<8x64xf32> to vector<8xf32>
    %339 = vector.shape_cast %338 : vector<8xf32> to vector<8x1xf32>
    %cst_193 = arith.constant 6.400000e+01 : f32
    %340 = vector.broadcast %cst_193 : f32 to vector<8x1xf32>
    %341 = arith.divf %339, %340 : vector<8x1xf32>
    %342 = vector.broadcast %334 : vector<8x1xf32> to vector<8x64xf32>
    %343 = arith.subf %326, %342 : vector<8x64xf32>
    %cst_194 = arith.constant 9.99999974E-6 : f32
    %344 = vector.broadcast %cst_194 : f32 to vector<8x1xf32>
    %345 = arith.addf %341, %344 : vector<8x1xf32>
    %346 = math.rsqrt %345 : vector<8x1xf32>
    %347 = vector.broadcast %346 : vector<8x1xf32> to vector<8x64xf32>
    %348 = arith.mulf %343, %347 : vector<8x64xf32>
    %349 = vector.broadcast %328 : vector<1x64xf32> to vector<8x64xf32>
    %350 = arith.mulf %348, %349 : vector<8x64xf32>
    %351 = vector.broadcast %330 : vector<1x64xf32> to vector<8x64xf32>
    %352 = arith.addf %350, %351 : vector<8x64xf32>
    %c0_195 = arith.constant 0 : index
    %c54 = arith.constant 54 : index
    %c0_196 = arith.constant 0 : index
    %c0_197 = arith.constant 0 : index
    %353 = vector.load %arg4[%c0_195, %c54, %c0_196, %c0_197] : memref<1x59x1x64xf32, #tpu.memory_space<vmem>>, vector<1x1x1x64xf32>
    %354 = vector.shape_cast %353 : vector<1x1x1x64xf32> to vector<1x64xf32>
    %c0_198 = arith.constant 0 : index
    %c55 = arith.constant 55 : index
    %c0_199 = arith.constant 0 : index
    %c0_200 = arith.constant 0 : index
    %355 = vector.load %arg4[%c0_198, %c55, %c0_199, %c0_200] : memref<1x59x1x64xf32, #tpu.memory_space<vmem>>, vector<1x1x1x64xf32>
    %356 = vector.shape_cast %355 : vector<1x1x1x64xf32> to vector<1x64xf32>
    %cst_201 = arith.constant dense<0.000000e+00> : vector<8xf32>
    %357 = vector.multi_reduction <add>, %352, %cst_201 [1] : vector<8x64xf32> to vector<8xf32>
    %358 = vector.shape_cast %357 : vector<8xf32> to vector<8x1xf32>
    %cst_202 = arith.constant 6.400000e+01 : f32
    %359 = vector.broadcast %cst_202 : f32 to vector<8x1xf32>
    %360 = arith.divf %358, %359 : vector<8x1xf32>
    %361 = vector.broadcast %360 : vector<8x1xf32> to vector<8x64xf32>
    %362 = arith.subf %352, %361 : vector<8x64xf32>
    %363 = arith.mulf %362, %362 : vector<8x64xf32>
    %cst_203 = arith.constant dense<0.000000e+00> : vector<8xf32>
    %364 = vector.multi_reduction <add>, %363, %cst_203 [1] : vector<8x64xf32> to vector<8xf32>
    %365 = vector.shape_cast %364 : vector<8xf32> to vector<8x1xf32>
    %cst_204 = arith.constant 6.400000e+01 : f32
    %366 = vector.broadcast %cst_204 : f32 to vector<8x1xf32>
    %367 = arith.divf %365, %366 : vector<8x1xf32>
    %368 = vector.broadcast %360 : vector<8x1xf32> to vector<8x64xf32>
    %369 = arith.subf %352, %368 : vector<8x64xf32>
    %cst_205 = arith.constant 9.99999974E-6 : f32
    %370 = vector.broadcast %cst_205 : f32 to vector<8x1xf32>
    %371 = arith.addf %367, %370 : vector<8x1xf32>
    %372 = math.rsqrt %371 : vector<8x1xf32>
    %373 = vector.broadcast %372 : vector<8x1xf32> to vector<8x64xf32>
    %374 = arith.mulf %369, %373 : vector<8x64xf32>
    %375 = vector.broadcast %354 : vector<1x64xf32> to vector<8x64xf32>
    %376 = arith.mulf %374, %375 : vector<8x64xf32>
    %377 = vector.broadcast %356 : vector<1x64xf32> to vector<8x64xf32>
    %378 = arith.addf %376, %377 : vector<8x64xf32>
    %c0_206 = arith.constant 0 : index
    %c14_207 = arith.constant 14 : index
    %c0_208 = arith.constant 0 : index
    %c0_209 = arith.constant 0 : index
    %379 = vector.load %arg3[%c0_206, %c14_207, %c0_208, %c0_209] : memref<1x35x64x64xf32, #tpu.memory_space<vmem>>, vector<1x1x64x64xf32>
    %380 = vector.shape_cast %379 : vector<1x1x64x64xf32> to vector<64x64xf32>
    %cst_210 = arith.constant dense<0.000000e+00> : vector<8x64xf32>
    %381 = tpu.matmul %8, %380, %cst_210 {dimension_numbers = #tpu.dot_dimension_numbers<[1], [0], [0], [1], [0, 0, 1, 1], [], []>} : vector<8x64xf32>, vector<64x64xf32>, vector<8x64xf32> -> vector<8x64xf32>
    %c0_211 = arith.constant 0 : index
    %c22 = arith.constant 22 : index
    %c0_212 = arith.constant 0 : index
    %c0_213 = arith.constant 0 : index
    %382 = vector.load %arg4[%c0_211, %c22, %c0_212, %c0_213] : memref<1x59x1x64xf32, #tpu.memory_space<vmem>>, vector<1x1x1x64xf32>
    %383 = vector.shape_cast %382 : vector<1x1x1x64xf32> to vector<1x64xf32>
    %384 = vector.broadcast %383 : vector<1x64xf32> to vector<8x64xf32>
    %385 = arith.addf %381, %384 : vector<8x64xf32>
    %c0_214 = arith.constant 0 : index
    %c15_215 = arith.constant 15 : index
    %c0_216 = arith.constant 0 : index
    %c0_217 = arith.constant 0 : index
    %386 = vector.load %arg3[%c0_214, %c15_215, %c0_216, %c0_217] : memref<1x35x64x64xf32, #tpu.memory_space<vmem>>, vector<1x1x64x64xf32>
    %387 = vector.shape_cast %386 : vector<1x1x64x64xf32> to vector<64x64xf32>
    %cst_218 = arith.constant dense<0.000000e+00> : vector<8x64xf32>
    %388 = tpu.matmul %8, %387, %cst_218 {dimension_numbers = #tpu.dot_dimension_numbers<[1], [0], [0], [1], [0, 0, 1, 1], [], []>} : vector<8x64xf32>, vector<64x64xf32>, vector<8x64xf32> -> vector<8x64xf32>
    %c0_219 = arith.constant 0 : index
    %c23 = arith.constant 23 : index
    %c0_220 = arith.constant 0 : index
    %c0_221 = arith.constant 0 : index
    %389 = vector.load %arg4[%c0_219, %c23, %c0_220, %c0_221] : memref<1x59x1x64xf32, #tpu.memory_space<vmem>>, vector<1x1x1x64xf32>
    %390 = vector.shape_cast %389 : vector<1x1x1x64xf32> to vector<1x64xf32>
    %391 = vector.broadcast %390 : vector<1x64xf32> to vector<8x64xf32>
    %392 = arith.addf %388, %391 : vector<8x64xf32>
    %c0_222 = arith.constant 0 : index
    %c16_223 = arith.constant 16 : index
    %c0_224 = arith.constant 0 : index
    %c0_225 = arith.constant 0 : index
    %393 = vector.load %arg3[%c0_222, %c16_223, %c0_224, %c0_225] : memref<1x35x64x64xf32, #tpu.memory_space<vmem>>, vector<1x1x64x64xf32>
    %394 = vector.shape_cast %393 : vector<1x1x64x64xf32> to vector<64x64xf32>
    %cst_226 = arith.constant dense<0.000000e+00> : vector<8x64xf32>
    %395 = tpu.matmul %8, %394, %cst_226 {dimension_numbers = #tpu.dot_dimension_numbers<[1], [0], [0], [1], [0, 0, 1, 1], [], []>} : vector<8x64xf32>, vector<64x64xf32>, vector<8x64xf32> -> vector<8x64xf32>
    %c0_227 = arith.constant 0 : index
    %c24 = arith.constant 24 : index
    %c0_228 = arith.constant 0 : index
    %c0_229 = arith.constant 0 : index
    %396 = vector.load %arg4[%c0_227, %c24, %c0_228, %c0_229] : memref<1x59x1x64xf32, #tpu.memory_space<vmem>>, vector<1x1x1x64xf32>
    %397 = vector.shape_cast %396 : vector<1x1x1x64xf32> to vector<1x64xf32>
    %398 = vector.broadcast %397 : vector<1x64xf32> to vector<8x64xf32>
    %399 = arith.addf %395, %398 : vector<8x64xf32>
    %c0_230 = arith.constant 0 : index
    %c17_231 = arith.constant 17 : index
    %c0_232 = arith.constant 0 : index
    %c0_233 = arith.constant 0 : index
    %400 = vector.load %arg3[%c0_230, %c17_231, %c0_232, %c0_233] : memref<1x35x64x64xf32, #tpu.memory_space<vmem>>, vector<1x1x64x64xf32>
    %401 = vector.shape_cast %400 : vector<1x1x64x64xf32> to vector<64x64xf32>
    %402 = vector.extract_strided_slice %385 {offsets = [0, 0], sizes = [8, 16], strides = [1, 1]} : vector<8x64xf32> to vector<8x16xf32>
    %403 = vector.extract_strided_slice %392 {offsets = [0, 0], sizes = [8, 16], strides = [1, 1]} : vector<8x64xf32> to vector<8x16xf32>
    %cst_234 = arith.constant dense<0.000000e+00> : vector<8x8xf32>
    %404 = tpu.matmul %402, %403, %cst_234 {dimension_numbers = #tpu.dot_dimension_numbers<[1], [1], [0], [0], [0, 0, 1, 0], [], []>} : vector<8x16xf32>, vector<8x16xf32>, vector<8x8xf32> -> vector<8x8xf32>
    %cst_235 = arith.constant 2.500000e-01 : f32
    %405 = vector.broadcast %cst_235 : f32 to vector<8x8xf32>
    %406 = arith.mulf %405, %404 : vector<8x8xf32>
    %cst_236 = arith.constant dense<0xFF800000> : vector<8xf32>
    %407 = vector.multi_reduction <maximumf>, %406, %cst_236 [1] : vector<8x8xf32> to vector<8xf32>
    %408 = vector.shape_cast %407 : vector<8xf32> to vector<8x1xf32>
    %409 = vector.broadcast %408 : vector<8x1xf32> to vector<8x8xf32>
    %410 = arith.subf %406, %409 : vector<8x8xf32>
    %411 = math.exp %410 : vector<8x8xf32>
    %cst_237 = arith.constant dense<0.000000e+00> : vector<8xf32>
    %412 = vector.multi_reduction <add>, %411, %cst_237 [1] : vector<8x8xf32> to vector<8xf32>
    %413 = vector.shape_cast %412 : vector<8xf32> to vector<8x1xf32>
    %414 = vector.broadcast %413 : vector<8x1xf32> to vector<8x8xf32>
    %415 = arith.divf %411, %414 : vector<8x8xf32>
    %416 = vector.extract_strided_slice %399 {offsets = [0, 0], sizes = [8, 16], strides = [1, 1]} : vector<8x64xf32> to vector<8x16xf32>
    %cst_238 = arith.constant dense<0.000000e+00> : vector<8x16xf32>
    %417 = tpu.matmul %415, %416, %cst_238 {dimension_numbers = #tpu.dot_dimension_numbers<[1], [0], [0], [1], [0, 0, 1, 1], [], []>} : vector<8x8xf32>, vector<8x16xf32>, vector<8x16xf32> -> vector<8x16xf32>
    %418 = vector.extract_strided_slice %401 {offsets = [0, 0], sizes = [16, 64], strides = [1, 1]} : vector<64x64xf32> to vector<16x64xf32>
    %cst_239 = arith.constant dense<0.000000e+00> : vector<8x64xf32>
    %419 = tpu.matmul %417, %418, %cst_239 {dimension_numbers = #tpu.dot_dimension_numbers<[1], [0], [0], [1], [0, 0, 1, 1], [], []>} : vector<8x16xf32>, vector<16x64xf32>, vector<8x64xf32> -> vector<8x64xf32>
    %420 = vector.extract_strided_slice %385 {offsets = [0, 16], sizes = [8, 16], strides = [1, 1]} : vector<8x64xf32> to vector<8x16xf32>
    %421 = vector.extract_strided_slice %392 {offsets = [0, 16], sizes = [8, 16], strides = [1, 1]} : vector<8x64xf32> to vector<8x16xf32>
    %cst_240 = arith.constant dense<0.000000e+00> : vector<8x8xf32>
    %422 = tpu.matmul %420, %421, %cst_240 {dimension_numbers = #tpu.dot_dimension_numbers<[1], [1], [0], [0], [0, 0, 1, 0], [], []>} : vector<8x16xf32>, vector<8x16xf32>, vector<8x8xf32> -> vector<8x8xf32>
    %cst_241 = arith.constant 2.500000e-01 : f32
    %423 = vector.broadcast %cst_241 : f32 to vector<8x8xf32>
    %424 = arith.mulf %423, %422 : vector<8x8xf32>
    %cst_242 = arith.constant dense<0xFF800000> : vector<8xf32>
    %425 = vector.multi_reduction <maximumf>, %424, %cst_242 [1] : vector<8x8xf32> to vector<8xf32>
    %426 = vector.shape_cast %425 : vector<8xf32> to vector<8x1xf32>
    %427 = vector.broadcast %426 : vector<8x1xf32> to vector<8x8xf32>
    %428 = arith.subf %424, %427 : vector<8x8xf32>
    %429 = math.exp %428 : vector<8x8xf32>
    %cst_243 = arith.constant dense<0.000000e+00> : vector<8xf32>
    %430 = vector.multi_reduction <add>, %429, %cst_243 [1] : vector<8x8xf32> to vector<8xf32>
    %431 = vector.shape_cast %430 : vector<8xf32> to vector<8x1xf32>
    %432 = vector.broadcast %431 : vector<8x1xf32> to vector<8x8xf32>
    %433 = arith.divf %429, %432 : vector<8x8xf32>
    %434 = vector.extract_strided_slice %399 {offsets = [0, 16], sizes = [8, 16], strides = [1, 1]} : vector<8x64xf32> to vector<8x16xf32>
    %cst_244 = arith.constant dense<0.000000e+00> : vector<8x16xf32>
    %435 = tpu.matmul %433, %434, %cst_244 {dimension_numbers = #tpu.dot_dimension_numbers<[1], [0], [0], [1], [0, 0, 1, 1], [], []>} : vector<8x8xf32>, vector<8x16xf32>, vector<8x16xf32> -> vector<8x16xf32>
    %436 = vector.extract_strided_slice %401 {offsets = [16, 0], sizes = [16, 64], strides = [1, 1]} : vector<64x64xf32> to vector<16x64xf32>
    %cst_245 = arith.constant dense<0.000000e+00> : vector<8x64xf32>
    %437 = tpu.matmul %435, %436, %cst_245 {dimension_numbers = #tpu.dot_dimension_numbers<[1], [0], [0], [1], [0, 0, 1, 1], [], []>} : vector<8x16xf32>, vector<16x64xf32>, vector<8x64xf32> -> vector<8x64xf32>
    %438 = arith.addf %419, %437 : vector<8x64xf32>
    %439 = vector.extract_strided_slice %385 {offsets = [0, 32], sizes = [8, 16], strides = [1, 1]} : vector<8x64xf32> to vector<8x16xf32>
    %440 = vector.extract_strided_slice %392 {offsets = [0, 32], sizes = [8, 16], strides = [1, 1]} : vector<8x64xf32> to vector<8x16xf32>
    %cst_246 = arith.constant dense<0.000000e+00> : vector<8x8xf32>
    %441 = tpu.matmul %439, %440, %cst_246 {dimension_numbers = #tpu.dot_dimension_numbers<[1], [1], [0], [0], [0, 0, 1, 0], [], []>} : vector<8x16xf32>, vector<8x16xf32>, vector<8x8xf32> -> vector<8x8xf32>
    %cst_247 = arith.constant 2.500000e-01 : f32
    %442 = vector.broadcast %cst_247 : f32 to vector<8x8xf32>
    %443 = arith.mulf %442, %441 : vector<8x8xf32>
    %cst_248 = arith.constant dense<0xFF800000> : vector<8xf32>
    %444 = vector.multi_reduction <maximumf>, %443, %cst_248 [1] : vector<8x8xf32> to vector<8xf32>
    %445 = vector.shape_cast %444 : vector<8xf32> to vector<8x1xf32>
    %446 = vector.broadcast %445 : vector<8x1xf32> to vector<8x8xf32>
    %447 = arith.subf %443, %446 : vector<8x8xf32>
    %448 = math.exp %447 : vector<8x8xf32>
    %cst_249 = arith.constant dense<0.000000e+00> : vector<8xf32>
    %449 = vector.multi_reduction <add>, %448, %cst_249 [1] : vector<8x8xf32> to vector<8xf32>
    %450 = vector.shape_cast %449 : vector<8xf32> to vector<8x1xf32>
    %451 = vector.broadcast %450 : vector<8x1xf32> to vector<8x8xf32>
    %452 = arith.divf %448, %451 : vector<8x8xf32>
    %453 = vector.extract_strided_slice %399 {offsets = [0, 32], sizes = [8, 16], strides = [1, 1]} : vector<8x64xf32> to vector<8x16xf32>
    %cst_250 = arith.constant dense<0.000000e+00> : vector<8x16xf32>
    %454 = tpu.matmul %452, %453, %cst_250 {dimension_numbers = #tpu.dot_dimension_numbers<[1], [0], [0], [1], [0, 0, 1, 1], [], []>} : vector<8x8xf32>, vector<8x16xf32>, vector<8x16xf32> -> vector<8x16xf32>
    %455 = vector.extract_strided_slice %401 {offsets = [32, 0], sizes = [16, 64], strides = [1, 1]} : vector<64x64xf32> to vector<16x64xf32>
    %cst_251 = arith.constant dense<0.000000e+00> : vector<8x64xf32>
    %456 = tpu.matmul %454, %455, %cst_251 {dimension_numbers = #tpu.dot_dimension_numbers<[1], [0], [0], [1], [0, 0, 1, 1], [], []>} : vector<8x16xf32>, vector<16x64xf32>, vector<8x64xf32> -> vector<8x64xf32>
    %457 = arith.addf %438, %456 : vector<8x64xf32>
    %458 = vector.extract_strided_slice %385 {offsets = [0, 48], sizes = [8, 16], strides = [1, 1]} : vector<8x64xf32> to vector<8x16xf32>
    %459 = vector.extract_strided_slice %392 {offsets = [0, 48], sizes = [8, 16], strides = [1, 1]} : vector<8x64xf32> to vector<8x16xf32>
    %cst_252 = arith.constant dense<0.000000e+00> : vector<8x8xf32>
    %460 = tpu.matmul %458, %459, %cst_252 {dimension_numbers = #tpu.dot_dimension_numbers<[1], [1], [0], [0], [0, 0, 1, 0], [], []>} : vector<8x16xf32>, vector<8x16xf32>, vector<8x8xf32> -> vector<8x8xf32>
    %cst_253 = arith.constant 2.500000e-01 : f32
    %461 = vector.broadcast %cst_253 : f32 to vector<8x8xf32>
    %462 = arith.mulf %461, %460 : vector<8x8xf32>
    %cst_254 = arith.constant dense<0xFF800000> : vector<8xf32>
    %463 = vector.multi_reduction <maximumf>, %462, %cst_254 [1] : vector<8x8xf32> to vector<8xf32>
    %464 = vector.shape_cast %463 : vector<8xf32> to vector<8x1xf32>
    %465 = vector.broadcast %464 : vector<8x1xf32> to vector<8x8xf32>
    %466 = arith.subf %462, %465 : vector<8x8xf32>
    %467 = math.exp %466 : vector<8x8xf32>
    %cst_255 = arith.constant dense<0.000000e+00> : vector<8xf32>
    %468 = vector.multi_reduction <add>, %467, %cst_255 [1] : vector<8x8xf32> to vector<8xf32>
    %469 = vector.shape_cast %468 : vector<8xf32> to vector<8x1xf32>
    %470 = vector.broadcast %469 : vector<8x1xf32> to vector<8x8xf32>
    %471 = arith.divf %467, %470 : vector<8x8xf32>
    %472 = vector.extract_strided_slice %399 {offsets = [0, 48], sizes = [8, 16], strides = [1, 1]} : vector<8x64xf32> to vector<8x16xf32>
    %cst_256 = arith.constant dense<0.000000e+00> : vector<8x16xf32>
    %473 = tpu.matmul %471, %472, %cst_256 {dimension_numbers = #tpu.dot_dimension_numbers<[1], [0], [0], [1], [0, 0, 1, 1], [], []>} : vector<8x8xf32>, vector<8x16xf32>, vector<8x16xf32> -> vector<8x16xf32>
    %474 = vector.extract_strided_slice %401 {offsets = [48, 0], sizes = [16, 64], strides = [1, 1]} : vector<64x64xf32> to vector<16x64xf32>
    %cst_257 = arith.constant dense<0.000000e+00> : vector<8x64xf32>
    %475 = tpu.matmul %473, %474, %cst_257 {dimension_numbers = #tpu.dot_dimension_numbers<[1], [0], [0], [1], [0, 0, 1, 1], [], []>} : vector<8x16xf32>, vector<16x64xf32>, vector<8x64xf32> -> vector<8x64xf32>
    %476 = arith.addf %457, %475 : vector<8x64xf32>
    %c0_258 = arith.constant 0 : index
    %c25 = arith.constant 25 : index
    %c0_259 = arith.constant 0 : index
    %c0_260 = arith.constant 0 : index
    %477 = vector.load %arg4[%c0_258, %c25, %c0_259, %c0_260] : memref<1x59x1x64xf32, #tpu.memory_space<vmem>>, vector<1x1x1x64xf32>
    %478 = vector.shape_cast %477 : vector<1x1x1x64xf32> to vector<1x64xf32>
    %479 = vector.broadcast %478 : vector<1x64xf32> to vector<8x64xf32>
    %480 = arith.addf %476, %479 : vector<8x64xf32>
    %481 = arith.addf %8, %480 : vector<8x64xf32>
    %c0_261 = arith.constant 0 : index
    %c32 = arith.constant 32 : index
    %c0_262 = arith.constant 0 : index
    %c0_263 = arith.constant 0 : index
    %482 = vector.load %arg4[%c0_261, %c32, %c0_262, %c0_263] : memref<1x59x1x64xf32, #tpu.memory_space<vmem>>, vector<1x1x1x64xf32>
    %483 = vector.shape_cast %482 : vector<1x1x1x64xf32> to vector<1x64xf32>
    %c0_264 = arith.constant 0 : index
    %c33 = arith.constant 33 : index
    %c0_265 = arith.constant 0 : index
    %c0_266 = arith.constant 0 : index
    %484 = vector.load %arg4[%c0_264, %c33, %c0_265, %c0_266] : memref<1x59x1x64xf32, #tpu.memory_space<vmem>>, vector<1x1x1x64xf32>
    %485 = vector.shape_cast %484 : vector<1x1x1x64xf32> to vector<1x64xf32>
    %cst_267 = arith.constant dense<0.000000e+00> : vector<8xf32>
    %486 = vector.multi_reduction <add>, %481, %cst_267 [1] : vector<8x64xf32> to vector<8xf32>
    %487 = vector.shape_cast %486 : vector<8xf32> to vector<8x1xf32>
    %cst_268 = arith.constant 6.400000e+01 : f32
    %488 = vector.broadcast %cst_268 : f32 to vector<8x1xf32>
    %489 = arith.divf %487, %488 : vector<8x1xf32>
    %490 = vector.broadcast %489 : vector<8x1xf32> to vector<8x64xf32>
    %491 = arith.subf %481, %490 : vector<8x64xf32>
    %492 = arith.mulf %491, %491 : vector<8x64xf32>
    %cst_269 = arith.constant dense<0.000000e+00> : vector<8xf32>
    %493 = vector.multi_reduction <add>, %492, %cst_269 [1] : vector<8x64xf32> to vector<8xf32>
    %494 = vector.shape_cast %493 : vector<8xf32> to vector<8x1xf32>
    %cst_270 = arith.constant 6.400000e+01 : f32
    %495 = vector.broadcast %cst_270 : f32 to vector<8x1xf32>
    %496 = arith.divf %494, %495 : vector<8x1xf32>
    %497 = vector.broadcast %489 : vector<8x1xf32> to vector<8x64xf32>
    %498 = arith.subf %481, %497 : vector<8x64xf32>
    %cst_271 = arith.constant 9.99999974E-6 : f32
    %499 = vector.broadcast %cst_271 : f32 to vector<8x1xf32>
    %500 = arith.addf %496, %499 : vector<8x1xf32>
    %501 = math.rsqrt %500 : vector<8x1xf32>
    %502 = vector.broadcast %501 : vector<8x1xf32> to vector<8x64xf32>
    %503 = arith.mulf %498, %502 : vector<8x64xf32>
    %504 = vector.broadcast %483 : vector<1x64xf32> to vector<8x64xf32>
    %505 = arith.mulf %503, %504 : vector<8x64xf32>
    %506 = vector.broadcast %485 : vector<1x64xf32> to vector<8x64xf32>
    %507 = arith.addf %505, %506 : vector<8x64xf32>
    %c0_272 = arith.constant 0 : index
    %c18_273 = arith.constant 18 : index
    %c0_274 = arith.constant 0 : index
    %c0_275 = arith.constant 0 : index
    %508 = vector.load %arg3[%c0_272, %c18_273, %c0_274, %c0_275] : memref<1x35x64x64xf32, #tpu.memory_space<vmem>>, vector<1x1x64x64xf32>
    %509 = vector.shape_cast %508 : vector<1x1x64x64xf32> to vector<64x64xf32>
    %cst_276 = arith.constant dense<0.000000e+00> : vector<8x64xf32>
    %510 = tpu.matmul %507, %509, %cst_276 {dimension_numbers = #tpu.dot_dimension_numbers<[1], [0], [0], [1], [0, 0, 1, 1], [], []>} : vector<8x64xf32>, vector<64x64xf32>, vector<8x64xf32> -> vector<8x64xf32>
    %c0_277 = arith.constant 0 : index
    %c26 = arith.constant 26 : index
    %c0_278 = arith.constant 0 : index
    %c0_279 = arith.constant 0 : index
    %511 = vector.load %arg4[%c0_277, %c26, %c0_278, %c0_279] : memref<1x59x1x64xf32, #tpu.memory_space<vmem>>, vector<1x1x1x64xf32>
    %512 = vector.shape_cast %511 : vector<1x1x1x64xf32> to vector<1x64xf32>
    %513 = vector.broadcast %512 : vector<1x64xf32> to vector<8x64xf32>
    %514 = arith.addf %510, %513 : vector<8x64xf32>
    %c0_280 = arith.constant 0 : index
    %c19_281 = arith.constant 19 : index
    %c0_282 = arith.constant 0 : index
    %c0_283 = arith.constant 0 : index
    %515 = vector.load %arg3[%c0_280, %c19_281, %c0_282, %c0_283] : memref<1x35x64x64xf32, #tpu.memory_space<vmem>>, vector<1x1x64x64xf32>
    %516 = vector.shape_cast %515 : vector<1x1x64x64xf32> to vector<64x64xf32>
    %cst_284 = arith.constant dense<0.000000e+00> : vector<8x64xf32>
    %517 = tpu.matmul %378, %516, %cst_284 {dimension_numbers = #tpu.dot_dimension_numbers<[1], [0], [0], [1], [0, 0, 1, 1], [], []>} : vector<8x64xf32>, vector<64x64xf32>, vector<8x64xf32> -> vector<8x64xf32>
    %c0_285 = arith.constant 0 : index
    %c27 = arith.constant 27 : index
    %c0_286 = arith.constant 0 : index
    %c0_287 = arith.constant 0 : index
    %518 = vector.load %arg4[%c0_285, %c27, %c0_286, %c0_287] : memref<1x59x1x64xf32, #tpu.memory_space<vmem>>, vector<1x1x1x64xf32>
    %519 = vector.shape_cast %518 : vector<1x1x1x64xf32> to vector<1x64xf32>
    %520 = vector.broadcast %519 : vector<1x64xf32> to vector<8x64xf32>
    %521 = arith.addf %517, %520 : vector<8x64xf32>
    %c0_288 = arith.constant 0 : index
    %c20_289 = arith.constant 20 : index
    %c0_290 = arith.constant 0 : index
    %c0_291 = arith.constant 0 : index
    %522 = vector.load %arg3[%c0_288, %c20_289, %c0_290, %c0_291] : memref<1x35x64x64xf32, #tpu.memory_space<vmem>>, vector<1x1x64x64xf32>
    %523 = vector.shape_cast %522 : vector<1x1x64x64xf32> to vector<64x64xf32>
    %cst_292 = arith.constant dense<0.000000e+00> : vector<8x64xf32>
    %524 = tpu.matmul %378, %523, %cst_292 {dimension_numbers = #tpu.dot_dimension_numbers<[1], [0], [0], [1], [0, 0, 1, 1], [], []>} : vector<8x64xf32>, vector<64x64xf32>, vector<8x64xf32> -> vector<8x64xf32>
    %c0_293 = arith.constant 0 : index
    %c28 = arith.constant 28 : index
    %c0_294 = arith.constant 0 : index
    %c0_295 = arith.constant 0 : index
    %525 = vector.load %arg4[%c0_293, %c28, %c0_294, %c0_295] : memref<1x59x1x64xf32, #tpu.memory_space<vmem>>, vector<1x1x1x64xf32>
    %526 = vector.shape_cast %525 : vector<1x1x1x64xf32> to vector<1x64xf32>
    %527 = vector.broadcast %526 : vector<1x64xf32> to vector<8x64xf32>
    %528 = arith.addf %524, %527 : vector<8x64xf32>
    %c0_296 = arith.constant 0 : index
    %c21_297 = arith.constant 21 : index
    %c0_298 = arith.constant 0 : index
    %c0_299 = arith.constant 0 : index
    %529 = vector.load %arg3[%c0_296, %c21_297, %c0_298, %c0_299] : memref<1x35x64x64xf32, #tpu.memory_space<vmem>>, vector<1x1x64x64xf32>
    %530 = vector.shape_cast %529 : vector<1x1x64x64xf32> to vector<64x64xf32>
    %531 = vector.extract_strided_slice %514 {offsets = [0, 0], sizes = [8, 16], strides = [1, 1]} : vector<8x64xf32> to vector<8x16xf32>
    %532 = vector.extract_strided_slice %521 {offsets = [0, 0], sizes = [8, 16], strides = [1, 1]} : vector<8x64xf32> to vector<8x16xf32>
    %cst_300 = arith.constant dense<0.000000e+00> : vector<8x8xf32>
    %533 = tpu.matmul %531, %532, %cst_300 {dimension_numbers = #tpu.dot_dimension_numbers<[1], [1], [0], [0], [0, 0, 1, 0], [], []>} : vector<8x16xf32>, vector<8x16xf32>, vector<8x8xf32> -> vector<8x8xf32>
    %cst_301 = arith.constant 2.500000e-01 : f32
    %534 = vector.broadcast %cst_301 : f32 to vector<8x8xf32>
    %535 = arith.mulf %534, %533 : vector<8x8xf32>
    %cst_302 = arith.constant dense<0xFF800000> : vector<8xf32>
    %536 = vector.multi_reduction <maximumf>, %535, %cst_302 [1] : vector<8x8xf32> to vector<8xf32>
    %537 = vector.shape_cast %536 : vector<8xf32> to vector<8x1xf32>
    %538 = vector.broadcast %537 : vector<8x1xf32> to vector<8x8xf32>
    %539 = arith.subf %535, %538 : vector<8x8xf32>
    %540 = math.exp %539 : vector<8x8xf32>
    %cst_303 = arith.constant dense<0.000000e+00> : vector<8xf32>
    %541 = vector.multi_reduction <add>, %540, %cst_303 [1] : vector<8x8xf32> to vector<8xf32>
    %542 = vector.shape_cast %541 : vector<8xf32> to vector<8x1xf32>
    %543 = vector.broadcast %542 : vector<8x1xf32> to vector<8x8xf32>
    %544 = arith.divf %540, %543 : vector<8x8xf32>
    %545 = vector.extract_strided_slice %528 {offsets = [0, 0], sizes = [8, 16], strides = [1, 1]} : vector<8x64xf32> to vector<8x16xf32>
    %cst_304 = arith.constant dense<0.000000e+00> : vector<8x16xf32>
    %546 = tpu.matmul %544, %545, %cst_304 {dimension_numbers = #tpu.dot_dimension_numbers<[1], [0], [0], [1], [0, 0, 1, 1], [], []>} : vector<8x8xf32>, vector<8x16xf32>, vector<8x16xf32> -> vector<8x16xf32>
    %547 = vector.extract_strided_slice %530 {offsets = [0, 0], sizes = [16, 64], strides = [1, 1]} : vector<64x64xf32> to vector<16x64xf32>
    %cst_305 = arith.constant dense<0.000000e+00> : vector<8x64xf32>
    %548 = tpu.matmul %546, %547, %cst_305 {dimension_numbers = #tpu.dot_dimension_numbers<[1], [0], [0], [1], [0, 0, 1, 1], [], []>} : vector<8x16xf32>, vector<16x64xf32>, vector<8x64xf32> -> vector<8x64xf32>
    %549 = vector.extract_strided_slice %514 {offsets = [0, 16], sizes = [8, 16], strides = [1, 1]} : vector<8x64xf32> to vector<8x16xf32>
    %550 = vector.extract_strided_slice %521 {offsets = [0, 16], sizes = [8, 16], strides = [1, 1]} : vector<8x64xf32> to vector<8x16xf32>
    %cst_306 = arith.constant dense<0.000000e+00> : vector<8x8xf32>
    %551 = tpu.matmul %549, %550, %cst_306 {dimension_numbers = #tpu.dot_dimension_numbers<[1], [1], [0], [0], [0, 0, 1, 0], [], []>} : vector<8x16xf32>, vector<8x16xf32>, vector<8x8xf32> -> vector<8x8xf32>
    %cst_307 = arith.constant 2.500000e-01 : f32
    %552 = vector.broadcast %cst_307 : f32 to vector<8x8xf32>
    %553 = arith.mulf %552, %551 : vector<8x8xf32>
    %cst_308 = arith.constant dense<0xFF800000> : vector<8xf32>
    %554 = vector.multi_reduction <maximumf>, %553, %cst_308 [1] : vector<8x8xf32> to vector<8xf32>
    %555 = vector.shape_cast %554 : vector<8xf32> to vector<8x1xf32>
    %556 = vector.broadcast %555 : vector<8x1xf32> to vector<8x8xf32>
    %557 = arith.subf %553, %556 : vector<8x8xf32>
    %558 = math.exp %557 : vector<8x8xf32>
    %cst_309 = arith.constant dense<0.000000e+00> : vector<8xf32>
    %559 = vector.multi_reduction <add>, %558, %cst_309 [1] : vector<8x8xf32> to vector<8xf32>
    %560 = vector.shape_cast %559 : vector<8xf32> to vector<8x1xf32>
    %561 = vector.broadcast %560 : vector<8x1xf32> to vector<8x8xf32>
    %562 = arith.divf %558, %561 : vector<8x8xf32>
    %563 = vector.extract_strided_slice %528 {offsets = [0, 16], sizes = [8, 16], strides = [1, 1]} : vector<8x64xf32> to vector<8x16xf32>
    %cst_310 = arith.constant dense<0.000000e+00> : vector<8x16xf32>
    %564 = tpu.matmul %562, %563, %cst_310 {dimension_numbers = #tpu.dot_dimension_numbers<[1], [0], [0], [1], [0, 0, 1, 1], [], []>} : vector<8x8xf32>, vector<8x16xf32>, vector<8x16xf32> -> vector<8x16xf32>
    %565 = vector.extract_strided_slice %530 {offsets = [16, 0], sizes = [16, 64], strides = [1, 1]} : vector<64x64xf32> to vector<16x64xf32>
    %cst_311 = arith.constant dense<0.000000e+00> : vector<8x64xf32>
    %566 = tpu.matmul %564, %565, %cst_311 {dimension_numbers = #tpu.dot_dimension_numbers<[1], [0], [0], [1], [0, 0, 1, 1], [], []>} : vector<8x16xf32>, vector<16x64xf32>, vector<8x64xf32> -> vector<8x64xf32>
    %567 = arith.addf %548, %566 : vector<8x64xf32>
    %568 = vector.extract_strided_slice %514 {offsets = [0, 32], sizes = [8, 16], strides = [1, 1]} : vector<8x64xf32> to vector<8x16xf32>
    %569 = vector.extract_strided_slice %521 {offsets = [0, 32], sizes = [8, 16], strides = [1, 1]} : vector<8x64xf32> to vector<8x16xf32>
    %cst_312 = arith.constant dense<0.000000e+00> : vector<8x8xf32>
    %570 = tpu.matmul %568, %569, %cst_312 {dimension_numbers = #tpu.dot_dimension_numbers<[1], [1], [0], [0], [0, 0, 1, 0], [], []>} : vector<8x16xf32>, vector<8x16xf32>, vector<8x8xf32> -> vector<8x8xf32>
    %cst_313 = arith.constant 2.500000e-01 : f32
    %571 = vector.broadcast %cst_313 : f32 to vector<8x8xf32>
    %572 = arith.mulf %571, %570 : vector<8x8xf32>
    %cst_314 = arith.constant dense<0xFF800000> : vector<8xf32>
    %573 = vector.multi_reduction <maximumf>, %572, %cst_314 [1] : vector<8x8xf32> to vector<8xf32>
    %574 = vector.shape_cast %573 : vector<8xf32> to vector<8x1xf32>
    %575 = vector.broadcast %574 : vector<8x1xf32> to vector<8x8xf32>
    %576 = arith.subf %572, %575 : vector<8x8xf32>
    %577 = math.exp %576 : vector<8x8xf32>
    %cst_315 = arith.constant dense<0.000000e+00> : vector<8xf32>
    %578 = vector.multi_reduction <add>, %577, %cst_315 [1] : vector<8x8xf32> to vector<8xf32>
    %579 = vector.shape_cast %578 : vector<8xf32> to vector<8x1xf32>
    %580 = vector.broadcast %579 : vector<8x1xf32> to vector<8x8xf32>
    %581 = arith.divf %577, %580 : vector<8x8xf32>
    %582 = vector.extract_strided_slice %528 {offsets = [0, 32], sizes = [8, 16], strides = [1, 1]} : vector<8x64xf32> to vector<8x16xf32>
    %cst_316 = arith.constant dense<0.000000e+00> : vector<8x16xf32>
    %583 = tpu.matmul %581, %582, %cst_316 {dimension_numbers = #tpu.dot_dimension_numbers<[1], [0], [0], [1], [0, 0, 1, 1], [], []>} : vector<8x8xf32>, vector<8x16xf32>, vector<8x16xf32> -> vector<8x16xf32>
    %584 = vector.extract_strided_slice %530 {offsets = [32, 0], sizes = [16, 64], strides = [1, 1]} : vector<64x64xf32> to vector<16x64xf32>
    %cst_317 = arith.constant dense<0.000000e+00> : vector<8x64xf32>
    %585 = tpu.matmul %583, %584, %cst_317 {dimension_numbers = #tpu.dot_dimension_numbers<[1], [0], [0], [1], [0, 0, 1, 1], [], []>} : vector<8x16xf32>, vector<16x64xf32>, vector<8x64xf32> -> vector<8x64xf32>
    %586 = arith.addf %567, %585 : vector<8x64xf32>
    %587 = vector.extract_strided_slice %514 {offsets = [0, 48], sizes = [8, 16], strides = [1, 1]} : vector<8x64xf32> to vector<8x16xf32>
    %588 = vector.extract_strided_slice %521 {offsets = [0, 48], sizes = [8, 16], strides = [1, 1]} : vector<8x64xf32> to vector<8x16xf32>
    %cst_318 = arith.constant dense<0.000000e+00> : vector<8x8xf32>
    %589 = tpu.matmul %587, %588, %cst_318 {dimension_numbers = #tpu.dot_dimension_numbers<[1], [1], [0], [0], [0, 0, 1, 0], [], []>} : vector<8x16xf32>, vector<8x16xf32>, vector<8x8xf32> -> vector<8x8xf32>
    %cst_319 = arith.constant 2.500000e-01 : f32
    %590 = vector.broadcast %cst_319 : f32 to vector<8x8xf32>
    %591 = arith.mulf %590, %589 : vector<8x8xf32>
    %cst_320 = arith.constant dense<0xFF800000> : vector<8xf32>
    %592 = vector.multi_reduction <maximumf>, %591, %cst_320 [1] : vector<8x8xf32> to vector<8xf32>
    %593 = vector.shape_cast %592 : vector<8xf32> to vector<8x1xf32>
    %594 = vector.broadcast %593 : vector<8x1xf32> to vector<8x8xf32>
    %595 = arith.subf %591, %594 : vector<8x8xf32>
    %596 = math.exp %595 : vector<8x8xf32>
    %cst_321 = arith.constant dense<0.000000e+00> : vector<8xf32>
    %597 = vector.multi_reduction <add>, %596, %cst_321 [1] : vector<8x8xf32> to vector<8xf32>
    %598 = vector.shape_cast %597 : vector<8xf32> to vector<8x1xf32>
    %599 = vector.broadcast %598 : vector<8x1xf32> to vector<8x8xf32>
    %600 = arith.divf %596, %599 : vector<8x8xf32>
    %601 = vector.extract_strided_slice %528 {offsets = [0, 48], sizes = [8, 16], strides = [1, 1]} : vector<8x64xf32> to vector<8x16xf32>
    %cst_322 = arith.constant dense<0.000000e+00> : vector<8x16xf32>
    %602 = tpu.matmul %600, %601, %cst_322 {dimension_numbers = #tpu.dot_dimension_numbers<[1], [0], [0], [1], [0, 0, 1, 1], [], []>} : vector<8x8xf32>, vector<8x16xf32>, vector<8x16xf32> -> vector<8x16xf32>
    %603 = vector.extract_strided_slice %530 {offsets = [48, 0], sizes = [16, 64], strides = [1, 1]} : vector<64x64xf32> to vector<16x64xf32>
    %cst_323 = arith.constant dense<0.000000e+00> : vector<8x64xf32>
    %604 = tpu.matmul %602, %603, %cst_323 {dimension_numbers = #tpu.dot_dimension_numbers<[1], [0], [0], [1], [0, 0, 1, 1], [], []>} : vector<8x16xf32>, vector<16x64xf32>, vector<8x64xf32> -> vector<8x64xf32>
    %605 = arith.addf %586, %604 : vector<8x64xf32>
    %c0_324 = arith.constant 0 : index
    %c29 = arith.constant 29 : index
    %c0_325 = arith.constant 0 : index
    %c0_326 = arith.constant 0 : index
    %606 = vector.load %arg4[%c0_324, %c29, %c0_325, %c0_326] : memref<1x59x1x64xf32, #tpu.memory_space<vmem>>, vector<1x1x1x64xf32>
    %607 = vector.shape_cast %606 : vector<1x1x1x64xf32> to vector<1x64xf32>
    %608 = vector.broadcast %607 : vector<1x64xf32> to vector<8x64xf32>
    %609 = arith.addf %605, %608 : vector<8x64xf32>
    %610 = arith.addf %507, %609 : vector<8x64xf32>
    %c0_327 = arith.constant 0 : index
    %c34 = arith.constant 34 : index
    %c0_328 = arith.constant 0 : index
    %c0_329 = arith.constant 0 : index
    %611 = vector.load %arg4[%c0_327, %c34, %c0_328, %c0_329] : memref<1x59x1x64xf32, #tpu.memory_space<vmem>>, vector<1x1x1x64xf32>
    %612 = vector.shape_cast %611 : vector<1x1x1x64xf32> to vector<1x64xf32>
    %c0_330 = arith.constant 0 : index
    %c35 = arith.constant 35 : index
    %c0_331 = arith.constant 0 : index
    %c0_332 = arith.constant 0 : index
    %613 = vector.load %arg4[%c0_330, %c35, %c0_331, %c0_332] : memref<1x59x1x64xf32, #tpu.memory_space<vmem>>, vector<1x1x1x64xf32>
    %614 = vector.shape_cast %613 : vector<1x1x1x64xf32> to vector<1x64xf32>
    %cst_333 = arith.constant dense<0.000000e+00> : vector<8xf32>
    %615 = vector.multi_reduction <add>, %610, %cst_333 [1] : vector<8x64xf32> to vector<8xf32>
    %616 = vector.shape_cast %615 : vector<8xf32> to vector<8x1xf32>
    %cst_334 = arith.constant 6.400000e+01 : f32
    %617 = vector.broadcast %cst_334 : f32 to vector<8x1xf32>
    %618 = arith.divf %616, %617 : vector<8x1xf32>
    %619 = vector.broadcast %618 : vector<8x1xf32> to vector<8x64xf32>
    %620 = arith.subf %610, %619 : vector<8x64xf32>
    %621 = arith.mulf %620, %620 : vector<8x64xf32>
    %cst_335 = arith.constant dense<0.000000e+00> : vector<8xf32>
    %622 = vector.multi_reduction <add>, %621, %cst_335 [1] : vector<8x64xf32> to vector<8xf32>
    %623 = vector.shape_cast %622 : vector<8xf32> to vector<8x1xf32>
    %cst_336 = arith.constant 6.400000e+01 : f32
    %624 = vector.broadcast %cst_336 : f32 to vector<8x1xf32>
    %625 = arith.divf %623, %624 : vector<8x1xf32>
    %626 = vector.broadcast %618 : vector<8x1xf32> to vector<8x64xf32>
    %627 = arith.subf %610, %626 : vector<8x64xf32>
    %cst_337 = arith.constant 9.99999974E-6 : f32
    %628 = vector.broadcast %cst_337 : f32 to vector<8x1xf32>
    %629 = arith.addf %625, %628 : vector<8x1xf32>
    %630 = math.rsqrt %629 : vector<8x1xf32>
    %631 = vector.broadcast %630 : vector<8x1xf32> to vector<8x64xf32>
    %632 = arith.mulf %627, %631 : vector<8x64xf32>
    %633 = vector.broadcast %612 : vector<1x64xf32> to vector<8x64xf32>
    %634 = arith.mulf %632, %633 : vector<8x64xf32>
    %635 = vector.broadcast %614 : vector<1x64xf32> to vector<8x64xf32>
    %636 = arith.addf %634, %635 : vector<8x64xf32>
    %c0_338 = arith.constant 0 : index
    %c22_339 = arith.constant 22 : index
    %c0_340 = arith.constant 0 : index
    %c0_341 = arith.constant 0 : index
    %637 = vector.load %arg3[%c0_338, %c22_339, %c0_340, %c0_341] : memref<1x35x64x64xf32, #tpu.memory_space<vmem>>, vector<1x1x64x64xf32>
    %638 = vector.shape_cast %637 : vector<1x1x64x64xf32> to vector<64x64xf32>
    %cst_342 = arith.constant dense<0.000000e+00> : vector<8x64xf32>
    %639 = tpu.matmul %636, %638, %cst_342 {dimension_numbers = #tpu.dot_dimension_numbers<[1], [0], [0], [1], [0, 0, 1, 1], [], []>} : vector<8x64xf32>, vector<64x64xf32>, vector<8x64xf32> -> vector<8x64xf32>
    %c0_343 = arith.constant 0 : index
    %c30 = arith.constant 30 : index
    %c0_344 = arith.constant 0 : index
    %c0_345 = arith.constant 0 : index
    %640 = vector.load %arg4[%c0_343, %c30, %c0_344, %c0_345] : memref<1x59x1x64xf32, #tpu.memory_space<vmem>>, vector<1x1x1x64xf32>
    %641 = vector.shape_cast %640 : vector<1x1x1x64xf32> to vector<1x64xf32>
    %642 = vector.broadcast %641 : vector<1x64xf32> to vector<8x64xf32>
    %643 = arith.addf %639, %642 : vector<8x64xf32>
    %cst_346 = arith.constant 0.000000e+00 : f32
    %644 = vector.broadcast %cst_346 : f32 to vector<8x64xf32>
    %645 = arith.maximumf %643, %644 : vector<8x64xf32>
    %c0_347 = arith.constant 0 : index
    %c23_348 = arith.constant 23 : index
    %c0_349 = arith.constant 0 : index
    %c0_350 = arith.constant 0 : index
    %646 = vector.load %arg3[%c0_347, %c23_348, %c0_349, %c0_350] : memref<1x35x64x64xf32, #tpu.memory_space<vmem>>, vector<1x1x64x64xf32>
    %647 = vector.shape_cast %646 : vector<1x1x64x64xf32> to vector<64x64xf32>
    %cst_351 = arith.constant dense<0.000000e+00> : vector<8x64xf32>
    %648 = tpu.matmul %645, %647, %cst_351 {dimension_numbers = #tpu.dot_dimension_numbers<[1], [0], [0], [1], [0, 0, 1, 1], [], []>} : vector<8x64xf32>, vector<64x64xf32>, vector<8x64xf32> -> vector<8x64xf32>
    %c0_352 = arith.constant 0 : index
    %c31 = arith.constant 31 : index
    %c0_353 = arith.constant 0 : index
    %c0_354 = arith.constant 0 : index
    %649 = vector.load %arg4[%c0_352, %c31, %c0_353, %c0_354] : memref<1x59x1x64xf32, #tpu.memory_space<vmem>>, vector<1x1x1x64xf32>
    %650 = vector.shape_cast %649 : vector<1x1x1x64xf32> to vector<1x64xf32>
    %651 = vector.broadcast %650 : vector<1x64xf32> to vector<8x64xf32>
    %652 = arith.addf %648, %651 : vector<8x64xf32>
    %653 = arith.addf %636, %652 : vector<8x64xf32>
    %c0_355 = arith.constant 0 : index
    %c36 = arith.constant 36 : index
    %c0_356 = arith.constant 0 : index
    %c0_357 = arith.constant 0 : index
    %654 = vector.load %arg4[%c0_355, %c36, %c0_356, %c0_357] : memref<1x59x1x64xf32, #tpu.memory_space<vmem>>, vector<1x1x1x64xf32>
    %655 = vector.shape_cast %654 : vector<1x1x1x64xf32> to vector<1x64xf32>
    %c0_358 = arith.constant 0 : index
    %c37 = arith.constant 37 : index
    %c0_359 = arith.constant 0 : index
    %c0_360 = arith.constant 0 : index
    %656 = vector.load %arg4[%c0_358, %c37, %c0_359, %c0_360] : memref<1x59x1x64xf32, #tpu.memory_space<vmem>>, vector<1x1x1x64xf32>
    %657 = vector.shape_cast %656 : vector<1x1x1x64xf32> to vector<1x64xf32>
    %cst_361 = arith.constant dense<0.000000e+00> : vector<8xf32>
    %658 = vector.multi_reduction <add>, %653, %cst_361 [1] : vector<8x64xf32> to vector<8xf32>
    %659 = vector.shape_cast %658 : vector<8xf32> to vector<8x1xf32>
    %cst_362 = arith.constant 6.400000e+01 : f32
    %660 = vector.broadcast %cst_362 : f32 to vector<8x1xf32>
    %661 = arith.divf %659, %660 : vector<8x1xf32>
    %662 = vector.broadcast %661 : vector<8x1xf32> to vector<8x64xf32>
    %663 = arith.subf %653, %662 : vector<8x64xf32>
    %664 = arith.mulf %663, %663 : vector<8x64xf32>
    %cst_363 = arith.constant dense<0.000000e+00> : vector<8xf32>
    %665 = vector.multi_reduction <add>, %664, %cst_363 [1] : vector<8x64xf32> to vector<8xf32>
    %666 = vector.shape_cast %665 : vector<8xf32> to vector<8x1xf32>
    %cst_364 = arith.constant 6.400000e+01 : f32
    %667 = vector.broadcast %cst_364 : f32 to vector<8x1xf32>
    %668 = arith.divf %666, %667 : vector<8x1xf32>
    %669 = vector.broadcast %661 : vector<8x1xf32> to vector<8x64xf32>
    %670 = arith.subf %653, %669 : vector<8x64xf32>
    %cst_365 = arith.constant 9.99999974E-6 : f32
    %671 = vector.broadcast %cst_365 : f32 to vector<8x1xf32>
    %672 = arith.addf %668, %671 : vector<8x1xf32>
    %673 = math.rsqrt %672 : vector<8x1xf32>
    %674 = vector.broadcast %673 : vector<8x1xf32> to vector<8x64xf32>
    %675 = arith.mulf %670, %674 : vector<8x64xf32>
    %676 = vector.broadcast %655 : vector<1x64xf32> to vector<8x64xf32>
    %677 = arith.mulf %675, %676 : vector<8x64xf32>
    %678 = vector.broadcast %657 : vector<1x64xf32> to vector<8x64xf32>
    %679 = arith.addf %677, %678 : vector<8x64xf32>
    %c0_366 = arith.constant 0 : index
    %c24_367 = arith.constant 24 : index
    %c0_368 = arith.constant 0 : index
    %c0_369 = arith.constant 0 : index
    %680 = vector.load %arg3[%c0_366, %c24_367, %c0_368, %c0_369] : memref<1x35x64x64xf32, #tpu.memory_space<vmem>>, vector<1x1x64x64xf32>
    %681 = vector.shape_cast %680 : vector<1x1x64x64xf32> to vector<64x64xf32>
    %cst_370 = arith.constant dense<0.000000e+00> : vector<8x64xf32>
    %682 = tpu.matmul %679, %681, %cst_370 {dimension_numbers = #tpu.dot_dimension_numbers<[1], [0], [0], [1], [0, 0, 1, 1], [], []>} : vector<8x64xf32>, vector<64x64xf32>, vector<8x64xf32> -> vector<8x64xf32>
    %c0_371 = arith.constant 0 : index
    %c38 = arith.constant 38 : index
    %c0_372 = arith.constant 0 : index
    %c0_373 = arith.constant 0 : index
    %683 = vector.load %arg4[%c0_371, %c38, %c0_372, %c0_373] : memref<1x59x1x64xf32, #tpu.memory_space<vmem>>, vector<1x1x1x64xf32>
    %684 = vector.shape_cast %683 : vector<1x1x1x64xf32> to vector<1x64xf32>
    %685 = vector.broadcast %684 : vector<1x64xf32> to vector<8x64xf32>
    %686 = arith.addf %682, %685 : vector<8x64xf32>
    %c0_374 = arith.constant 0 : index
    %c25_375 = arith.constant 25 : index
    %c0_376 = arith.constant 0 : index
    %c0_377 = arith.constant 0 : index
    %687 = vector.load %arg3[%c0_374, %c25_375, %c0_376, %c0_377] : memref<1x35x64x64xf32, #tpu.memory_space<vmem>>, vector<1x1x64x64xf32>
    %688 = vector.shape_cast %687 : vector<1x1x64x64xf32> to vector<64x64xf32>
    %cst_378 = arith.constant dense<0.000000e+00> : vector<8x64xf32>
    %689 = tpu.matmul %679, %688, %cst_378 {dimension_numbers = #tpu.dot_dimension_numbers<[1], [0], [0], [1], [0, 0, 1, 1], [], []>} : vector<8x64xf32>, vector<64x64xf32>, vector<8x64xf32> -> vector<8x64xf32>
    %c0_379 = arith.constant 0 : index
    %c39 = arith.constant 39 : index
    %c0_380 = arith.constant 0 : index
    %c0_381 = arith.constant 0 : index
    %690 = vector.load %arg4[%c0_379, %c39, %c0_380, %c0_381] : memref<1x59x1x64xf32, #tpu.memory_space<vmem>>, vector<1x1x1x64xf32>
    %691 = vector.shape_cast %690 : vector<1x1x1x64xf32> to vector<1x64xf32>
    %692 = vector.broadcast %691 : vector<1x64xf32> to vector<8x64xf32>
    %693 = arith.addf %689, %692 : vector<8x64xf32>
    %c0_382 = arith.constant 0 : index
    %c26_383 = arith.constant 26 : index
    %c0_384 = arith.constant 0 : index
    %c0_385 = arith.constant 0 : index
    %694 = vector.load %arg3[%c0_382, %c26_383, %c0_384, %c0_385] : memref<1x35x64x64xf32, #tpu.memory_space<vmem>>, vector<1x1x64x64xf32>
    %695 = vector.shape_cast %694 : vector<1x1x64x64xf32> to vector<64x64xf32>
    %cst_386 = arith.constant dense<0.000000e+00> : vector<8x64xf32>
    %696 = tpu.matmul %679, %695, %cst_386 {dimension_numbers = #tpu.dot_dimension_numbers<[1], [0], [0], [1], [0, 0, 1, 1], [], []>} : vector<8x64xf32>, vector<64x64xf32>, vector<8x64xf32> -> vector<8x64xf32>
    %c0_387 = arith.constant 0 : index
    %c40 = arith.constant 40 : index
    %c0_388 = arith.constant 0 : index
    %c0_389 = arith.constant 0 : index
    %697 = vector.load %arg4[%c0_387, %c40, %c0_388, %c0_389] : memref<1x59x1x64xf32, #tpu.memory_space<vmem>>, vector<1x1x1x64xf32>
    %698 = vector.shape_cast %697 : vector<1x1x1x64xf32> to vector<1x64xf32>
    %699 = vector.broadcast %698 : vector<1x64xf32> to vector<8x64xf32>
    %700 = arith.addf %696, %699 : vector<8x64xf32>
    %c0_390 = arith.constant 0 : index
    %c27_391 = arith.constant 27 : index
    %c0_392 = arith.constant 0 : index
    %c0_393 = arith.constant 0 : index
    %701 = vector.load %arg3[%c0_390, %c27_391, %c0_392, %c0_393] : memref<1x35x64x64xf32, #tpu.memory_space<vmem>>, vector<1x1x64x64xf32>
    %702 = vector.shape_cast %701 : vector<1x1x64x64xf32> to vector<64x64xf32>
    %703 = vector.extract_strided_slice %686 {offsets = [0, 0], sizes = [8, 16], strides = [1, 1]} : vector<8x64xf32> to vector<8x16xf32>
    %704 = vector.extract_strided_slice %693 {offsets = [0, 0], sizes = [8, 16], strides = [1, 1]} : vector<8x64xf32> to vector<8x16xf32>
    %cst_394 = arith.constant dense<0.000000e+00> : vector<8x8xf32>
    %705 = tpu.matmul %703, %704, %cst_394 {dimension_numbers = #tpu.dot_dimension_numbers<[1], [1], [0], [0], [0, 0, 1, 0], [], []>} : vector<8x16xf32>, vector<8x16xf32>, vector<8x8xf32> -> vector<8x8xf32>
    %cst_395 = arith.constant 2.500000e-01 : f32
    %706 = vector.broadcast %cst_395 : f32 to vector<8x8xf32>
    %707 = arith.mulf %706, %705 : vector<8x8xf32>
    %cst_396 = arith.constant dense<0xFF800000> : vector<8xf32>
    %708 = vector.multi_reduction <maximumf>, %707, %cst_396 [1] : vector<8x8xf32> to vector<8xf32>
    %709 = vector.shape_cast %708 : vector<8xf32> to vector<8x1xf32>
    %710 = vector.broadcast %709 : vector<8x1xf32> to vector<8x8xf32>
    %711 = arith.subf %707, %710 : vector<8x8xf32>
    %712 = math.exp %711 : vector<8x8xf32>
    %cst_397 = arith.constant dense<0.000000e+00> : vector<8xf32>
    %713 = vector.multi_reduction <add>, %712, %cst_397 [1] : vector<8x8xf32> to vector<8xf32>
    %714 = vector.shape_cast %713 : vector<8xf32> to vector<8x1xf32>
    %715 = vector.broadcast %714 : vector<8x1xf32> to vector<8x8xf32>
    %716 = arith.divf %712, %715 : vector<8x8xf32>
    %717 = vector.extract_strided_slice %700 {offsets = [0, 0], sizes = [8, 16], strides = [1, 1]} : vector<8x64xf32> to vector<8x16xf32>
    %cst_398 = arith.constant dense<0.000000e+00> : vector<8x16xf32>
    %718 = tpu.matmul %716, %717, %cst_398 {dimension_numbers = #tpu.dot_dimension_numbers<[1], [0], [0], [1], [0, 0, 1, 1], [], []>} : vector<8x8xf32>, vector<8x16xf32>, vector<8x16xf32> -> vector<8x16xf32>
    %719 = vector.extract_strided_slice %702 {offsets = [0, 0], sizes = [16, 64], strides = [1, 1]} : vector<64x64xf32> to vector<16x64xf32>
    %cst_399 = arith.constant dense<0.000000e+00> : vector<8x64xf32>
    %720 = tpu.matmul %718, %719, %cst_399 {dimension_numbers = #tpu.dot_dimension_numbers<[1], [0], [0], [1], [0, 0, 1, 1], [], []>} : vector<8x16xf32>, vector<16x64xf32>, vector<8x64xf32> -> vector<8x64xf32>
    %721 = vector.extract_strided_slice %686 {offsets = [0, 16], sizes = [8, 16], strides = [1, 1]} : vector<8x64xf32> to vector<8x16xf32>
    %722 = vector.extract_strided_slice %693 {offsets = [0, 16], sizes = [8, 16], strides = [1, 1]} : vector<8x64xf32> to vector<8x16xf32>
    %cst_400 = arith.constant dense<0.000000e+00> : vector<8x8xf32>
    %723 = tpu.matmul %721, %722, %cst_400 {dimension_numbers = #tpu.dot_dimension_numbers<[1], [1], [0], [0], [0, 0, 1, 0], [], []>} : vector<8x16xf32>, vector<8x16xf32>, vector<8x8xf32> -> vector<8x8xf32>
    %cst_401 = arith.constant 2.500000e-01 : f32
    %724 = vector.broadcast %cst_401 : f32 to vector<8x8xf32>
    %725 = arith.mulf %724, %723 : vector<8x8xf32>
    %cst_402 = arith.constant dense<0xFF800000> : vector<8xf32>
    %726 = vector.multi_reduction <maximumf>, %725, %cst_402 [1] : vector<8x8xf32> to vector<8xf32>
    %727 = vector.shape_cast %726 : vector<8xf32> to vector<8x1xf32>
    %728 = vector.broadcast %727 : vector<8x1xf32> to vector<8x8xf32>
    %729 = arith.subf %725, %728 : vector<8x8xf32>
    %730 = math.exp %729 : vector<8x8xf32>
    %cst_403 = arith.constant dense<0.000000e+00> : vector<8xf32>
    %731 = vector.multi_reduction <add>, %730, %cst_403 [1] : vector<8x8xf32> to vector<8xf32>
    %732 = vector.shape_cast %731 : vector<8xf32> to vector<8x1xf32>
    %733 = vector.broadcast %732 : vector<8x1xf32> to vector<8x8xf32>
    %734 = arith.divf %730, %733 : vector<8x8xf32>
    %735 = vector.extract_strided_slice %700 {offsets = [0, 16], sizes = [8, 16], strides = [1, 1]} : vector<8x64xf32> to vector<8x16xf32>
    %cst_404 = arith.constant dense<0.000000e+00> : vector<8x16xf32>
    %736 = tpu.matmul %734, %735, %cst_404 {dimension_numbers = #tpu.dot_dimension_numbers<[1], [0], [0], [1], [0, 0, 1, 1], [], []>} : vector<8x8xf32>, vector<8x16xf32>, vector<8x16xf32> -> vector<8x16xf32>
    %737 = vector.extract_strided_slice %702 {offsets = [16, 0], sizes = [16, 64], strides = [1, 1]} : vector<64x64xf32> to vector<16x64xf32>
    %cst_405 = arith.constant dense<0.000000e+00> : vector<8x64xf32>
    %738 = tpu.matmul %736, %737, %cst_405 {dimension_numbers = #tpu.dot_dimension_numbers<[1], [0], [0], [1], [0, 0, 1, 1], [], []>} : vector<8x16xf32>, vector<16x64xf32>, vector<8x64xf32> -> vector<8x64xf32>
    %739 = arith.addf %720, %738 : vector<8x64xf32>
    %740 = vector.extract_strided_slice %686 {offsets = [0, 32], sizes = [8, 16], strides = [1, 1]} : vector<8x64xf32> to vector<8x16xf32>
    %741 = vector.extract_strided_slice %693 {offsets = [0, 32], sizes = [8, 16], strides = [1, 1]} : vector<8x64xf32> to vector<8x16xf32>
    %cst_406 = arith.constant dense<0.000000e+00> : vector<8x8xf32>
    %742 = tpu.matmul %740, %741, %cst_406 {dimension_numbers = #tpu.dot_dimension_numbers<[1], [1], [0], [0], [0, 0, 1, 0], [], []>} : vector<8x16xf32>, vector<8x16xf32>, vector<8x8xf32> -> vector<8x8xf32>
    %cst_407 = arith.constant 2.500000e-01 : f32
    %743 = vector.broadcast %cst_407 : f32 to vector<8x8xf32>
    %744 = arith.mulf %743, %742 : vector<8x8xf32>
    %cst_408 = arith.constant dense<0xFF800000> : vector<8xf32>
    %745 = vector.multi_reduction <maximumf>, %744, %cst_408 [1] : vector<8x8xf32> to vector<8xf32>
    %746 = vector.shape_cast %745 : vector<8xf32> to vector<8x1xf32>
    %747 = vector.broadcast %746 : vector<8x1xf32> to vector<8x8xf32>
    %748 = arith.subf %744, %747 : vector<8x8xf32>
    %749 = math.exp %748 : vector<8x8xf32>
    %cst_409 = arith.constant dense<0.000000e+00> : vector<8xf32>
    %750 = vector.multi_reduction <add>, %749, %cst_409 [1] : vector<8x8xf32> to vector<8xf32>
    %751 = vector.shape_cast %750 : vector<8xf32> to vector<8x1xf32>
    %752 = vector.broadcast %751 : vector<8x1xf32> to vector<8x8xf32>
    %753 = arith.divf %749, %752 : vector<8x8xf32>
    %754 = vector.extract_strided_slice %700 {offsets = [0, 32], sizes = [8, 16], strides = [1, 1]} : vector<8x64xf32> to vector<8x16xf32>
    %cst_410 = arith.constant dense<0.000000e+00> : vector<8x16xf32>
    %755 = tpu.matmul %753, %754, %cst_410 {dimension_numbers = #tpu.dot_dimension_numbers<[1], [0], [0], [1], [0, 0, 1, 1], [], []>} : vector<8x8xf32>, vector<8x16xf32>, vector<8x16xf32> -> vector<8x16xf32>
    %756 = vector.extract_strided_slice %702 {offsets = [32, 0], sizes = [16, 64], strides = [1, 1]} : vector<64x64xf32> to vector<16x64xf32>
    %cst_411 = arith.constant dense<0.000000e+00> : vector<8x64xf32>
    %757 = tpu.matmul %755, %756, %cst_411 {dimension_numbers = #tpu.dot_dimension_numbers<[1], [0], [0], [1], [0, 0, 1, 1], [], []>} : vector<8x16xf32>, vector<16x64xf32>, vector<8x64xf32> -> vector<8x64xf32>
    %758 = arith.addf %739, %757 : vector<8x64xf32>
    %759 = vector.extract_strided_slice %686 {offsets = [0, 48], sizes = [8, 16], strides = [1, 1]} : vector<8x64xf32> to vector<8x16xf32>
    %760 = vector.extract_strided_slice %693 {offsets = [0, 48], sizes = [8, 16], strides = [1, 1]} : vector<8x64xf32> to vector<8x16xf32>
    %cst_412 = arith.constant dense<0.000000e+00> : vector<8x8xf32>
    %761 = tpu.matmul %759, %760, %cst_412 {dimension_numbers = #tpu.dot_dimension_numbers<[1], [1], [0], [0], [0, 0, 1, 0], [], []>} : vector<8x16xf32>, vector<8x16xf32>, vector<8x8xf32> -> vector<8x8xf32>
    %cst_413 = arith.constant 2.500000e-01 : f32
    %762 = vector.broadcast %cst_413 : f32 to vector<8x8xf32>
    %763 = arith.mulf %762, %761 : vector<8x8xf32>
    %cst_414 = arith.constant dense<0xFF800000> : vector<8xf32>
    %764 = vector.multi_reduction <maximumf>, %763, %cst_414 [1] : vector<8x8xf32> to vector<8xf32>
    %765 = vector.shape_cast %764 : vector<8xf32> to vector<8x1xf32>
    %766 = vector.broadcast %765 : vector<8x1xf32> to vector<8x8xf32>
    %767 = arith.subf %763, %766 : vector<8x8xf32>
    %768 = math.exp %767 : vector<8x8xf32>
    %cst_415 = arith.constant dense<0.000000e+00> : vector<8xf32>
    %769 = vector.multi_reduction <add>, %768, %cst_415 [1] : vector<8x8xf32> to vector<8xf32>
    %770 = vector.shape_cast %769 : vector<8xf32> to vector<8x1xf32>
    %771 = vector.broadcast %770 : vector<8x1xf32> to vector<8x8xf32>
    %772 = arith.divf %768, %771 : vector<8x8xf32>
    %773 = vector.extract_strided_slice %700 {offsets = [0, 48], sizes = [8, 16], strides = [1, 1]} : vector<8x64xf32> to vector<8x16xf32>
    %cst_416 = arith.constant dense<0.000000e+00> : vector<8x16xf32>
    %774 = tpu.matmul %772, %773, %cst_416 {dimension_numbers = #tpu.dot_dimension_numbers<[1], [0], [0], [1], [0, 0, 1, 1], [], []>} : vector<8x8xf32>, vector<8x16xf32>, vector<8x16xf32> -> vector<8x16xf32>
    %775 = vector.extract_strided_slice %702 {offsets = [48, 0], sizes = [16, 64], strides = [1, 1]} : vector<64x64xf32> to vector<16x64xf32>
    %cst_417 = arith.constant dense<0.000000e+00> : vector<8x64xf32>
    %776 = tpu.matmul %774, %775, %cst_417 {dimension_numbers = #tpu.dot_dimension_numbers<[1], [0], [0], [1], [0, 0, 1, 1], [], []>} : vector<8x16xf32>, vector<16x64xf32>, vector<8x64xf32> -> vector<8x64xf32>
    %777 = arith.addf %758, %776 : vector<8x64xf32>
    %c0_418 = arith.constant 0 : index
    %c41 = arith.constant 41 : index
    %c0_419 = arith.constant 0 : index
    %c0_420 = arith.constant 0 : index
    %778 = vector.load %arg4[%c0_418, %c41, %c0_419, %c0_420] : memref<1x59x1x64xf32, #tpu.memory_space<vmem>>, vector<1x1x1x64xf32>
    %779 = vector.shape_cast %778 : vector<1x1x1x64xf32> to vector<1x64xf32>
    %780 = vector.broadcast %779 : vector<1x64xf32> to vector<8x64xf32>
    %781 = arith.addf %777, %780 : vector<8x64xf32>
    %782 = arith.addf %679, %781 : vector<8x64xf32>
    %c0_421 = arith.constant 0 : index
    %c48 = arith.constant 48 : index
    %c0_422 = arith.constant 0 : index
    %c0_423 = arith.constant 0 : index
    %783 = vector.load %arg4[%c0_421, %c48, %c0_422, %c0_423] : memref<1x59x1x64xf32, #tpu.memory_space<vmem>>, vector<1x1x1x64xf32>
    %784 = vector.shape_cast %783 : vector<1x1x1x64xf32> to vector<1x64xf32>
    %c0_424 = arith.constant 0 : index
    %c49 = arith.constant 49 : index
    %c0_425 = arith.constant 0 : index
    %c0_426 = arith.constant 0 : index
    %785 = vector.load %arg4[%c0_424, %c49, %c0_425, %c0_426] : memref<1x59x1x64xf32, #tpu.memory_space<vmem>>, vector<1x1x1x64xf32>
    %786 = vector.shape_cast %785 : vector<1x1x1x64xf32> to vector<1x64xf32>
    %cst_427 = arith.constant dense<0.000000e+00> : vector<8xf32>
    %787 = vector.multi_reduction <add>, %782, %cst_427 [1] : vector<8x64xf32> to vector<8xf32>
    %788 = vector.shape_cast %787 : vector<8xf32> to vector<8x1xf32>
    %cst_428 = arith.constant 6.400000e+01 : f32
    %789 = vector.broadcast %cst_428 : f32 to vector<8x1xf32>
    %790 = arith.divf %788, %789 : vector<8x1xf32>
    %791 = vector.broadcast %790 : vector<8x1xf32> to vector<8x64xf32>
    %792 = arith.subf %782, %791 : vector<8x64xf32>
    %793 = arith.mulf %792, %792 : vector<8x64xf32>
    %cst_429 = arith.constant dense<0.000000e+00> : vector<8xf32>
    %794 = vector.multi_reduction <add>, %793, %cst_429 [1] : vector<8x64xf32> to vector<8xf32>
    %795 = vector.shape_cast %794 : vector<8xf32> to vector<8x1xf32>
    %cst_430 = arith.constant 6.400000e+01 : f32
    %796 = vector.broadcast %cst_430 : f32 to vector<8x1xf32>
    %797 = arith.divf %795, %796 : vector<8x1xf32>
    %798 = vector.broadcast %790 : vector<8x1xf32> to vector<8x64xf32>
    %799 = arith.subf %782, %798 : vector<8x64xf32>
    %cst_431 = arith.constant 9.99999974E-6 : f32
    %800 = vector.broadcast %cst_431 : f32 to vector<8x1xf32>
    %801 = arith.addf %797, %800 : vector<8x1xf32>
    %802 = math.rsqrt %801 : vector<8x1xf32>
    %803 = vector.broadcast %802 : vector<8x1xf32> to vector<8x64xf32>
    %804 = arith.mulf %799, %803 : vector<8x64xf32>
    %805 = vector.broadcast %784 : vector<1x64xf32> to vector<8x64xf32>
    %806 = arith.mulf %804, %805 : vector<8x64xf32>
    %807 = vector.broadcast %786 : vector<1x64xf32> to vector<8x64xf32>
    %808 = arith.addf %806, %807 : vector<8x64xf32>
    %c0_432 = arith.constant 0 : index
    %c28_433 = arith.constant 28 : index
    %c0_434 = arith.constant 0 : index
    %c0_435 = arith.constant 0 : index
    %809 = vector.load %arg3[%c0_432, %c28_433, %c0_434, %c0_435] : memref<1x35x64x64xf32, #tpu.memory_space<vmem>>, vector<1x1x64x64xf32>
    %810 = vector.shape_cast %809 : vector<1x1x64x64xf32> to vector<64x64xf32>
    %cst_436 = arith.constant dense<0.000000e+00> : vector<8x64xf32>
    %811 = tpu.matmul %808, %810, %cst_436 {dimension_numbers = #tpu.dot_dimension_numbers<[1], [0], [0], [1], [0, 0, 1, 1], [], []>} : vector<8x64xf32>, vector<64x64xf32>, vector<8x64xf32> -> vector<8x64xf32>
    %c0_437 = arith.constant 0 : index
    %c42 = arith.constant 42 : index
    %c0_438 = arith.constant 0 : index
    %c0_439 = arith.constant 0 : index
    %812 = vector.load %arg4[%c0_437, %c42, %c0_438, %c0_439] : memref<1x59x1x64xf32, #tpu.memory_space<vmem>>, vector<1x1x1x64xf32>
    %813 = vector.shape_cast %812 : vector<1x1x1x64xf32> to vector<1x64xf32>
    %814 = vector.broadcast %813 : vector<1x64xf32> to vector<8x64xf32>
    %815 = arith.addf %811, %814 : vector<8x64xf32>
    %c0_440 = arith.constant 0 : index
    %c29_441 = arith.constant 29 : index
    %c0_442 = arith.constant 0 : index
    %c0_443 = arith.constant 0 : index
    %816 = vector.load %arg3[%c0_440, %c29_441, %c0_442, %c0_443] : memref<1x35x64x64xf32, #tpu.memory_space<vmem>>, vector<1x1x64x64xf32>
    %817 = vector.shape_cast %816 : vector<1x1x64x64xf32> to vector<64x64xf32>
    %cst_444 = arith.constant dense<0.000000e+00> : vector<8x64xf32>
    %818 = tpu.matmul %378, %817, %cst_444 {dimension_numbers = #tpu.dot_dimension_numbers<[1], [0], [0], [1], [0, 0, 1, 1], [], []>} : vector<8x64xf32>, vector<64x64xf32>, vector<8x64xf32> -> vector<8x64xf32>
    %c0_445 = arith.constant 0 : index
    %c43 = arith.constant 43 : index
    %c0_446 = arith.constant 0 : index
    %c0_447 = arith.constant 0 : index
    %819 = vector.load %arg4[%c0_445, %c43, %c0_446, %c0_447] : memref<1x59x1x64xf32, #tpu.memory_space<vmem>>, vector<1x1x1x64xf32>
    %820 = vector.shape_cast %819 : vector<1x1x1x64xf32> to vector<1x64xf32>
    %821 = vector.broadcast %820 : vector<1x64xf32> to vector<8x64xf32>
    %822 = arith.addf %818, %821 : vector<8x64xf32>
    %c0_448 = arith.constant 0 : index
    %c30_449 = arith.constant 30 : index
    %c0_450 = arith.constant 0 : index
    %c0_451 = arith.constant 0 : index
    %823 = vector.load %arg3[%c0_448, %c30_449, %c0_450, %c0_451] : memref<1x35x64x64xf32, #tpu.memory_space<vmem>>, vector<1x1x64x64xf32>
    %824 = vector.shape_cast %823 : vector<1x1x64x64xf32> to vector<64x64xf32>
    %cst_452 = arith.constant dense<0.000000e+00> : vector<8x64xf32>
    %825 = tpu.matmul %378, %824, %cst_452 {dimension_numbers = #tpu.dot_dimension_numbers<[1], [0], [0], [1], [0, 0, 1, 1], [], []>} : vector<8x64xf32>, vector<64x64xf32>, vector<8x64xf32> -> vector<8x64xf32>
    %c0_453 = arith.constant 0 : index
    %c44 = arith.constant 44 : index
    %c0_454 = arith.constant 0 : index
    %c0_455 = arith.constant 0 : index
    %826 = vector.load %arg4[%c0_453, %c44, %c0_454, %c0_455] : memref<1x59x1x64xf32, #tpu.memory_space<vmem>>, vector<1x1x1x64xf32>
    %827 = vector.shape_cast %826 : vector<1x1x1x64xf32> to vector<1x64xf32>
    %828 = vector.broadcast %827 : vector<1x64xf32> to vector<8x64xf32>
    %829 = arith.addf %825, %828 : vector<8x64xf32>
    %c0_456 = arith.constant 0 : index
    %c31_457 = arith.constant 31 : index
    %c0_458 = arith.constant 0 : index
    %c0_459 = arith.constant 0 : index
    %830 = vector.load %arg3[%c0_456, %c31_457, %c0_458, %c0_459] : memref<1x35x64x64xf32, #tpu.memory_space<vmem>>, vector<1x1x64x64xf32>
    %831 = vector.shape_cast %830 : vector<1x1x64x64xf32> to vector<64x64xf32>
    %832 = vector.extract_strided_slice %815 {offsets = [0, 0], sizes = [8, 16], strides = [1, 1]} : vector<8x64xf32> to vector<8x16xf32>
    %833 = vector.extract_strided_slice %822 {offsets = [0, 0], sizes = [8, 16], strides = [1, 1]} : vector<8x64xf32> to vector<8x16xf32>
    %cst_460 = arith.constant dense<0.000000e+00> : vector<8x8xf32>
    %834 = tpu.matmul %832, %833, %cst_460 {dimension_numbers = #tpu.dot_dimension_numbers<[1], [1], [0], [0], [0, 0, 1, 0], [], []>} : vector<8x16xf32>, vector<8x16xf32>, vector<8x8xf32> -> vector<8x8xf32>
    %cst_461 = arith.constant 2.500000e-01 : f32
    %835 = vector.broadcast %cst_461 : f32 to vector<8x8xf32>
    %836 = arith.mulf %835, %834 : vector<8x8xf32>
    %cst_462 = arith.constant dense<0xFF800000> : vector<8xf32>
    %837 = vector.multi_reduction <maximumf>, %836, %cst_462 [1] : vector<8x8xf32> to vector<8xf32>
    %838 = vector.shape_cast %837 : vector<8xf32> to vector<8x1xf32>
    %839 = vector.broadcast %838 : vector<8x1xf32> to vector<8x8xf32>
    %840 = arith.subf %836, %839 : vector<8x8xf32>
    %841 = math.exp %840 : vector<8x8xf32>
    %cst_463 = arith.constant dense<0.000000e+00> : vector<8xf32>
    %842 = vector.multi_reduction <add>, %841, %cst_463 [1] : vector<8x8xf32> to vector<8xf32>
    %843 = vector.shape_cast %842 : vector<8xf32> to vector<8x1xf32>
    %844 = vector.broadcast %843 : vector<8x1xf32> to vector<8x8xf32>
    %845 = arith.divf %841, %844 : vector<8x8xf32>
    %846 = vector.extract_strided_slice %829 {offsets = [0, 0], sizes = [8, 16], strides = [1, 1]} : vector<8x64xf32> to vector<8x16xf32>
    %cst_464 = arith.constant dense<0.000000e+00> : vector<8x16xf32>
    %847 = tpu.matmul %845, %846, %cst_464 {dimension_numbers = #tpu.dot_dimension_numbers<[1], [0], [0], [1], [0, 0, 1, 1], [], []>} : vector<8x8xf32>, vector<8x16xf32>, vector<8x16xf32> -> vector<8x16xf32>
    %848 = vector.extract_strided_slice %831 {offsets = [0, 0], sizes = [16, 64], strides = [1, 1]} : vector<64x64xf32> to vector<16x64xf32>
    %cst_465 = arith.constant dense<0.000000e+00> : vector<8x64xf32>
    %849 = tpu.matmul %847, %848, %cst_465 {dimension_numbers = #tpu.dot_dimension_numbers<[1], [0], [0], [1], [0, 0, 1, 1], [], []>} : vector<8x16xf32>, vector<16x64xf32>, vector<8x64xf32> -> vector<8x64xf32>
    %850 = vector.extract_strided_slice %815 {offsets = [0, 16], sizes = [8, 16], strides = [1, 1]} : vector<8x64xf32> to vector<8x16xf32>
    %851 = vector.extract_strided_slice %822 {offsets = [0, 16], sizes = [8, 16], strides = [1, 1]} : vector<8x64xf32> to vector<8x16xf32>
    %cst_466 = arith.constant dense<0.000000e+00> : vector<8x8xf32>
    %852 = tpu.matmul %850, %851, %cst_466 {dimension_numbers = #tpu.dot_dimension_numbers<[1], [1], [0], [0], [0, 0, 1, 0], [], []>} : vector<8x16xf32>, vector<8x16xf32>, vector<8x8xf32> -> vector<8x8xf32>
    %cst_467 = arith.constant 2.500000e-01 : f32
    %853 = vector.broadcast %cst_467 : f32 to vector<8x8xf32>
    %854 = arith.mulf %853, %852 : vector<8x8xf32>
    %cst_468 = arith.constant dense<0xFF800000> : vector<8xf32>
    %855 = vector.multi_reduction <maximumf>, %854, %cst_468 [1] : vector<8x8xf32> to vector<8xf32>
    %856 = vector.shape_cast %855 : vector<8xf32> to vector<8x1xf32>
    %857 = vector.broadcast %856 : vector<8x1xf32> to vector<8x8xf32>
    %858 = arith.subf %854, %857 : vector<8x8xf32>
    %859 = math.exp %858 : vector<8x8xf32>
    %cst_469 = arith.constant dense<0.000000e+00> : vector<8xf32>
    %860 = vector.multi_reduction <add>, %859, %cst_469 [1] : vector<8x8xf32> to vector<8xf32>
    %861 = vector.shape_cast %860 : vector<8xf32> to vector<8x1xf32>
    %862 = vector.broadcast %861 : vector<8x1xf32> to vector<8x8xf32>
    %863 = arith.divf %859, %862 : vector<8x8xf32>
    %864 = vector.extract_strided_slice %829 {offsets = [0, 16], sizes = [8, 16], strides = [1, 1]} : vector<8x64xf32> to vector<8x16xf32>
    %cst_470 = arith.constant dense<0.000000e+00> : vector<8x16xf32>
    %865 = tpu.matmul %863, %864, %cst_470 {dimension_numbers = #tpu.dot_dimension_numbers<[1], [0], [0], [1], [0, 0, 1, 1], [], []>} : vector<8x8xf32>, vector<8x16xf32>, vector<8x16xf32> -> vector<8x16xf32>
    %866 = vector.extract_strided_slice %831 {offsets = [16, 0], sizes = [16, 64], strides = [1, 1]} : vector<64x64xf32> to vector<16x64xf32>
    %cst_471 = arith.constant dense<0.000000e+00> : vector<8x64xf32>
    %867 = tpu.matmul %865, %866, %cst_471 {dimension_numbers = #tpu.dot_dimension_numbers<[1], [0], [0], [1], [0, 0, 1, 1], [], []>} : vector<8x16xf32>, vector<16x64xf32>, vector<8x64xf32> -> vector<8x64xf32>
    %868 = arith.addf %849, %867 : vector<8x64xf32>
    %869 = vector.extract_strided_slice %815 {offsets = [0, 32], sizes = [8, 16], strides = [1, 1]} : vector<8x64xf32> to vector<8x16xf32>
    %870 = vector.extract_strided_slice %822 {offsets = [0, 32], sizes = [8, 16], strides = [1, 1]} : vector<8x64xf32> to vector<8x16xf32>
    %cst_472 = arith.constant dense<0.000000e+00> : vector<8x8xf32>
    %871 = tpu.matmul %869, %870, %cst_472 {dimension_numbers = #tpu.dot_dimension_numbers<[1], [1], [0], [0], [0, 0, 1, 0], [], []>} : vector<8x16xf32>, vector<8x16xf32>, vector<8x8xf32> -> vector<8x8xf32>
    %cst_473 = arith.constant 2.500000e-01 : f32
    %872 = vector.broadcast %cst_473 : f32 to vector<8x8xf32>
    %873 = arith.mulf %872, %871 : vector<8x8xf32>
    %cst_474 = arith.constant dense<0xFF800000> : vector<8xf32>
    %874 = vector.multi_reduction <maximumf>, %873, %cst_474 [1] : vector<8x8xf32> to vector<8xf32>
    %875 = vector.shape_cast %874 : vector<8xf32> to vector<8x1xf32>
    %876 = vector.broadcast %875 : vector<8x1xf32> to vector<8x8xf32>
    %877 = arith.subf %873, %876 : vector<8x8xf32>
    %878 = math.exp %877 : vector<8x8xf32>
    %cst_475 = arith.constant dense<0.000000e+00> : vector<8xf32>
    %879 = vector.multi_reduction <add>, %878, %cst_475 [1] : vector<8x8xf32> to vector<8xf32>
    %880 = vector.shape_cast %879 : vector<8xf32> to vector<8x1xf32>
    %881 = vector.broadcast %880 : vector<8x1xf32> to vector<8x8xf32>
    %882 = arith.divf %878, %881 : vector<8x8xf32>
    %883 = vector.extract_strided_slice %829 {offsets = [0, 32], sizes = [8, 16], strides = [1, 1]} : vector<8x64xf32> to vector<8x16xf32>
    %cst_476 = arith.constant dense<0.000000e+00> : vector<8x16xf32>
    %884 = tpu.matmul %882, %883, %cst_476 {dimension_numbers = #tpu.dot_dimension_numbers<[1], [0], [0], [1], [0, 0, 1, 1], [], []>} : vector<8x8xf32>, vector<8x16xf32>, vector<8x16xf32> -> vector<8x16xf32>
    %885 = vector.extract_strided_slice %831 {offsets = [32, 0], sizes = [16, 64], strides = [1, 1]} : vector<64x64xf32> to vector<16x64xf32>
    %cst_477 = arith.constant dense<0.000000e+00> : vector<8x64xf32>
    %886 = tpu.matmul %884, %885, %cst_477 {dimension_numbers = #tpu.dot_dimension_numbers<[1], [0], [0], [1], [0, 0, 1, 1], [], []>} : vector<8x16xf32>, vector<16x64xf32>, vector<8x64xf32> -> vector<8x64xf32>
    %887 = arith.addf %868, %886 : vector<8x64xf32>
    %888 = vector.extract_strided_slice %815 {offsets = [0, 48], sizes = [8, 16], strides = [1, 1]} : vector<8x64xf32> to vector<8x16xf32>
    %889 = vector.extract_strided_slice %822 {offsets = [0, 48], sizes = [8, 16], strides = [1, 1]} : vector<8x64xf32> to vector<8x16xf32>
    %cst_478 = arith.constant dense<0.000000e+00> : vector<8x8xf32>
    %890 = tpu.matmul %888, %889, %cst_478 {dimension_numbers = #tpu.dot_dimension_numbers<[1], [1], [0], [0], [0, 0, 1, 0], [], []>} : vector<8x16xf32>, vector<8x16xf32>, vector<8x8xf32> -> vector<8x8xf32>
    %cst_479 = arith.constant 2.500000e-01 : f32
    %891 = vector.broadcast %cst_479 : f32 to vector<8x8xf32>
    %892 = arith.mulf %891, %890 : vector<8x8xf32>
    %cst_480 = arith.constant dense<0xFF800000> : vector<8xf32>
    %893 = vector.multi_reduction <maximumf>, %892, %cst_480 [1] : vector<8x8xf32> to vector<8xf32>
    %894 = vector.shape_cast %893 : vector<8xf32> to vector<8x1xf32>
    %895 = vector.broadcast %894 : vector<8x1xf32> to vector<8x8xf32>
    %896 = arith.subf %892, %895 : vector<8x8xf32>
    %897 = math.exp %896 : vector<8x8xf32>
    %cst_481 = arith.constant dense<0.000000e+00> : vector<8xf32>
    %898 = vector.multi_reduction <add>, %897, %cst_481 [1] : vector<8x8xf32> to vector<8xf32>
    %899 = vector.shape_cast %898 : vector<8xf32> to vector<8x1xf32>
    %900 = vector.broadcast %899 : vector<8x1xf32> to vector<8x8xf32>
    %901 = arith.divf %897, %900 : vector<8x8xf32>
    %902 = vector.extract_strided_slice %829 {offsets = [0, 48], sizes = [8, 16], strides = [1, 1]} : vector<8x64xf32> to vector<8x16xf32>
    %cst_482 = arith.constant dense<0.000000e+00> : vector<8x16xf32>
    %903 = tpu.matmul %901, %902, %cst_482 {dimension_numbers = #tpu.dot_dimension_numbers<[1], [0], [0], [1], [0, 0, 1, 1], [], []>} : vector<8x8xf32>, vector<8x16xf32>, vector<8x16xf32> -> vector<8x16xf32>
    %904 = vector.extract_strided_slice %831 {offsets = [48, 0], sizes = [16, 64], strides = [1, 1]} : vector<64x64xf32> to vector<16x64xf32>
    %cst_483 = arith.constant dense<0.000000e+00> : vector<8x64xf32>
    %905 = tpu.matmul %903, %904, %cst_483 {dimension_numbers = #tpu.dot_dimension_numbers<[1], [0], [0], [1], [0, 0, 1, 1], [], []>} : vector<8x16xf32>, vector<16x64xf32>, vector<8x64xf32> -> vector<8x64xf32>
    %906 = arith.addf %887, %905 : vector<8x64xf32>
    %c0_484 = arith.constant 0 : index
    %c45 = arith.constant 45 : index
    %c0_485 = arith.constant 0 : index
    %c0_486 = arith.constant 0 : index
    %907 = vector.load %arg4[%c0_484, %c45, %c0_485, %c0_486] : memref<1x59x1x64xf32, #tpu.memory_space<vmem>>, vector<1x1x1x64xf32>
    %908 = vector.shape_cast %907 : vector<1x1x1x64xf32> to vector<1x64xf32>
    %909 = vector.broadcast %908 : vector<1x64xf32> to vector<8x64xf32>
    %910 = arith.addf %906, %909 : vector<8x64xf32>
    %911 = arith.addf %808, %910 : vector<8x64xf32>
    %c0_487 = arith.constant 0 : index
    %c50 = arith.constant 50 : index
    %c0_488 = arith.constant 0 : index
    %c0_489 = arith.constant 0 : index
    %912 = vector.load %arg4[%c0_487, %c50, %c0_488, %c0_489] : memref<1x59x1x64xf32, #tpu.memory_space<vmem>>, vector<1x1x1x64xf32>
    %913 = vector.shape_cast %912 : vector<1x1x1x64xf32> to vector<1x64xf32>
    %c0_490 = arith.constant 0 : index
    %c51 = arith.constant 51 : index
    %c0_491 = arith.constant 0 : index
    %c0_492 = arith.constant 0 : index
    %914 = vector.load %arg4[%c0_490, %c51, %c0_491, %c0_492] : memref<1x59x1x64xf32, #tpu.memory_space<vmem>>, vector<1x1x1x64xf32>
    %915 = vector.shape_cast %914 : vector<1x1x1x64xf32> to vector<1x64xf32>
    %cst_493 = arith.constant dense<0.000000e+00> : vector<8xf32>
    %916 = vector.multi_reduction <add>, %911, %cst_493 [1] : vector<8x64xf32> to vector<8xf32>
    %917 = vector.shape_cast %916 : vector<8xf32> to vector<8x1xf32>
    %cst_494 = arith.constant 6.400000e+01 : f32
    %918 = vector.broadcast %cst_494 : f32 to vector<8x1xf32>
    %919 = arith.divf %917, %918 : vector<8x1xf32>
    %920 = vector.broadcast %919 : vector<8x1xf32> to vector<8x64xf32>
    %921 = arith.subf %911, %920 : vector<8x64xf32>
    %922 = arith.mulf %921, %921 : vector<8x64xf32>
    %cst_495 = arith.constant dense<0.000000e+00> : vector<8xf32>
    %923 = vector.multi_reduction <add>, %922, %cst_495 [1] : vector<8x64xf32> to vector<8xf32>
    %924 = vector.shape_cast %923 : vector<8xf32> to vector<8x1xf32>
    %cst_496 = arith.constant 6.400000e+01 : f32
    %925 = vector.broadcast %cst_496 : f32 to vector<8x1xf32>
    %926 = arith.divf %924, %925 : vector<8x1xf32>
    %927 = vector.broadcast %919 : vector<8x1xf32> to vector<8x64xf32>
    %928 = arith.subf %911, %927 : vector<8x64xf32>
    %cst_497 = arith.constant 9.99999974E-6 : f32
    %929 = vector.broadcast %cst_497 : f32 to vector<8x1xf32>
    %930 = arith.addf %926, %929 : vector<8x1xf32>
    %931 = math.rsqrt %930 : vector<8x1xf32>
    %932 = vector.broadcast %931 : vector<8x1xf32> to vector<8x64xf32>
    %933 = arith.mulf %928, %932 : vector<8x64xf32>
    %934 = vector.broadcast %913 : vector<1x64xf32> to vector<8x64xf32>
    %935 = arith.mulf %933, %934 : vector<8x64xf32>
    %936 = vector.broadcast %915 : vector<1x64xf32> to vector<8x64xf32>
    %937 = arith.addf %935, %936 : vector<8x64xf32>
    %c0_498 = arith.constant 0 : index
    %c32_499 = arith.constant 32 : index
    %c0_500 = arith.constant 0 : index
    %c0_501 = arith.constant 0 : index
    %938 = vector.load %arg3[%c0_498, %c32_499, %c0_500, %c0_501] : memref<1x35x64x64xf32, #tpu.memory_space<vmem>>, vector<1x1x64x64xf32>
    %939 = vector.shape_cast %938 : vector<1x1x64x64xf32> to vector<64x64xf32>
    %cst_502 = arith.constant dense<0.000000e+00> : vector<8x64xf32>
    %940 = tpu.matmul %937, %939, %cst_502 {dimension_numbers = #tpu.dot_dimension_numbers<[1], [0], [0], [1], [0, 0, 1, 1], [], []>} : vector<8x64xf32>, vector<64x64xf32>, vector<8x64xf32> -> vector<8x64xf32>
    %c0_503 = arith.constant 0 : index
    %c46 = arith.constant 46 : index
    %c0_504 = arith.constant 0 : index
    %c0_505 = arith.constant 0 : index
    %941 = vector.load %arg4[%c0_503, %c46, %c0_504, %c0_505] : memref<1x59x1x64xf32, #tpu.memory_space<vmem>>, vector<1x1x1x64xf32>
    %942 = vector.shape_cast %941 : vector<1x1x1x64xf32> to vector<1x64xf32>
    %943 = vector.broadcast %942 : vector<1x64xf32> to vector<8x64xf32>
    %944 = arith.addf %940, %943 : vector<8x64xf32>
    %cst_506 = arith.constant 0.000000e+00 : f32
    %945 = vector.broadcast %cst_506 : f32 to vector<8x64xf32>
    %946 = arith.maximumf %944, %945 : vector<8x64xf32>
    %c0_507 = arith.constant 0 : index
    %c33_508 = arith.constant 33 : index
    %c0_509 = arith.constant 0 : index
    %c0_510 = arith.constant 0 : index
    %947 = vector.load %arg3[%c0_507, %c33_508, %c0_509, %c0_510] : memref<1x35x64x64xf32, #tpu.memory_space<vmem>>, vector<1x1x64x64xf32>
    %948 = vector.shape_cast %947 : vector<1x1x64x64xf32> to vector<64x64xf32>
    %cst_511 = arith.constant dense<0.000000e+00> : vector<8x64xf32>
    %949 = tpu.matmul %946, %948, %cst_511 {dimension_numbers = #tpu.dot_dimension_numbers<[1], [0], [0], [1], [0, 0, 1, 1], [], []>} : vector<8x64xf32>, vector<64x64xf32>, vector<8x64xf32> -> vector<8x64xf32>
    %c0_512 = arith.constant 0 : index
    %c47 = arith.constant 47 : index
    %c0_513 = arith.constant 0 : index
    %c0_514 = arith.constant 0 : index
    %950 = vector.load %arg4[%c0_512, %c47, %c0_513, %c0_514] : memref<1x59x1x64xf32, #tpu.memory_space<vmem>>, vector<1x1x1x64xf32>
    %951 = vector.shape_cast %950 : vector<1x1x1x64xf32> to vector<1x64xf32>
    %952 = vector.broadcast %951 : vector<1x64xf32> to vector<8x64xf32>
    %953 = arith.addf %949, %952 : vector<8x64xf32>
    %954 = arith.addf %937, %953 : vector<8x64xf32>
    %c0_515 = arith.constant 0 : index
    %c52 = arith.constant 52 : index
    %c0_516 = arith.constant 0 : index
    %c0_517 = arith.constant 0 : index
    %955 = vector.load %arg4[%c0_515, %c52, %c0_516, %c0_517] : memref<1x59x1x64xf32, #tpu.memory_space<vmem>>, vector<1x1x1x64xf32>
    %956 = vector.shape_cast %955 : vector<1x1x1x64xf32> to vector<1x64xf32>
    %c0_518 = arith.constant 0 : index
    %c53 = arith.constant 53 : index
    %c0_519 = arith.constant 0 : index
    %c0_520 = arith.constant 0 : index
    %957 = vector.load %arg4[%c0_518, %c53, %c0_519, %c0_520] : memref<1x59x1x64xf32, #tpu.memory_space<vmem>>, vector<1x1x1x64xf32>
    %958 = vector.shape_cast %957 : vector<1x1x1x64xf32> to vector<1x64xf32>
    %cst_521 = arith.constant dense<0.000000e+00> : vector<8xf32>
    %959 = vector.multi_reduction <add>, %954, %cst_521 [1] : vector<8x64xf32> to vector<8xf32>
    %960 = vector.shape_cast %959 : vector<8xf32> to vector<8x1xf32>
    %cst_522 = arith.constant 6.400000e+01 : f32
    %961 = vector.broadcast %cst_522 : f32 to vector<8x1xf32>
    %962 = arith.divf %960, %961 : vector<8x1xf32>
    %963 = vector.broadcast %962 : vector<8x1xf32> to vector<8x64xf32>
    %964 = arith.subf %954, %963 : vector<8x64xf32>
    %965 = arith.mulf %964, %964 : vector<8x64xf32>
    %cst_523 = arith.constant dense<0.000000e+00> : vector<8xf32>
    %966 = vector.multi_reduction <add>, %965, %cst_523 [1] : vector<8x64xf32> to vector<8xf32>
    %967 = vector.shape_cast %966 : vector<8xf32> to vector<8x1xf32>
    %cst_524 = arith.constant 6.400000e+01 : f32
    %968 = vector.broadcast %cst_524 : f32 to vector<8x1xf32>
    %969 = arith.divf %967, %968 : vector<8x1xf32>
    %970 = vector.broadcast %962 : vector<8x1xf32> to vector<8x64xf32>
    %971 = arith.subf %954, %970 : vector<8x64xf32>
    %cst_525 = arith.constant 9.99999974E-6 : f32
    %972 = vector.broadcast %cst_525 : f32 to vector<8x1xf32>
    %973 = arith.addf %969, %972 : vector<8x1xf32>
    %974 = math.rsqrt %973 : vector<8x1xf32>
    %975 = vector.broadcast %974 : vector<8x1xf32> to vector<8x64xf32>
    %976 = arith.mulf %971, %975 : vector<8x64xf32>
    %977 = vector.broadcast %956 : vector<1x64xf32> to vector<8x64xf32>
    %978 = arith.mulf %976, %977 : vector<8x64xf32>
    %979 = vector.broadcast %958 : vector<1x64xf32> to vector<8x64xf32>
    %980 = arith.addf %978, %979 : vector<8x64xf32>
    %c0_526 = arith.constant 0 : index
    %c56 = arith.constant 56 : index
    %c0_527 = arith.constant 0 : index
    %c0_528 = arith.constant 0 : index
    %981 = vector.load %arg4[%c0_526, %c56, %c0_527, %c0_528] : memref<1x59x1x64xf32, #tpu.memory_space<vmem>>, vector<1x1x1x64xf32>
    %982 = vector.shape_cast %981 : vector<1x1x1x64xf32> to vector<1x64xf32>
    %c0_529 = arith.constant 0 : index
    %c57 = arith.constant 57 : index
    %c0_530 = arith.constant 0 : index
    %c0_531 = arith.constant 0 : index
    %983 = vector.load %arg4[%c0_529, %c57, %c0_530, %c0_531] : memref<1x59x1x64xf32, #tpu.memory_space<vmem>>, vector<1x1x1x64xf32>
    %984 = vector.shape_cast %983 : vector<1x1x1x64xf32> to vector<1x64xf32>
    %cst_532 = arith.constant dense<0.000000e+00> : vector<8xf32>
    %985 = vector.multi_reduction <add>, %980, %cst_532 [1] : vector<8x64xf32> to vector<8xf32>
    %986 = vector.shape_cast %985 : vector<8xf32> to vector<8x1xf32>
    %cst_533 = arith.constant 6.400000e+01 : f32
    %987 = vector.broadcast %cst_533 : f32 to vector<8x1xf32>
    %988 = arith.divf %986, %987 : vector<8x1xf32>
    %989 = vector.broadcast %988 : vector<8x1xf32> to vector<8x64xf32>
    %990 = arith.subf %980, %989 : vector<8x64xf32>
    %991 = arith.mulf %990, %990 : vector<8x64xf32>
    %cst_534 = arith.constant dense<0.000000e+00> : vector<8xf32>
    %992 = vector.multi_reduction <add>, %991, %cst_534 [1] : vector<8x64xf32> to vector<8xf32>
    %993 = vector.shape_cast %992 : vector<8xf32> to vector<8x1xf32>
    %cst_535 = arith.constant 6.400000e+01 : f32
    %994 = vector.broadcast %cst_535 : f32 to vector<8x1xf32>
    %995 = arith.divf %993, %994 : vector<8x1xf32>
    %996 = vector.broadcast %988 : vector<8x1xf32> to vector<8x64xf32>
    %997 = arith.subf %980, %996 : vector<8x64xf32>
    %cst_536 = arith.constant 9.99999974E-6 : f32
    %998 = vector.broadcast %cst_536 : f32 to vector<8x1xf32>
    %999 = arith.addf %995, %998 : vector<8x1xf32>
    %1000 = math.rsqrt %999 : vector<8x1xf32>
    %1001 = vector.broadcast %1000 : vector<8x1xf32> to vector<8x64xf32>
    %1002 = arith.mulf %997, %1001 : vector<8x64xf32>
    %1003 = vector.broadcast %982 : vector<1x64xf32> to vector<8x64xf32>
    %1004 = arith.mulf %1002, %1003 : vector<8x64xf32>
    %1005 = vector.broadcast %984 : vector<1x64xf32> to vector<8x64xf32>
    %1006 = arith.addf %1004, %1005 : vector<8x64xf32>
    %c0_537 = arith.constant 0 : index
    %c34_538 = arith.constant 34 : index
    %c0_539 = arith.constant 0 : index
    %c0_540 = arith.constant 0 : index
    %1007 = vector.load %arg3[%c0_537, %c34_538, %c0_539, %c0_540] : memref<1x35x64x64xf32, #tpu.memory_space<vmem>>, vector<1x1x64x64xf32>
    %1008 = vector.shape_cast %1007 : vector<1x1x64x64xf32> to vector<64x64xf32>
    %cst_541 = arith.constant dense<0.000000e+00> : vector<8x64xf32>
    %1009 = tpu.matmul %1006, %1008, %cst_541 {dimension_numbers = #tpu.dot_dimension_numbers<[1], [0], [0], [1], [0, 0, 1, 1], [], []>} : vector<8x64xf32>, vector<64x64xf32>, vector<8x64xf32> -> vector<8x64xf32>
    %c0_542 = arith.constant 0 : index
    %c58 = arith.constant 58 : index
    %c0_543 = arith.constant 0 : index
    %c0_544 = arith.constant 0 : index
    %1010 = vector.load %arg4[%c0_542, %c58, %c0_543, %c0_544] : memref<1x59x1x64xf32, #tpu.memory_space<vmem>>, vector<1x1x1x64xf32>
    %1011 = vector.shape_cast %1010 : vector<1x1x1x64xf32> to vector<1x64xf32>
    %1012 = vector.broadcast %1011 : vector<1x64xf32> to vector<8x64xf32>
    %1013 = arith.addf %1009, %1012 : vector<8x64xf32>
    %c0_545 = arith.constant 0 : index
    %c0_546 = arith.constant 0 : index
    %c0_547 = arith.constant 0 : index
    %1014 = vector.load %arg5[%c0_545, %c0_546, %c0_547] : memref<1x8x64xf32, #tpu.memory_space<vmem>>, vector<1x8x64xf32>
    %1015 = vector.shape_cast %1014 : vector<1x8x64xf32> to vector<8x64xf32>
    %1016 = vector.shape_cast %1013 : vector<8x64xf32> to vector<1x8x64xf32>
    tpu.vector_store %arg5[%c0_545, %c0_546, %c0_547], %1016 {strides = array<i32>} : memref<1x8x64xf32, #tpu.memory_space<vmem>>, vector<1x8x64xf32>,
    return
  }
  func.func @transform_0(%arg0: i32) -> (i32, i32) {
    %c0_i32 = arith.constant 0 : i32
    %c0_i32_0 = arith.constant 0 : i32
    %c0_i32_1 = arith.constant 0 : i32
    return %c0_i32, %c0_i32_0 : i32, i32
  }
  func.func @transform_1(%arg0: i32) -> (i32, i32, i32, i32) {
    %c0_i32 = arith.constant 0 : i32
    %c0_i32_0 = arith.constant 0 : i32
    %c0_i32_1 = arith.constant 0 : i32
    %c0_i32_2 = arith.constant 0 : i32
    return %arg0, %c0_i32, %c0_i32_0, %c0_i32_1 : i32, i32, i32, i32
  }
  func.func @transform_2(%arg0: i32) -> (i32, i32, i32, i32) {
    %c0_i32 = arith.constant 0 : i32
    %c0_i32_0 = arith.constant 0 : i32
    %c0_i32_1 = arith.constant 0 : i32
    %c0_i32_2 = arith.constant 0 : i32
    return %arg0, %c0_i32, %c0_i32_0, %c0_i32_1 : i32, i32, i32, i32
  }
  func.func @transform_3(%arg0: i32) -> (i32, i32, i32, i32) {
    %c0_i32 = arith.constant 0 : i32
    %c0_i32_0 = arith.constant 0 : i32
    %c0_i32_1 = arith.constant 0 : i32
    %c0_i32_2 = arith.constant 0 : i32
    return %arg0, %c0_i32, %c0_i32_0, %c0_i32_1 : i32, i32, i32, i32
  }
  func.func @transform_4(%arg0: i32) -> (i32, i32, i32) {
    %c0_i32 = arith.constant 0 : i32
    %c0_i32_0 = arith.constant 0 : i32
    %c0_i32_1 = arith.constant 0 : i32
    return %arg0, %c0_i32, %c0_i32_0 : i32, i32, i32
  }
}

</mosaic_0001>

<bundles_post_ra>
// kernel: multi_combination_forward.1
= control target key start
LH: loop header
LB: loop body
LE: loop exit
PB: predicated region body
PF: predicated region fallthrough
CT: control target
= control target key end

     0   :  { %9 = vsyncpa [#allocation5], 0  ;;  %s13560_s0 = inlined_call_operand.hbm [shape: f32[8,64], index: 0, kind: input, shape index: {}]   ;;  %s13561_s1 = inlined_call_operand.hbm [shape: f32[3,2,64,64], index: 1, kind: input, shape index: {}]   ;;  %s13562_s2 = inlined_call_operand.hbm [shape: f32[3,35,64,64], index: 2, kind: input, shape index: {}]   ;;  %s13563_s3 = inlined_call_operand.hbm [shape: f32[3,59,1,64], index: 3, kind: input, shape index: {}]   ;;  %s13564_s4 = inlined_call_operand.vmem [shape: f32[3,8,64], index: 4, kind: output, shape index: {}]  }
   0x1   :  { %10 = vsyncpa [#allocation7], 0 }
   0x2   :  { %12 = vsyncpa [#allocation7 + $0x1], 0 }
   0x3   :  { %13 = vsyncpa [#allocation10], 0 }
   0x4   :  { %15 = vsyncpa [#allocation10 + $0x1], 0  ;;  %s11934_s15 = smov 0   ;;  %s11936_s16 = smov 0  }
   0x5   :  { %s11938_s17 = smov 0   ;;  %s11940_s18 = smov 0  }
   0x6 LB: > { %s11955_s19 = sadd.s32 1, %s11876_s18   ;;  %s49_s20 = sadd.s32 1, %s11872_s17  ;;  %s11876_s18 = sphi %s11940_s18, %s13583_s18   ;;  %s11872_s17 = sphi %s11938_s17, %s13582_s17   ;;  %s11868_s16 = sphi %s11936_s16, %s13581_s16   ;;  %s11864_s15 = sphi %s11934_s15, %s13580_s15  }
   0x7   : > { %s46_s21 = ssub.s32 %s11876_s18, %s11955_s19  ;;  %p56_p0 = scmp.ne.s32.totalorder %s11872_s17, %s11868_s16 }
   0x8   : > { %p47_p1 = scmp.eq.s32.totalorder %s46_s21, 0  ;;  %p57_p2 = scmp.eq.s32.totalorder %s11876_s18, 0 }
   0x9   : > { %p11540_p3 = scmp.lt.s32.totalorder %s11876_s18, 3  ;;  %s175_s23 = sand.u32 1, %s11876_s18  }
   0xa   : > { %s11965_s22 = scalar_select %p47_p1, %s11872_s17, %s49_s20  }
   0xb   : > { %p58_p4 = por %p57_p2, %p56_p0  ;;  %s11969_s24 = sand.u32 1, %s11872_s17  }
   0xc   : > { %s9527_s25 = sshll.u32 %s11969_s24, 7  ;;  %s10064_s26 = sshll.u32 %s11876_s18, 11 }
   0xd   : > { %s11976_s29 = scalar_lea.hbm %s13561_s1, %s10064_s26  ;;  %s179_s30 = scalar_lea.vmem [#allocation6], %s9527_s25 }
   0xe   : > { %s186_s5 = sshll.u32 %s179_s30, 4  ;;  %p11978_p5 = pnand %p11540_p3, %p58_p4  ;;  %s11982_s5 = int_to_ptr.vmem [resolvable:$true] %s186_s5 }
   0xf   : > { %s11984_s7 = scalar_lea.sflag [#allocation7], %s175_s23  ;;  %s11724_s8 = scalar_lea.hbm %s11976_s29, 2048 }
  0x10   : > { %p11725_p6 = scmp.ne.s32.totalorder %s11976_s29, %s11724_s8  ;;  %p11990_p7 = pneg %p11978_p5 }
  0x11   : > { %s11729_s12 = scalar_lea.hbm %s13561_s1, 6144  ;;  %p11730_p10 = scmp.lt.s32.totalorder %s11976_s29, %s13561_s1 }
  0x12   : > { %p11727_p8 = pnand %p11990_p7, %p11725_p6  ;;  %p11731_p11 = scmp.lt.s32.totalorder %s11729_s12, %s11724_s8 }
  0x14   : > { %p11728_p9 = pneg %p11727_p8  ;;  %p11732_p12 = por %p11731_p11, %p11730_p10 }
  0x16   : > { %p11733_p13 = pnand %p11732_p12, %p11728_p9 }
  0x18   : > { %11736 = shalt.err (!%p11733_p13)
}
  0x19   : > { %s11737_s20 = scalar_lea.vmem %s11982_s5, 2048  ;;  %s11878_s21 = smov [#allocation6]  }
  0x1a   : > { %p11738_p0 = scmp.ne.s32.totalorder %s11982_s5, %s11737_s20  ;;  %s11742_s23 = sshll.u32 %s11878_s21, 4  ;;  %s11743_s23 = int_to_ptr.vmem [resolvable:$false] %s11742_s23 }
  0x1b   : > { %s11744_s25 = scalar_lea.vmem %s11743_s23, 4096  ;;  %p11745_p3 = scmp.lt.s32.totalorder %s11982_s5, %s11743_s23 }
  0x1c   : > { %p11740_p1 = pnand %p11738_p0, %p11990_p7  ;;  %p11746_p4 = scmp.lt.s32.totalorder %s11744_s25, %s11737_s20 }
  0x1e   : > { %p11741_p2 = pneg %p11740_p1  ;;  %p11747_p6 = por %p11746_p4, %p11745_p3 }
  0x20   : > { %p11748_p8 = pnand %p11747_p6, %p11741_p2 }
  0x22   : > { %11751 = shalt.err (!%p11748_p8)
}
  0x23   : > { %s11879_s26 = smov 128   ;;  %s11880_s27 = smov 8  }
  0x24   : > { %11532 = dma.hbm_to_vmem [thread:$0]  (!%p11978_p5), %s11976_s29, 2048, %s11982_s5, %s11984_s7, %s11879_s26, %s11879_s26, %s11880_s27  }
  0x25   : > { %s12017_s28 = sadd.s32 4294967295, %s11876_s18   ;;  %p62_p10 = scmp.ne.s32.totalorder %s11868_s16, %s11864_s15 }
  0x26   : > { %p13565_p9 = scmp.eq.s32.totalorder %s12017_s28, 0  ;;  %p9524_p11 = scmp.ge.s32.totalorder %s11876_s18, 1 }
  0x27   : > { %p151_p12 = scmp.lt.s32.totalorder %s11876_s18, 4  ;;  %s11881_s29 = smov [#allocation4]  }
  0x28   : > { %p12027_p0 = por %p13565_p9, %p62_p10  ;;  %s164_s5 = sshll.u32 %s11881_s29, 4  ;;  %s165_s5 = int_to_ptr.vmem [resolvable:$true] %s164_s5 }
  0x29   : > { %p12031_p1 = pnand %p9524_p11, %p151_p12  ;;  %s11509_s10 = smul.u32 2240, %s11969_s24 }
  0x2a   : > { %s13570_s30 = scalar_select %p12027_p0, 1, 0 }
  0x2b   : > { %s13571_s8 = scalar_select %p12031_p1, 1, 0 }
  0x2c   : > { %p11525_p2 = pneg %p12031_p1  ;;  %s11510_s15 = smul.u32 35840, %s11876_s18 }
  0x2d   : > { %s200_s20 = scalar_lea.vmem [#allocation8], %s11509_s10  ;;  %s11763_s25 = scalar_lea.vmem %s165_s5, 128 }
  0x2e   : > { %p12041_p3 = pnand %p11525_p2, %p13565_p9  ;;  %s12048_s14 = scalar_lea.hbm %s13562_s2, %s11510_s15 }
  0x2f   : > { %s207_s21 = sshll.u32 %s200_s20, 4  ;;  %p11764_p6 = scmp.ne.s32.totalorder %s165_s5, %s11763_s25  ;;  %s12051_s21 = int_to_ptr.vmem [resolvable:$true] %s207_s21 }
  0x30   : > { %p11754_p4 = pneg %p12041_p3  ;;  %p11771_p11 = scmp.lt.s32.totalorder %s165_s5, %s165_s5 }
  0x31   : > { %p11772_p12 = scmp.lt.s32.totalorder %s11763_s25, %s11763_s25 }
  0x32   : > { %p11766_p8 = pnand %p11764_p6, %p11754_p4 }
  0x33   : > { %p11773_p2 = por %p11772_p12, %p11771_p11 }
  0x34   : > { %p11767_p10 = pneg %p11766_p8 }
  0x36   : > { %p11774_p13 = pnand %p11773_p2, %p11767_p10 }
  0x38   : > { %11777 = shalt.err (!%p11774_p13)
}
  0x39   : > { %11528 = dma.hbm_to_vmem [thread:$0]  (!%p12041_p3), %s13560_s0, 128, %s165_s5, [#allocation5]  }
  0x3a   : > { %s11778_s10 = scalar_lea.hbm %s12048_s14, 35840  ;;  %s11783_s20 = scalar_lea.hbm %s13562_s2, 107520 }
  0x3b   : > { %p11779_p9 = scmp.ne.s32.totalorder %s12048_s14, %s11778_s10  ;;  %p11784_p13 = scmp.lt.s32.totalorder %s12048_s14, %s13562_s2 }
  0x3c   : > { %p11785_p8 = scmp.lt.s32.totalorder %s11783_s20, %s11778_s10 }
  0x3d   : > { %p11781_p4 = pnand %p11779_p9, %p11990_p7 }
  0x3e   : > { %p11786_p10 = por %p11785_p8, %p11784_p13 }
  0x3f   : > { %p11782_p6 = pneg %p11781_p4 }
  0x41   : > { %p11787_p11 = pnand %p11786_p10, %p11782_p6 }
  0x43   : > { %11790 = shalt.err (!%p11787_p11)
}
  0x44   : > { %s11791_s5 = scalar_lea.vmem %s12051_s21, 35840  ;;  %s11882_s11 = smov [#allocation8]  }
  0x45   : > { %p11792_p3 = scmp.ne.s32.totalorder %s12051_s21, %s11791_s5  ;;  %s11796_s29 = sshll.u32 %s11882_s11, 4  ;;  %s11797_s29 = int_to_ptr.vmem [resolvable:$false] %s11796_s29 }
  0x46   : > { %s11798_s15 = scalar_lea.vmem %s11797_s29, 71680  ;;  %p11799_p2 = scmp.lt.s32.totalorder %s12051_s21, %s11797_s29 }
  0x47   : > { %p11794_p9 = pnand %p11792_p3, %p11990_p7  ;;  %p11800_p4 = scmp.lt.s32.totalorder %s11798_s15, %s11791_s5 }
  0x49   : > { %p11795_p12 = pneg %p11794_p9  ;;  %p11801_p0 = por %p11800_p4, %p11799_p2 }
  0x4b   : > { %p11802_p1 = pnand %p11801_p0, %p11795_p12 }
  0x4d   : > { %11805 = shalt.err (!%p11802_p1)
}
  0x4e   : > { %11535 = dma.hbm_to_vmem [thread:$0]  (!%p11978_p5), %s12048_s14, 35840, %s12051_s21, %s11984_s7, %s11879_s26, %s11879_s26, %s11880_s27  }
  0x4f   : > { %s11512_s23 = smul.u32 944, %s11876_s18  ;;  %s218_s11 = scalar_lea.sflag [#allocation10], %s11969_s24 }
  0x50   : > { %s13573_s10 = smul.u32 59, %s11969_s24  ;;  %s11811_s26 = scalar_lea.hbm %s13563_s3, 2832 }
  0x51   : > { %s12090_s5 = scalar_lea.hbm %s13563_s3, %s11512_s23 }
  0x52   : > { %s221_s12 = scalar_lea.vmem [#allocation9], %s13573_s10  ;;  %s11806_s29 = scalar_lea.hbm %s12090_s5, 944 }
  0x53   : > { %s228_s13 = sshll.u32 %s221_s12, 4  ;;  %p11807_p0 = scmp.ne.s32.totalorder %s12090_s5, %s11806_s29  ;;  %s12092_s13 = int_to_ptr.vmem [resolvable:$true] %s228_s13 }
  0x54   : > { %p11812_p13 = scmp.lt.s32.totalorder %s12090_s5, %s13563_s3  ;;  %p11813_p8 = scmp.lt.s32.totalorder %s11811_s26, %s11806_s29 }
  0x55   : > { %p11809_p1 = pnand %p11807_p0, %p11990_p7 }
  0x56   : > { %p11814_p10 = por %p11813_p8, %p11812_p13 }
  0x57   : > { %p11810_p6 = pneg %p11809_p1 }
  0x59   : > { %p11815_p11 = pnand %p11814_p10, %p11810_p6 }
  0x5b   : > { %11818 = shalt.err (!%p11815_p11)
}
  0x5c   : > { %s11819_s21 = scalar_lea.vmem %s12092_s13, 944  ;;  %s11883_s15 = smov [#allocation9]  }
  0x5d   : > { %p11820_p3 = scmp.ne.s32.totalorder %s12092_s13, %s11819_s21  ;;  %s11824_s23 = sshll.u32 %s11883_s15, 4  ;;  %s11825_s23 = int_to_ptr.vmem [resolvable:$false] %s11824_s23 }
  0x5e   : > { %s11826_s10 = scalar_lea.vmem %s11825_s23, 1888  ;;  %p11827_p2 = scmp.lt.s32.totalorder %s12092_s13, %s11825_s23 }
  0x5f   : > { %p11822_p9 = pnand %p11820_p3, %p11990_p7  ;;  %p11828_p4 = scmp.lt.s32.totalorder %s11826_s10, %s11819_s21 }
  0x61   : > { %p11823_p12 = pneg %p11822_p9  ;;  %p11829_p0 = por %p11828_p4, %p11827_p2 }
  0x63   : > { %p11830_p1 = pnand %p11829_p0, %p11823_p12 }
  0x65   : > { %11833 = shalt.err (!%p11830_p1)
}
  0x66   : > { %s11884_s12 = smov 16   ;;  %s11885_s20 = smov 1  }
  0x67   : > { %11538 = dma.hbm_to_vmem [thread:$0]  (!%p11978_p5), %s12090_s5, 944, %s12092_s13, %s218_s11, %s11884_s12, %s11884_s12, %s11885_s20  }
  0x68   : > { %p13574_p7 = scmp.ne.s32.totalorder %s13571_s8, 0 }
  0x69   : > { %p13575_p6 = scmp.eq.s32.totalorder (!%p13574_p7), %s12017_s28, 0 }
  0x6a   : > { %240 = sbr.rel (%p13574_p7) target bundleno = 22370 (0x5762), region = 36 }
  0x6f   : > { %11851 = dma.done.wait (%p13575_p6), [#allocation5], 128   ;;  %p13576_p13 = pmov %p13575_p6 }
  0x70   : > { %s246_s9 = sand.u32 1, %s12017_s28   ;;  %s248_s25 = sand.u32 1, %s11868_s16  }
  0x71   : > { %11853 = vsyncadd (%p13576_p13), [#allocation5], 4294967168  ;;  %s9534_s29 = sshll.u32 %s248_s25, 7  ;;  %s247_s18 = scalar_lea.sflag [#allocation7], %s246_s9 }
  0x72   : > { %s12125_s7 = scalar_lea.vmem [#allocation6], %s9534_s29  ;;  %p13577_p8 = scmp.ne.s32.totalorder %s13570_s30, 0 }
  0x74   : > { %11855 = dma.done.wait (%p13577_p8), %s247_s18, 37888  }
  0x75   : > { %11857 = vsyncadd (%p13577_p8), %s247_s18, 4294929408  ;;  %s11513_s24 = smul.u32 2240, %s248_s25  ;;  %s265_s13 = scalar_lea.sflag [#allocation10], %s248_s25 }
  0x76   : > { %s11514_s6 = smul.u32 59, %s248_s25 }
  0x77   : > { %s12131_s8 = scalar_lea.vmem [#allocation8], %s11513_s24 }
  0x78   : > { %s12133_s5 = scalar_lea.vmem [#allocation9], %s11514_s6 }
  0x79   : > { %11859 = dma.done.wait (%p13577_p8), %s265_s13, 944  }
  0x7a   : > { %11861 = vsyncadd (%p13577_p8), %s265_s13, 4294966352  ;;  %p302_p5 = scmp.lt.s32.totalorder %s12017_s28, 2  ;;  %v12146_v0 = vld [vmem:[#allocation4] sm:$0xff]  ;;  %p13578_p10 = scmp.ne.s32.totalorder %s12017_s28, 0 }
  0x7c   : > { %s303_s11 = scalar_select %p302_p5, %s12017_s28, 2 }
  0x7d   : > { %310 = sbr.rel (%p13578_p10) target bundleno = 344 (0x158), region = 56 }
  0x7e   : > { %s9535_s26 = sshll.u32 %s303_s11, 3 }
  0x7f   : > { %s12144_s21 = scalar_lea.vmem %s13564_s4, %s9535_s26 }
  0x82   : > { %v318_v1 = vld [vmem:[%s12131_s8 + $0x38] sm:$0xff]  ;;  %v11886_v3 = vmov 0.0   ;;  %v317_v4 = vld [vmem:[%s12131_s8 + $0x30] sm:$0xff]  ;;  %v316_v6 = vld [vmem:[%s12131_s8 + $0x28] sm:$0xff]  ;;  %vm326_vm0 = vcmask 523264   ;;  %vm11887_vm1 = vmmov 0  }
  0x83   : > { %v9546_v2 = vld [vmem:[%s12131_s8 + $0x78] sm:$0xff]  ;;  %10512 = vmatprep.subr.mxu0 %v11886_v3  ;;  %10531 = vmatprep.subr.mxu1 %v11886_v3  ;;  %v9545_v5 = vld [vmem:[%s12131_s8 + $0x70] sm:$0xff]  ;;  %v9544_v7 = vld [vmem:[%s12131_s8 + $0x68] sm:$0xff] }
  0x84   : > { %10513 = vmatpush3.msra.mxu0 %v318_v1  ;;  %10532 = vmatpush3.msra.mxu1 %v9546_v2  ;;  %v315_v8 = vld [vmem:[%s12131_s8 + $0x20] sm:$0xff]  ;;  %v314_v10 = vld [vmem:[%s12131_s8 + $0x18] sm:$0xff]  ;;  %v313_v12 = vld [vmem:[%s12131_s8 + $0x10] sm:$0xff] }
  0x85   : > { %10514 = vmatprep.subr.mxu0 %v11886_v3  ;;  %10533 = vmatprep.subr.mxu1 %v11886_v3  ;;  %v9543_v9 = vld [vmem:[%s12131_s8 + $0x60] sm:$0xff]  ;;  %v9542_v11 = vld [vmem:[%s12131_s8 + $0x58] sm:$0xff]  ;;  %v9541_v13 = vld [vmem:[%s12131_s8 + $0x50] sm:$0xff] }
  0x86   : > { %10515 = vmatpush3.msra.mxu0 %v317_v4  ;;  %10534 = vmatpush3.msra.mxu1 %v9545_v5  ;;  %v312_v14 = vld [vmem:[%s12131_s8 + $0x8] sm:$0xff]  ;;  %v311_v16 = vld [vmem:[%s12131_s8] sm:$0xff] }
  0x87   : > { %10516 = vmatprep.subr.mxu0 %v11886_v3  ;;  %10535 = vmatprep.subr.mxu1 %v11886_v3  ;;  %v9540_v15 = vld [vmem:[%s12131_s8 + $0x48] sm:$0xff]  ;;  %v9539_v17 = vld [vmem:[%s12131_s8 + $0x40] sm:$0xff] }
  0x88   : > { %10517 = vmatpush3.msra.mxu0 %v316_v6  ;;  %10536 = vmatpush3.msra.mxu1 %v9544_v7  ;;  %v9537_v18 = vld [vmem:[%s12133_s5] ss:$0 sm:$0xff]  ;;  %v9548_v19 = vld [vmem:[%s12133_s5 + $0x1] ss:$0 sm:$0xff] }
  0x89   : > { %10518 = vmatprep.subr.mxu0 %v11886_v3  ;;  %10537 = vmatprep.subr.mxu1 %v11886_v3 }
  0x8a   : > { %10519 = vmatpush3.msra.mxu0 %v315_v8  ;;  %10538 = vmatpush3.msra.mxu1 %v9543_v9 }
  0x8b   : > { %10520 = vmatprep.subr.mxu0 %v11886_v3  ;;  %10539 = vmatprep.subr.mxu1 %v11886_v3 }
  0x8c   : > { %10521 = vmatpush3.msra.mxu0 %v314_v10  ;;  %10540 = vmatpush3.msra.mxu1 %v9542_v11 }
  0x8d   : > { %10522 = vmatprep.subr.mxu0 %v11886_v3  ;;  %10541 = vmatprep.subr.mxu1 %v11886_v3 }
  0x8e   : > { %10523 = vmatpush3.msra.mxu0 %v313_v12  ;;  %10542 = vmatpush3.msra.mxu1 %v9541_v13 }
  0x8f   : > { %10524 = vmatprep.subr.mxu0 %v11886_v3  ;;  %10543 = vmatprep.subr.mxu1 %v11886_v3 }
  0x90   : > { %10525 = vmatpush3.msra.mxu0 %v312_v14  ;;  %10544 = vmatpush3.msra.mxu1 %v9540_v15 }
  0x91   : > { %10526 = vmatprep.subr.mxu0 %v11886_v3  ;;  %10545 = vmatprep.subr.mxu1 %v11886_v3 }
  0x92   : > { %10527 = vmatpush3.msra.mxu0 %v311_v16  ;;  %10528 = vmatprep.mubr.msk.f32.mxu0 %vm11887_vm1, %v11886_v3 }
  0x93   : > { %10546 = vmatpush3.msra.mxu1 %v9539_v17  ;;  %10547 = vmatprep.mubr.msk.f32.mxu1 %vm11887_vm1, %v11886_v3 }
  0x94   : > { %10529 = vmatmul.mubr.msk.f32.vlgmr.msra.gmra.mxu0 %vm326_vm0, %v12146_v0  ;;  %10548 = vmatmul.mubr.msk.f32.vlgmr.msra.gmra.mxu1 %vm326_vm0, %v12146_v0 }
 0x154   : > { %v396_v20 = vpop.f32.mrf.mxu0  ;;  %v484_v21 = vpop.f32.mrf.mxu1 }
 0x155   : > { %v397_v22 = vadd.f32 %v9537_v18, %v396_v20  ;;  %v485_v23 = vadd.f32 %v9548_v19, %v484_v21 }
 0x156   : > { %v10530_v24 = vpop.f32.mrf.mxu0  ;;  %v10549_v25 = vpop.f32.mrf.mxu1 }
 0x157   : > { %400 = vst.msk [vmem:[#allocation2] sm:$0xff] %vm326_vm0, %v397_v22  ;;  %488 = vst.msk [vmem:[#allocation3] sm:$0xff] %vm326_vm0, %v485_v23 }
 0x158 PF: > { %p13579_p11 = scmp.eq.s32.totalorder %s12017_s28, 0 }
 0x159   : > { %s11890_s28 = smov (!%p13579_p11), 104   ;;  %s11891_s30 = smov (!%p13579_p11), 120  }
 0x15a   : > { %492 = sbr.rel (%p13579_p11) target bundleno = 745 (0x2e9), region = 60  ;;  %s11892_s15 = smov (!%p13579_p11), 96  }
 0x15b   : > { %s11893_s23 = smov (!%p13579_p11), 112   ;;  %s11894_s10 = smov (!%p13579_p11), 80  }
 0x15c   : > { %s11895_s12 = smov (!%p13579_p11), 88   ;;  %s11896_s20 = smov (!%p13579_p11), 8  }
 0x15d   : > { %s11897_s9 = smov (!%p13579_p11), 72   ;;  %s11898_s25 = smov (!%p13579_p11), 24  }
 0x15e   : > { %s11899_s29 = smov (!%p13579_p11), 16   ;;  %s11900_s18 = smov (!%p13579_p11), 40  }
 0x15f   : > { %v500_v26 = vld [vmem:[%s12125_s7 + $0x38] sm:$0xff]  ;;  %v11888_v28 = vmov 0.0   ;;  %v499_v29 = vld [vmem:[%s12125_s7 + $0x30] sm:$0xff]  ;;  %v498_v31 = vld [vmem:[%s12125_s7 + $0x28] sm:$0xff]  ;;  %vm501_vm2 = vcmask 523264   ;;  %vm11889_vm3 = vmmov 0  }
 0x160   : > { %v9559_v27 = vld [vmem:[%s12125_s7 + $0x78] sm:$0xff]  ;;  %10550 = vmatprep.subr.mxu0 %v11888_v28  ;;  %10569 = vmatprep.subr.mxu1 %v11888_v28  ;;  %v9558_v30 = vld [vmem:[%s12125_s7 + $0x70] sm:$0xff]  ;;  %v9557_v32 = vld [vmem:[%s12125_s7 + $0x68] sm:$0xff]  ;;  %vm664_vm5 = vcmask 57344   ;;  %s11902_s24 = smov 56   ;;  %s11903_s6 = smov 48  }
 0x161   : > { %10551 = vmatpush3.msra.mxu0 %v500_v26  ;;  %10570 = vmatpush3.msra.mxu1 %v9559_v27  ;;  %v497_v33 = vld [vmem:[%s12125_s7 + $0x20] sm:$0xff]  ;;  %v496_v35 = vld [vmem:[%s12125_s7 + $0x18] sm:$0xff]  ;;  %v495_v37 = vld [vmem:[%s12125_s7 + $0x10] sm:$0xff]  ;;  %vm670_vm7 = vcmask 123969   ;;  %vm675_vm8 = vcmask 190594   ;;  %vm680_vm9 = vcmask 257219  }
 0x162   : > { %10552 = vmatprep.subr.mxu0 %v11888_v28  ;;  %10571 = vmatprep.subr.mxu1 %v11888_v28  ;;  %v9556_v34 = vld [vmem:[%s12125_s7 + $0x60] sm:$0xff]  ;;  %v9555_v36 = vld [vmem:[%s12125_s7 + $0x58] sm:$0xff]  ;;  %v9554_v38 = vld [vmem:[%s12125_s7 + $0x50] sm:$0xff]  ;;  %vm685_vm10 = vcmask 323844   ;;  %vm690_vm11 = vcmask 390469   ;;  %vm695_vm12 = vcmask 457094  }
 0x163   : > { %10553 = vmatpush3.msra.mxu0 %v499_v29  ;;  %10572 = vmatpush3.msra.mxu1 %v9558_v30  ;;  %v494_v39 = vld [vmem:[%s12125_s7 + $0x8] sm:$0xff]  ;;  %v493_v41 = vld [vmem:[%s12125_s7] sm:$0xff]  ;;  %vm700_vm13 = vcmask 523719  }
 0x164   : > { %10554 = vmatprep.subr.mxu0 %v11888_v28  ;;  %10573 = vmatprep.subr.mxu1 %v11888_v28  ;;  %v9553_v40 = vld [vmem:[%s12125_s7 + $0x48] sm:$0xff]  ;;  %v9552_v42 = vld [vmem:[%s12125_s7 + $0x40] sm:$0xff]  ;;  %s11901_s7 = smov 32  }
 0x165   : > { %10555 = vmatpush3.msra.mxu0 %v498_v31  ;;  %10574 = vmatpush3.msra.mxu1 %v9557_v32 }
 0x166   : > { %10556 = vmatprep.subr.mxu0 %v11888_v28  ;;  %10575 = vmatprep.subr.mxu1 %v11888_v28 }
 0x167   : > { %10557 = vmatpush3.msra.mxu0 %v497_v33  ;;  %10576 = vmatpush3.msra.mxu1 %v9556_v34 }
 0x168   : > { %10558 = vmatprep.subr.mxu0 %v11888_v28  ;;  %10577 = vmatprep.subr.mxu1 %v11888_v28 }
 0x169   : > { %10559 = vmatpush3.msra.mxu0 %v496_v35  ;;  %10578 = vmatpush3.msra.mxu1 %v9555_v36 }
 0x16a   : > { %10560 = vmatprep.subr.mxu0 %v11888_v28  ;;  %10579 = vmatprep.subr.mxu1 %v11888_v28 }
 0x16b   : > { %10561 = vmatpush3.msra.mxu0 %v495_v37  ;;  %10580 = vmatpush3.msra.mxu1 %v9554_v38 }
 0x16c   : > { %10562 = vmatprep.subr.mxu0 %v11888_v28  ;;  %10581 = vmatprep.subr.mxu1 %v11888_v28 }
 0x16d   : > { %10563 = vmatpush3.msra.mxu0 %v494_v39  ;;  %10582 = vmatpush3.msra.mxu1 %v9553_v40 }
 0x16e   : > { %10564 = vmatprep.subr.mxu0 %v11888_v28  ;;  %10583 = vmatprep.subr.mxu1 %v11888_v28 }
 0x16f   : > { %10565 = vmatpush3.msra.mxu0 %v493_v41  ;;  %10566 = vmatprep.mubr.msk.f32.mxu0 %vm11889_vm3, %v11888_v28 }
 0x170   : > { %10584 = vmatpush3.msra.mxu1 %v9552_v42  ;;  %10585 = vmatprep.mubr.msk.f32.mxu1 %vm11889_vm3, %v11888_v28 }
 0x171   : > { %10567 = vmatmul.mubr.msk.f32.vlgmr.msra.gmra.mxu0 %vm501_vm2, %v12146_v0  ;;  %10586 = vmatmul.mubr.msk.f32.vlgmr.msra.gmra.mxu1 %vm501_vm2, %v12146_v0 }
 0x231   : > { %v571_v43 = vpop.f32.mrf.mxu0  ;;  %v650_v44 = vpop.f32.mrf.mxu1 }
 0x232   : > { %v654_v45 = vmul.f32 %v571_v43, %v571_v43  ;;  %v655_v46 = vmul.f32 %v650_v44, %v650_v44 }
 0x233   : > { %v10568_v47 = vpop.f32.mrf.mxu0  ;;  %v10587_v48 = vpop.f32.mrf.mxu1 }
 0x234   : > { %v656_v49 = vadd.f32 %v655_v46, %v654_v45 }
 0x236   : > { %11602 = vrsqrt.f32 %v656_v49  ;;  %vm659_vm4 = vcmp.eq.f32.partialorder %v656_v49, inf  ;;  %v662_v52 = vand.u32 2147483648, %v656_v49  ;;  %vm661_vm6 = vcmp.eq.f32.partialorder %v656_v49, 0.0 }
 0x243   : > { %v11603_v50 = vpop.eup %11602 }
 0x244   : > { %v658_v51 = vmul.f32 %v11603_v50, %v656_v49 }
 0x246   : > { %v660_v53 = vsel %vm659_vm4, %v656_v49, %v658_v51 }
 0x247   : > { %v12196_v54 = vsel %vm661_vm6, %v662_v52, %v660_v53 }
 0x248   : > { %724 = vrot.lane.b32.xlu1 %v12196_v54, %s11890_s28  ;;  %702 = vrot.lane.b32.xlu0 %v12196_v54, %s11891_s30  ;;  %665 = vst.msk [vmem:[#allocation2] sm:$0x1] %vm664_vm5, %v12196_v54 }
 0x24c   : > { %735 = vrot.lane.b32.xlu1 %v12196_v54, %s11892_s15  ;;  %713 = vrot.lane.b32.xlu0 %v12196_v54, %s11893_s23 }
 0x250   : > { %757 = vrot.lane.b32.xlu1 %v12196_v54, %s11894_s10  ;;  %746 = vrot.lane.b32.xlu0 %v12196_v54, %s11895_s12 }
 0x254   : > { %667 = vrot.lane.b32.xlu1 %v12196_v54, %s11896_s20  ;;  %768 = vrot.lane.b32.xlu0 %v12196_v54, %s11897_s9 }
 0x258   : > { %677 = vrot.lane.b32.xlu1 %v12196_v54, %s11898_s25  ;;  %672 = vrot.lane.b32.xlu0 %v12196_v54, %s11899_s29 }
 0x25c   : > { %687 = vrot.lane.b32.xlu1 %v12196_v54, %s11900_s18  ;;  %682 = vrot.lane.b32.xlu0 %v12196_v54, %s11901_s7 }
 0x260   : > { %697 = vrot.lane.b32.xlu1 %v12196_v54, %s11902_s24  ;;  %692 = vrot.lane.b32.xlu0 %v12196_v54, %s11903_s6 }
 0x2ba   : > { %v725_v55 = vpop.permute.xlu1 %724  ;;  %v12214_v56 = vpop.permute.xlu0 %702 }
 0x2bb   : > { %727 = vst.msk [vmem:[#allocation2 + $0x3] sm:$0x1] %vm664_vm5, %v725_v55  ;;  %705 = vst.msk [vmem:[#allocation2 + $0x1] sm:$0x1] %vm664_vm5, %v12214_v56 }
 0x2bc   : > { %706 = vst.msk [vmem:[#allocation2] sm:$0x2] %vm670_vm7, %v12196_v54 }
 0x2be   : > { %v736_v57 = vpop.permute.xlu1 %735  ;;  %v714_v58 = vpop.permute.xlu0 %713 }
 0x2bf   : > { %738 = vst.msk [vmem:[#allocation2 + $0x4] sm:$0x1] %vm664_vm5, %v736_v57  ;;  %716 = vst.msk [vmem:[#allocation2 + $0x2] sm:$0x1] %vm664_vm5, %v714_v58 }
 0x2c0   : > { %728 = vst.msk [vmem:[#allocation2 + $0x2] sm:$0x2] %vm670_vm7, %v714_v58  ;;  %739 = vst.msk [vmem:[#allocation2 + $0x3] sm:$0x2] %vm670_vm7, %v725_v55 }
 0x2c1   : > { %717 = vst.msk [vmem:[#allocation2 + $0x1] sm:$0x2] %vm670_vm7, %v12214_v56 }
 0x2c2   : > { %729 = vst.msk [vmem:[#allocation2 + $0x1] sm:$0x4] %vm675_vm8, %v12214_v56  ;;  %740 = vst.msk [vmem:[#allocation2 + $0x2] sm:$0x4] %vm675_vm8, %v714_v58  ;;  %v758_v59 = vpop.permute.xlu1 %757  ;;  %v747_v60 = vpop.permute.xlu0 %746 }
 0x2c3   : > { %718 = vst.msk [vmem:[#allocation2] sm:$0x4] %vm675_vm8, %v12196_v54 }
 0x2c4   : > { %730 = vst.msk [vmem:[#allocation2] sm:$0x8] %vm680_vm9, %v12196_v54  ;;  %741 = vst.msk [vmem:[#allocation2 + $0x1] sm:$0x8] %vm680_vm9, %v12214_v56 }
 0x2c5   : > { %760 = vst.msk [vmem:[#allocation2 + $0x6] sm:$0x1] %vm664_vm5, %v758_v59  ;;  %749 = vst.msk [vmem:[#allocation2 + $0x5] sm:$0x1] %vm664_vm5, %v747_v60 }
 0x2c6   : > { %742 = vst.msk [vmem:[#allocation2] sm:$0x10] %vm685_vm10, %v12196_v54  ;;  %v668_v61 = vpop.permute.xlu1 %667  ;;  %v769_v62 = vpop.permute.xlu0 %768 }
 0x2c7   : > { %750 = vst.msk [vmem:[#allocation2 + $0x4] sm:$0x2] %vm670_vm7, %v736_v57  ;;  %761 = vst.msk [vmem:[#allocation2 + $0x5] sm:$0x2] %vm670_vm7, %v747_v60 }
 0x2c8   : > { %751 = vst.msk [vmem:[#allocation2 + $0x3] sm:$0x4] %vm675_vm8, %v725_v55  ;;  %762 = vst.msk [vmem:[#allocation2 + $0x4] sm:$0x4] %vm675_vm8, %v736_v57 }
 0x2c9   : > { %752 = vst.msk [vmem:[#allocation2 + $0x2] sm:$0x8] %vm680_vm9, %v714_v58  ;;  %763 = vst.msk [vmem:[#allocation2 + $0x3] sm:$0x8] %vm680_vm9, %v725_v55 }
 0x2ca   : > { %753 = vst.msk [vmem:[#allocation2 + $0x1] sm:$0x10] %vm685_vm10, %v12214_v56  ;;  %764 = vst.msk [vmem:[#allocation2 + $0x2] sm:$0x10] %vm685_vm10, %v714_v58  ;;  %v678_v63 = vpop.permute.xlu1 %677  ;;  %v673_v0 = vpop.permute.xlu0 %672 }
 0x2cb   : > { %671 = vst.msk [vmem:[#allocation2 - $0x1] sm:$0x2] %vm670_vm7, %v668_v61 }
 0x2cc   : > { %707 = vst.msk [vmem:[#allocation2 - $0x1] sm:$0x4] %vm675_vm8, %v668_v61  ;;  %676 = vst.msk [vmem:[#allocation2 - $0x2] sm:$0x4] %vm675_vm8, %v673_v0 }
 0x2cd   : > { %719 = vst.msk [vmem:[#allocation2 - $0x1] sm:$0x8] %vm680_vm9, %v668_v61  ;;  %708 = vst.msk [vmem:[#allocation2 - $0x2] sm:$0x8] %vm680_vm9, %v673_v0 }
 0x2ce   : > { %731 = vst.msk [vmem:[#allocation2 - $0x1] sm:$0x10] %vm685_vm10, %v668_v61  ;;  %720 = vst.msk [vmem:[#allocation2 - $0x2] sm:$0x10] %vm685_vm10, %v673_v0  ;;  %v688_v1 = vpop.permute.xlu1 %687  ;;  %v683_v2 = vpop.permute.xlu0 %682 }
 0x2cf   : > { %743 = vst.msk [vmem:[#allocation2 - $0x1] sm:$0x20] %vm690_vm11, %v668_v61  ;;  %754 = vst.msk [vmem:[#allocation2] sm:$0x20] %vm690_vm11, %v12196_v54 }
 0x2d0   : > { %771 = vst.msk [vmem:[#allocation2 + $0x7] sm:$0x1] %vm664_vm5, %v769_v62 }
 0x2d1   : > { %765 = vst.msk [vmem:[#allocation2 + $0x1] sm:$0x20] %vm690_vm11, %v12214_v56  ;;  %732 = vst.msk [vmem:[#allocation2 - $0x2] sm:$0x20] %vm690_vm11, %v673_v0 }
 0x2d2   : > { %772 = vst.msk [vmem:[#allocation2 + $0x6] sm:$0x2] %vm670_vm7, %v758_v59  ;;  %v698_v3 = vpop.permute.xlu1 %697  ;;  %v693_v4 = vpop.permute.xlu0 %692 }
 0x2d3   : > { %766 = vst.msk [vmem:[#allocation2] sm:$0x40] %vm695_vm12, %v12196_v54  ;;  %755 = vst.msk [vmem:[#allocation2 - $0x1] sm:$0x40] %vm695_vm12, %v668_v61 }
 0x2d4   : > { %773 = vst.msk [vmem:[#allocation2 + $0x5] sm:$0x4] %vm675_vm8, %v747_v60 }
 0x2d5   : > { %767 = vst.msk [vmem:[#allocation2 - $0x1] sm:$0x80] %vm700_vm13, %v668_v61  ;;  %756 = vst.msk [vmem:[#allocation2 - $0x2] sm:$0x80] %vm700_vm13, %v673_v0 }
 0x2d6   : > { %774 = vst.msk [vmem:[#allocation2 + $0x4] sm:$0x8] %vm680_vm9, %v736_v57  ;;  %681 = vst.msk [vmem:[#allocation2 - $0x3] sm:$0x8] %vm680_vm9, %v678_v63 }
 0x2d7   : > { %775 = vst.msk [vmem:[#allocation2 + $0x3] sm:$0x10] %vm685_vm10, %v725_v55  ;;  %709 = vst.msk [vmem:[#allocation2 - $0x3] sm:$0x10] %vm685_vm10, %v678_v63 }
 0x2d8   : > { %744 = vst.msk [vmem:[#allocation2 - $0x2] sm:$0x40] %vm695_vm12, %v673_v0  ;;  %733 = vst.msk [vmem:[#allocation2 - $0x3] sm:$0x40] %vm695_vm12, %v678_v63 }
 0x2d9   : > { %776 = vst.msk [vmem:[#allocation2 + $0x2] sm:$0x20] %vm690_vm11, %v714_v58  ;;  %721 = vst.msk [vmem:[#allocation2 - $0x3] sm:$0x20] %vm690_vm11, %v678_v63 }
 0x2da   : > { %745 = vst.msk [vmem:[#allocation2 - $0x3] sm:$0x80] %vm700_vm13, %v678_v63  ;;  %734 = vst.msk [vmem:[#allocation2 - $0x4] sm:$0x80] %vm700_vm13, %v683_v2 }
 0x2db   : > { %777 = vst.msk [vmem:[#allocation2 + $0x1] sm:$0x40] %vm695_vm12, %v12214_v56  ;;  %722 = vst.msk [vmem:[#allocation2 - $0x4] sm:$0x40] %vm695_vm12, %v683_v2 }
 0x2dc   : > { %778 = vst.msk [vmem:[#allocation2] sm:$0x80] %vm700_vm13, %v12196_v54  ;;  %723 = vst.msk [vmem:[#allocation2 - $0x5] sm:$0x80] %vm700_vm13, %v688_v1 }
 0x2dd   : > { %686 = vst.msk [vmem:[#allocation2 - $0x4] sm:$0x10] %vm685_vm10, %v683_v2 }
 0x2de   : > { %710 = vst.msk [vmem:[#allocation2 - $0x4] sm:$0x20] %vm690_vm11, %v683_v2  ;;  %691 = vst.msk [vmem:[#allocation2 - $0x5] sm:$0x20] %vm690_vm11, %v688_v1 }
 0x2df   : > { %711 = vst.msk [vmem:[#allocation2 - $0x5] sm:$0x40] %vm695_vm12, %v688_v1  ;;  %696 = vst.msk [vmem:[#allocation2 - $0x6] sm:$0x40] %vm695_vm12, %v693_v4 }
 0x2e0   : > { %712 = vst.msk [vmem:[#allocation2 - $0x6] sm:$0x80] %vm700_vm13, %v693_v4  ;;  %701 = vst.msk [vmem:[#allocation2 - $0x7] sm:$0x80] %vm700_vm13, %v698_v3 }
 0x2e7   : > { %v779_v5 = vld [vmem:[#allocation2] sm:$0xff] }
 0x2e8   : > { %780 = vst.msk [vmem:[#allocation3] sm:$0xff] %vm501_vm2, %v779_v5 }
 0x2e9 PF: > { %v9579_v6 = vld [vmem:[%s12131_s8 + $0xf8] sm:$0xff]  ;;  %v11904_v8 = vmov 0.0   ;;  %v9578_v9 = vld [vmem:[%s12131_s8 + $0xf0] sm:$0xff]  ;;  %v9577_v11 = vld [vmem:[%s12131_s8 + $0xe8] sm:$0xff]  ;;  %vm800_vm14 = vcmask 523264   ;;  %vm11905_vm15 = vmmov 0  }
 0x2ea   : > { %v9568_v7 = vld [vmem:[%s12131_s8 + $0xb8] sm:$0xff]  ;;  %10607 = vmatprep.subr.mxu1 %v11904_v8  ;;  %10588 = vmatprep.subr.mxu0 %v11904_v8  ;;  %v9567_v10 = vld [vmem:[%s12131_s8 + $0xb0] sm:$0xff]  ;;  %v9566_v12 = vld [vmem:[%s12131_s8 + $0xa8] sm:$0xff]  ;;  %vm1057_vm0 = vcmask 130048   ;;  %s11906_s13 = smov 112   ;;  %vm1135_vm1 = vcmask 64512  }
 0x2eb   : > { %10608 = vmatpush3.msra.mxu1 %v9579_v6  ;;  %10589 = vmatpush3.msra.mxu0 %v9568_v7  ;;  %v9576_v13 = vld [vmem:[%s12131_s8 + $0xe0] sm:$0xff]  ;;  %v9575_v15 = vld [vmem:[%s12131_s8 + $0xd8] sm:$0xff]  ;;  %v9574_v17 = vld [vmem:[%s12131_s8 + $0xd0] sm:$0xff]  ;;  %s11907_s11 = smov 96   ;;  %s11908_s26 = smov 80  }
 0x2ec   : > { %10609 = vmatprep.subr.mxu1 %v11904_v8  ;;  %10590 = vmatprep.subr.mxu0 %v11904_v8  ;;  %v9565_v14 = vld [vmem:[%s12131_s8 + $0xa0] sm:$0xff]  ;;  %v9564_v16 = vld [vmem:[%s12131_s8 + $0x98] sm:$0xff]  ;;  %v9563_v18 = vld [vmem:[%s12131_s8 + $0x90] sm:$0xff] }
 0x2ed   : > { %10610 = vmatpush3.msra.mxu1 %v9578_v9  ;;  %10591 = vmatpush3.msra.mxu0 %v9567_v10  ;;  %v9573_v19 = vld [vmem:[%s12131_s8 + $0xc8] sm:$0xff]  ;;  %v9572_v21 = vld [vmem:[%s12131_s8 + $0xc0] sm:$0xff]  ;;  %v9590_v32 = vld [vmem:[%s12131_s8 + $0x138] sm:$0xff] }
 0x2ee   : > { %10611 = vmatprep.subr.mxu1 %v11904_v8  ;;  %10592 = vmatprep.subr.mxu0 %v11904_v8  ;;  %v9562_v20 = vld [vmem:[%s12131_s8 + $0x88] sm:$0xff]  ;;  %v9561_v22 = vld [vmem:[%s12131_s8 + $0x80] sm:$0xff]  ;;  %v9589_v33 = vld [vmem:[%s12131_s8 + $0x130] sm:$0xff] }
 0x2ef   : > { %10612 = vmatpush3.msra.mxu1 %v9577_v11  ;;  %10593 = vmatpush3.msra.mxu0 %v9566_v12  ;;  %v12326_v23 = vld [vmem:[#allocation2] sm:$0xff]  ;;  %v9581_v24 = vld [vmem:[%s12133_s5 + $0x3] ss:$0 sm:$0xff]  ;;  %v9570_v25 = vld [vmem:[%s12133_s5 + $0x2] ss:$0 sm:$0xff] }
 0x2f0   : > { %10613 = vmatprep.subr.mxu1 %v11904_v8  ;;  %10594 = vmatprep.subr.mxu0 %v11904_v8  ;;  %v9588_v34 = vld [vmem:[%s12131_s8 + $0x128] sm:$0xff]  ;;  %v9587_v35 = vld [vmem:[%s12131_s8 + $0x120] sm:$0xff]  ;;  %v9586_v36 = vld [vmem:[%s12131_s8 + $0x118] sm:$0xff] }
 0x2f1   : > { %10614 = vmatpush3.msra.mxu1 %v9576_v13  ;;  %10595 = vmatpush3.msra.mxu0 %v9565_v14  ;;  %v9585_v37 = vld [vmem:[%s12131_s8 + $0x110] sm:$0xff]  ;;  %v9584_v38 = vld [vmem:[%s12131_s8 + $0x108] sm:$0xff]  ;;  %v9583_v39 = vld [vmem:[%s12131_s8 + $0x100] sm:$0xff] }
 0x2f2   : > { %10615 = vmatprep.subr.mxu1 %v11904_v8  ;;  %10596 = vmatprep.subr.mxu0 %v11904_v8  ;;  %v9592_v49 = vld [vmem:[%s12133_s5 + $0x4] ss:$0 sm:$0xff]  ;;  %v9596_v11 = vld [vmem:[%s12131_s8 + $0x150] sm:$0xff]  ;;  %v9595_v12 = vld [vmem:[%s12131_s8 + $0x148] sm:$0xff] }
 0x2f3   : > { %10616 = vmatpush3.msra.mxu1 %v9575_v15  ;;  %10597 = vmatpush3.msra.mxu0 %v9564_v16  ;;  %v9597_v10 = vld [vmem:[%s12131_s8 + $0x158] sm:$0xff]  ;;  %v9594_v14 = vld [vmem:[%s12131_s8 + $0x140] sm:$0xff] }
 0x2f4   : > { %10617 = vmatprep.subr.mxu1 %v11904_v8  ;;  %10598 = vmatprep.subr.mxu0 %v11904_v8 }
 0x2f5   : > { %10618 = vmatpush3.msra.mxu1 %v9574_v17  ;;  %10599 = vmatpush3.msra.mxu0 %v9563_v18 }
 0x2f6   : > { %10619 = vmatprep.subr.mxu1 %v11904_v8  ;;  %10600 = vmatprep.subr.mxu0 %v11904_v8 }
 0x2f7   : > { %10620 = vmatpush3.msra.mxu1 %v9573_v19  ;;  %10601 = vmatpush3.msra.mxu0 %v9562_v20 }
 0x2f8   : > { %10621 = vmatprep.subr.mxu1 %v11904_v8  ;;  %10602 = vmatprep.subr.mxu0 %v11904_v8 }
 0x2f9   : > { %10622 = vmatpush3.msra.mxu1 %v9572_v21  ;;  %10623 = vmatprep.mubr.msk.f32.mxu1 %vm11905_vm15, %v11904_v8 }
 0x2fa   : > { %10603 = vmatpush3.msra.mxu0 %v9561_v22  ;;  %10604 = vmatprep.mubr.msk.f32.mxu0 %vm11905_vm15, %v11904_v8 }
 0x2fb   : > { %10624 = vmatmul.mubr.msk.f32.vlgmr.msra.gmra.mxu1 %vm800_vm14, %v12326_v23  ;;  %10605 = vmatmul.mubr.msk.f32.vlgmr.msra.gmra.mxu0 %vm800_vm14, %v12326_v23 }
 0x2fc   : > { %10645 = vmatprep.subr.mxu1 %v11904_v8  ;;  %10647 = vmatprep.mubr.msk.f32.mxu1 %vm11905_vm15, %v11904_v8 }
 0x2fd   : > { %10626 = vmatprep.subr.mxu0 %v11904_v8  ;;  %10642 = vmatprep.mubr.msk.f32.mxu0 %vm11905_vm15, %v11904_v8 }
 0x2fe   : > { %10627 = vmatpush3.msra.mxu0 %v9590_v32 }
 0x2ff   : > { %10628 = vmatprep.subr.mxu0 %v11904_v8 }
 0x300   : > { %10629 = vmatpush3.msra.mxu0 %v9589_v33 }
 0x301   : > { %10630 = vmatprep.subr.mxu0 %v11904_v8 }
 0x302   : > { %10631 = vmatpush3.msra.mxu0 %v9588_v34 }
 0x303   : > { %10632 = vmatprep.subr.mxu0 %v11904_v8 }
 0x304   : > { %10633 = vmatpush3.msra.mxu0 %v9587_v35  ;;  %v9599_v35 = vld [vmem:[%s12131_s8 + $0x168] sm:$0xff] }
 0x305   : > { %10634 = vmatprep.subr.mxu0 %v11904_v8 }
 0x306   : > { %10635 = vmatpush3.msra.mxu0 %v9586_v36 }
 0x307   : > { %10636 = vmatprep.subr.mxu0 %v11904_v8 }
 0x308   : > { %10637 = vmatpush3.msra.mxu0 %v9585_v37 }
 0x309   : > { %10638 = vmatprep.subr.mxu0 %v11904_v8 }
 0x30a   : > { %10639 = vmatpush3.msra.mxu0 %v9584_v38 }
 0x30b   : > { %10640 = vmatprep.subr.mxu0 %v11904_v8 }
 0x30c   : > { %10641 = vmatpush3.msra.mxu0 %v9583_v39 }
 0x30d   : > { %10643 = vmatmul.mubr.msk.f32.vlgmr.msra.gmra.mxu0 %vm800_vm14, %v12326_v23  ;;  %10689 = vmatprep.subr.mxu0 %v11904_v8 }
 0x30e   : > { %10693 = vmatprep.mubr.msk.f32.mxu0 %vm11905_vm15, %v11904_v8  ;;  %10690 = vmatpush3.msra.mxu0 %v9599_v35  ;;  %v9637_v35 = vld [vmem:[%s12131_s8 + $0x1d0] sm:$0xff] }
 0x30f   : > { %10691 = vmatprep.subr.mxu0 %v11904_v8 }
 0x3bb   : > { %v957_v26 = vpop.f32.mrf.mxu1  ;;  %v870_v27 = vpop.f32.mrf.mxu0 }
 0x3bc   : > { %v12344_v28 = vadd.f32 %v9581_v24, %v957_v26  ;;  %v12346_v29 = vadd.f32 %v9570_v25, %v870_v27 }
 0x3bd   : > { %v10625_v30 = vpop.f32.mrf.mxu1  ;;  %v10606_v31 = vpop.f32.mrf.mxu0 }
 0x3be   : > { %1222 = vrot.lane.b32.xlu1 %v12344_v28, %s11906_s13  ;;  %10646 = vmatpush3.xpose.msk.msra.mxu1 %vm1057_vm0, %v12344_v28 }
 0x3bf   : > { %10650 = vmatprep.subr.mxu1 %v11904_v8 }
 0x3c1   : > { %10648 = vmatmul.mubr.msk.f32.vlgmr.msra.gmra.mxu1 %vm1057_vm0, %v12346_v29 }
 0x3c2   : > { %1220 = vrot.lane.b32.xlu1 %v12346_v29, %s11906_s13  ;;  %10652 = vmatprep.mubr.msk.f32.mxu1 %vm11905_vm15, %v11904_v8 }
 0x3cd   : > { %v1044_v50 = vpop.f32.mrf.mxu0 }
 0x3ce   : > { %v12382_v51 = vadd.f32 %v9592_v49, %v1044_v50 }
 0x3cf   : > { %v10644_v52 = vpop.f32.mrf.mxu0 }
 0x3d0   : > { %10651 = vmatpush3.msra.mxu1 %v12382_v51 }
 0x3d1   : > { %10655 = vmatprep.subr.mxu1 %v11904_v8 }
 0x430   : > { %v1223_v55 = vpop.permute.xlu1 %1222 }
 0x434   : > { %v1221_v57 = vpop.permute.xlu1 %1220 }
 0x481   : > { %v1130_v40 = vpop.f32.mrf.mxu1 }
 0x482   : > { %v1134_v41 = vmul.f32 0.25, %v1130_v40  ;;  %v9598_v40 = vld [vmem:[%s12131_s8 + $0x160] sm:$0xff] }
 0x483   : > { %v10649_v42 = vpop.f32.mrf.mxu1  ;;  %10692 = vmatpush3.msra.mxu0 %v9598_v40 }
 0x484   : > { %v1136_v43 = vsel %vm1135_vm1, %v1134_v41, -inf  ;;  %10701 = vmatprep.subr.mxu0 %v11904_v8 }
 0x485   : > { %1137 = vmax.xlane.f32.xlu0 %v1136_v43 }
 0x50e   : > { %v1138_v44 = vpop.xlane.xlu0 %1137 }
 0x50f   : > { %v1139_v45 = vsub.f32 %v1134_v41, %v1138_v44 }
 0x511   : > { %v1140_v46 = vmul.f32 1.442695, %v1139_v45 }
 0x513   : > { %11604 = vpow2.f32 %v1140_v46 }
 0x520   : > { %v11605_v47 = vpop.eup %11604 }
 0x521   : > { %v1142_v48 = vsel %vm1135_vm1, %v11605_v47, 0.0 }
 0x522   : > { %1143 = vadd.xlane.f32.xlu0 %v1142_v48 }
 0x5ab   : > { %v1144_v53 = vpop.xlane.xlu0 %1143 }
 0x5ac   : > { %11606 = vrcp.f32 %v1144_v53 }
 0x5b9   : > { %v11607_v54 = vpop.eup %11606 }
 0x5ba   : > { %v1146_v56 = vmul.f32 %v11607_v54, %v11605_v47  ;;  %v9601_v54 = vld [vmem:[%s12131_s8 + $0x178] sm:$0xff] }
 0x5bc   : > { %10653 = vmatmul.mubr.msk.f32.vlgmr.msra.gmra.mxu1 %vm1135_vm1, %v1146_v56 }
 0x5bd   : > { %10656 = vmatpush3.xpose.msk.msra.mxu1 %vm1057_vm0, %v1223_v55  ;;  %10657 = vmatprep.mubr.msk.f32.mxu1 %vm11905_vm15, %v11904_v8 }
 0x5be   : > { %10660 = vmatprep.subr.mxu1 %v11904_v8 }
 0x5c0   : > { %10658 = vmatmul.mubr.msk.f32.vlgmr.msra.gmra.mxu1 %vm1057_vm0, %v1221_v57 }
 0x5c1   : > { %10662 = vmatprep.mubr.msk.f32.mxu1 %vm11905_vm15, %v11904_v8 }
 0x67c   : > { %v1216_v58 = vpop.f32.mrf.mxu1 }
 0x67e   : > { %v10654_v59 = vpop.f32.mrf.mxu1 }
 0x680   : > { %v1294_v60 = vpop.f32.mrf.mxu1 }
 0x681   : > { %v1298_v61 = vmul.f32 0.25, %v1294_v60  ;;  %v9600_v60 = vld [vmem:[%s12131_s8 + $0x170] sm:$0xff] }
 0x682   : > { %v10659_v62 = vpop.f32.mrf.mxu1 }
 0x683   : > { %v1299_v63 = vsel %vm1135_vm1, %v1298_v61, -inf }
 0x684   : > { %1300 = vmax.xlane.f32.xlu0 %v1299_v63 }
 0x69a   : > { %1311 = vrot.lane.b32.xlu0 %v12382_v51, %s11906_s13 }
 0x69e   : > { %1535 = vrot.lane.b32.xlu0 %v12344_v28, %s11907_s11 }
 0x6a2   : > { %1533 = vrot.lane.b32.xlu0 %v12346_v29, %s11907_s11 }
 0x70d   : > { %v1301_v0 = vpop.xlane.xlu0 %1300 }
 0x70e   : > { %v1302_v1 = vsub.f32 %v1298_v61, %v1301_v0  ;;  %v9619_v0 = vld [vmem:[%s12133_s5 + $0x5] ss:$0 sm:$0xff] }
 0x710   : > { %v1303_v2 = vmul.f32 1.442695, %v1302_v1 }
 0x711   : > { %v1312_v3 = vpop.permute.xlu0 %1311 }
 0x712   : > { %11608 = vpow2.f32 %v1303_v2  ;;  %10661 = vmatpush3.msra.mxu1 %v1312_v3 }
 0x713   : > { %10665 = vmatprep.subr.mxu1 %v11904_v8 }
 0x715   : > { %v1536_v15 = vpop.permute.xlu0 %1535 }
 0x719   : > { %v1534_v17 = vpop.permute.xlu0 %1533 }
 0x71f   : > { %v11609_v4 = vpop.eup %11608 }
 0x720   : > { %v1305_v5 = vsel %vm1135_vm1, %v11609_v4, 0.0 }
 0x721   : > { %1306 = vadd.xlane.f32.xlu1 %v1305_v5 }
 0x732   : > { %1623 = vrot.lane.b32.xlu1 %v12382_v51, %s11907_s11 }
 0x736   : > { %1775 = vrot.lane.b32.xlu1 %v12344_v28, %s11908_s26 }
 0x7aa   : > { %v1307_v6 = vpop.xlane.xlu1 %1306 }
 0x7ab   : > { %11610 = vrcp.f32 %v1307_v6 }
 0x7ae   : > { %v1624_v18 = vpop.permute.xlu1 %1623 }
 0x7b2   : > { %v1776_v36 = vpop.permute.xlu1 %1775 }
 0x7b8   : > { %v11611_v7 = vpop.eup %11610 }
 0x7b9   : > { %v1309_v9 = vmul.f32 %v11611_v7, %v11609_v4 }
 0x7bb   : > { %10663 = vmatmul.mubr.msk.f32.vlgmr.msra.gmra.mxu1 %vm1135_vm1, %v1309_v9 }
 0x7bc   : > { %10666 = vmatpush3.msra.mxu1 %v9597_v10  ;;  %10669 = vmatprep.mubr.msk.f32.mxu1 %vm11905_vm15, %v11904_v8 }
 0x7bd   : > { %10667 = vmatprep.subr.mxu1 %v11904_v8 }
 0x7be   : > { %10668 = vmatpush3.msra.mxu1 %v9596_v11 }
 0x7bf   : > { %10672 = vmatprep.subr.mxu1 %v11904_v8 }
 0x87b   : > { %v1383_v13 = vpop.f32.mrf.mxu1 }
 0x87c   : > { %10670 = vmatmul.mubr.msk.f32.vlgmr.msra.gmra.mxu1 %vm1057_vm0, %v1383_v13  ;;  %v9630_v13 = vld [vmem:[%s12131_s8 + $0x1b0] sm:$0xff] }
 0x87d   : > { %10673 = vmatpush3.msra.mxu1 %v9595_v12  ;;  %v10664_v16 = vpop.f32.mrf.mxu1  ;;  %10676 = vmatprep.mubr.msk.f32.mxu1 %vm11905_vm15, %v11904_v8  ;;  %v9631_v12 = vld [vmem:[%s12131_s8 + $0x1b8] sm:$0xff] }
 0x87e   : > { %10674 = vmatprep.subr.mxu1 %v11904_v8  ;;  %v9626_v16 = vld [vmem:[%s12131_s8 + $0x190] sm:$0xff] }
 0x87f   : > { %10675 = vmatpush3.msra.mxu1 %v9594_v14  ;;  %v9628_v14 = vld [vmem:[%s12131_s8 + $0x1a0] sm:$0xff] }
 0x880   : > { %10679 = vmatprep.subr.mxu1 %v11904_v8  ;;  %10677 = vmatmul.mubr.msk.f32.vlgmr.msra.gmra.mxu1 %vm1057_vm0, %v1216_v58 }
 0x881   : > { %10680 = vmatpush3.xpose.msk.msra.mxu1 %vm1057_vm0, %v1536_v15  ;;  %10681 = vmatprep.mubr.msk.f32.mxu1 %vm11905_vm15, %v11904_v8  ;;  %v9627_v15 = vld [vmem:[%s12131_s8 + $0x198] sm:$0xff] }
 0x882   : > { %10684 = vmatprep.subr.mxu1 %v11904_v8 }
 0x884   : > { %10682 = vmatmul.mubr.msk.f32.vlgmr.msra.gmra.mxu1 %vm1057_vm0, %v1534_v17  ;;  %v9625_v17 = vld [vmem:[%s12131_s8 + $0x188] sm:$0xff] }
 0x885   : > { %10685 = vmatpush3.msra.mxu1 %v1624_v18  ;;  %10686 = vmatprep.mubr.msk.f32.mxu1 %vm11905_vm15, %v11904_v8  ;;  %v9624_v18 = vld [vmem:[%s12131_s8 + $0x180] sm:$0xff] }
 0x886   : > { %10696 = vmatprep.subr.mxu1 %v11904_v8 }
 0x93c   : > { %v1456_v19 = vpop.f32.mrf.mxu1 }
 0x93e   : > { %v10671_v20 = vpop.f32.mrf.mxu1 }
 0x93f   : > { %v9641_v20 = vld [vmem:[%s12131_s8 + $0x1f0] sm:$0xff] }
 0x940   : > { %v1529_v21 = vpop.f32.mrf.mxu1 }
 0x941   : > { %v1530_v22 = vadd.f32 %v1529_v21, %v1456_v19  ;;  %v9642_v19 = vld [vmem:[%s12131_s8 + $0x1f8] sm:$0xff]  ;;  %v9640_v21 = vld [vmem:[%s12131_s8 + $0x1e8] sm:$0xff] }
 0x942   : > { %v10678_v24 = vpop.f32.mrf.mxu1 }
 0x943   : > { %v9638_v24 = vld [vmem:[%s12131_s8 + $0x1d8] sm:$0xff] }
 0x944   : > { %v1607_v25 = vpop.f32.mrf.mxu1 }
 0x945   : > { %v1611_v26 = vmul.f32 0.25, %v1607_v25 }
 0x946   : > { %v10683_v27 = vpop.f32.mrf.mxu1 }
 0x947   : > { %v1612_v28 = vsel %vm1135_vm1, %v1611_v26, -inf }
 0x948   : > { %1613 = vmax.xlane.f32.xlu0 %v1612_v28 }
 0x9d1   : > { %v1614_v30 = vpop.xlane.xlu0 %1613 }
 0x9d2   : > { %v1615_v31 = vsub.f32 %v1611_v26, %v1614_v30  ;;  %v9622_v30 = vld [vmem:[%s12133_s5 + $0x8] ss:$0 sm:$0xff] }
 0x9d4   : > { %v1616_v32 = vmul.f32 1.442695, %v1615_v31 }
 0x9d6   : > { %11612 = vpow2.f32 %v1616_v32  ;;  %v9623_v32 = vld [vmem:[%s12133_s5 + $0x9] ss:$0 sm:$0xff] }
 0x9e3   : > { %v11613_v33 = vpop.eup %11612 }
 0x9e4   : > { %v1618_v34 = vsel %vm1135_vm1, %v11613_v33, 0.0 }
 0x9e5   : > { %1619 = vadd.xlane.f32.xlu1 %v1618_v34 }
 0x9f6   : > { %1773 = vrot.lane.b32.xlu1 %v12346_v29, %s11908_s26 }
 0xa6e   : > { %v1620_v37 = vpop.xlane.xlu1 %1619 }
 0xa6f   : > { %11614 = vrcp.f32 %v1620_v37  ;;  %v9635_v37 = vld [vmem:[%s12131_s8 + $0x1c0] sm:$0xff] }
 0xa72   : > { %v1774_v29 = vpop.permute.xlu1 %1773 }
 0xa7c   : > { %v11615_v38 = vpop.eup %11614 }
 0xa7d   : > { %v1622_v39 = vmul.f32 %v11615_v38, %v11613_v33  ;;  %v9633_v38 = vld [vmem:[%s12133_s5 + $0x6] ss:$0 sm:$0xff] }
 0xa7f   : > { %10687 = vmatmul.mubr.msk.f32.vlgmr.msra.gmra.mxu1 %vm1135_vm1, %v1622_v39 }
 0xa80   : > { %10697 = vmatpush3.xpose.msk.msra.mxu1 %vm1057_vm0, %v1776_v36  ;;  %10698 = vmatprep.mubr.msk.f32.mxu1 %vm11905_vm15, %v11904_v8  ;;  %v9636_v36 = vld [vmem:[%s12131_s8 + $0x1c8] sm:$0xff] }
 0xa81   : > { %10706 = vmatprep.subr.mxu1 %v11904_v8 }
 0xa83   : > { %10699 = vmatmul.mubr.msk.f32.vlgmr.msra.gmra.mxu1 %vm1057_vm0, %v1774_v29 }
 0xa84   : > { %10710 = vmatprep.mubr.msk.f32.mxu1 %vm11905_vm15, %v11904_v8  ;;  %10707 = vmatpush3.msra.mxu1 %v9601_v54  ;;  %v9657_v54 = vld [vmem:[%s12131_s8 + $0x238] sm:$0xff] }
 0xa85   : > { %10708 = vmatprep.subr.mxu1 %v11904_v8 }
 0xa86   : > { %10709 = vmatpush3.msra.mxu1 %v9600_v60  ;;  %v9665_v60 = vld [vmem:[%s12131_s8 + $0x260] sm:$0xff] }
 0xa87   : > { %10732 = vmatprep.subr.mxu1 %v11904_v8 }
 0xb3f   : > { %v1695_v41 = vpop.f32.mrf.mxu1 }
 0xb40   : > { %10694 = vmatmul.mubr.msk.f32.vlgmr.msra.gmra.mxu0 %vm1057_vm0, %v1695_v41 }
 0xb41   : > { %v10688_v42 = vpop.f32.mrf.mxu1  ;;  %10703 = vmatprep.mubr.msk.f32.mxu0 %vm11905_vm15, %v11904_v8 }
 0xb42   : > { %v9644_v42 = vld [vmem:[%s12133_s5 + $0x7] ss:$0 sm:$0xff] }
 0xb43   : > { %v1847_v43 = vpop.f32.mrf.mxu1 }
 0xb44   : > { %v1851_v44 = vmul.f32 0.25, %v1847_v43 }
 0xb45   : > { %v10700_v45 = vpop.f32.mrf.mxu1 }
 0xb46   : > { %v1852_v46 = vsel %vm1135_vm1, %v1851_v44, -inf }
 0xb47   : > { %1853 = vmax.xlane.f32.xlu0 %v1852_v46 }
 0xb5d   : > { %1863 = vrot.lane.b32.xlu0 %v12382_v51, %s11908_s26 }
 0xbd0   : > { %v1854_v47 = vpop.xlane.xlu0 %1853 }
 0xbd1   : > { %v1855_v48 = vsub.f32 %v1851_v44, %v1854_v47 }
 0xbd3   : > { %v1856_v49 = vmul.f32 1.442695, %v1855_v48 }
 0xbd4   : > { %v1864_v50 = vpop.permute.xlu0 %1863 }
 0xbd5   : > { %11616 = vpow2.f32 %v1856_v49  ;;  %10702 = vmatpush3.msra.mxu0 %v1864_v50 }
 0xbd6   : > { %10713 = vmatprep.subr.mxu0 %v11904_v8 }
 0xbe2   : > { %v11617_v52 = vpop.eup %11616 }
 0xbe3   : > { %v1858_v53 = vsel %vm1135_vm1, %v11617_v52, 0.0 }
 0xbe4   : > { %1859 = vadd.xlane.f32.xlu1 %v1858_v53 }
 0xc00   : > { %v1768_v55 = vpop.f32.mrf.mxu0 }
 0xc01   : > { %v1772_v56 = vadd.f32 %v1768_v55, %v1530_v22  ;;  %v9639_v22 = vld [vmem:[%s12131_s8 + $0x1e0] sm:$0xff]  ;;  %v9668_v55 = vld [vmem:[%s12131_s8 + $0x278] sm:$0xff] }
 0xc02   : > { %v10695_v51 = vpop.f32.mrf.mxu0 }
 0xc03   : > { %v9667_v51 = vld [vmem:[%s12131_s8 + $0x270] sm:$0xff] }
 0xc6d   : > { %v1860_v57 = vpop.xlane.xlu1 %1859 }
 0xc6e   : > { %11618 = vrcp.f32 %v1860_v57  ;;  %v9655_v57 = vld [vmem:[%s12131_s8 + $0x228] sm:$0xff] }
 0xc7b   : > { %v11619_v58 = vpop.eup %11618 }
 0xc7c   : > { %v1862_v59 = vmul.f32 %v11619_v58, %v11617_v52  ;;  %v9666_v58 = vld [vmem:[%s12131_s8 + $0x268] sm:$0xff] }
 0xc7e   : > { %10704 = vmatmul.mubr.msk.f32.vlgmr.msra.gmra.mxu0 %vm1135_vm1, %v1862_v59  ;;  %v9654_v59 = vld [vmem:[%s12131_s8 + $0x220] sm:$0xff] }
 0xc7f   : > { %10729 = vmatprep.mubr.msk.f32.mxu0 %vm11905_vm15, %v11904_v8  ;;  %10714 = vmatpush3.msra.mxu0 %v9631_v12  ;;  %v9649_v12 = vld [vmem:[%s12133_s5 + $0xb] ss:$0 sm:$0xff] }
 0xc80   : > { %10715 = vmatprep.subr.mxu0 %v11904_v8 }
 0xc81   : > { %10716 = vmatpush3.msra.mxu0 %v9630_v13 }
 0xc82   : > { %10717 = vmatprep.subr.mxu0 %v11904_v8 }
 0xd3e   : > { %v1935_v61 = vpop.f32.mrf.mxu0 }
 0xd3f   : > { %10711 = vmatmul.mubr.msk.f32.vlgmr.msra.gmra.mxu1 %vm1057_vm0, %v1935_v61  ;;  %v9653_v61 = vld [vmem:[%s12131_s8 + $0x218] sm:$0xff] }
 0xd40   : > { %v10705_v62 = vpop.f32.mrf.mxu0  ;;  %10748 = vmatprep.mubr.msk.f32.mxu1 %vm11905_vm15, %v11904_v8  ;;  %10733 = vmatpush3.msra.mxu1 %v9642_v19  ;;  %v9674_v19 = vld [vmem:[%s12131_s8 + $0x290] sm:$0xff] }
 0xd41   : > { %10734 = vmatprep.subr.mxu1 %v11904_v8  ;;  %v9664_v62 = vld [vmem:[%s12131_s8 + $0x258] sm:$0xff] }
 0xd42   : > { %10735 = vmatpush3.msra.mxu1 %v9641_v20  ;;  %v9673_v20 = vld [vmem:[%s12131_s8 + $0x288] sm:$0xff] }
 0xd43   : > { %10736 = vmatprep.subr.mxu1 %v11904_v8 }
 0xd44   : > { %10737 = vmatpush3.msra.mxu1 %v9640_v21  ;;  %v9672_v21 = vld [vmem:[%s12131_s8 + $0x280] sm:$0xff] }
 0xd45   : > { %10738 = vmatprep.subr.mxu1 %v11904_v8 }
 0xd46   : > { %10739 = vmatpush3.msra.mxu1 %v9639_v22  ;;  %v9659_v22 = vld [vmem:[%s12133_s5 + $0xc] ss:$0 sm:$0xff] }
 0xd47   : > { %10740 = vmatprep.subr.mxu1 %v11904_v8 }
 0xd48   : > { %10741 = vmatpush3.msra.mxu1 %v9638_v24  ;;  %v9670_v24 = vld [vmem:[%s12133_s5 + $0xd] ss:$0 sm:$0xff] }
 0xd49   : > { %10742 = vmatprep.subr.mxu1 %v11904_v8 }
 0xd4a   : > { %10743 = vmatpush3.msra.mxu1 %v9637_v35 }
 0xd4b   : > { %10744 = vmatprep.subr.mxu1 %v11904_v8 }
 0xd4c   : > { %10745 = vmatpush3.msra.mxu1 %v9636_v36 }
 0xd4d   : > { %10746 = vmatprep.subr.mxu1 %v11904_v8 }
 0xd4e   : > { %10747 = vmatpush3.msra.mxu1 %v9635_v37 }
 0xd4f   : > { %10770 = vmatprep.subr.mxu1 %v11904_v8 }
 0xdff   : > { %v2008_v63 = vpop.f32.mrf.mxu1 }
 0xe00   : > { %v2012_v1 = vadd.f32 %v2008_v63, %v1772_v56  ;;  %v9656_v56 = vld [vmem:[%s12131_s8 + $0x230] sm:$0xff] }
 0xe01   : > { %v10712_v2 = vpop.f32.mrf.mxu1  ;;  %v9652_v63 = vld [vmem:[%s12131_s8 + $0x210] sm:$0xff] }
 0xe02   : > { %v2021_v3 = vadd.f32 %v9619_v0, %v2012_v1  ;;  %v9663_v0 = vld [vmem:[%s12131_s8 + $0x250] sm:$0xff]  ;;  %v9651_v1 = vld [vmem:[%s12131_s8 + $0x208] sm:$0xff] }
 0xe03   : > { %v9662_v2 = vld [vmem:[%s12131_s8 + $0x248] sm:$0xff] }
 0xe04   : > { %v2022_v4 = vadd.f32 %v2021_v3, %v12326_v23  ;;  %v9629_v23 = vld [vmem:[%s12131_s8 + $0x1a8] sm:$0xff]  ;;  %v9650_v3 = vld [vmem:[%s12131_s8 + $0x200] sm:$0xff] }
 0xe05   : > { %10718 = vmatpush3.msra.mxu0 %v9629_v23 }
 0xe06   : > { %v2027_v5 = vsel %vm800_vm14, %v2022_v4, 0.0  ;;  %10719 = vmatprep.subr.mxu0 %v11904_v8 }
 0xe07   : > { %2028 = vadd.xlane.f32.xlu0 %v2027_v5  ;;  %10720 = vmatpush3.msra.mxu0 %v9628_v14  ;;  %v9679_v14 = vld [vmem:[%s12131_s8 + $0x2b8] sm:$0xff] }
 0xe08   : > { %10721 = vmatprep.subr.mxu0 %v11904_v8 }
 0xe09   : > { %10722 = vmatpush3.msra.mxu0 %v9627_v15  ;;  %v9678_v15 = vld [vmem:[%s12131_s8 + $0x2b0] sm:$0xff] }
 0xe0a   : > { %10723 = vmatprep.subr.mxu0 %v11904_v8 }
 0xe0b   : > { %10724 = vmatpush3.msra.mxu0 %v9626_v16  ;;  %v9677_v16 = vld [vmem:[%s12131_s8 + $0x2a8] sm:$0xff] }
 0xe0c   : > { %10725 = vmatprep.subr.mxu0 %v11904_v8 }
 0xe0d   : > { %10726 = vmatpush3.msra.mxu0 %v9625_v17  ;;  %v9676_v17 = vld [vmem:[%s12131_s8 + $0x2a0] sm:$0xff] }
 0xe0e   : > { %10727 = vmatprep.subr.mxu0 %v11904_v8 }
 0xe0f   : > { %10728 = vmatpush3.msra.mxu0 %v9624_v18  ;;  %v9675_v18 = vld [vmem:[%s12131_s8 + $0x298] sm:$0xff] }
 0xe10   : > { %10751 = vmatprep.subr.mxu0 %v11904_v8 }
 0xe90   : > { %v2029_v6 = vpop.xlane.xlu0 %2028 }
 0xe91   : > { %v2031_v7 = vmul.f32 0.015625, %v2029_v6 }
 0xe93   : > { %v2032_v9 = vsub.f32 %v2022_v4, %v2031_v7  ;;  %v9661_v4 = vld [vmem:[%s12131_s8 + $0x240] sm:$0xff] }
 0xe95   : > { %v2033_v10 = vmul.f32 %v2032_v9, %v2032_v9 }
 0xe97   : > { %v2034_v11 = vsel %vm800_vm14, %v2033_v10, 0.0  ;;  %v9648_v10 = vld [vmem:[%s12133_s5 + $0xa] ss:$0 sm:$0xff] }
 0xe98   : > { %2035 = vadd.xlane.f32.xlu1 %v2034_v11 }
 0xf21   : > { %v2036_v25 = vpop.xlane.xlu1 %2035 }
 0xf22   : > { %v2037_v26 = vmul.f32 0.015625, %v2036_v25 }
 0xf24   : > { %v2038_v27 = vadd.f32 1e-05, %v2037_v26 }
 0xf26   : > { %11620 = vrsqrt.f32 %v2038_v27 }
 0xf33   : > { %v11621_v28 = vpop.eup %11620 }
 0xf34   : > { %v2040_v31 = vmul.f32 %v11621_v28, %v2032_v9 }
 0xf36   : > { %v2047_v33 = vmul.f32 %v9622_v30, %v2040_v31 }
 0xf38   : > { %v2054_v34 = vadd.f32 %v9623_v32, %v2047_v33  ;;  %v9681_v32 = vld [vmem:[%s12133_s5 + $0xe] ss:$0 sm:$0xff] }
 0xf3a   : > { %10730 = vmatmul.mubr.msk.f32.vlgmr.msra.gmra.mxu0 %vm800_vm14, %v2054_v34 }
 0xf3b   : > { %10767 = vmatprep.mubr.msk.f32.mxu0 %vm11905_vm15, %v11904_v8  ;;  %10752 = vmatpush3.msra.mxu0 %v9657_v54 }
 0xf3c   : > { %10753 = vmatprep.subr.mxu0 %v11904_v8 }
 0xf3d   : > { %10754 = vmatpush3.msra.mxu0 %v9656_v56 }
 0xf3e   : > { %10755 = vmatprep.subr.mxu0 %v11904_v8 }
 0xf3f   : > { %10756 = vmatpush3.msra.mxu0 %v9655_v57 }
 0xf40   : > { %10757 = vmatprep.subr.mxu0 %v11904_v8 }
 0xf41   : > { %10758 = vmatpush3.msra.mxu0 %v9654_v59 }
 0xf42   : > { %10759 = vmatprep.subr.mxu0 %v11904_v8 }
 0xf43   : > { %10760 = vmatpush3.msra.mxu0 %v9653_v61  ;;  %v9686_v61 = vld [vmem:[%s12131_s8 + $0x2d8] sm:$0xff] }
 0xf44   : > { %10761 = vmatprep.subr.mxu0 %v11904_v8 }
 0xf45   : > { %10762 = vmatpush3.msra.mxu0 %v9652_v63 }
 0xf46   : > { %10763 = vmatprep.subr.mxu0 %v11904_v8 }
 0xf47   : > { %10764 = vmatpush3.msra.mxu0 %v9651_v1 }
 0xf48   : > { %10765 = vmatprep.subr.mxu0 %v11904_v8 }
 0xf49   : > { %10766 = vmatpush3.msra.mxu0 %v9650_v3  ;;  %v9683_v3 = vld [vmem:[%s12131_s8 + $0x2c0] sm:$0xff] }
 0xf4a   : > { %10789 = vmatprep.subr.mxu0 %v11904_v8 }
 0xffa   : > { %v2141_v39 = vpop.f32.mrf.mxu0 }
 0xffb   : > { %v2142_v29 = vadd.f32 %v9633_v38, %v2141_v39 }
 0xffc   : > { %v10731_v40 = vpop.f32.mrf.mxu0 }
 0xffd   : > { %v2145_v41 = vmax.f32 %v2142_v29, 0.0 }
 0xfff   : > { %10749 = vmatmul.mubr.msk.f32.vlgmr.msra.gmra.mxu1 %vm800_vm14, %v2145_v41 }
0x1000   : > { %10786 = vmatprep.mubr.msk.f32.mxu1 %vm11905_vm15, %v11904_v8  ;;  %10771 = vmatpush3.msra.mxu1 %v9668_v55 }
0x1001   : > { %10772 = vmatprep.subr.mxu1 %v11904_v8 }
0x1002   : > { %10773 = vmatpush3.msra.mxu1 %v9667_v51 }
0x1003   : > { %10774 = vmatprep.subr.mxu1 %v11904_v8 }
0x1004   : > { %10775 = vmatpush3.msra.mxu1 %v9666_v58 }
0x1005   : > { %10776 = vmatprep.subr.mxu1 %v11904_v8 }
0x1006   : > { %10777 = vmatpush3.msra.mxu1 %v9665_v60 }
0x1007   : > { %10778 = vmatprep.subr.mxu1 %v11904_v8 }
0x1008   : > { %10779 = vmatpush3.msra.mxu1 %v9664_v62  ;;  %v9685_v62 = vld [vmem:[%s12131_s8 + $0x2d0] sm:$0xff] }
0x1009   : > { %10780 = vmatprep.subr.mxu1 %v11904_v8 }
0x100a   : > { %10781 = vmatpush3.msra.mxu1 %v9663_v0 }
0x100b   : > { %10782 = vmatprep.subr.mxu1 %v11904_v8 }
0x100c   : > { %10783 = vmatpush3.msra.mxu1 %v9662_v2  ;;  %v9684_v2 = vld [vmem:[%s12131_s8 + $0x2c8] sm:$0xff] }
0x100d   : > { %10784 = vmatprep.subr.mxu1 %v11904_v8 }
0x100e   : > { %10785 = vmatpush3.msra.mxu1 %v9661_v4 }
0x100f   : > { %10808 = vmatprep.subr.mxu1 %v11904_v8 }
0x10bf   : > { %v2232_v43 = vpop.f32.mrf.mxu1 }
0x10c0   : > { %v2233_v44 = vadd.f32 %v9644_v42, %v2232_v43 }
0x10c1   : > { %v10750_v45 = vpop.f32.mrf.mxu1 }
0x10c2   : > { %v2236_v46 = vadd.f32 %v2233_v44, %v2054_v34 }
0x10c4   : > { %v2241_v47 = vsel %vm800_vm14, %v2236_v46, 0.0 }
0x10c5   : > { %2242 = vadd.xlane.f32.xlu1 %v2241_v47 }
0x114e   : > { %v2243_v48 = vpop.xlane.xlu1 %2242 }
0x114f   : > { %v2244_v49 = vmul.f32 0.015625, %v2243_v48 }
0x1151   : > { %v2245_v50 = vsub.f32 %v2236_v46, %v2244_v49 }
0x1153   : > { %v2246_v52 = vmul.f32 %v2245_v50, %v2245_v50 }
0x1155   : > { %v2247_v53 = vsel %vm800_vm14, %v2246_v52, 0.0 }
0x1156   : > { %2248 = vadd.xlane.f32.xlu1 %v2247_v53 }
0x11df   : > { %v2249_v5 = vpop.xlane.xlu1 %2248 }
0x11e0   : > { %v2250_v6 = vmul.f32 0.015625, %v2249_v5 }
0x11e2   : > { %v2251_v7 = vadd.f32 1e-05, %v2250_v6 }
0x11e4   : > { %11622 = vrsqrt.f32 %v2251_v7 }
0x11f1   : > { %v11623_v9 = vpop.eup %11622 }
0x11f2   : > { %v2253_v11 = vmul.f32 %v11623_v9, %v2245_v50 }
0x11f4   : > { %v2260_v13 = vmul.f32 %v9648_v10, %v2253_v11 }
0x11f6   : > { %v12546_v23 = vadd.f32 %v9649_v12, %v2260_v13 }
0x11f8   : > { %10768 = vmatmul.mubr.msk.f32.vlgmr.msra.gmra.mxu0 %vm800_vm14, %v12546_v23  ;;  %10787 = vmatmul.mubr.msk.f32.vlgmr.msra.gmra.mxu1 %vm800_vm14, %v12546_v23 }
0x11f9   : > { %10790 = vmatpush3.msra.mxu0 %v9679_v14  ;;  %10805 = vmatprep.mubr.msk.f32.mxu0 %vm11905_vm15, %v11904_v8 }
0x11fa   : > { %10791 = vmatprep.subr.mxu0 %v11904_v8  ;;  %10810 = vmatprep.mubr.msk.f32.mxu1 %vm11905_vm15, %v11904_v8 }
0x11fb   : > { %10792 = vmatpush3.msra.mxu0 %v9678_v15 }
0x11fc   : > { %10793 = vmatprep.subr.mxu0 %v11904_v8 }
0x11fd   : > { %10794 = vmatpush3.msra.mxu0 %v9677_v16 }
0x11fe   : > { %10795 = vmatprep.subr.mxu0 %v11904_v8 }
0x11ff   : > { %10796 = vmatpush3.msra.mxu0 %v9676_v17 }
0x1200   : > { %10797 = vmatprep.subr.mxu0 %v11904_v8 }
0x1201   : > { %10798 = vmatpush3.msra.mxu0 %v9675_v18 }
0x1202   : > { %10799 = vmatprep.subr.mxu0 %v11904_v8 }
0x1203   : > { %10800 = vmatpush3.msra.mxu0 %v9674_v19 }
0x1204   : > { %10801 = vmatprep.subr.mxu0 %v11904_v8 }
0x1205   : > { %10802 = vmatpush3.msra.mxu0 %v9673_v20 }
0x1206   : > { %10803 = vmatprep.subr.mxu0 %v11904_v8 }
0x1207   : > { %10804 = vmatpush3.msra.mxu0 %v9672_v21 }
0x1208   : > { %10806 = vmatmul.mubr.msk.f32.vlgmr.msra.gmra.mxu0 %vm800_vm14, %v12546_v23  ;;  %10828 = vmatprep.subr.mxu0 %v11904_v8 }
0x1209   : > { %10832 = vmatprep.mubr.msk.f32.mxu0 %vm11905_vm15, %v11904_v8  ;;  %10829 = vmatpush3.msra.mxu0 %v9686_v61 }
0x120a   : > { %10830 = vmatprep.subr.mxu0 %v11904_v8 }
0x120b   : > { %10831 = vmatpush3.msra.mxu0 %v9685_v62 }
0x120c   : > { %10842 = vmatprep.subr.mxu0 %v11904_v8 }
0x12b8   : > { %v2354_v25 = vpop.f32.mrf.mxu0  ;;  %v2441_v26 = vpop.f32.mrf.mxu1 }
0x12b9   : > { %v12578_v27 = vadd.f32 %v9659_v22, %v2354_v25  ;;  %v12580_v28 = vadd.f32 %v9670_v24, %v2441_v26  ;;  %v9688_v22 = vld [vmem:[%s12131_s8 + $0x2e8] sm:$0xff] }
0x12ba   : > { %v10769_v30 = vpop.f32.mrf.mxu0  ;;  %v10788_v31 = vpop.f32.mrf.mxu1 }
0x12bb   : > { %10809 = vmatpush3.xpose.msk.msra.mxu1 %vm1057_vm0, %v12580_v28  ;;  %2702 = vrot.lane.b32.xlu0 %v12578_v27, %s11906_s13  ;;  %v9687_v31 = vld [vmem:[%s12131_s8 + $0x2e0] sm:$0xff] }
0x12bc   : > { %10813 = vmatprep.subr.mxu1 %v11904_v8 }
0x12be   : > { %10811 = vmatmul.mubr.msk.f32.vlgmr.msra.gmra.mxu1 %vm1057_vm0, %v12578_v27 }
0x12bf   : > { %10815 = vmatprep.mubr.msk.f32.mxu1 %vm11905_vm15, %v11904_v8 }
0x12c8   : > { %v2528_v33 = vpop.f32.mrf.mxu0 }
0x12c9   : > { %v12592_v34 = vadd.f32 %v9681_v32, %v2528_v33 }
0x12ca   : > { %v10807_v35 = vpop.f32.mrf.mxu0 }
0x12cb   : > { %10814 = vmatpush3.msra.mxu1 %v12592_v34 }
0x12cc   : > { %10818 = vmatprep.subr.mxu1 %v11904_v8 }
0x132d   : > { %v2703_v48 = vpop.permute.xlu0 %2702 }
0x137e   : > { %v2613_v36 = vpop.f32.mrf.mxu1 }
0x137f   : > { %v2617_v37 = vmul.f32 0.25, %v2613_v36 }
0x1380   : > { %v10812_v38 = vpop.f32.mrf.mxu1 }
0x1381   : > { %v2618_v39 = vsel %vm1135_vm1, %v2617_v37, -inf }
0x1382   : > { %2619 = vmax.xlane.f32.xlu1 %v2618_v39 }
0x140b   : > { %v2620_v29 = vpop.xlane.xlu1 %2619 }
0x140c   : > { %v2621_v40 = vsub.f32 %v2617_v37, %v2620_v29 }
0x140e   : > { %v2622_v41 = vmul.f32 1.442695, %v2621_v40 }
0x1410   : > { %11624 = vpow2.f32 %v2622_v41 }
0x141d   : > { %v11625_v42 = vpop.eup %11624 }
0x141e   : > { %v2624_v43 = vsel %vm1135_vm1, %v11625_v42, 0.0 }
0x141f   : > { %2625 = vadd.xlane.f32.xlu1 %v2624_v43 }
0x1430   : > { %2704 = vrot.lane.b32.xlu1 %v12580_v28, %s11906_s13 }
0x14a8   : > { %v2626_v44 = vpop.xlane.xlu1 %2625 }
0x14a9   : > { %11626 = vrcp.f32 %v2626_v44  ;;  %v9690_v44 = vld [vmem:[%s12131_s8 + $0x2f8] sm:$0xff] }
0x14ac   : > { %v2705_v47 = vpop.permute.xlu1 %2704 }
0x14b6   : > { %v11627_v45 = vpop.eup %11626 }
0x14b7   : > { %v2628_v46 = vmul.f32 %v11627_v45, %v11625_v42 }
0x14b9   : > { %10816 = vmatmul.mubr.msk.f32.vlgmr.msra.gmra.mxu1 %vm1135_vm1, %v2628_v46 }
0x14ba   : > { %10819 = vmatpush3.xpose.msk.msra.mxu1 %vm1057_vm0, %v2705_v47  ;;  %10820 = vmatprep.mubr.msk.f32.mxu1 %vm11905_vm15, %v11904_v8 }
0x14bb   : > { %10823 = vmatprep.subr.mxu1 %v11904_v8 }
0x14bd   : > { %10821 = vmatmul.mubr.msk.f32.vlgmr.msra.gmra.mxu1 %vm1057_vm0, %v2703_v48 }
0x14be   : > { %10825 = vmatprep.mubr.msk.f32.mxu1 %vm11905_vm15, %v11904_v8 }
0x1579   : > { %v2698_v49 = vpop.f32.mrf.mxu1 }
0x157b   : > { %v10817_v50 = vpop.f32.mrf.mxu1 }
0x157d   : > { %v2776_v52 = vpop.f32.mrf.mxu1 }
0x157e   : > { %v2780_v53 = vmul.f32 0.25, %v2776_v52  ;;  %v9689_v52 = vld [vmem:[%s12131_s8 + $0x2f0] sm:$0xff] }
0x157f   : > { %v10822_v54 = vpop.f32.mrf.mxu1 }
0x1580   : > { %v2781_v55 = vsel %vm1135_vm1, %v2780_v53, -inf }
0x1581   : > { %2782 = vmax.xlane.f32.xlu1 %v2781_v55 }
0x1592   : > { %2793 = vrot.lane.b32.xlu1 %v12592_v34, %s11906_s13 }
0x1596   : > { %3015 = vrot.lane.b32.xlu1 %v12578_v27, %s11907_s11 }
0x160a   : > { %v2783_v56 = vpop.xlane.xlu1 %2782 }
0x160b   : > { %v2784_v51 = vsub.f32 %v2780_v53, %v2783_v56  ;;  %v9708_v56 = vld [vmem:[%s12133_s5 + $0xf] ss:$0 sm:$0xff] }
0x160d   : > { %v2785_v57 = vmul.f32 1.442695, %v2784_v51 }
0x160e   : > { %v2794_v58 = vpop.permute.xlu1 %2793 }
0x160f   : > { %11628 = vpow2.f32 %v2785_v57  ;;  %10824 = vmatpush3.msra.mxu1 %v2794_v58 }
0x1610   : > { %10835 = vmatprep.subr.mxu1 %v11904_v8 }
0x1612   : > { %v3016_v7 = vpop.permute.xlu1 %3015 }
0x161c   : > { %v11629_v59 = vpop.eup %11628 }
0x161d   : > { %v2787_v60 = vsel %vm1135_vm1, %v11629_v59, 0.0 }
0x161e   : > { %2788 = vadd.xlane.f32.xlu0 %v2787_v60 }
0x1634   : > { %3017 = vrot.lane.b32.xlu0 %v12580_v28, %s11907_s11 }
0x16a7   : > { %v2789_v63 = vpop.xlane.xlu0 %2788 }
0x16a8   : > { %11630 = vrcp.f32 %v2789_v63 }
0x16ab   : > { %v3018_v5 = vpop.permute.xlu0 %3017 }
0x16b5   : > { %v11631_v0 = vpop.eup %11630 }
0x16b6   : > { %v2791_v1 = vmul.f32 %v11631_v0, %v11629_v59 }
0x16b8   : > { %10826 = vmatmul.mubr.msk.f32.vlgmr.msra.gmra.mxu1 %vm1135_vm1, %v2791_v1 }
0x16b9   : > { %10836 = vmatpush3.msra.mxu1 %v9684_v2  ;;  %10839 = vmatprep.mubr.msk.f32.mxu1 %vm11905_vm15, %v11904_v8  ;;  %v9720_v2 = vld [vmem:[%s12131_s8 + $0x338] sm:$0xff] }
0x16ba   : > { %10837 = vmatprep.subr.mxu1 %v11904_v8 }
0x16bb   : > { %10838 = vmatpush3.msra.mxu1 %v9683_v3  ;;  %v9719_v3 = vld [vmem:[%s12131_s8 + $0x330] sm:$0xff] }
0x16bc   : > { %10840 = vmatmul.mubr.msk.f32.vlgmr.msra.gmra.mxu1 %vm1057_vm0, %v2698_v49  ;;  %10847 = vmatprep.subr.mxu1 %v11904_v8 }
0x16bd   : > { %10849 = vmatprep.mubr.msk.f32.mxu1 %vm11905_vm15, %v11904_v8 }
0x1778   : > { %v2865_v4 = vpop.f32.mrf.mxu1 }
0x1779   : > { %10833 = vmatmul.mubr.msk.f32.vlgmr.msra.gmra.mxu0 %vm1057_vm0, %v2865_v4  ;;  %v9717_v4 = vld [vmem:[%s12131_s8 + $0x320] sm:$0xff] }
0x177a   : > { %10843 = vmatpush3.xpose.msk.msra.mxu0 %vm1057_vm0, %v3018_v5  ;;  %v10827_v6 = vpop.f32.mrf.mxu1  ;;  %10844 = vmatprep.mubr.msk.f32.mxu0 %vm11905_vm15, %v11904_v8  ;;  %v9716_v5 = vld [vmem:[%s12131_s8 + $0x318] sm:$0xff] }
0x177b   : > { %10852 = vmatprep.subr.mxu0 %v11904_v8  ;;  %v9715_v6 = vld [vmem:[%s12131_s8 + $0x310] sm:$0xff] }
0x177c   : > { %v12636_v9 = vpop.f32.mrf.mxu1 }
0x177d   : > { %10845 = vmatmul.mubr.msk.f32.vlgmr.msra.gmra.mxu0 %vm1057_vm0, %v3016_v7  ;;  %v9714_v7 = vld [vmem:[%s12131_s8 + $0x308] sm:$0xff] }
0x177e   : > { %v10841_v10 = vpop.f32.mrf.mxu1  ;;  %10856 = vmatprep.mubr.msk.f32.mxu0 %vm11905_vm15, %v11904_v8  ;;  %10853 = vmatpush3.msra.mxu0 %v9688_v22  ;;  %v9712_v22 = vld [vmem:[%s12133_s5 + $0x13] ss:$0 sm:$0xff] }
0x177f   : > { %10854 = vmatprep.subr.mxu0 %v11904_v8  ;;  %v9731_v10 = vld [vmem:[%s12131_s8 + $0x378] sm:$0xff] }
0x1780   : > { %10855 = vmatpush3.msra.mxu0 %v9687_v31  ;;  %v9748_v31 = vld [vmem:[%s12131_s8 + $0x3a8] sm:$0xff] }
0x1781   : > { %10864 = vmatprep.subr.mxu0 %v11904_v8 }
0x1839   : > { %v2938_v11 = vpop.f32.mrf.mxu0 }
0x183a   : > { %v3012_v45 = vadd.f32 %v12636_v9, %v2938_v11  ;;  %v9713_v9 = vld [vmem:[%s12131_s8 + $0x300] sm:$0xff]  ;;  %v9730_v11 = vld [vmem:[%s12131_s8 + $0x370] sm:$0xff] }
0x183b   : > { %v10834_v12 = vpop.f32.mrf.mxu0 }
0x183c   : > { %v9729_v12 = vld [vmem:[%s12131_s8 + $0x368] sm:$0xff] }
0x183d   : > { %v3089_v13 = vpop.f32.mrf.mxu0 }
0x183e   : > { %v3093_v14 = vmul.f32 0.25, %v3089_v13  ;;  %v9728_v13 = vld [vmem:[%s12131_s8 + $0x360] sm:$0xff] }
0x183f   : > { %v10846_v15 = vpop.f32.mrf.mxu0 }
0x1840   : > { %v3094_v16 = vsel %vm1135_vm1, %v3093_v14, -inf  ;;  %v9726_v15 = vld [vmem:[%s12131_s8 + $0x350] sm:$0xff] }
0x1841   : > { %3095 = vmax.xlane.f32.xlu1 %v3094_v16 }
0x1852   : > { %3257 = vrot.lane.b32.xlu1 %v12580_v28, %s11908_s26 }
0x1856   : > { %3255 = vrot.lane.b32.xlu1 %v12578_v27, %s11908_s26 }
0x18ca   : > { %v3096_v17 = vpop.xlane.xlu1 %3095 }
0x18cb   : > { %v3097_v18 = vsub.f32 %v3093_v14, %v3096_v17  ;;  %v9727_v14 = vld [vmem:[%s12131_s8 + $0x358] sm:$0xff] }
0x18cd   : > { %v3098_v19 = vmul.f32 1.442695, %v3097_v18 }
0x18ce   : > { %v3258_v27 = vpop.permute.xlu1 %3257 }
0x18cf   : > { %11632 = vpow2.f32 %v3098_v19 }
0x18d2   : > { %v3256_v30 = vpop.permute.xlu1 %3255 }
0x18dc   : > { %v11633_v20 = vpop.eup %11632 }
0x18dd   : > { %v3100_v21 = vsel %vm1135_vm1, %v11633_v20, 0.0 }
0x18de   : > { %3101 = vadd.xlane.f32.xlu0 %v3100_v21 }
0x18f4   : > { %3105 = vrot.lane.b32.xlu0 %v12592_v34, %s11907_s11 }
0x1967   : > { %v3102_v24 = vpop.xlane.xlu0 %3101 }
0x1968   : > { %11634 = vrcp.f32 %v3102_v24 }
0x196b   : > { %v3106_v25 = vpop.permute.xlu0 %3105 }
0x196c   : > { %10848 = vmatpush3.msra.mxu1 %v3106_v25 }
0x196d   : > { %10859 = vmatprep.subr.mxu1 %v11904_v8 }
0x1975   : > { %v11635_v26 = vpop.eup %11634 }
0x1976   : > { %v3104_v28 = vmul.f32 %v11635_v26, %v11633_v20  ;;  %v9711_v20 = vld [vmem:[%s12133_s5 + $0x12] ss:$0 sm:$0xff] }
0x1977   : > { %v9725_v26 = vld [vmem:[%s12131_s8 + $0x348] sm:$0xff] }
0x1978   : > { %10850 = vmatmul.mubr.msk.f32.vlgmr.msra.gmra.mxu1 %vm1135_vm1, %v3104_v28  ;;  %v9750_v28 = vld [vmem:[%s12131_s8 + $0x3b8] sm:$0xff] }
0x1979   : > { %10860 = vmatpush3.xpose.msk.msra.mxu1 %vm1057_vm0, %v3258_v27  ;;  %10861 = vmatprep.mubr.msk.f32.mxu1 %vm11905_vm15, %v11904_v8  ;;  %v9724_v27 = vld [vmem:[%s12131_s8 + $0x340] sm:$0xff] }
0x197a   : > { %10869 = vmatprep.subr.mxu1 %v11904_v8 }
0x197c   : > { %10862 = vmatmul.mubr.msk.f32.vlgmr.msra.gmra.mxu1 %vm1057_vm0, %v3256_v30  ;;  %v9749_v30 = vld [vmem:[%s12131_s8 + $0x3b0] sm:$0xff] }
0x197d   : > { %10873 = vmatprep.mubr.msk.f32.mxu1 %vm11905_vm15, %v11904_v8  ;;  %10870 = vmatpush3.msra.mxu1 %v9690_v44  ;;  %v9760_v44 = vld [vmem:[%s12131_s8 + $0x3f0] sm:$0xff] }
0x197e   : > { %10871 = vmatprep.subr.mxu1 %v11904_v8 }
0x197f   : > { %10872 = vmatpush3.msra.mxu1 %v9689_v52 }
0x1980   : > { %10895 = vmatprep.subr.mxu1 %v11904_v8 }
0x1a38   : > { %v3177_v32 = vpop.f32.mrf.mxu1 }
0x1a39   : > { %10857 = vmatmul.mubr.msk.f32.vlgmr.msra.gmra.mxu0 %vm1057_vm0, %v3177_v32  ;;  %v9747_v32 = vld [vmem:[%s12131_s8 + $0x3a0] sm:$0xff] }
0x1a3a   : > { %v10851_v33 = vpop.f32.mrf.mxu1  ;;  %10866 = vmatprep.mubr.msk.f32.mxu0 %vm11905_vm15, %v11904_v8 }
0x1a3b   : > { %v9746_v33 = vld [vmem:[%s12131_s8 + $0x398] sm:$0xff] }
0x1a3c   : > { %v3329_v35 = vpop.f32.mrf.mxu1 }
0x1a3d   : > { %v3333_v36 = vmul.f32 0.25, %v3329_v35  ;;  %v9745_v35 = vld [vmem:[%s12131_s8 + $0x390] sm:$0xff] }
0x1a3e   : > { %v10863_v37 = vpop.f32.mrf.mxu1 }
0x1a3f   : > { %v3334_v38 = vsel %vm1135_vm1, %v3333_v36, -inf  ;;  %v9743_v37 = vld [vmem:[%s12131_s8 + $0x380] sm:$0xff] }
0x1a40   : > { %3335 = vmax.xlane.f32.xlu0 %v3334_v38  ;;  %v12740_v38 = vld [vmem:[#allocation3] sm:$0xff] }
0x1a56   : > { %3345 = vrot.lane.b32.xlu0 %v12592_v34, %s11908_s26 }
0x1ac9   : > { %v3336_v39 = vpop.xlane.xlu0 %3335 }
0x1aca   : > { %v3337_v29 = vsub.f32 %v3333_v36, %v3336_v39  ;;  %v9744_v36 = vld [vmem:[%s12131_s8 + $0x388] sm:$0xff] }
0x1acb   : > { %v9722_v39 = vld [vmem:[%s12133_s5 + $0x10] ss:$0 sm:$0xff] }
0x1acc   : > { %v3338_v40 = vmul.f32 1.442695, %v3337_v29 }
0x1acd   : > { %v3346_v41 = vpop.permute.xlu0 %3345 }
0x1ace   : > { %11636 = vpow2.f32 %v3338_v40  ;;  %10865 = vmatpush3.msra.mxu0 %v3346_v41 }
0x1acf   : > { %10876 = vmatprep.subr.mxu0 %v11904_v8 }
0x1adb   : > { %v11637_v42 = vpop.eup %11636 }
0x1adc   : > { %v3340_v43 = vsel %vm1135_vm1, %v11637_v42, 0.0 }
0x1add   : > { %3341 = vadd.xlane.f32.xlu1 %v3340_v43  ;;  %v9761_v43 = vld [vmem:[%s12131_s8 + $0x3f8] sm:$0xff] }
0x1af9   : > { %v3250_v46 = vpop.f32.mrf.mxu0 }
0x1afa   : > { %v3254_v34 = vadd.f32 %v3250_v46, %v3012_v45  ;;  %v9759_v45 = vld [vmem:[%s12131_s8 + $0x3e8] sm:$0xff]  ;;  %v9758_v46 = vld [vmem:[%s12131_s8 + $0x3e0] sm:$0xff] }
0x1afb   : > { %v10858_v47 = vpop.f32.mrf.mxu0 }
0x1afc   : > { %v9756_v47 = vld [vmem:[%s12131_s8 + $0x3d0] sm:$0xff] }
0x1b66   : > { %v3342_v48 = vpop.xlane.xlu1 %3341 }
0x1b67   : > { %11638 = vrcp.f32 %v3342_v48  ;;  %v9755_v48 = vld [vmem:[%s12131_s8 + $0x3c8] sm:$0xff] }
0x1b74   : > { %v11639_v49 = vpop.eup %11638 }
0x1b75   : > { %v3344_v50 = vmul.f32 %v11639_v49, %v11637_v42  ;;  %v9754_v49 = vld [vmem:[%s12131_s8 + $0x3c0] sm:$0xff] }
0x1b77   : > { %10867 = vmatmul.mubr.msk.f32.vlgmr.msra.gmra.mxu0 %vm1135_vm1, %v3344_v50 }
0x1b78   : > { %10892 = vmatprep.mubr.msk.f32.mxu0 %vm11905_vm15, %v11904_v8  ;;  %10877 = vmatpush3.msra.mxu0 %v9720_v2  ;;  %v9766_v2 = vld [vmem:[%s12131_s8 + $0x408] sm:$0xff] }
0x1b79   : > { %10878 = vmatprep.subr.mxu0 %v11904_v8 }
0x1b7a   : > { %10879 = vmatpush3.msra.mxu0 %v9719_v3  ;;  %v9765_v3 = vld [vmem:[%s12131_s8 + $0x400] sm:$0xff] }
0x1b7b   : > { %10880 = vmatprep.subr.mxu0 %v11904_v8 }
0x1c37   : > { %v3417_v53 = vpop.f32.mrf.mxu0 }
0x1c38   : > { %10874 = vmatmul.mubr.msk.f32.vlgmr.msra.gmra.mxu1 %vm1057_vm0, %v3417_v53 }
0x1c39   : > { %v10868_v54 = vpop.f32.mrf.mxu0  ;;  %10911 = vmatprep.mubr.msk.f32.mxu1 %vm11905_vm15, %v11904_v8  ;;  %10896 = vmatpush3.msra.mxu1 %v9731_v10 }
0x1c3a   : > { %10897 = vmatprep.subr.mxu1 %v11904_v8 }
0x1c3b   : > { %10898 = vmatpush3.msra.mxu1 %v9730_v11 }
0x1c3c   : > { %10899 = vmatprep.subr.mxu1 %v11904_v8 }
0x1c3d   : > { %10900 = vmatpush3.msra.mxu1 %v9729_v12 }
0x1c3e   : > { %10901 = vmatprep.subr.mxu1 %v11904_v8 }
0x1c3f   : > { %10902 = vmatpush3.msra.mxu1 %v9728_v13  ;;  %v9774_v13 = vld [vmem:[%s12133_s5 + $0x18] ss:$0 sm:$0xff] }
0x1c40   : > { %10903 = vmatprep.subr.mxu1 %v11904_v8 }
0x1c41   : > { %10904 = vmatpush3.msra.mxu1 %v9727_v14 }
0x1c42   : > { %10905 = vmatprep.subr.mxu1 %v11904_v8 }
0x1c43   : > { %10906 = vmatpush3.msra.mxu1 %v9726_v15 }
0x1c44   : > { %10907 = vmatprep.subr.mxu1 %v11904_v8 }
0x1c45   : > { %10908 = vmatpush3.msra.mxu1 %v9725_v26 }
0x1c46   : > { %10909 = vmatprep.subr.mxu1 %v11904_v8 }
0x1c47   : > { %10910 = vmatpush3.msra.mxu1 %v9724_v27 }
0x1c48   : > { %10933 = vmatprep.subr.mxu1 %v11904_v8 }
0x1cf8   : > { %v3490_v55 = vpop.f32.mrf.mxu1 }
0x1cf9   : > { %v3494_v51 = vadd.f32 %v3490_v55, %v3254_v34  ;;  %v9757_v34 = vld [vmem:[%s12131_s8 + $0x3d8] sm:$0xff]  ;;  %v9763_v55 = vld [vmem:[%s12133_s5 + $0x17] ss:$0 sm:$0xff] }
0x1cfa   : > { %v10875_v57 = vpop.f32.mrf.mxu1 }
0x1cfb   : > { %v3503_v58 = vadd.f32 %v9708_v56, %v3494_v51  ;;  %v9752_v56 = vld [vmem:[%s12133_s5 + $0x16] ss:$0 sm:$0xff] }
0x1cfd   : > { %v3504_v59 = vadd.f32 %v3503_v58, %v12546_v23  ;;  %v9718_v23 = vld [vmem:[%s12131_s8 + $0x328] sm:$0xff] }
0x1cfe   : > { %10881 = vmatpush3.msra.mxu0 %v9718_v23 }
0x1cff   : > { %v3509_v60 = vsel %vm800_vm14, %v3504_v59, 0.0  ;;  %10882 = vmatprep.subr.mxu0 %v11904_v8 }
0x1d00   : > { %3510 = vadd.xlane.f32.xlu1 %v3509_v60  ;;  %10883 = vmatpush3.msra.mxu0 %v9717_v4  ;;  %v9772_v60 = vld [vmem:[%s12131_s8 + $0x438] sm:$0xff] }
0x1d01   : > { %10884 = vmatprep.subr.mxu0 %v11904_v8 }
0x1d02   : > { %10885 = vmatpush3.msra.mxu0 %v9716_v5 }
0x1d03   : > { %10886 = vmatprep.subr.mxu0 %v11904_v8 }
0x1d04   : > { %10887 = vmatpush3.msra.mxu0 %v9715_v6 }
0x1d05   : > { %10888 = vmatprep.subr.mxu0 %v11904_v8 }
0x1d06   : > { %10889 = vmatpush3.msra.mxu0 %v9714_v7 }
0x1d07   : > { %10890 = vmatprep.subr.mxu0 %v11904_v8 }
0x1d08   : > { %10891 = vmatpush3.msra.mxu0 %v9713_v9 }
0x1d09   : > { %10914 = vmatprep.subr.mxu0 %v11904_v8 }
0x1d89   : > { %v3511_v61 = vpop.xlane.xlu1 %3510 }
0x1d8a   : > { %v3512_v62 = vmul.f32 0.015625, %v3511_v61  ;;  %v9771_v61 = vld [vmem:[%s12131_s8 + $0x430] sm:$0xff] }
0x1d8c   : > { %v3513_v63 = vsub.f32 %v3504_v59, %v3512_v62  ;;  %v9770_v62 = vld [vmem:[%s12131_s8 + $0x428] sm:$0xff] }
0x1d8e   : > { %v3514_v0 = vmul.f32 %v3513_v63, %v3513_v63 }
0x1d90   : > { %v3515_v1 = vsel %vm800_vm14, %v3514_v0, 0.0  ;;  %v9768_v0 = vld [vmem:[%s12131_s8 + $0x418] sm:$0xff] }
0x1d91   : > { %3516 = vadd.xlane.f32.xlu1 %v3515_v1  ;;  %v9767_v1 = vld [vmem:[%s12131_s8 + $0x410] sm:$0xff] }
0x1e1a   : > { %v3517_v16 = vpop.xlane.xlu1 %3516 }
0x1e1b   : > { %v3518_v17 = vmul.f32 0.015625, %v3517_v16 }
0x1e1d   : > { %v3519_v18 = vadd.f32 1e-05, %v3518_v17 }
0x1e1f   : > { %11640 = vrsqrt.f32 %v3519_v18 }
0x1e2c   : > { %v11641_v19 = vpop.eup %11640 }
0x1e2d   : > { %v3521_v21 = vmul.f32 %v11641_v19, %v3513_v63  ;;  %v9769_v63 = vld [vmem:[%s12131_s8 + $0x420] sm:$0xff] }
0x1e2f   : > { %v3528_v24 = vmul.f32 %v9711_v20, %v3521_v21 }
0x1e31   : > { %v12715_v25 = vadd.f32 %v9712_v22, %v3528_v24 }
0x1e33   : > { %10893 = vmatmul.mubr.msk.f32.vlgmr.msra.gmra.mxu0 %vm800_vm14, %v12715_v25 }
0x1e34   : > { %10930 = vmatprep.mubr.msk.f32.mxu0 %vm11905_vm15, %v11904_v8  ;;  %10915 = vmatpush3.msra.mxu0 %v9750_v28 }
0x1e35   : > { %10916 = vmatprep.subr.mxu0 %v11904_v8 }
0x1e36   : > { %10917 = vmatpush3.msra.mxu0 %v9749_v30 }
0x1e37   : > { %10918 = vmatprep.subr.mxu0 %v11904_v8 }
0x1e38   : > { %10919 = vmatpush3.msra.mxu0 %v9748_v31 }
0x1e39   : > { %10920 = vmatprep.subr.mxu0 %v11904_v8 }
0x1e3a   : > { %10921 = vmatpush3.msra.mxu0 %v9747_v32 }
0x1e3b   : > { %10922 = vmatprep.subr.mxu0 %v11904_v8 }
0x1e3c   : > { %10923 = vmatpush3.msra.mxu0 %v9746_v33 }
0x1e3d   : > { %10924 = vmatprep.subr.mxu0 %v11904_v8 }
0x1e3e   : > { %10925 = vmatpush3.msra.mxu0 %v9745_v35 }
0x1e3f   : > { %10926 = vmatprep.subr.mxu0 %v11904_v8 }
0x1e40   : > { %10927 = vmatpush3.msra.mxu0 %v9744_v36 }
0x1e41   : > { %10928 = vmatprep.subr.mxu0 %v11904_v8 }
0x1e42   : > { %10929 = vmatpush3.msra.mxu0 %v9743_v37 }
0x1e43   : > { %10931 = vmatmul.mubr.msk.f32.vlgmr.msra.gmra.mxu0 %vm800_vm14, %v12740_v38  ;;  %10952 = vmatprep.subr.mxu0 %v11904_v8 }
0x1e44   : > { %10968 = vmatprep.mubr.msk.f32.mxu0 %vm11905_vm15, %v11904_v8  ;;  %10953 = vmatpush3.msra.mxu0 %v9772_v60 }
0x1e45   : > { %10954 = vmatprep.subr.mxu0 %v11904_v8 }
0x1e46   : > { %10955 = vmatpush3.msra.mxu0 %v9771_v61 }
0x1e47   : > { %10956 = vmatprep.subr.mxu0 %v11904_v8 }
0x1e48   : > { %10957 = vmatpush3.msra.mxu0 %v9770_v62 }
0x1e49   : > { %10958 = vmatprep.subr.mxu0 %v11904_v8 }
0x1e4a   : > { %10959 = vmatpush3.msra.mxu0 %v9769_v63 }
0x1e4b   : > { %10960 = vmatprep.subr.mxu0 %v11904_v8 }
0x1e4c   : > { %10961 = vmatpush3.msra.mxu0 %v9768_v0 }
0x1e4d   : > { %10962 = vmatprep.subr.mxu0 %v11904_v8 }
0x1e4e   : > { %10963 = vmatpush3.msra.mxu0 %v9767_v1  ;;  %v9781_v1 = vld [vmem:[%s12131_s8 + $0x468] sm:$0xff] }
0x1e4f   : > { %10964 = vmatprep.subr.mxu0 %v11904_v8 }
0x1e50   : > { %10965 = vmatpush3.msra.mxu0 %v9766_v2 }
0x1e51   : > { %10966 = vmatprep.subr.mxu0 %v11904_v8 }
0x1e52   : > { %10967 = vmatpush3.msra.mxu0 %v9765_v3 }
0x1e53   : > { %10969 = vmatmul.mubr.msk.f32.vlgmr.msra.gmra.mxu0 %vm800_vm14, %v12740_v38  ;;  %10991 = vmatprep.subr.mxu0 %v11904_v8 }
0x1e54   : > { %10995 = vmatprep.mubr.msk.f32.mxu0 %vm11905_vm15, %v11904_v8 }
0x1ef3   : > { %v3622_v29 = vpop.f32.mrf.mxu0 }
0x1ef4   : > { %v3623_v40 = vadd.f32 %v9722_v39, %v3622_v29  ;;  %v9779_v39 = vld [vmem:[%s12131_s8 + $0x458] sm:$0xff]  ;;  %v9778_v29 = vld [vmem:[%s12131_s8 + $0x450] sm:$0xff] }
0x1ef5   : > { %v10894_v41 = vpop.f32.mrf.mxu0  ;;  %10992 = vmatpush3.msra.mxu0 %v9779_v39 }
0x1ef6   : > { %v3626_v42 = vmax.f32 %v3623_v40, 0.0  ;;  %10993 = vmatprep.subr.mxu0 %v11904_v8 }
0x1ef7   : > { %10994 = vmatpush3.msra.mxu0 %v9778_v29 }
0x1ef8   : > { %10912 = vmatmul.mubr.msk.f32.vlgmr.msra.gmra.mxu1 %vm800_vm14, %v3626_v42  ;;  %11005 = vmatprep.subr.mxu0 %v11904_v8 }
0x1ef9   : > { %10934 = vmatpush3.msra.mxu1 %v9761_v43  ;;  %10949 = vmatprep.mubr.msk.f32.mxu1 %vm11905_vm15, %v11904_v8  ;;  %v9777_v43 = vld [vmem:[%s12131_s8 + $0x448] sm:$0xff] }
0x1efa   : > { %10935 = vmatprep.subr.mxu1 %v11904_v8 }
0x1efb   : > { %10936 = vmatpush3.msra.mxu1 %v9760_v44  ;;  %v9776_v44 = vld [vmem:[%s12131_s8 + $0x440] sm:$0xff] }
0x1efc   : > { %10937 = vmatprep.subr.mxu1 %v11904_v8 }
0x1efd   : > { %10938 = vmatpush3.msra.mxu1 %v9759_v45 }
0x1efe   : > { %10939 = vmatprep.subr.mxu1 %v11904_v8 }
0x1eff   : > { %10940 = vmatpush3.msra.mxu1 %v9758_v46 }
0x1f00   : > { %10941 = vmatprep.subr.mxu1 %v11904_v8 }
0x1f01   : > { %10942 = vmatpush3.msra.mxu1 %v9757_v34 }
0x1f02   : > { %10943 = vmatprep.subr.mxu1 %v11904_v8 }
0x1f03   : > { %10944 = vmatpush3.msra.mxu1 %v9756_v47  ;;  %v3866_v50 = vpop.f32.mrf.mxu0 }
0x1f04   : > { %10945 = vmatprep.subr.mxu1 %v11904_v8  ;;  %v12777_v58 = vadd.f32 %v9752_v56, %v3866_v50 }
0x1f05   : > { %10946 = vmatpush3.msra.mxu1 %v9755_v48  ;;  %v10932_v52 = vpop.f32.mrf.mxu0 }
0x1f06   : > { %10947 = vmatprep.subr.mxu1 %v11904_v8 }
0x1f07   : > { %10948 = vmatpush3.msra.mxu1 %v9754_v49 }
0x1f08   : > { %10950 = vmatmul.mubr.msk.f32.vlgmr.msra.gmra.mxu1 %vm800_vm14, %v12740_v38  ;;  %10971 = vmatprep.subr.mxu1 %v11904_v8 }
0x1f09   : > { %10973 = vmatprep.mubr.msk.f32.mxu1 %vm11905_vm15, %v11904_v8 }
0x1f13   : > { %v4040_v14 = vpop.f32.mrf.mxu0 }
0x1f14   : > { %v12811_v15 = vadd.f32 %v9774_v13, %v4040_v14 }
0x1f15   : > { %v10970_v16 = vpop.f32.mrf.mxu0 }
0x1fb8   : > { %v12771_v53 = vpop.f32.mrf.mxu1 }
0x1fba   : > { %v10913_v54 = vpop.f32.mrf.mxu1 }
0x1fc8   : > { %v3953_v51 = vpop.f32.mrf.mxu1 }
0x1fc9   : > { %v12775_v57 = vadd.f32 %v9763_v55, %v3953_v51 }
0x1fca   : > { %v10951_v59 = vpop.f32.mrf.mxu1 }
0x1fcb   : > { %4216 = vrot.lane.b32.xlu0 %v12775_v57, %s11906_s13  ;;  %10972 = vmatpush3.xpose.msk.msra.mxu1 %vm1057_vm0, %v12775_v57 }
0x1fcc   : > { %10976 = vmatprep.subr.mxu1 %v11904_v8 }
0x1fce   : > { %10974 = vmatmul.mubr.msk.f32.vlgmr.msra.gmra.mxu1 %vm1057_vm0, %v12777_v58 }
0x1fcf   : > { %10978 = vmatprep.mubr.msk.f32.mxu1 %vm11905_vm15, %v11904_v8  ;;  %10977 = vmatpush3.msra.mxu1 %v12811_v15 }
0x1fd0   : > { %10981 = vmatprep.subr.mxu1 %v11904_v8 }
0x203d   : > { %v4217_v20 = vpop.permute.xlu0 %4216 }
0x208e   : > { %v4125_v23 = vpop.f32.mrf.mxu1 }
0x208f   : > { %v4129_v4 = vmul.f32 0.25, %v4125_v23 }
0x2090   : > { %v10975_v5 = vpop.f32.mrf.mxu1 }
0x2091   : > { %v4130_v6 = vsel %vm1135_vm1, %v4129_v4, -inf }
0x2092   : > { %4131 = vmax.xlane.f32.xlu1 %v4130_v6 }
0x211b   : > { %v4132_v7 = vpop.xlane.xlu1 %4131 }
0x211c   : > { %v4133_v9 = vsub.f32 %v4129_v4, %v4132_v7  ;;  %v9780_v4 = vld [vmem:[%s12131_s8 + $0x460] sm:$0xff] }
0x211e   : > { %v4134_v10 = vmul.f32 1.442695, %v4133_v9 }
0x2120   : > { %11642 = vpow2.f32 %v4134_v10 }
0x212d   : > { %v11643_v11 = vpop.eup %11642 }
0x212e   : > { %v4136_v12 = vsel %vm1135_vm1, %v11643_v11, 0.0 }
0x212f   : > { %4137 = vadd.xlane.f32.xlu1 %v4136_v12 }
0x2140   : > { %4214 = vrot.lane.b32.xlu1 %v12777_v58, %s11906_s13 }
0x21b8   : > { %v4138_v17 = vpop.xlane.xlu1 %4137 }
0x21b9   : > { %11644 = vrcp.f32 %v4138_v17  ;;  %v9733_v17 = vld [vmem:[%s12133_s5 + $0x11] ss:$0 sm:$0xff] }
0x21bc   : > { %v4215_v21 = vpop.permute.xlu1 %4214 }
0x21c6   : > { %v11645_v18 = vpop.eup %11644 }
0x21c7   : > { %v4140_v19 = vmul.f32 %v11645_v18, %v11643_v11  ;;  %v3714_v18 = vadd.f32 %v9733_v17, %v12771_v53 }
0x21c9   : > { %10979 = vmatmul.mubr.msk.f32.vlgmr.msra.gmra.mxu1 %vm1135_vm1, %v4140_v19 }
0x21ca   : > { %10982 = vmatpush3.xpose.msk.msra.mxu1 %vm1057_vm0, %v4217_v20  ;;  %10983 = vmatprep.mubr.msk.f32.mxu1 %vm11905_vm15, %v11904_v8 }
0x21cb   : > { %10986 = vmatprep.subr.mxu1 %v11904_v8 }
0x21cd   : > { %10984 = vmatmul.mubr.msk.f32.vlgmr.msra.gmra.mxu1 %vm1057_vm0, %v4215_v21  ;;  %v3717_v21 = vadd.f32 %v3714_v18, %v12715_v25 }
0x21ce   : > { %10988 = vmatprep.mubr.msk.f32.mxu1 %vm11905_vm15, %v11904_v8 }
0x2289   : > { %v4210_v22 = vpop.f32.mrf.mxu1 }
0x228b   : > { %v10980_v24 = vpop.f32.mrf.mxu1 }
0x228d   : > { %v4288_v26 = vpop.f32.mrf.mxu1 }
0x228e   : > { %v4292_v27 = vmul.f32 0.25, %v4288_v26 }
0x228f   : > { %v10985_v28 = vpop.f32.mrf.mxu1 }
0x2290   : > { %v4293_v30 = vsel %vm1135_vm1, %v4292_v27, -inf }
0x2291   : > { %4294 = vmax.xlane.f32.xlu0 %v4293_v30 }
0x22a7   : > { %4305 = vrot.lane.b32.xlu0 %v12811_v15, %s11906_s13 }
0x22ab   : > { %4527 = vrot.lane.b32.xlu0 %v12777_v58, %s11907_s11 }
0x231a   : > { %v4295_v31 = vpop.xlane.xlu0 %4294 }
0x231b   : > { %v4296_v32 = vsub.f32 %v4292_v27, %v4295_v31 }
0x231d   : > { %v4297_v33 = vmul.f32 1.442695, %v4296_v32 }
0x231e   : > { %v4306_v35 = vpop.permute.xlu0 %4305 }
0x231f   : > { %11646 = vpow2.f32 %v4297_v33  ;;  %10987 = vmatpush3.msra.mxu1 %v4306_v35 }
0x2320   : > { %10998 = vmatprep.subr.mxu1 %v11904_v8 }
0x2322   : > { %v4528_v47 = vpop.permute.xlu0 %4527 }
0x232c   : > { %v11647_v36 = vpop.eup %11646 }
0x232d   : > { %v4299_v37 = vsel %vm1135_vm1, %v11647_v36, 0.0 }
0x232e   : > { %4300 = vadd.xlane.f32.xlu1 %v4299_v37  ;;  %v9782_v37 = vld [vmem:[%s12131_s8 + $0x470] sm:$0xff] }
0x233f   : > { %4529 = vrot.lane.b32.xlu1 %v12775_v57, %s11907_s11 }
0x23b7   : > { %v4301_v40 = vpop.xlane.xlu1 %4300 }
0x23b8   : > { %11648 = vrcp.f32 %v4301_v40 }
0x23bb   : > { %v4530_v46 = vpop.permute.xlu1 %4529 }
0x23c5   : > { %v11649_v41 = vpop.eup %11648 }
0x23c6   : > { %v4303_v42 = vmul.f32 %v11649_v41, %v11647_v36  ;;  %v9783_v36 = vld [vmem:[%s12131_s8 + $0x478] sm:$0xff] }
0x23c8   : > { %10989 = vmatmul.mubr.msk.f32.vlgmr.msra.gmra.mxu1 %vm1135_vm1, %v4303_v42  ;;  %v9737_v42 = vld [vmem:[%s12133_s5 + $0x14] ss:$0 sm:$0xff] }
0x23c9   : > { %10999 = vmatpush3.msra.mxu1 %v9777_v43  ;;  %11002 = vmatprep.mubr.msk.f32.mxu1 %vm11905_vm15, %v11904_v8 }
0x23ca   : > { %11000 = vmatprep.subr.mxu1 %v11904_v8 }
0x23cb   : > { %11001 = vmatpush3.msra.mxu1 %v9776_v44  ;;  %v9738_v44 = vld [vmem:[%s12133_s5 + $0x15] ss:$0 sm:$0xff] }
0x23cc   : > { %11003 = vmatmul.mubr.msk.f32.vlgmr.msra.gmra.mxu1 %vm1057_vm0, %v4210_v22  ;;  %11010 = vmatprep.subr.mxu1 %v11904_v8  ;;  %v3722_v22 = vsel %vm800_vm14, %v3717_v21, 0.0 }
0x23cd   : > { %11012 = vmatprep.mubr.msk.f32.mxu1 %vm11905_vm15, %v11904_v8 }
0x2488   : > { %v4377_v45 = vpop.f32.mrf.mxu1 }
0x2489   : > { %10996 = vmatmul.mubr.msk.f32.vlgmr.msra.gmra.mxu0 %vm1057_vm0, %v4377_v45 }
0x248a   : > { %11006 = vmatpush3.xpose.msk.msra.mxu0 %vm1057_vm0, %v4530_v46  ;;  %v10990_v34 = vpop.f32.mrf.mxu1  ;;  %11007 = vmatprep.mubr.msk.f32.mxu0 %vm11905_vm15, %v11904_v8 }
0x248b   : > { %11015 = vmatprep.subr.mxu0 %v11904_v8 }
0x248c   : > { %v12853_v48 = vpop.f32.mrf.mxu1 }
0x248d   : > { %11008 = vmatmul.mubr.msk.f32.vlgmr.msra.gmra.mxu0 %vm1057_vm0, %v4528_v47 }
0x248e   : > { %v11004_v49 = vpop.f32.mrf.mxu1  ;;  %11019 = vmatprep.mubr.msk.f32.mxu0 %vm11905_vm15, %v11904_v8  ;;  %11016 = vmatpush3.msra.mxu0 %v9781_v1 }
0x248f   : > { %11017 = vmatprep.subr.mxu0 %v11904_v8 }
0x2490   : > { %11018 = vmatpush3.msra.mxu0 %v9780_v4 }
0x2491   : > { %11027 = vmatprep.subr.mxu0 %v11904_v8 }
0x2549   : > { %v12858_v50 = vpop.f32.mrf.mxu0 }
0x254b   : > { %v10997_v52 = vpop.f32.mrf.mxu0 }
0x254d   : > { %v4601_v54 = vpop.f32.mrf.mxu0 }
0x254e   : > { %v4605_v55 = vmul.f32 0.25, %v4601_v54 }
0x254f   : > { %v11009_v56 = vpop.f32.mrf.mxu0 }
0x2550   : > { %v4606_v51 = vsel %vm1135_vm1, %v4605_v55, -inf  ;;  %v9824_v56 = vld [vmem:[%s12131_s8 + $0x4f8] sm:$0xff] }
0x2551   : > { %4607 = vmax.xlane.f32.xlu0 %v4606_v51  ;;  %v9823_v51 = vld [vmem:[%s12131_s8 + $0x4f0] sm:$0xff] }
0x2567   : > { %4617 = vrot.lane.b32.xlu0 %v12811_v15, %s11907_s11 }
0x256b   : > { %4767 = vrot.lane.b32.xlu0 %v12777_v58, %s11908_s26 }
0x25da   : > { %v4608_v59 = vpop.xlane.xlu0 %4607 }
0x25db   : > { %v4609_v60 = vsub.f32 %v4605_v55, %v4608_v59  ;;  %v9822_v59 = vld [vmem:[%s12131_s8 + $0x4e8] sm:$0xff] }
0x25dd   : > { %v4610_v61 = vmul.f32 1.442695, %v4609_v60  ;;  %v9821_v60 = vld [vmem:[%s12131_s8 + $0x4e0] sm:$0xff] }
0x25de   : > { %v4618_v62 = vpop.permute.xlu0 %4617 }
0x25df   : > { %11650 = vpow2.f32 %v4610_v61  ;;  %11011 = vmatpush3.msra.mxu1 %v4618_v62  ;;  %v9820_v61 = vld [vmem:[%s12131_s8 + $0x4d8] sm:$0xff]  ;;  %v9819_v62 = vld [vmem:[%s12131_s8 + $0x4d0] sm:$0xff] }
0x25e0   : > { %11022 = vmatprep.subr.mxu1 %v11904_v8 }
0x25ec   : > { %v11651_v63 = vpop.eup %11650 }
0x25ed   : > { %v4612_v0 = vsel %vm1135_vm1, %v11651_v63, 0.0 }
0x25ee   : > { %4613 = vadd.xlane.f32.xlu1 %v4612_v0  ;;  %v9817_v0 = vld [vmem:[%s12131_s8 + $0x4c0] sm:$0xff] }
0x25ff   : > { %4769 = vrot.lane.b32.xlu1 %v12775_v57, %s11908_s26  ;;  %v4768_v57 = vpop.permute.xlu0 %4767 }
0x2677   : > { %v4614_v58 = vpop.xlane.xlu1 %4613 }
0x2678   : > { %11652 = vrcp.f32 %v4614_v58  ;;  %v9801_v58 = vld [vmem:[%s12133_s5 + $0x19] ss:$0 sm:$0xff] }
0x267b   : > { %v4770_v23 = vpop.permute.xlu1 %4769 }
0x2685   : > { %v11653_v2 = vpop.eup %11652 }
0x2686   : > { %v4616_v3 = vmul.f32 %v11653_v2, %v11651_v63  ;;  %v9818_v63 = vld [vmem:[%s12131_s8 + $0x4c8] sm:$0xff] }
0x2688   : > { %11013 = vmatmul.mubr.msk.f32.vlgmr.msra.gmra.mxu1 %vm1135_vm1, %v4616_v3 }
0x2689   : > { %11023 = vmatpush3.xpose.msk.msra.mxu1 %vm1057_vm0, %v4770_v23  ;;  %11024 = vmatprep.mubr.msk.f32.mxu1 %vm11905_vm15, %v11904_v8 }
0x268a   : > { %11032 = vmatprep.subr.mxu1 %v11904_v8 }
0x268c   : > { %11025 = vmatmul.mubr.msk.f32.vlgmr.msra.gmra.mxu1 %vm1057_vm0, %v4768_v57 }
0x268d   : > { %11036 = vmatprep.mubr.msk.f32.mxu1 %vm11905_vm15, %v11904_v8  ;;  %11033 = vmatpush3.msra.mxu1 %v9783_v36 }
0x268e   : > { %11034 = vmatprep.subr.mxu1 %v11904_v8 }
0x268f   : > { %11035 = vmatpush3.msra.mxu1 %v9782_v37  ;;  %v9804_v37 = vld [vmem:[%s12133_s5 + $0x20] ss:$0 sm:$0xff] }
0x2690   : > { %11058 = vmatprep.subr.mxu1 %v11904_v8 }
0x2748   : > { %v4689_v5 = vpop.f32.mrf.mxu1 }
0x2749   : > { %11020 = vmatmul.mubr.msk.f32.vlgmr.msra.gmra.mxu0 %vm1057_vm0, %v4689_v5 }
0x274a   : > { %v11014_v6 = vpop.f32.mrf.mxu1  ;;  %11029 = vmatprep.mubr.msk.f32.mxu0 %vm11905_vm15, %v11904_v8 }
0x274c   : > { %v4841_v7 = vpop.f32.mrf.mxu1 }
0x274d   : > { %v4845_v9 = vmul.f32 0.25, %v4841_v7 }
0x274e   : > { %v11026_v10 = vpop.f32.mrf.mxu1 }
0x274f   : > { %v4846_v11 = vsel %vm1135_vm1, %v4845_v9, -inf  ;;  %v9741_v10 = vld [vmem:[%s12133_s5 + $0x36] ss:$0 sm:$0xff] }
0x2750   : > { %4847 = vmax.xlane.f32.xlu0 %v4846_v11 }
0x2766   : > { %4857 = vrot.lane.b32.xlu0 %v12811_v15, %s11908_s26  ;;  %v4524_v15 = vadd.f32 %v12853_v48, %v12858_v50 }
0x27d9   : > { %v4848_v12 = vpop.xlane.xlu0 %4847 }
0x27da   : > { %v4849_v13 = vsub.f32 %v4845_v9, %v4848_v12  ;;  %v9742_v12 = vld [vmem:[%s12133_s5 + $0x37] ss:$0 sm:$0xff] }
0x27dc   : > { %v4850_v14 = vmul.f32 1.442695, %v4849_v13 }
0x27dd   : > { %v4858_v16 = vpop.permute.xlu0 %4857 }
0x27de   : > { %11654 = vpow2.f32 %v4850_v14  ;;  %11028 = vmatpush3.msra.mxu0 %v4858_v16 }
0x27df   : > { %11039 = vmatprep.subr.mxu0 %v11904_v8 }
0x27eb   : > { %v11655_v19 = vpop.eup %11654 }
0x27ec   : > { %v4852_v20 = vsel %vm1135_vm1, %v11655_v19, 0.0 }
0x27ed   : > { %4853 = vadd.xlane.f32.xlu1 %v4852_v20  ;;  %v9813_v20 = vld [vmem:[%s12131_s8 + $0x4b8] sm:$0xff] }
0x27f1   : > { %3723 = vadd.xlane.f32.xlu1 %v3722_v22  ;;  %v9811_v22 = vld [vmem:[%s12131_s8 + $0x4a8] sm:$0xff] }
0x2809   : > { %v4762_v24 = vpop.f32.mrf.mxu0 }
0x280a   : > { %v12895_v26 = vadd.f32 %v4762_v24, %v4524_v15  ;;  %v9810_v15 = vld [vmem:[%s12131_s8 + $0x4a0] sm:$0xff]  ;;  %v9809_v24 = vld [vmem:[%s12131_s8 + $0x498] sm:$0xff] }
0x280b   : > { %v11021_v27 = vpop.f32.mrf.mxu0 }
0x280c   : > { %v9807_v27 = vld [vmem:[%s12131_s8 + $0x488] sm:$0xff] }
0x2876   : > { %v4854_v28 = vpop.xlane.xlu1 %4853 }
0x2877   : > { %11656 = vrcp.f32 %v4854_v28  ;;  %v9806_v28 = vld [vmem:[%s12131_s8 + $0x480] sm:$0xff] }
0x287a   : > { %v3724_v53 = vpop.xlane.xlu1 %3723 }
0x287b   : > { %v3725_v30 = vmul.f32 0.015625, %v3724_v53  ;;  %v9826_v53 = vld [vmem:[%s12133_s5 + $0x1b] ss:$0 sm:$0xff] }
0x287d   : > { %v3726_v31 = vsub.f32 %v3717_v21, %v3725_v30  ;;  %v9812_v21 = vld [vmem:[%s12131_s8 + $0x4b0] sm:$0xff] }
0x287f   : > { %v3727_v32 = vmul.f32 %v3726_v31, %v3726_v31 }
0x2881   : > { %v3728_v25 = vsel %vm800_vm14, %v3727_v32, 0.0 }
0x2882   : > { %3729 = vadd.xlane.f32.xlu1 %v3728_v25 }
0x2884   : > { %v11657_v33 = vpop.eup %11656 }
0x2885   : > { %v4856_v35 = vmul.f32 %v11657_v33, %v11655_v19 }
0x2887   : > { %11030 = vmatmul.mubr.msk.f32.vlgmr.msra.gmra.mxu0 %vm1135_vm1, %v4856_v35 }
0x2888   : > { %11055 = vmatprep.mubr.msk.f32.mxu0 %vm11905_vm15, %v11904_v8  ;;  %11040 = vmatpush3.msra.mxu0 %v9813_v20 }
0x2889   : > { %11041 = vmatprep.subr.mxu0 %v11904_v8 }
0x288a   : > { %11042 = vmatpush3.msra.mxu0 %v9812_v21  ;;  %v9842_v21 = vld [vmem:[%s12131_s8 + $0x558] sm:$0xff] }
0x288b   : > { %11043 = vmatprep.subr.mxu0 %v11904_v8 }
0x288c   : > { %11044 = vmatpush3.msra.mxu0 %v9811_v22  ;;  %v9841_v22 = vld [vmem:[%s12131_s8 + $0x550] sm:$0xff] }
0x288d   : > { %11045 = vmatprep.subr.mxu0 %v11904_v8 }
0x288e   : > { %11046 = vmatpush3.msra.mxu0 %v9810_v15 }
0x288f   : > { %11047 = vmatprep.subr.mxu0 %v11904_v8 }
0x2890   : > { %11048 = vmatpush3.msra.mxu0 %v9809_v24 }
0x2891   : > { %11049 = vmatprep.subr.mxu0 %v11904_v8 }
0x290b   : > { %v3730_v39 = vpop.xlane.xlu1 %3729 }
0x290c   : > { %v3731_v29 = vmul.f32 0.015625, %v3730_v39 }
0x290e   : > { %v3732_v40 = vadd.f32 1e-05, %v3731_v29  ;;  %v9805_v29 = vld [vmem:[%s12133_s5 + $0x21] ss:$0 sm:$0xff] }
0x2910   : > { %11658 = vrsqrt.f32 %v3732_v40 }
0x291d   : > { %v11659_v41 = vpop.eup %11658 }
0x291e   : > { %v3734_v43 = vmul.f32 %v11659_v41, %v3726_v31 }
0x2920   : > { %v3741_v45 = vmul.f32 %v9737_v42, %v3734_v43  ;;  %v9835_v42 = vld [vmem:[%s12131_s8 + $0x538] sm:$0xff]  ;;  %v9834_v43 = vld [vmem:[%s12131_s8 + $0x530] sm:$0xff] }
0x2922   : > { %v3748_v46 = vadd.f32 %v9738_v44, %v3741_v45  ;;  %v9833_v44 = vld [vmem:[%s12131_s8 + $0x528] sm:$0xff]  ;;  %v9832_v45 = vld [vmem:[%s12131_s8 + $0x520] sm:$0xff] }
0x2924   : > { %v3753_v34 = vsel %vm800_vm14, %v3748_v46, 0.0 }
0x2925   : > { %3754 = vadd.xlane.f32.xlu1 %v3753_v34  ;;  %v9830_v34 = vld [vmem:[%s12131_s8 + $0x510] sm:$0xff] }
0x2947   : > { %v4929_v47 = vpop.f32.mrf.mxu0 }
0x2948   : > { %11037 = vmatmul.mubr.msk.f32.vlgmr.msra.gmra.mxu1 %vm1057_vm0, %v4929_v47  ;;  %v9829_v47 = vld [vmem:[%s12131_s8 + $0x508] sm:$0xff] }
0x2949   : > { %v11031_v48 = vpop.f32.mrf.mxu0  ;;  %11074 = vmatprep.mubr.msk.f32.mxu1 %vm11905_vm15, %v11904_v8  ;;  %11059 = vmatpush3.msra.mxu1 %v9824_v56 }
0x294a   : > { %11060 = vmatprep.subr.mxu1 %v11904_v8  ;;  %v9828_v48 = vld [vmem:[%s12131_s8 + $0x500] sm:$0xff] }
0x294b   : > { %11061 = vmatpush3.msra.mxu1 %v9823_v51 }
0x294c   : > { %11062 = vmatprep.subr.mxu1 %v11904_v8 }
0x294d   : > { %11063 = vmatpush3.msra.mxu1 %v9822_v59 }
0x294e   : > { %11064 = vmatprep.subr.mxu1 %v11904_v8 }
0x294f   : > { %11065 = vmatpush3.msra.mxu1 %v9821_v60 }
0x2950   : > { %11066 = vmatprep.subr.mxu1 %v11904_v8 }
0x2951   : > { %11067 = vmatpush3.msra.mxu1 %v9820_v61 }
0x2952   : > { %11068 = vmatprep.subr.mxu1 %v11904_v8 }
0x2953   : > { %11069 = vmatpush3.msra.mxu1 %v9819_v62 }
0x2954   : > { %11070 = vmatprep.subr.mxu1 %v11904_v8 }
0x2955   : > { %11071 = vmatpush3.msra.mxu1 %v9818_v63 }
0x2956   : > { %11072 = vmatprep.subr.mxu1 %v11904_v8 }
0x2957   : > { %11073 = vmatpush3.msra.mxu1 %v9817_v0 }
0x2958   : > { %11096 = vmatprep.subr.mxu1 %v11904_v8 }
0x29ae   : > { %v3755_v49 = vpop.xlane.xlu1 %3754 }
0x29af   : > { %v3756_v50 = vmul.f32 0.015625, %v3755_v49  ;;  %v9815_v49 = vld [vmem:[%s12133_s5 + $0x1a] ss:$0 sm:$0xff] }
0x29b1   : > { %v3757_v52 = vsub.f32 %v3748_v46, %v3756_v50  ;;  %v9831_v46 = vld [vmem:[%s12131_s8 + $0x518] sm:$0xff] }
0x29b3   : > { %v3758_v54 = vmul.f32 %v3757_v52, %v3757_v52 }
0x29b5   : > { %v3759_v55 = vsel %vm800_vm14, %v3758_v54, 0.0 }
0x29b6   : > { %3760 = vadd.xlane.f32.xlu1 %v3759_v55  ;;  %v9837_v55 = vld [vmem:[%s12133_s5 + $0x1c] ss:$0 sm:$0xff] }
0x2a08   : > { %v5002_v1 = vpop.f32.mrf.mxu1 }
0x2a09   : > { %v5006_v2 = vadd.f32 %v5002_v1, %v12895_v26  ;;  %v9808_v26 = vld [vmem:[%s12131_s8 + $0x490] sm:$0xff] }
0x2a0a   : > { %v11038_v3 = vpop.f32.mrf.mxu1  ;;  %11050 = vmatpush3.msra.mxu0 %v9808_v26 }
0x2a0b   : > { %v5015_v23 = vadd.f32 %v9801_v58, %v5006_v2  ;;  %11051 = vmatprep.subr.mxu0 %v11904_v8 }
0x2a0c   : > { %11052 = vmatpush3.msra.mxu0 %v9807_v27  ;;  %v9840_v27 = vld [vmem:[%s12131_s8 + $0x548] sm:$0xff] }
0x2a0d   : > { %v5016_v57 = vadd.f32 %v5015_v23, %v12740_v38  ;;  %11053 = vmatprep.subr.mxu0 %v11904_v8 }
0x2a0e   : > { %11054 = vmatpush3.msra.mxu0 %v9806_v28  ;;  %v9839_v28 = vld [vmem:[%s12131_s8 + $0x540] sm:$0xff] }
0x2a0f   : > { %v5021_v4 = vsel %vm800_vm14, %v5016_v57, 0.0  ;;  %11077 = vmatprep.subr.mxu0 %v11904_v8 }
0x2a10   : > { %5022 = vadd.xlane.f32.xlu0 %v5021_v4 }
0x2a3f   : > { %v3761_v5 = vpop.xlane.xlu1 %3760 }
0x2a40   : > { %v3762_v6 = vmul.f32 0.015625, %v3761_v5 }
0x2a42   : > { %v3763_v7 = vadd.f32 1e-05, %v3762_v6 }
0x2a44   : > { %11660 = vrsqrt.f32 %v3763_v7 }
0x2a51   : > { %v11661_v9 = vpop.eup %11660 }
0x2a52   : > { %v3765_v11 = vmul.f32 %v11661_v9, %v3757_v52 }
0x2a54   : > { %v3772_v13 = vmul.f32 %v9741_v10, %v3765_v11 }
0x2a56   : > { %v12934_v14 = vadd.f32 %v9742_v12, %v3772_v13 }
0x2a58   : > { %11075 = vmatmul.mubr.msk.f32.vlgmr.msra.gmra.mxu1 %vm800_vm14, %v12934_v14 }
0x2a59   : > { %11098 = vmatprep.mubr.msk.f32.mxu1 %vm11905_vm15, %v11904_v8 }
0x2a99   : > { %v5023_v38 = vpop.xlane.xlu0 %5022 }
0x2a9a   : > { %v5024_v16 = vmul.f32 0.015625, %v5023_v38 }
0x2a9c   : > { %v5025_v17 = vsub.f32 %v5016_v57, %v5024_v16 }
0x2a9e   : > { %v5026_v18 = vmul.f32 %v5025_v17, %v5025_v17 }
0x2aa0   : > { %v5027_v19 = vsel %vm800_vm14, %v5026_v18, 0.0 }
0x2aa1   : > { %5028 = vadd.xlane.f32.xlu1 %v5027_v19 }
0x2b18   : > { %v5224_v30 = vpop.f32.mrf.mxu1 }
0x2b19   : > { %v12958_v31 = vadd.f32 %v9826_v53, %v5224_v30 }
0x2b1a   : > { %v11076_v32 = vpop.f32.mrf.mxu1 }
0x2b1b   : > { %11097 = vmatpush3.xpose.msk.msra.mxu1 %vm1057_vm0, %v12958_v31 }
0x2b1c   : > { %11101 = vmatprep.subr.mxu1 %v11904_v8 }
0x2b2a   : > { %v5029_v25 = vpop.xlane.xlu1 %5028 }
0x2b2b   : > { %v5030_v33 = vmul.f32 0.015625, %v5029_v25 }
0x2b2d   : > { %v5031_v35 = vadd.f32 1e-05, %v5030_v33 }
0x2b2f   : > { %11662 = vrsqrt.f32 %v5031_v35 }
0x2b3c   : > { %v11663_v36 = vpop.eup %11662 }
0x2b3d   : > { %v5033_v39 = vmul.f32 %v11663_v36, %v5025_v17 }
0x2b3f   : > { %v5040_v40 = vmul.f32 %v9804_v37, %v5033_v39 }
0x2b41   : > { %v12965_v41 = vadd.f32 %v9805_v29, %v5040_v40 }
0x2b43   : > { %11056 = vmatmul.mubr.msk.f32.vlgmr.msra.gmra.mxu0 %vm800_vm14, %v12965_v41 }
0x2b44   : > { %11078 = vmatpush3.msra.mxu0 %v9835_v42  ;;  %11093 = vmatprep.mubr.msk.f32.mxu0 %vm11905_vm15, %v11904_v8 }
0x2b45   : > { %11079 = vmatprep.subr.mxu0 %v11904_v8 }
0x2b46   : > { %11080 = vmatpush3.msra.mxu0 %v9834_v43 }
0x2b47   : > { %11081 = vmatprep.subr.mxu0 %v11904_v8 }
0x2b48   : > { %11082 = vmatpush3.msra.mxu0 %v9833_v44 }
0x2b49   : > { %11083 = vmatprep.subr.mxu0 %v11904_v8 }
0x2b4a   : > { %11084 = vmatpush3.msra.mxu0 %v9832_v45 }
0x2b4b   : > { %11085 = vmatprep.subr.mxu0 %v11904_v8 }
0x2b4c   : > { %11086 = vmatpush3.msra.mxu0 %v9831_v46 }
0x2b4d   : > { %11087 = vmatprep.subr.mxu0 %v11904_v8 }
0x2b4e   : > { %11088 = vmatpush3.msra.mxu0 %v9830_v34 }
0x2b4f   : > { %11089 = vmatprep.subr.mxu0 %v11904_v8 }
0x2b50   : > { %11090 = vmatpush3.msra.mxu0 %v9829_v47 }
0x2b51   : > { %11091 = vmatprep.subr.mxu0 %v11904_v8 }
0x2b52   : > { %11092 = vmatpush3.msra.mxu0 %v9828_v48  ;;  %v9844_v48 = vld [vmem:[%s12131_s8 + $0x568] sm:$0xff] }
0x2b53   : > { %11094 = vmatmul.mubr.msk.f32.vlgmr.msra.gmra.mxu0 %vm800_vm14, %v12934_v14  ;;  %11116 = vmatprep.subr.mxu0 %v11904_v8 }
0x2b54   : > { %11120 = vmatprep.mubr.msk.f32.mxu0 %vm11905_vm15, %v11904_v8  ;;  %11117 = vmatpush3.msra.mxu0 %v9842_v21 }
0x2b55   : > { %11118 = vmatprep.subr.mxu0 %v11904_v8 }
0x2b56   : > { %11119 = vmatpush3.msra.mxu0 %v9841_v22 }
0x2b57   : > { %11130 = vmatprep.subr.mxu0 %v11904_v8 }
0x2c03   : > { %v5134_v50 = vpop.f32.mrf.mxu0 }
0x2c04   : > { %v12992_v52 = vadd.f32 %v9815_v49, %v5134_v50 }
0x2c05   : > { %v11057_v54 = vpop.f32.mrf.mxu0 }
0x2c06   : > { %5485 = vrot.lane.b32.xlu0 %v12992_v52, %s11906_s13  ;;  %11099 = vmatmul.mubr.msk.f32.vlgmr.msra.gmra.mxu1 %vm1057_vm0, %v12992_v52 }
0x2c07   : > { %11103 = vmatprep.mubr.msk.f32.mxu1 %vm11905_vm15, %v11904_v8 }
0x2c13   : > { %v5311_v56 = vpop.f32.mrf.mxu0 }
0x2c14   : > { %v13001_v51 = vadd.f32 %v9837_v55, %v5311_v56  ;;  %v9843_v55 = vld [vmem:[%s12131_s8 + $0x560] sm:$0xff] }
0x2c15   : > { %v11095_v59 = vpop.f32.mrf.mxu0 }
0x2c16   : > { %11102 = vmatpush3.msra.mxu1 %v13001_v51 }
0x2c17   : > { %11106 = vmatprep.subr.mxu1 %v11904_v8 }
0x2c78   : > { %v5486_v6 = vpop.permute.xlu0 %5485 }
0x2cc6   : > { %v5396_v60 = vpop.f32.mrf.mxu1 }
0x2cc7   : > { %v5400_v61 = vmul.f32 0.25, %v5396_v60 }
0x2cc8   : > { %v11100_v62 = vpop.f32.mrf.mxu1 }
0x2cc9   : > { %v5401_v63 = vsel %vm1135_vm1, %v5400_v61, -inf }
0x2cca   : > { %5402 = vmax.xlane.f32.xlu1 %v5401_v63 }
0x2d53   : > { %v5403_v0 = vpop.xlane.xlu1 %5402 }
0x2d54   : > { %v5404_v1 = vsub.f32 %v5400_v61, %v5403_v0 }
0x2d56   : > { %v5405_v58 = vmul.f32 1.442695, %v5404_v1 }
0x2d58   : > { %11664 = vpow2.f32 %v5405_v58 }
0x2d65   : > { %v11665_v2 = vpop.eup %11664 }
0x2d66   : > { %v5407_v3 = vsel %vm1135_vm1, %v11665_v2, 0.0 }
0x2d67   : > { %5408 = vadd.xlane.f32.xlu1 %v5407_v3 }
0x2d78   : > { %5487 = vrot.lane.b32.xlu1 %v12958_v31, %s11906_s13 }
0x2df0   : > { %v5409_v23 = vpop.xlane.xlu1 %5408 }
0x2df1   : > { %11666 = vrcp.f32 %v5409_v23 }
0x2df4   : > { %v5488_v5 = vpop.permute.xlu1 %5487 }
0x2dfe   : > { %v11667_v57 = vpop.eup %11666 }
0x2dff   : > { %v5411_v4 = vmul.f32 %v11667_v57, %v11665_v2  ;;  %v9846_v57 = vld [vmem:[%s12131_s8 + $0x578] sm:$0xff] }
0x2e01   : > { %11104 = vmatmul.mubr.msk.f32.vlgmr.msra.gmra.mxu1 %vm1135_vm1, %v5411_v4 }
0x2e02   : > { %11107 = vmatpush3.xpose.msk.msra.mxu1 %vm1057_vm0, %v5488_v5  ;;  %11108 = vmatprep.mubr.msk.f32.mxu1 %vm11905_vm15, %v11904_v8 }
0x2e03   : > { %11111 = vmatprep.subr.mxu1 %v11904_v8 }
0x2e05   : > { %11109 = vmatmul.mubr.msk.f32.vlgmr.msra.gmra.mxu1 %vm1057_vm0, %v5486_v6 }
0x2e06   : > { %11113 = vmatprep.mubr.msk.f32.mxu1 %vm11905_vm15, %v11904_v8 }
0x2ec1   : > { %v5481_v7 = vpop.f32.mrf.mxu1 }
0x2ec3   : > { %v11105_v9 = vpop.f32.mrf.mxu1 }
0x2ec5   : > { %v5559_v10 = vpop.f32.mrf.mxu1 }
0x2ec6   : > { %v5563_v11 = vmul.f32 0.25, %v5559_v10 }
0x2ec7   : > { %v11110_v12 = vpop.f32.mrf.mxu1 }
0x2ec8   : > { %v5564_v13 = vsel %vm1135_vm1, %v5563_v11, -inf }
0x2ec9   : > { %5565 = vmax.xlane.f32.xlu1 %v5564_v13 }
0x2eda   : > { %5576 = vrot.lane.b32.xlu1 %v13001_v51, %s11906_s13 }
0x2ede   : > { %5798 = vrot.lane.b32.xlu1 %v12992_v52, %s11907_s11 }
0x2f52   : > { %v5566_v38 = vpop.xlane.xlu1 %5565 }
0x2f53   : > { %v5567_v16 = vsub.f32 %v5563_v11, %v5566_v38  ;;  %v9845_v11 = vld [vmem:[%s12131_s8 + $0x570] sm:$0xff] }
0x2f55   : > { %v5568_v17 = vmul.f32 1.442695, %v5567_v16  ;;  %v9864_v16 = vld [vmem:[%s12133_s5 + $0x1d] ss:$0 sm:$0xff] }
0x2f56   : > { %v5577_v18 = vpop.permute.xlu1 %5576 }
0x2f57   : > { %11668 = vpow2.f32 %v5568_v17  ;;  %11112 = vmatpush3.msra.mxu1 %v5577_v18 }
0x2f58   : > { %11123 = vmatprep.subr.mxu1 %v11904_v8 }
0x2f5a   : > { %v5799_v25 = vpop.permute.xlu1 %5798 }
0x2f64   : > { %v11669_v19 = vpop.eup %11668 }
0x2f65   : > { %v5570_v20 = vsel %vm1135_vm1, %v11669_v19, 0.0 }
0x2f66   : > { %5571 = vadd.xlane.f32.xlu0 %v5570_v20 }
0x2f7c   : > { %5800 = vrot.lane.b32.xlu0 %v12958_v31, %s11907_s11 }
0x2fef   : > { %v5572_v15 = vpop.xlane.xlu0 %5571 }
0x2ff0   : > { %11670 = vrcp.f32 %v5572_v15 }
0x2ff3   : > { %v5801_v30 = vpop.permute.xlu0 %5800 }
0x2ffd   : > { %v11671_v24 = vpop.eup %11670 }
0x2ffe   : > { %v5574_v26 = vmul.f32 %v11671_v24, %v11669_v19 }
0x3000   : > { %11114 = vmatmul.mubr.msk.f32.vlgmr.msra.gmra.mxu1 %vm1135_vm1, %v5574_v26 }
0x3001   : > { %11124 = vmatpush3.msra.mxu1 %v9840_v27  ;;  %11127 = vmatprep.mubr.msk.f32.mxu1 %vm11905_vm15, %v11904_v8 }
0x3002   : > { %11125 = vmatprep.subr.mxu1 %v11904_v8 }
0x3003   : > { %11126 = vmatpush3.msra.mxu1 %v9839_v28  ;;  %v9876_v28 = vld [vmem:[%s12131_s8 + $0x5b8] sm:$0xff] }
0x3004   : > { %11128 = vmatmul.mubr.msk.f32.vlgmr.msra.gmra.mxu1 %vm1057_vm0, %v5481_v7  ;;  %11135 = vmatprep.subr.mxu1 %v11904_v8 }
0x3005   : > { %11137 = vmatprep.mubr.msk.f32.mxu1 %vm11905_vm15, %v11904_v8 }
0x30c0   : > { %v5648_v53 = vpop.f32.mrf.mxu1 }
0x30c1   : > { %11121 = vmatmul.mubr.msk.f32.vlgmr.msra.gmra.mxu0 %vm1057_vm0, %v5648_v53  ;;  %v9875_v53 = vld [vmem:[%s12131_s8 + $0x5b0] sm:$0xff] }
0x30c2   : > { %11131 = vmatpush3.xpose.msk.msra.mxu0 %vm1057_vm0, %v5801_v30  ;;  %v11115_v32 = vpop.f32.mrf.mxu1  ;;  %11132 = vmatprep.mubr.msk.f32.mxu0 %vm11905_vm15, %v11904_v8  ;;  %v9873_v30 = vld [vmem:[%s12131_s8 + $0x5a0] sm:$0xff] }
0x30c3   : > { %11140 = vmatprep.subr.mxu0 %v11904_v8  ;;  %v9872_v32 = vld [vmem:[%s12131_s8 + $0x598] sm:$0xff] }
0x30c4   : > { %v13045_v33 = vpop.f32.mrf.mxu1 }
0x30c5   : > { %11133 = vmatmul.mubr.msk.f32.vlgmr.msra.gmra.mxu0 %vm1057_vm0, %v5799_v25  ;;  %v9871_v25 = vld [vmem:[%s12131_s8 + $0x590] sm:$0xff] }
0x30c6   : > { %v11129_v35 = vpop.f32.mrf.mxu1  ;;  %11144 = vmatprep.mubr.msk.f32.mxu0 %vm11905_vm15, %v11904_v8  ;;  %11141 = vmatpush3.msra.mxu0 %v9844_v48 }
0x30c7   : > { %11142 = vmatprep.subr.mxu0 %v11904_v8  ;;  %v9869_v35 = vld [vmem:[%s12131_s8 + $0x580] sm:$0xff] }
0x30c8   : > { %11143 = vmatpush3.msra.mxu0 %v9843_v55 }
0x30c9   : > { %11152 = vmatprep.subr.mxu0 %v11904_v8 }
0x3181   : > { %v5721_v36 = vpop.f32.mrf.mxu0 }
0x3182   : > { %v5795_v4 = vadd.f32 %v13045_v33, %v5721_v36  ;;  %v9870_v33 = vld [vmem:[%s12131_s8 + $0x588] sm:$0xff]  ;;  %v9887_v36 = vld [vmem:[%s12131_s8 + $0x5f8] sm:$0xff] }
0x3183   : > { %v11122_v37 = vpop.f32.mrf.mxu0 }
0x3184   : > { %v9886_v37 = vld [vmem:[%s12131_s8 + $0x5f0] sm:$0xff] }
0x3185   : > { %v5872_v39 = vpop.f32.mrf.mxu0 }
0x3186   : > { %v5876_v29 = vmul.f32 0.25, %v5872_v39  ;;  %v9885_v39 = vld [vmem:[%s12131_s8 + $0x5e8] sm:$0xff] }
0x3187   : > { %v11134_v40 = vpop.f32.mrf.mxu0 }
0x3188   : > { %v5877_v42 = vsel %vm1135_vm1, %v5876_v29, -inf  ;;  %v9883_v40 = vld [vmem:[%s12131_s8 + $0x5d8] sm:$0xff] }
0x3189   : > { %5878 = vmax.xlane.f32.xlu1 %v5877_v42 }
0x319a   : > { %5888 = vrot.lane.b32.xlu1 %v13001_v51, %s11907_s11 }
0x319e   : > { %6038 = vrot.lane.b32.xlu1 %v12992_v52, %s11908_s26 }
0x3212   : > { %v5879_v43 = vpop.xlane.xlu1 %5878 }
0x3213   : > { %v5880_v44 = vsub.f32 %v5876_v29, %v5879_v43  ;;  %v9884_v29 = vld [vmem:[%s12131_s8 + $0x5e0] sm:$0xff] }
0x3215   : > { %v5881_v45 = vmul.f32 1.442695, %v5880_v44 }
0x3216   : > { %v5889_v46 = vpop.permute.xlu1 %5888 }
0x3217   : > { %11672 = vpow2.f32 %v5881_v45  ;;  %11136 = vmatpush3.msra.mxu1 %v5889_v46  ;;  %v9867_v46 = vld [vmem:[%s12133_s5 + $0x22] ss:$0 sm:$0xff] }
0x3218   : > { %11147 = vmatprep.subr.mxu1 %v11904_v8 }
0x3224   : > { %v11673_v34 = vpop.eup %11672 }
0x3225   : > { %v5883_v47 = vsel %vm1135_vm1, %v11673_v34, 0.0 }
0x3226   : > { %5884 = vadd.xlane.f32.xlu0 %v5883_v47  ;;  %v9868_v47 = vld [vmem:[%s12133_s5 + $0x23] ss:$0 sm:$0xff] }
0x323c   : > { %6040 = vrot.lane.b32.xlu0 %v12958_v31, %s11908_s26  ;;  %v6039_v31 = vpop.permute.xlu1 %6038 }
0x32af   : > { %v5885_v49 = vpop.xlane.xlu0 %5884 }
0x32b0   : > { %11674 = vrcp.f32 %v5885_v49 }
0x32b3   : > { %v6041_v54 = vpop.permute.xlu0 %6040 }
0x32bd   : > { %v11675_v50 = vpop.eup %11674 }
0x32be   : > { %v5887_v52 = vmul.f32 %v11675_v50, %v11673_v34  ;;  %v9882_v50 = vld [vmem:[%s12131_s8 + $0x5d0] sm:$0xff] }
0x32c0   : > { %11138 = vmatmul.mubr.msk.f32.vlgmr.msra.gmra.mxu1 %vm1135_vm1, %v5887_v52  ;;  %v9881_v52 = vld [vmem:[%s12131_s8 + $0x5c8] sm:$0xff] }
0x32c1   : > { %11148 = vmatpush3.xpose.msk.msra.mxu1 %vm1057_vm0, %v6041_v54  ;;  %11149 = vmatprep.mubr.msk.f32.mxu1 %vm11905_vm15, %v11904_v8  ;;  %v9880_v54 = vld [vmem:[%s12131_s8 + $0x5c0] sm:$0xff] }
0x32c2   : > { %11157 = vmatprep.subr.mxu1 %v11904_v8 }
0x32c4   : > { %11150 = vmatmul.mubr.msk.f32.vlgmr.msra.gmra.mxu1 %vm1057_vm0, %v6039_v31  ;;  %v9878_v31 = vld [vmem:[%s12133_s5 + $0x1e] ss:$0 sm:$0xff] }
0x32c5   : > { %11161 = vmatprep.mubr.msk.f32.mxu1 %vm11905_vm15, %v11904_v8  ;;  %11158 = vmatpush3.msra.mxu1 %v9846_v57 }
0x32c6   : > { %11159 = vmatprep.subr.mxu1 %v11904_v8 }
0x32c7   : > { %11160 = vmatpush3.msra.mxu1 %v9845_v11  ;;  %v9899_v11 = vld [vmem:[%s12131_s8 + $0x620] sm:$0xff] }
0x32c8   : > { %11183 = vmatprep.subr.mxu1 %v11904_v8 }
0x3380   : > { %v5960_v56 = vpop.f32.mrf.mxu1 }
0x3381   : > { %11145 = vmatmul.mubr.msk.f32.vlgmr.msra.gmra.mxu0 %vm1057_vm0, %v5960_v56 }
0x3382   : > { %v11139_v59 = vpop.f32.mrf.mxu1  ;;  %11154 = vmatprep.mubr.msk.f32.mxu0 %vm11905_vm15, %v11904_v8 }
0x3384   : > { %v6112_v60 = vpop.f32.mrf.mxu1 }
0x3385   : > { %v6116_v61 = vmul.f32 0.25, %v6112_v60 }
0x3386   : > { %v11151_v62 = vpop.f32.mrf.mxu1 }
0x3387   : > { %v6117_v63 = vsel %vm1135_vm1, %v6116_v61, -inf }
0x3388   : > { %6118 = vmax.xlane.f32.xlu1 %v6117_v63 }
0x3399   : > { %6128 = vrot.lane.b32.xlu1 %v13001_v51, %s11908_s26 }
0x3411   : > { %v6119_v0 = vpop.xlane.xlu1 %6118 }
0x3412   : > { %v6120_v1 = vsub.f32 %v6116_v61, %v6119_v0  ;;  %v9889_v61 = vld [vmem:[%s12133_s5 + $0x1f] ss:$0 sm:$0xff] }
0x3414   : > { %v6121_v58 = vmul.f32 1.442695, %v6120_v1 }
0x3415   : > { %v6129_v2 = vpop.permute.xlu1 %6128 }
0x3416   : > { %11676 = vpow2.f32 %v6121_v58  ;;  %11153 = vmatpush3.msra.mxu0 %v6129_v2 }
0x3417   : > { %11164 = vmatprep.subr.mxu0 %v11904_v8 }
0x3423   : > { %v11677_v3 = vpop.eup %11676 }
0x3424   : > { %v6123_v23 = vsel %vm1135_vm1, %v11677_v3, 0.0 }
0x3425   : > { %6124 = vadd.xlane.f32.xlu0 %v6123_v23 }
0x3441   : > { %v6033_v5 = vpop.f32.mrf.mxu0 }
0x3442   : > { %v6037_v51 = vadd.f32 %v6033_v5, %v5795_v4  ;;  %v9902_v5 = vld [vmem:[%s12131_s8 + $0x638] sm:$0xff] }
0x3443   : > { %v11146_v6 = vpop.f32.mrf.mxu0 }
0x3444   : > { %v9901_v6 = vld [vmem:[%s12131_s8 + $0x630] sm:$0xff] }
0x34ae   : > { %v6125_v7 = vpop.xlane.xlu0 %6124 }
0x34af   : > { %11678 = vrcp.f32 %v6125_v7  ;;  %v9912_v7 = vld [vmem:[%s12131_s8 + $0x670] sm:$0xff] }
0x34bc   : > { %v11679_v9 = vpop.eup %11678 }
0x34bd   : > { %v6127_v10 = vmul.f32 %v11679_v9, %v11677_v3  ;;  %v9900_v9 = vld [vmem:[%s12131_s8 + $0x628] sm:$0xff] }
0x34bf   : > { %11155 = vmatmul.mubr.msk.f32.vlgmr.msra.gmra.mxu0 %vm1135_vm1, %v6127_v10  ;;  %v9911_v10 = vld [vmem:[%s12131_s8 + $0x668] sm:$0xff] }
0x34c0   : > { %11180 = vmatprep.mubr.msk.f32.mxu0 %vm11905_vm15, %v11904_v8  ;;  %11165 = vmatpush3.msra.mxu0 %v9876_v28 }
0x34c1   : > { %11166 = vmatprep.subr.mxu0 %v11904_v8 }
0x34c2   : > { %11167 = vmatpush3.msra.mxu0 %v9875_v53  ;;  %v9894_v53 = vld [vmem:[%s12133_s5 + $0x25] ss:$0 sm:$0xff] }
0x34c3   : > { %11168 = vmatprep.subr.mxu0 %v11904_v8 }
0x357f   : > { %v6200_v12 = vpop.f32.mrf.mxu0 }
0x3580   : > { %11162 = vmatmul.mubr.msk.f32.vlgmr.msra.gmra.mxu1 %vm1057_vm0, %v6200_v12  ;;  %v9910_v12 = vld [vmem:[%s12131_s8 + $0x660] sm:$0xff] }
0x3581   : > { %v11156_v13 = vpop.f32.mrf.mxu0  ;;  %11199 = vmatprep.mubr.msk.f32.mxu1 %vm11905_vm15, %v11904_v8  ;;  %11184 = vmatpush3.msra.mxu1 %v9887_v36  ;;  %v9920_v36 = vld [vmem:[%s12131_s8 + $0x698] sm:$0xff] }
0x3582   : > { %11185 = vmatprep.subr.mxu1 %v11904_v8  ;;  %v9898_v13 = vld [vmem:[%s12131_s8 + $0x618] sm:$0xff] }
0x3583   : > { %11186 = vmatpush3.msra.mxu1 %v9886_v37  ;;  %v9919_v37 = vld [vmem:[%s12131_s8 + $0x690] sm:$0xff] }
0x3584   : > { %11187 = vmatprep.subr.mxu1 %v11904_v8 }
0x3585   : > { %11188 = vmatpush3.msra.mxu1 %v9885_v39  ;;  %v9918_v39 = vld [vmem:[%s12131_s8 + $0x688] sm:$0xff] }
0x3586   : > { %11189 = vmatprep.subr.mxu1 %v11904_v8 }
0x3587   : > { %11190 = vmatpush3.msra.mxu1 %v9884_v29  ;;  %v9917_v29 = vld [vmem:[%s12131_s8 + $0x680] sm:$0xff] }
0x3588   : > { %11191 = vmatprep.subr.mxu1 %v11904_v8 }
0x3589   : > { %11192 = vmatpush3.msra.mxu1 %v9883_v40  ;;  %v9915_v40 = vld [vmem:[%s12133_s5 + $0x27] ss:$0 sm:$0xff] }
0x358a   : > { %11193 = vmatprep.subr.mxu1 %v11904_v8 }
0x358b   : > { %11194 = vmatpush3.msra.mxu1 %v9882_v50 }
0x358c   : > { %11195 = vmatprep.subr.mxu1 %v11904_v8 }
0x358d   : > { %11196 = vmatpush3.msra.mxu1 %v9881_v52 }
0x358e   : > { %11197 = vmatprep.subr.mxu1 %v11904_v8 }
0x358f   : > { %11198 = vmatpush3.msra.mxu1 %v9880_v54 }
0x3590   : > { %11221 = vmatprep.subr.mxu1 %v11904_v8 }
0x3640   : > { %v6273_v38 = vpop.f32.mrf.mxu1 }
0x3641   : > { %v6277_v17 = vadd.f32 %v6273_v38, %v6037_v51  ;;  %v9913_v51 = vld [vmem:[%s12131_s8 + $0x678] sm:$0xff] }
0x3642   : > { %v11163_v18 = vpop.f32.mrf.mxu1  ;;  %v9909_v38 = vld [vmem:[%s12131_s8 + $0x658] sm:$0xff] }
0x3643   : > { %v6286_v19 = vadd.f32 %v9864_v16, %v6277_v17  ;;  %v9897_v16 = vld [vmem:[%s12131_s8 + $0x610] sm:$0xff]  ;;  %v9896_v18 = vld [vmem:[%s12131_s8 + $0x608] sm:$0xff] }
0x3644   : > { %v9908_v17 = vld [vmem:[%s12131_s8 + $0x650] sm:$0xff] }
0x3645   : > { %v6287_v20 = vadd.f32 %v6286_v19, %v12965_v41  ;;  %v9874_v41 = vld [vmem:[%s12131_s8 + $0x5a8] sm:$0xff] }
0x3646   : > { %11169 = vmatpush3.msra.mxu0 %v9874_v41  ;;  %v9907_v19 = vld [vmem:[%s12131_s8 + $0x648] sm:$0xff] }
0x3647   : > { %v6292_v21 = vsel %vm800_vm14, %v6287_v20, 0.0  ;;  %11170 = vmatprep.subr.mxu0 %v11904_v8 }
0x3648   : > { %6293 = vadd.xlane.f32.xlu0 %v6292_v21  ;;  %11171 = vmatpush3.msra.mxu0 %v9873_v30  ;;  %v9906_v21 = vld [vmem:[%s12131_s8 + $0x640] sm:$0xff] }
0x3649   : > { %11172 = vmatprep.subr.mxu0 %v11904_v8 }
0x364a   : > { %11173 = vmatpush3.msra.mxu0 %v9872_v32  ;;  %v9924_v32 = vld [vmem:[%s12131_s8 + $0x6b8] sm:$0xff] }
0x364b   : > { %11174 = vmatprep.subr.mxu0 %v11904_v8 }
0x364c   : > { %11175 = vmatpush3.msra.mxu0 %v9871_v25  ;;  %v9923_v25 = vld [vmem:[%s12131_s8 + $0x6b0] sm:$0xff] }
0x364d   : > { %11176 = vmatprep.subr.mxu0 %v11904_v8 }
0x364e   : > { %11177 = vmatpush3.msra.mxu0 %v9870_v33  ;;  %v9922_v33 = vld [vmem:[%s12131_s8 + $0x6a8] sm:$0xff] }
0x364f   : > { %11178 = vmatprep.subr.mxu0 %v11904_v8 }
0x3650   : > { %11179 = vmatpush3.msra.mxu0 %v9869_v35  ;;  %v9921_v35 = vld [vmem:[%s12131_s8 + $0x6a0] sm:$0xff] }
0x3651   : > { %11202 = vmatprep.subr.mxu0 %v11904_v8 }
0x36d1   : > { %v6294_v22 = vpop.xlane.xlu0 %6293 }
0x36d2   : > { %v6295_v15 = vmul.f32 0.015625, %v6294_v22 }
0x36d4   : > { %v6296_v24 = vsub.f32 %v6287_v20, %v6295_v15  ;;  %v9895_v20 = vld [vmem:[%s12131_s8 + $0x600] sm:$0xff] }
0x36d6   : > { %v6297_v26 = vmul.f32 %v6296_v24, %v6296_v24 }
0x36d8   : > { %v6298_v27 = vsel %vm800_vm14, %v6297_v26, 0.0 }
0x36d9   : > { %6299 = vadd.xlane.f32.xlu0 %v6298_v27  ;;  %v9893_v27 = vld [vmem:[%s12133_s5 + $0x24] ss:$0 sm:$0xff] }
0x3762   : > { %v6300_v42 = vpop.xlane.xlu0 %6299 }
0x3763   : > { %v6301_v43 = vmul.f32 0.015625, %v6300_v42 }
0x3765   : > { %v6302_v44 = vadd.f32 1e-05, %v6301_v43 }
0x3767   : > { %11680 = vrsqrt.f32 %v6302_v44  ;;  %v9904_v44 = vld [vmem:[%s12133_s5 + $0x26] ss:$0 sm:$0xff] }
0x3774   : > { %v11681_v45 = vpop.eup %11680 }
0x3775   : > { %v6304_v34 = vmul.f32 %v11681_v45, %v6296_v24 }
0x3777   : > { %v6311_v48 = vmul.f32 %v9867_v46, %v6304_v34 }
0x3779   : > { %v6318_v49 = vadd.f32 %v9868_v47, %v6311_v48  ;;  %v9926_v48 = vld [vmem:[%s12133_s5 + $0x28] ss:$0 sm:$0xff] }
0x377b   : > { %11181 = vmatmul.mubr.msk.f32.vlgmr.msra.gmra.mxu0 %vm800_vm14, %v6318_v49 }
0x377c   : > { %11218 = vmatprep.mubr.msk.f32.mxu0 %vm11905_vm15, %v11904_v8  ;;  %11203 = vmatpush3.msra.mxu0 %v9902_v5 }
0x377d   : > { %11204 = vmatprep.subr.mxu0 %v11904_v8 }
0x377e   : > { %11205 = vmatpush3.msra.mxu0 %v9901_v6 }
0x377f   : > { %11206 = vmatprep.subr.mxu0 %v11904_v8 }
0x3780   : > { %11207 = vmatpush3.msra.mxu0 %v9900_v9 }
0x3781   : > { %11208 = vmatprep.subr.mxu0 %v11904_v8 }
0x3782   : > { %11209 = vmatpush3.msra.mxu0 %v9899_v11 }
0x3783   : > { %11210 = vmatprep.subr.mxu0 %v11904_v8 }
0x3784   : > { %11211 = vmatpush3.msra.mxu0 %v9898_v13  ;;  %v9931_v13 = vld [vmem:[%s12131_s8 + $0x6d8] sm:$0xff] }
0x3785   : > { %11212 = vmatprep.subr.mxu0 %v11904_v8 }
0x3786   : > { %11213 = vmatpush3.msra.mxu0 %v9897_v16 }
0x3787   : > { %11214 = vmatprep.subr.mxu0 %v11904_v8 }
0x3788   : > { %11215 = vmatpush3.msra.mxu0 %v9896_v18 }
0x3789   : > { %11216 = vmatprep.subr.mxu0 %v11904_v8 }
0x378a   : > { %11217 = vmatpush3.msra.mxu0 %v9895_v20  ;;  %v9929_v20 = vld [vmem:[%s12131_s8 + $0x6c8] sm:$0xff] }
0x378b   : > { %11240 = vmatprep.subr.mxu0 %v11904_v8 }
0x383b   : > { %v6405_v55 = vpop.f32.mrf.mxu0 }
0x383c   : > { %v6406_v56 = vadd.f32 %v9878_v31, %v6405_v55 }
0x383d   : > { %v11182_v59 = vpop.f32.mrf.mxu0 }
0x383e   : > { %v6409_v60 = vmax.f32 %v6406_v56, 0.0 }
0x3840   : > { %11200 = vmatmul.mubr.msk.f32.vlgmr.msra.gmra.mxu1 %vm800_vm14, %v6409_v60 }
0x3841   : > { %11237 = vmatprep.mubr.msk.f32.mxu1 %vm11905_vm15, %v11904_v8  ;;  %11222 = vmatpush3.msra.mxu1 %v9913_v51 }
0x3842   : > { %11223 = vmatprep.subr.mxu1 %v11904_v8 }
0x3843   : > { %11224 = vmatpush3.msra.mxu1 %v9912_v7 }
0x3844   : > { %11225 = vmatprep.subr.mxu1 %v11904_v8 }
0x3845   : > { %11226 = vmatpush3.msra.mxu1 %v9911_v10 }
0x3846   : > { %11227 = vmatprep.subr.mxu1 %v11904_v8 }
0x3847   : > { %11228 = vmatpush3.msra.mxu1 %v9910_v12 }
0x3848   : > { %11229 = vmatprep.subr.mxu1 %v11904_v8 }
0x3849   : > { %11230 = vmatpush3.msra.mxu1 %v9909_v38  ;;  %v9930_v38 = vld [vmem:[%s12131_s8 + $0x6d0] sm:$0xff] }
0x384a   : > { %11231 = vmatprep.subr.mxu1 %v11904_v8 }
0x384b   : > { %11232 = vmatpush3.msra.mxu1 %v9908_v17 }
0x384c   : > { %11233 = vmatprep.subr.mxu1 %v11904_v8 }
0x384d   : > { %11234 = vmatpush3.msra.mxu1 %v9907_v19 }
0x384e   : > { %11235 = vmatprep.subr.mxu1 %v11904_v8 }
0x384f   : > { %11236 = vmatpush3.msra.mxu1 %v9906_v21  ;;  %v9928_v21 = vld [vmem:[%s12131_s8 + $0x6c0] sm:$0xff] }
0x3850   : > { %11259 = vmatprep.subr.mxu1 %v11904_v8 }
0x3900   : > { %v6496_v62 = vpop.f32.mrf.mxu1 }
0x3901   : > { %v6497_v63 = vadd.f32 %v9889_v61, %v6496_v62 }
0x3902   : > { %v11201_v0 = vpop.f32.mrf.mxu1 }
0x3903   : > { %v6500_v1 = vadd.f32 %v6497_v63, %v6318_v49 }
0x3905   : > { %v6505_v58 = vsel %vm800_vm14, %v6500_v1, 0.0 }
0x3906   : > { %6506 = vadd.xlane.f32.xlu0 %v6505_v58 }
0x398f   : > { %v6507_v2 = vpop.xlane.xlu0 %6506 }
0x3990   : > { %v6508_v3 = vmul.f32 0.015625, %v6507_v2 }
0x3992   : > { %v6509_v23 = vsub.f32 %v6500_v1, %v6508_v3 }
0x3994   : > { %v6510_v57 = vmul.f32 %v6509_v23, %v6509_v23 }
0x3996   : > { %v6511_v4 = vsel %vm800_vm14, %v6510_v57, 0.0 }
0x3997   : > { %6512 = vadd.xlane.f32.xlu1 %v6511_v4 }
0x3a20   : > { %v6513_v22 = vpop.xlane.xlu1 %6512 }
0x3a21   : > { %v6514_v15 = vmul.f32 0.015625, %v6513_v22 }
0x3a23   : > { %v6515_v24 = vadd.f32 1e-05, %v6514_v15 }
0x3a25   : > { %11682 = vrsqrt.f32 %v6515_v24 }
0x3a32   : > { %v11683_v26 = vpop.eup %11682 }
0x3a33   : > { %v6517_v28 = vmul.f32 %v11683_v26, %v6509_v23 }
0x3a35   : > { %v6524_v41 = vmul.f32 %v9893_v27, %v6517_v28 }
0x3a37   : > { %v13172_v30 = vadd.f32 %v9894_v53, %v6524_v41 }
0x3a39   : > { %11219 = vmatmul.mubr.msk.f32.vlgmr.msra.gmra.mxu0 %vm800_vm14, %v13172_v30  ;;  %11238 = vmatmul.mubr.msk.f32.vlgmr.msra.gmra.mxu1 %vm800_vm14, %v13172_v30 }
0x3a3a   : > { %11241 = vmatpush3.msra.mxu0 %v9924_v32  ;;  %11256 = vmatprep.mubr.msk.f32.mxu0 %vm11905_vm15, %v11904_v8 }
0x3a3b   : > { %11242 = vmatprep.subr.mxu0 %v11904_v8  ;;  %11261 = vmatprep.mubr.msk.f32.mxu1 %vm11905_vm15, %v11904_v8 }
0x3a3c   : > { %11243 = vmatpush3.msra.mxu0 %v9923_v25 }
0x3a3d   : > { %11244 = vmatprep.subr.mxu0 %v11904_v8 }
0x3a3e   : > { %11245 = vmatpush3.msra.mxu0 %v9922_v33 }
0x3a3f   : > { %11246 = vmatprep.subr.mxu0 %v11904_v8 }
0x3a40   : > { %11247 = vmatpush3.msra.mxu0 %v9921_v35 }
0x3a41   : > { %11248 = vmatprep.subr.mxu0 %v11904_v8 }
0x3a42   : > { %11249 = vmatpush3.msra.mxu0 %v9920_v36 }
0x3a43   : > { %11250 = vmatprep.subr.mxu0 %v11904_v8 }
0x3a44   : > { %11251 = vmatpush3.msra.mxu0 %v9919_v37 }
0x3a45   : > { %11252 = vmatprep.subr.mxu0 %v11904_v8 }
0x3a46   : > { %11253 = vmatpush3.msra.mxu0 %v9918_v39 }
0x3a47   : > { %11254 = vmatprep.subr.mxu0 %v11904_v8 }
0x3a48   : > { %11255 = vmatpush3.msra.mxu0 %v9917_v29 }
0x3a49   : > { %11257 = vmatmul.mubr.msk.f32.vlgmr.msra.gmra.mxu0 %vm800_vm14, %v13172_v30  ;;  %11279 = vmatprep.subr.mxu0 %v11904_v8 }
0x3a4a   : > { %11283 = vmatprep.mubr.msk.f32.mxu0 %vm11905_vm15, %v11904_v8  ;;  %11280 = vmatpush3.msra.mxu0 %v9931_v13  ;;  %v9971_v13 = vld [vmem:[%s12131_s8 + $0x750] sm:$0xff] }
0x3a4b   : > { %11281 = vmatprep.subr.mxu0 %v11904_v8 }
0x3a4c   : > { %11282 = vmatpush3.msra.mxu0 %v9930_v38  ;;  %v9970_v38 = vld [vmem:[%s12131_s8 + $0x748] sm:$0xff] }
0x3a4d   : > { %11293 = vmatprep.subr.mxu0 %v11904_v8 }
0x3af9   : > { %v6618_v42 = vpop.f32.mrf.mxu0  ;;  %v6705_v43 = vpop.f32.mrf.mxu1 }
0x3afa   : > { %v13204_v45 = vadd.f32 %v9915_v40, %v6705_v43  ;;  %v13208_v47 = vadd.f32 %v9904_v44, %v6618_v42  ;;  %v9933_v43 = vld [vmem:[%s12131_s8 + $0x6e8] sm:$0xff] }
0x3afb   : > { %v11220_v46 = vpop.f32.mrf.mxu0  ;;  %v11239_v34 = vpop.f32.mrf.mxu1 }
0x3afc   : > { %11260 = vmatpush3.xpose.msk.msra.mxu1 %vm1057_vm0, %v13204_v45 }
0x3afd   : > { %11264 = vmatprep.subr.mxu1 %v11904_v8 }
0x3aff   : > { %11262 = vmatmul.mubr.msk.f32.vlgmr.msra.gmra.mxu1 %vm1057_vm0, %v13208_v47 }
0x3b00   : > { %11266 = vmatprep.mubr.msk.f32.mxu1 %vm11905_vm15, %v11904_v8 }
0x3b09   : > { %v6792_v49 = vpop.f32.mrf.mxu0 }
0x3b0a   : > { %v13216_v50 = vadd.f32 %v9926_v48, %v6792_v49 }
0x3b0b   : > { %v11258_v52 = vpop.f32.mrf.mxu0 }
0x3b0c   : > { %11265 = vmatpush3.msra.mxu1 %v13216_v50 }
0x3b0d   : > { %11269 = vmatprep.subr.mxu1 %v11904_v8 }
0x3bbf   : > { %v6877_v54 = vpop.f32.mrf.mxu1 }
0x3bc0   : > { %v6881_v31 = vmul.f32 0.25, %v6877_v54 }
0x3bc1   : > { %v11263_v55 = vpop.f32.mrf.mxu1 }
0x3bc2   : > { %v6882_v56 = vsel %vm1135_vm1, %v6881_v31, -inf }
0x3bc3   : > { %6883 = vmax.xlane.f32.xlu0 %v6882_v56 }
0x3c4c   : > { %v6884_v59 = vpop.xlane.xlu0 %6883 }
0x3c4d   : > { %v6885_v60 = vsub.f32 %v6881_v31, %v6884_v59 }
0x3c4f   : > { %v6886_v61 = vmul.f32 1.442695, %v6885_v60 }
0x3c51   : > { %11684 = vpow2.f32 %v6886_v61 }
0x3c5e   : > { %v11685_v62 = vpop.eup %11684 }
0x3c5f   : > { %v6888_v63 = vsel %vm1135_vm1, %v11685_v62, 0.0 }
0x3c60   : > { %6889 = vadd.xlane.f32.xlu0 %v6888_v63 }
0x3c76   : > { %6968 = vrot.lane.b32.xlu0 %v13204_v45, %s11906_s13 }
0x3c7a   : > { %6966 = vrot.lane.b32.xlu0 %v13208_v47, %s11906_s13 }
0x3ce9   : > { %v6890_v0 = vpop.xlane.xlu0 %6889 }
0x3cea   : > { %11686 = vrcp.f32 %v6890_v0  ;;  %v9935_v0 = vld [vmem:[%s12131_s8 + $0x6f8] sm:$0xff] }
0x3ced   : > { %v6969_v58 = vpop.permute.xlu0 %6968 }
0x3cf1   : > { %v6967_v3 = vpop.permute.xlu0 %6966 }
0x3cf7   : > { %v11687_v1 = vpop.eup %11686 }
0x3cf8   : > { %v6892_v2 = vmul.f32 %v11687_v1, %v11685_v62  ;;  %v9934_v1 = vld [vmem:[%s12131_s8 + $0x6f0] sm:$0xff] }
0x3cfa   : > { %11267 = vmatmul.mubr.msk.f32.vlgmr.msra.gmra.mxu1 %vm1135_vm1, %v6892_v2 }
0x3cfb   : > { %11270 = vmatpush3.xpose.msk.msra.mxu1 %vm1057_vm0, %v6969_v58  ;;  %11271 = vmatprep.mubr.msk.f32.mxu1 %vm11905_vm15, %v11904_v8 }
0x3cfc   : > { %11274 = vmatprep.subr.mxu1 %v11904_v8 }
0x3cfe   : > { %11272 = vmatmul.mubr.msk.f32.vlgmr.msra.gmra.mxu1 %vm1057_vm0, %v6967_v3 }
0x3cff   : > { %11276 = vmatprep.mubr.msk.f32.mxu1 %vm11905_vm15, %v11904_v8 }
0x3dba   : > { %v6962_v23 = vpop.f32.mrf.mxu1 }
0x3dbc   : > { %v11268_v57 = vpop.f32.mrf.mxu1 }
0x3dbe   : > { %v7040_v4 = vpop.f32.mrf.mxu1 }
0x3dbf   : > { %v7044_v5 = vmul.f32 0.25, %v7040_v4 }
0x3dc0   : > { %v11273_v51 = vpop.f32.mrf.mxu1 }
0x3dc1   : > { %v7045_v6 = vsel %vm1135_vm1, %v7044_v5, -inf  ;;  %v9976_v51 = vld [vmem:[%s12131_s8 + $0x778] sm:$0xff] }
0x3dc2   : > { %7046 = vmax.xlane.f32.xlu0 %v7045_v6 }
0x3dd8   : > { %7369 = vrot.lane.b32.xlu0 %v13216_v50, %s11907_s11 }
0x3e4b   : > { %v7047_v7 = vpop.xlane.xlu0 %7046 }
0x3e4c   : > { %v7048_v9 = vsub.f32 %v7044_v5, %v7047_v7  ;;  %v9975_v7 = vld [vmem:[%s12131_s8 + $0x770] sm:$0xff] }
0x3e4e   : > { %v7049_v10 = vmul.f32 1.442695, %v7048_v9 }
0x3e4f   : > { %v7370_v22 = vpop.permute.xlu0 %7369 }
0x3e50   : > { %11688 = vpow2.f32 %v7049_v10  ;;  %v9974_v10 = vld [vmem:[%s12131_s8 + $0x768] sm:$0xff] }
0x3e5d   : > { %v11689_v11 = vpop.eup %11688 }
0x3e5e   : > { %v7051_v12 = vsel %vm1135_vm1, %v11689_v11, 0.0 }
0x3e5f   : > { %7052 = vadd.xlane.f32.xlu1 %v7051_v12  ;;  %v9972_v12 = vld [vmem:[%s12131_s8 + $0x758] sm:$0xff] }
0x3e70   : > { %7057 = vrot.lane.b32.xlu1 %v13216_v50, %s11906_s13 }
0x3e74   : > { %7281 = vrot.lane.b32.xlu1 %v13204_v45, %s11907_s11 }
0x3e78   : > { %7279 = vrot.lane.b32.xlu1 %v13208_v47, %s11907_s11 }
0x3ee8   : > { %v7053_v16 = vpop.xlane.xlu1 %7052 }
0x3ee9   : > { %11690 = vrcp.f32 %v7053_v16  ;;  %v9969_v16 = vld [vmem:[%s12131_s8 + $0x740] sm:$0xff] }
0x3eec   : > { %v7058_v17 = vpop.permute.xlu1 %7057 }
0x3eed   : > { %11275 = vmatpush3.msra.mxu1 %v7058_v17 }
0x3eee   : > { %11286 = vmatprep.subr.mxu1 %v11904_v8 }
0x3ef0   : > { %v7282_v15 = vpop.permute.xlu1 %7281 }
0x3ef4   : > { %v7280_v27 = vpop.permute.xlu1 %7279 }
0x3ef6   : > { %v11691_v18 = vpop.eup %11690 }
0x3ef7   : > { %v7055_v19 = vmul.f32 %v11691_v18, %v11689_v11  ;;  %v9973_v11 = vld [vmem:[%s12131_s8 + $0x760] sm:$0xff] }
0x3ef8   : > { %v9953_v18 = vld [vmem:[%s12133_s5 + $0x29] ss:$0 sm:$0xff] }
0x3ef9   : > { %11277 = vmatmul.mubr.msk.f32.vlgmr.msra.gmra.mxu1 %vm1135_vm1, %v7055_v19 }
0x3efa   : > { %11287 = vmatpush3.msra.mxu1 %v9929_v20  ;;  %11290 = vmatprep.mubr.msk.f32.mxu1 %vm11905_vm15, %v11904_v8 }
0x3efb   : > { %11288 = vmatprep.subr.mxu1 %v11904_v8 }
0x3efc   : > { %11289 = vmatpush3.msra.mxu1 %v9928_v21 }
0x3efd   : > { %11298 = vmatprep.subr.mxu1 %v11904_v8  ;;  %11291 = vmatmul.mubr.msk.f32.vlgmr.msra.gmra.mxu1 %vm1057_vm0, %v6962_v23 }
0x3efe   : > { %11299 = vmatpush3.msra.mxu1 %v7370_v22  ;;  %11300 = vmatprep.mubr.msk.f32.mxu1 %vm11905_vm15, %v11904_v8 }
0x3eff   : > { %11310 = vmatprep.subr.mxu1 %v11904_v8 }
0x3fb9   : > { %v7129_v24 = vpop.f32.mrf.mxu1 }
0x3fba   : > { %11284 = vmatmul.mubr.msk.f32.vlgmr.msra.gmra.mxu0 %vm1057_vm0, %v7129_v24  ;;  %v9978_v24 = vld [vmem:[%s12133_s5 + $0x2b] ss:$0 sm:$0xff] }
0x3fbb   : > { %11294 = vmatpush3.xpose.msk.msra.mxu0 %vm1057_vm0, %v7282_v15  ;;  %v11278_v26 = vpop.f32.mrf.mxu1  ;;  %11295 = vmatprep.mubr.msk.f32.mxu0 %vm11905_vm15, %v11904_v8 }
0x3fbc   : > { %11303 = vmatprep.subr.mxu0 %v11904_v8 }
0x3fbd   : > { %v7275_v28 = vpop.f32.mrf.mxu1 }
0x3fbe   : > { %11296 = vmatmul.mubr.msk.f32.vlgmr.msra.gmra.mxu0 %vm1057_vm0, %v7280_v27 }
0x3fbf   : > { %v11292_v53 = vpop.f32.mrf.mxu1  ;;  %11307 = vmatprep.mubr.msk.f32.mxu0 %vm11905_vm15, %v11904_v8  ;;  %11304 = vmatpush3.msra.mxu0 %v9933_v43 }
0x3fc0   : > { %11305 = vmatprep.subr.mxu0 %v11904_v8 }
0x407a   : > { %v7202_v41 = vpop.f32.mrf.mxu0 }
0x407b   : > { %v7276_v58 = vadd.f32 %v7275_v28, %v7202_v41 }
0x407c   : > { %v11285_v32 = vpop.f32.mrf.mxu0 }
0x407e   : > { %v7353_v25 = vpop.f32.mrf.mxu0 }
0x407f   : > { %v7357_v33 = vmul.f32 0.25, %v7353_v25 }
0x4080   : > { %v11297_v35 = vpop.f32.mrf.mxu0 }
0x4081   : > { %v7358_v36 = vsel %vm1135_vm1, %v7357_v33, -inf  ;;  %v9964_v35 = vld [vmem:[%s12131_s8 + $0x730] sm:$0xff] }
0x4082   : > { %7359 = vmax.xlane.f32.xlu1 %v7358_v36  ;;  %v9963_v36 = vld [vmem:[%s12131_s8 + $0x728] sm:$0xff] }
0x410b   : > { %v7360_v37 = vpop.xlane.xlu1 %7359 }
0x410c   : > { %v7361_v39 = vsub.f32 %v7357_v33, %v7360_v37  ;;  %v9965_v33 = vld [vmem:[%s12131_s8 + $0x738] sm:$0xff]  ;;  %v9962_v37 = vld [vmem:[%s12131_s8 + $0x720] sm:$0xff] }
0x410e   : > { %v7362_v29 = vmul.f32 1.442695, %v7361_v39  ;;  %v9961_v39 = vld [vmem:[%s12131_s8 + $0x718] sm:$0xff] }
0x4110   : > { %11692 = vpow2.f32 %v7362_v29  ;;  %v9960_v29 = vld [vmem:[%s12131_s8 + $0x710] sm:$0xff] }
0x411d   : > { %v11693_v40 = vpop.eup %11692 }
0x411e   : > { %v7364_v42 = vsel %vm1135_vm1, %v11693_v40, 0.0 }
0x411f   : > { %7365 = vadd.xlane.f32.xlu0 %v7364_v42  ;;  %v9958_v42 = vld [vmem:[%s12131_s8 + $0x700] sm:$0xff] }
0x4135   : > { %7521 = vrot.lane.b32.xlu0 %v13204_v45, %s11908_s26 }
0x4139   : > { %7519 = vrot.lane.b32.xlu0 %v13208_v47, %s11908_s26  ;;  %v9932_v47 = vld [vmem:[%s12131_s8 + $0x6e0] sm:$0xff] }
0x413a   : > { %11306 = vmatpush3.msra.mxu0 %v9932_v47  ;;  %v9957_v47 = vld [vmem:[%s12133_s5 + $0x31] ss:$0 sm:$0xff] }
0x413b   : > { %11315 = vmatprep.subr.mxu0 %v11904_v8 }
0x41a8   : > { %v7366_v44 = vpop.xlane.xlu0 %7365 }
0x41a9   : > { %11694 = vrcp.f32 %v7366_v44 }
0x41ac   : > { %v7522_v34 = vpop.permute.xlu0 %7521 }
0x41b0   : > { %v7520_v45 = vpop.permute.xlu0 %7519 }
0x41b6   : > { %v11695_v46 = vpop.eup %11694 }
0x41b7   : > { %v7368_v48 = vmul.f32 %v11695_v46, %v11693_v40  ;;  %v9959_v40 = vld [vmem:[%s12131_s8 + $0x708] sm:$0xff] }
0x41b9   : > { %11301 = vmatmul.mubr.msk.f32.vlgmr.msra.gmra.mxu1 %vm1135_vm1, %v7368_v48  ;;  %v9956_v48 = vld [vmem:[%s12133_s5 + $0x30] ss:$0 sm:$0xff] }
0x41ba   : > { %11311 = vmatpush3.xpose.msk.msra.mxu1 %vm1057_vm0, %v7522_v34  ;;  %11312 = vmatprep.mubr.msk.f32.mxu1 %vm11905_vm15, %v11904_v8 }
0x41bb   : > { %11320 = vmatprep.subr.mxu1 %v11904_v8 }
0x41bd   : > { %11313 = vmatmul.mubr.msk.f32.vlgmr.msra.gmra.mxu1 %vm1057_vm0, %v7520_v45 }
0x41be   : > { %11324 = vmatprep.mubr.msk.f32.mxu1 %vm11905_vm15, %v11904_v8  ;;  %11321 = vmatpush3.msra.mxu1 %v9935_v0 }
0x41bf   : > { %11322 = vmatprep.subr.mxu1 %v11904_v8 }
0x41c0   : > { %11323 = vmatpush3.msra.mxu1 %v9934_v1 }
0x41c1   : > { %11346 = vmatprep.subr.mxu1 %v11904_v8 }
0x4279   : > { %v7441_v49 = vpop.f32.mrf.mxu1 }
0x427a   : > { %11308 = vmatmul.mubr.msk.f32.vlgmr.msra.gmra.mxu0 %vm1057_vm0, %v7441_v49 }
0x427b   : > { %v11302_v52 = vpop.f32.mrf.mxu1  ;;  %11317 = vmatprep.mubr.msk.f32.mxu0 %vm11905_vm15, %v11904_v8 }
0x427d   : > { %v7593_v54 = vpop.f32.mrf.mxu1 }
0x427e   : > { %v7597_v31 = vmul.f32 0.25, %v7593_v54  ;;  %v9987_v54 = vld [vmem:[%s12131_s8 + $0x7b8] sm:$0xff] }
0x427f   : > { %v11314_v55 = vpop.f32.mrf.mxu1 }
0x4280   : > { %v7598_v56 = vsel %vm1135_vm1, %v7597_v31, -inf  ;;  %v9985_v55 = vld [vmem:[%s12131_s8 + $0x7a8] sm:$0xff] }
0x4281   : > { %7599 = vmax.xlane.f32.xlu0 %v7598_v56  ;;  %v9984_v56 = vld [vmem:[%s12131_s8 + $0x7a0] sm:$0xff] }
0x430a   : > { %v7600_v59 = vpop.xlane.xlu0 %7599 }
0x430b   : > { %v7601_v60 = vsub.f32 %v7597_v31, %v7600_v59  ;;  %v9986_v31 = vld [vmem:[%s12131_s8 + $0x7b0] sm:$0xff]  ;;  %v9983_v59 = vld [vmem:[%s12131_s8 + $0x798] sm:$0xff] }
0x430d   : > { %v7602_v61 = vmul.f32 1.442695, %v7601_v60  ;;  %v9982_v60 = vld [vmem:[%s12131_s8 + $0x790] sm:$0xff] }
0x430f   : > { %11696 = vpow2.f32 %v7602_v61  ;;  %v9981_v61 = vld [vmem:[%s12131_s8 + $0x788] sm:$0xff] }
0x431c   : > { %v11697_v62 = vpop.eup %11696 }
0x431d   : > { %v7604_v63 = vsel %vm1135_vm1, %v11697_v62, 0.0 }
0x431e   : > { %7605 = vadd.xlane.f32.xlu1 %v7604_v63  ;;  %v9967_v63 = vld [vmem:[%s12133_s5 + $0x2a] ss:$0 sm:$0xff] }
0x432f   : > { %7609 = vrot.lane.b32.xlu1 %v13216_v50, %s11908_s26 }
0x433a   : > { %v7514_v2 = vpop.f32.mrf.mxu0 }
0x433b   : > { %v7518_v3 = vadd.f32 %v7514_v2, %v7276_v58 }
0x433c   : > { %v11309_v23 = vpop.f32.mrf.mxu0 }
0x43a7   : > { %v7606_v57 = vpop.xlane.xlu1 %7605 }
0x43a8   : > { %11698 = vrcp.f32 %v7606_v57 }
0x43ab   : > { %v7610_v4 = vpop.permute.xlu1 %7609 }
0x43ac   : > { %11316 = vmatpush3.msra.mxu0 %v7610_v4 }
0x43ad   : > { %11327 = vmatprep.subr.mxu0 %v11904_v8 }
0x43b5   : > { %v11699_v50 = vpop.eup %11698 }
0x43b6   : > { %v7608_v5 = vmul.f32 %v11699_v50, %v11697_v62  ;;  %v9980_v62 = vld [vmem:[%s12131_s8 + $0x780] sm:$0xff] }
0x43b8   : > { %11318 = vmatmul.mubr.msk.f32.vlgmr.msra.gmra.mxu0 %vm1135_vm1, %v7608_v5 }
0x43b9   : > { %11343 = vmatprep.mubr.msk.f32.mxu0 %vm11905_vm15, %v11904_v8  ;;  %11328 = vmatpush3.msra.mxu0 %v9965_v33 }
0x43ba   : > { %11329 = vmatprep.subr.mxu0 %v11904_v8 }
0x43bb   : > { %11330 = vmatpush3.msra.mxu0 %v9964_v35 }
0x43bc   : > { %11331 = vmatprep.subr.mxu0 %v11904_v8 }
0x43bd   : > { %11332 = vmatpush3.msra.mxu0 %v9963_v36  ;;  %v9992_v36 = vld [vmem:[%s12131_s8 + $0x7c8] sm:$0xff] }
0x43be   : > { %11333 = vmatprep.subr.mxu0 %v11904_v8 }
0x43bf   : > { %11334 = vmatpush3.msra.mxu0 %v9962_v37  ;;  %v9991_v37 = vld [vmem:[%s12131_s8 + $0x7c0] sm:$0xff] }
0x43c0   : > { %11335 = vmatprep.subr.mxu0 %v11904_v8 }
0x43c1   : > { %11336 = vmatpush3.msra.mxu0 %v9961_v39 }
0x43c2   : > { %11337 = vmatprep.subr.mxu0 %v11904_v8 }
0x43c3   : > { %11338 = vmatpush3.msra.mxu0 %v9960_v29 }
0x43c4   : > { %11339 = vmatprep.subr.mxu0 %v11904_v8 }
0x43c5   : > { %11340 = vmatpush3.msra.mxu0 %v9959_v40 }
0x43c6   : > { %11341 = vmatprep.subr.mxu0 %v11904_v8 }
0x43c7   : > { %11342 = vmatpush3.msra.mxu0 %v9958_v42 }
0x43c8   : > { %11365 = vmatprep.subr.mxu0 %v11904_v8 }
0x4478   : > { %v7681_v6 = vpop.f32.mrf.mxu0 }
0x4479   : > { %11325 = vmatmul.mubr.msk.f32.vlgmr.msra.gmra.mxu1 %vm1057_vm0, %v7681_v6 }
0x447a   : > { %11347 = vmatpush3.msra.mxu1 %v9976_v51  ;;  %v11319_v9 = vpop.f32.mrf.mxu0  ;;  %11362 = vmatprep.mubr.msk.f32.mxu1 %vm11905_vm15, %v11904_v8 }
0x447b   : > { %11348 = vmatprep.subr.mxu1 %v11904_v8 }
0x447c   : > { %11349 = vmatpush3.msra.mxu1 %v9975_v7 }
0x447d   : > { %11350 = vmatprep.subr.mxu1 %v11904_v8 }
0x447e   : > { %11351 = vmatpush3.msra.mxu1 %v9974_v10 }
0x447f   : > { %11352 = vmatprep.subr.mxu1 %v11904_v8 }
0x4480   : > { %11353 = vmatpush3.msra.mxu1 %v9973_v11 }
0x4481   : > { %11354 = vmatprep.subr.mxu1 %v11904_v8 }
0x4482   : > { %11355 = vmatpush3.msra.mxu1 %v9972_v12 }
0x4483   : > { %11356 = vmatprep.subr.mxu1 %v11904_v8 }
0x4484   : > { %11357 = vmatpush3.msra.mxu1 %v9971_v13 }
0x4485   : > { %11358 = vmatprep.subr.mxu1 %v11904_v8 }
0x4486   : > { %11359 = vmatpush3.msra.mxu1 %v9970_v38 }
0x4487   : > { %11360 = vmatprep.subr.mxu1 %v11904_v8 }
0x4488   : > { %11361 = vmatpush3.msra.mxu1 %v9969_v16 }
0x4489   : > { %11363 = vmatmul.mubr.msk.f32.vlgmr.msra.gmra.mxu1 %vm800_vm14, %v12934_v14  ;;  %11384 = vmatprep.subr.mxu1 %v11904_v8 }
0x448a   : > { %11386 = vmatprep.mubr.msk.f32.mxu1 %vm11905_vm15, %v11904_v8 }
0x4539   : > { %v7754_v17 = vpop.f32.mrf.mxu1 }
0x453a   : > { %v7758_v19 = vadd.f32 %v7754_v17, %v7518_v3 }
0x453b   : > { %v11326_v20 = vpop.f32.mrf.mxu1 }
0x453c   : > { %v7767_v21 = vadd.f32 %v9953_v18, %v7758_v19 }
0x453e   : > { %v7768_v22 = vadd.f32 %v7767_v21, %v13172_v30 }
0x4540   : > { %v7773_v15 = vsel %vm800_vm14, %v7768_v22, 0.0 }
0x4541   : > { %7774 = vadd.xlane.f32.xlu1 %v7773_v15 }
0x4549   : > { %v7973_v26 = vpop.f32.mrf.mxu1 }
0x454a   : > { %v13328_v27 = vadd.f32 %v9978_v24, %v7973_v26 }
0x454b   : > { %v11364_v28 = vpop.f32.mrf.mxu1 }
0x454c   : > { %11385 = vmatpush3.xpose.msk.msra.mxu1 %vm1057_vm0, %v13328_v27 }
0x454d   : > { %11389 = vmatprep.subr.mxu1 %v11904_v8 }
0x45ca   : > { %v7775_v53 = vpop.xlane.xlu1 %7774 }
0x45cb   : > { %v7776_v41 = vmul.f32 0.015625, %v7775_v53 }
0x45cd   : > { %v7777_v32 = vsub.f32 %v7768_v22, %v7776_v41 }
0x45cf   : > { %v7778_v30 = vmul.f32 %v7777_v32, %v7777_v32 }
0x45d1   : > { %v7779_v25 = vsel %vm800_vm14, %v7778_v30, 0.0  ;;  %v9993_v30 = vld [vmem:[%s12131_s8 + $0x7d0] sm:$0xff] }
0x45d2   : > { %7780 = vadd.xlane.f32.xlu0 %v7779_v25 }
0x465b   : > { %v7781_v43 = vpop.xlane.xlu0 %7780 }
0x465c   : > { %v7782_v44 = vmul.f32 0.015625, %v7781_v43 }
0x465e   : > { %v7783_v46 = vadd.f32 1e-05, %v7782_v44 }
0x4660   : > { %11700 = vrsqrt.f32 %v7783_v46 }
0x466d   : > { %v11701_v34 = vpop.eup %11700 }
0x466e   : > { %v7785_v45 = vmul.f32 %v11701_v34, %v7777_v32  ;;  %v9994_v32 = vld [vmem:[%s12131_s8 + $0x7d8] sm:$0xff] }
0x4670   : > { %v7792_v49 = vmul.f32 %v9956_v48, %v7785_v45 }
0x4672   : > { %v13352_v52 = vadd.f32 %v9957_v47, %v7792_v49 }
0x4674   : > { %11344 = vmatmul.mubr.msk.f32.vlgmr.msra.gmra.mxu0 %vm800_vm14, %v13352_v52 }
0x4675   : > { %11366 = vmatpush3.msra.mxu0 %v9987_v54  ;;  %11381 = vmatprep.mubr.msk.f32.mxu0 %vm11905_vm15, %v11904_v8 }
0x4676   : > { %11367 = vmatprep.subr.mxu0 %v11904_v8 }
0x4677   : > { %11368 = vmatpush3.msra.mxu0 %v9986_v31 }
0x4678   : > { %11369 = vmatprep.subr.mxu0 %v11904_v8 }
0x4679   : > { %11370 = vmatpush3.msra.mxu0 %v9985_v55 }
0x467a   : > { %11371 = vmatprep.subr.mxu0 %v11904_v8 }
0x467b   : > { %11372 = vmatpush3.msra.mxu0 %v9984_v56 }
0x467c   : > { %11373 = vmatprep.subr.mxu0 %v11904_v8 }
0x467d   : > { %11374 = vmatpush3.msra.mxu0 %v9983_v59 }
0x467e   : > { %11375 = vmatprep.subr.mxu0 %v11904_v8 }
0x467f   : > { %11376 = vmatpush3.msra.mxu0 %v9982_v60 }
0x4680   : > { %11377 = vmatprep.subr.mxu0 %v11904_v8 }
0x4681   : > { %11378 = vmatpush3.msra.mxu0 %v9981_v61  ;;  %v9996_v61 = vld [vmem:[%s12131_s8 + $0x7e8] sm:$0xff] }
0x4682   : > { %11379 = vmatprep.subr.mxu0 %v11904_v8 }
0x4683   : > { %11380 = vmatpush3.msra.mxu0 %v9980_v62 }
0x4684   : > { %11382 = vmatmul.mubr.msk.f32.vlgmr.msra.gmra.mxu0 %vm800_vm14, %v12934_v14  ;;  %11404 = vmatprep.subr.mxu0 %v11904_v8  ;;  %v9989_v14 = vld [vmem:[%s12133_s5 + $0x2c] ss:$0 sm:$0xff] }
0x4685   : > { %11408 = vmatprep.mubr.msk.f32.mxu0 %vm11905_vm15, %v11904_v8  ;;  %11405 = vmatpush3.msra.mxu0 %v9994_v32 }
0x4686   : > { %11406 = vmatprep.subr.mxu0 %v11904_v8 }
0x4687   : > { %11407 = vmatpush3.msra.mxu0 %v9993_v30 }
0x4688   : > { %11418 = vmatprep.subr.mxu0 %v11904_v8 }
0x4734   : > { %v7886_v0 = vpop.f32.mrf.mxu0 }
0x4735   : > { %v13379_v1 = vadd.f32 %v9967_v63, %v7886_v0 }
0x4736   : > { %v11345_v58 = vpop.f32.mrf.mxu0 }
0x4737   : > { %8234 = vrot.lane.b32.xlu1 %v13379_v1, %s11906_s13  ;;  %11387 = vmatmul.mubr.msk.f32.vlgmr.msra.gmra.mxu1 %vm1057_vm0, %v13379_v1  ;;  %v9995_v58 = vld [vmem:[%s12131_s8 + $0x7e0] sm:$0xff] }
0x4738   : > { %11391 = vmatprep.mubr.msk.f32.mxu1 %vm11905_vm15, %v11904_v8 }
0x4744   : > { %v8060_v2 = vpop.f32.mrf.mxu0 }
0x4745   : > { %v13388_v3 = vadd.f32 %v9989_v14, %v8060_v2 }
0x4746   : > { %v11383_v23 = vpop.f32.mrf.mxu0 }
0x4747   : > { %11390 = vmatpush3.msra.mxu1 %v13388_v3 }
0x4748   : > { %11394 = vmatprep.subr.mxu1 %v11904_v8 }
0x47a9   : > { %v8235_v16 = vpop.permute.xlu1 %8234 }
0x47f7   : > { %v8145_v57 = vpop.f32.mrf.mxu1 }
0x47f8   : > { %v8149_v4 = vmul.f32 0.25, %v8145_v57 }
0x47f9   : > { %v11388_v50 = vpop.f32.mrf.mxu1 }
0x47fa   : > { %v8150_v5 = vsel %vm1135_vm1, %v8149_v4, -inf }
0x47fb   : > { %8151 = vmax.xlane.f32.xlu0 %v8150_v5 }
0x4884   : > { %v8152_v51 = vpop.xlane.xlu0 %8151 }
0x4885   : > { %v8153_v6 = vsub.f32 %v8149_v4, %v8152_v51 }
0x4887   : > { %v8154_v7 = vmul.f32 1.442695, %v8153_v6 }
0x4889   : > { %11702 = vpow2.f32 %v8154_v7 }
0x4896   : > { %v11703_v9 = vpop.eup %11702 }
0x4897   : > { %v8156_v10 = vsel %vm1135_vm1, %v11703_v9, 0.0 }
0x4898   : > { %8157 = vadd.xlane.f32.xlu0 %v8156_v10 }
0x48ae   : > { %8236 = vrot.lane.b32.xlu0 %v13328_v27, %s11906_s13 }
0x4921   : > { %v8158_v11 = vpop.xlane.xlu0 %8157 }
0x4922   : > { %11704 = vrcp.f32 %v8158_v11  ;;  %v9998_v11 = vld [vmem:[%s12131_s8 + $0x7f8] sm:$0xff] }
0x4925   : > { %v8237_v38 = vpop.permute.xlu0 %8236 }
0x492f   : > { %v11705_v12 = vpop.eup %11704 }
0x4930   : > { %v8160_v13 = vmul.f32 %v11705_v12, %v11703_v9 }
0x4932   : > { %11392 = vmatmul.mubr.msk.f32.vlgmr.msra.gmra.mxu1 %vm1135_vm1, %v8160_v13 }
0x4933   : > { %11395 = vmatpush3.xpose.msk.msra.mxu1 %vm1057_vm0, %v8237_v38  ;;  %11396 = vmatprep.mubr.msk.f32.mxu1 %vm11905_vm15, %v11904_v8 }
0x4934   : > { %11399 = vmatprep.subr.mxu1 %v11904_v8 }
0x4936   : > { %11397 = vmatmul.mubr.msk.f32.vlgmr.msra.gmra.mxu1 %vm1057_vm0, %v8235_v16 }
0x4937   : > { %11401 = vmatprep.mubr.msk.f32.mxu1 %vm11905_vm15, %v11904_v8 }
0x49f2   : > { %v8230_v17 = vpop.f32.mrf.mxu1 }
0x49f4   : > { %v11393_v18 = vpop.f32.mrf.mxu1 }
0x49f6   : > { %v8308_v19 = vpop.f32.mrf.mxu1 }
0x49f7   : > { %v8312_v20 = vmul.f32 0.25, %v8308_v19  ;;  %v9997_v19 = vld [vmem:[%s12131_s8 + $0x7f0] sm:$0xff] }
0x49f8   : > { %v11398_v21 = vpop.f32.mrf.mxu1 }
0x49f9   : > { %v8313_v22 = vsel %vm1135_vm1, %v8312_v20, -inf }
0x49fa   : > { %8314 = vmax.xlane.f32.xlu0 %v8313_v22 }
0x4a10   : > { %8325 = vrot.lane.b32.xlu0 %v13388_v3, %s11906_s13 }
0x4a14   : > { %8547 = vrot.lane.b32.xlu0 %v13379_v1, %s11907_s11 }
0x4a83   : > { %v8315_v15 = vpop.xlane.xlu0 %8314 }
0x4a84   : > { %v8316_v24 = vsub.f32 %v8312_v20, %v8315_v15  ;;  %v10016_v15 = vld [vmem:[%s12133_s5 + $0x2d] ss:$0 sm:$0xff] }
0x4a86   : > { %v8317_v26 = vmul.f32 1.442695, %v8316_v24 }
0x4a87   : > { %v8326_v28 = vpop.permute.xlu0 %8325 }
0x4a88   : > { %11706 = vpow2.f32 %v8317_v26  ;;  %11400 = vmatpush3.msra.mxu1 %v8326_v28 }
0x4a89   : > { %11411 = vmatprep.subr.mxu1 %v11904_v8 }
0x4a8b   : > { %v8548_v42 = vpop.permute.xlu0 %8547 }
0x4a95   : > { %v11707_v53 = vpop.eup %11706 }
0x4a96   : > { %v8319_v41 = vsel %vm1135_vm1, %v11707_v53, 0.0 }
0x4a97   : > { %8320 = vadd.xlane.f32.xlu1 %v8319_v41 }
0x4aa8   : > { %8549 = vrot.lane.b32.xlu1 %v13328_v27, %s11907_s11 }
0x4b20   : > { %v8321_v25 = vpop.xlane.xlu1 %8320 }
0x4b21   : > { %11708 = vrcp.f32 %v8321_v25 }
0x4b24   : > { %v8550_v29 = vpop.permute.xlu1 %8549 }
0x4b2e   : > { %v11709_v33 = vpop.eup %11708 }
0x4b2f   : > { %v8323_v35 = vmul.f32 %v11709_v33, %v11707_v53 }
0x4b31   : > { %11402 = vmatmul.mubr.msk.f32.vlgmr.msra.gmra.mxu1 %vm1135_vm1, %v8323_v35 }
0x4b32   : > { %11412 = vmatpush3.msra.mxu1 %v9992_v36  ;;  %11415 = vmatprep.mubr.msk.f32.mxu1 %vm11905_vm15, %v11904_v8  ;;  %v10028_v36 = vld [vmem:[%s12131_s8 + $0x838] sm:$0xff] }
0x4b33   : > { %11413 = vmatprep.subr.mxu1 %v11904_v8 }
0x4b34   : > { %11414 = vmatpush3.msra.mxu1 %v9991_v37  ;;  %v10027_v37 = vld [vmem:[%s12131_s8 + $0x830] sm:$0xff] }
0x4b35   : > { %11416 = vmatmul.mubr.msk.f32.vlgmr.msra.gmra.mxu1 %vm1057_vm0, %v8230_v17  ;;  %11423 = vmatprep.subr.mxu1 %v11904_v8 }
0x4b36   : > { %11425 = vmatprep.mubr.msk.f32.mxu1 %vm11905_vm15, %v11904_v8 }
0x4bf1   : > { %v8397_v39 = vpop.f32.mrf.mxu1 }
0x4bf2   : > { %11409 = vmatmul.mubr.msk.f32.vlgmr.msra.gmra.mxu0 %vm1057_vm0, %v8397_v39  ;;  %v10025_v39 = vld [vmem:[%s12131_s8 + $0x820] sm:$0xff] }
0x4bf3   : > { %11419 = vmatpush3.xpose.msk.msra.mxu0 %vm1057_vm0, %v8550_v29  ;;  %v11403_v40 = vpop.f32.mrf.mxu1  ;;  %11420 = vmatprep.mubr.msk.f32.mxu0 %vm11905_vm15, %v11904_v8  ;;  %v10024_v29 = vld [vmem:[%s12131_s8 + $0x818] sm:$0xff] }
0x4bf4   : > { %11428 = vmatprep.subr.mxu0 %v11904_v8  ;;  %v10023_v40 = vld [vmem:[%s12131_s8 + $0x810] sm:$0xff] }
0x4bf5   : > { %v13432_v43 = vpop.f32.mrf.mxu1 }
0x4bf6   : > { %11421 = vmatmul.mubr.msk.f32.vlgmr.msra.gmra.mxu0 %vm1057_vm0, %v8548_v42  ;;  %v10022_v42 = vld [vmem:[%s12131_s8 + $0x808] sm:$0xff] }
0x4bf7   : > { %v11417_v44 = vpop.f32.mrf.mxu1  ;;  %11432 = vmatprep.mubr.msk.f32.mxu0 %vm11905_vm15, %v11904_v8  ;;  %11429 = vmatpush3.msra.mxu0 %v9996_v61 }
0x4bf8   : > { %11430 = vmatprep.subr.mxu0 %v11904_v8  ;;  %v10039_v44 = vld [vmem:[%s12131_s8 + $0x878] sm:$0xff] }
0x4bf9   : > { %11431 = vmatpush3.msra.mxu0 %v9995_v58 }
0x4bfa   : > { %11440 = vmatprep.subr.mxu0 %v11904_v8 }
0x4cb2   : > { %v8470_v46 = vpop.f32.mrf.mxu0 }
0x4cb3   : > { %v8544_v12 = vadd.f32 %v13432_v43, %v8470_v46  ;;  %v10021_v43 = vld [vmem:[%s12131_s8 + $0x800] sm:$0xff]  ;;  %v10038_v46 = vld [vmem:[%s12131_s8 + $0x870] sm:$0xff] }
0x4cb4   : > { %v11410_v34 = vpop.f32.mrf.mxu0 }
0x4cb5   : > { %v10037_v34 = vld [vmem:[%s12131_s8 + $0x868] sm:$0xff] }
0x4cb6   : > { %v8621_v48 = vpop.f32.mrf.mxu0 }
0x4cb7   : > { %v8625_v45 = vmul.f32 0.25, %v8621_v48  ;;  %v10036_v48 = vld [vmem:[%s12131_s8 + $0x860] sm:$0xff] }
0x4cb8   : > { %v11422_v47 = vpop.f32.mrf.mxu0 }
0x4cb9   : > { %v8626_v49 = vsel %vm1135_vm1, %v8625_v45, -inf }
0x4cba   : > { %8627 = vmax.xlane.f32.xlu0 %v8626_v49 }
0x4cd0   : > { %8637 = vrot.lane.b32.xlu0 %v13388_v3, %s11907_s11 }
0x4cd4   : > { %8787 = vrot.lane.b32.xlu0 %v13379_v1, %s11908_s26 }
0x4d43   : > { %v8628_v54 = vpop.xlane.xlu0 %8627 }
0x4d44   : > { %v8629_v31 = vsub.f32 %v8625_v45, %v8628_v54  ;;  %v10035_v45 = vld [vmem:[%s12131_s8 + $0x858] sm:$0xff] }
0x4d46   : > { %v8630_v55 = vmul.f32 1.442695, %v8629_v31 }
0x4d47   : > { %v8638_v56 = vpop.permute.xlu0 %8637 }
0x4d48   : > { %11710 = vpow2.f32 %v8630_v55  ;;  %11424 = vmatpush3.msra.mxu1 %v8638_v56  ;;  %v10019_v55 = vld [vmem:[%s12133_s5 + $0x32] ss:$0 sm:$0xff] }
0x4d49   : > { %11435 = vmatprep.subr.mxu1 %v11904_v8 }
0x4d55   : > { %v11711_v59 = vpop.eup %11710 }
0x4d56   : > { %v8632_v60 = vsel %vm1135_vm1, %v11711_v59, 0.0 }
0x4d57   : > { %8633 = vadd.xlane.f32.xlu1 %v8632_v60 }
0x4d68   : > { %8789 = vrot.lane.b32.xlu1 %v13328_v27, %s11908_s26  ;;  %v8788_v27 = vpop.permute.xlu0 %8787 }
0x4de0   : > { %v8634_v62 = vpop.xlane.xlu1 %8633 }
0x4de1   : > { %11712 = vrcp.f32 %v8634_v62  ;;  %v10034_v62 = vld [vmem:[%s12131_s8 + $0x850] sm:$0xff] }
0x4de4   : > { %v8790_v1 = vpop.permute.xlu1 %8789 }
0x4dee   : > { %v11713_v63 = vpop.eup %11712 }
0x4def   : > { %v8636_v0 = vmul.f32 %v11713_v63, %v11711_v59  ;;  %v10020_v59 = vld [vmem:[%s12133_s5 + $0x33] ss:$0 sm:$0xff] }
0x4df0   : > { %v10033_v63 = vld [vmem:[%s12131_s8 + $0x848] sm:$0xff] }
0x4df1   : > { %11426 = vmatmul.mubr.msk.f32.vlgmr.msra.gmra.mxu1 %vm1135_vm1, %v8636_v0  ;;  %v10032_v0 = vld [vmem:[%s12131_s8 + $0x840] sm:$0xff] }
0x4df2   : > { %11436 = vmatpush3.xpose.msk.msra.mxu1 %vm1057_vm0, %v8790_v1  ;;  %11437 = vmatprep.mubr.msk.f32.mxu1 %vm11905_vm15, %v11904_v8  ;;  %v10030_v1 = vld [vmem:[%s12133_s5 + $0x2e] ss:$0 sm:$0xff] }
0x4df3   : > { %11445 = vmatprep.subr.mxu1 %v11904_v8 }
0x4df5   : > { %11438 = vmatmul.mubr.msk.f32.vlgmr.msra.gmra.mxu1 %vm1057_vm0, %v8788_v27 }
0x4df6   : > { %11449 = vmatprep.mubr.msk.f32.mxu1 %vm11905_vm15, %v11904_v8  ;;  %11446 = vmatpush3.msra.mxu1 %v9998_v11 }
0x4df7   : > { %11447 = vmatprep.subr.mxu1 %v11904_v8 }
0x4df8   : > { %11448 = vmatpush3.msra.mxu1 %v9997_v19 }
0x4df9   : > { %11471 = vmatprep.subr.mxu1 %v11904_v8 }
0x4eb1   : > { %v8709_v14 = vpop.f32.mrf.mxu1 }
0x4eb2   : > { %11433 = vmatmul.mubr.msk.f32.vlgmr.msra.gmra.mxu0 %vm1057_vm0, %v8709_v14 }
0x4eb3   : > { %v11427_v2 = vpop.f32.mrf.mxu1  ;;  %11442 = vmatprep.mubr.msk.f32.mxu0 %vm11905_vm15, %v11904_v8 }
0x4eb5   : > { %v8861_v23 = vpop.f32.mrf.mxu1 }
0x4eb6   : > { %v8865_v57 = vmul.f32 0.25, %v8861_v23  ;;  %v10041_v23 = vld [vmem:[%s12133_s5 + $0x2f] ss:$0 sm:$0xff] }
0x4eb7   : > { %v11439_v4 = vpop.f32.mrf.mxu1 }
0x4eb8   : > { %v8866_v50 = vsel %vm1135_vm1, %v8865_v57, -inf }
0x4eb9   : > { %8867 = vmax.xlane.f32.xlu0 %v8866_v50 }
0x4ecf   : > { %8877 = vrot.lane.b32.xlu0 %v13388_v3, %s11908_s26 }
0x4f42   : > { %v8868_v5 = vpop.xlane.xlu0 %8867 }
0x4f43   : > { %v8869_v51 = vsub.f32 %v8865_v57, %v8868_v5 }
0x4f45   : > { %v8870_v6 = vmul.f32 1.442695, %v8869_v51 }
0x4f46   : > { %v8878_v7 = vpop.permute.xlu0 %8877 }
0x4f47   : > { %11714 = vpow2.f32 %v8870_v6  ;;  %11441 = vmatpush3.msra.mxu0 %v8878_v7 }
0x4f48   : > { %11452 = vmatprep.subr.mxu0 %v11904_v8 }
0x4f54   : > { %v11715_v9 = vpop.eup %11714 }
0x4f55   : > { %v8872_v10 = vsel %vm1135_vm1, %v11715_v9, 0.0 }
0x4f56   : > { %8873 = vadd.xlane.f32.xlu1 %v8872_v10 }
0x4f72   : > { %v8782_v13 = vpop.f32.mrf.mxu0 }
0x4f73   : > { %v8786_v3 = vadd.f32 %v8782_v13, %v8544_v12 }
0x4f74   : > { %v11434_v38 = vpop.f32.mrf.mxu0 }
0x4fdf   : > { %v8874_v16 = vpop.xlane.xlu1 %8873 }
0x4fe0   : > { %11716 = vrcp.f32 %v8874_v16  ;;  %v10045_v16 = vld [vmem:[%s12133_s5 + $0x34] ss:$0 sm:$0xff] }
0x4fed   : > { %v11717_v17 = vpop.eup %11716 }
0x4fee   : > { %v8876_v18 = vmul.f32 %v11717_v17, %v11715_v9 }
0x4ff0   : > { %11443 = vmatmul.mubr.msk.f32.vlgmr.msra.gmra.mxu0 %vm1135_vm1, %v8876_v18  ;;  %v10046_v18 = vld [vmem:[%s12133_s5 + $0x35] ss:$0 sm:$0xff] }
0x4ff1   : > { %11468 = vmatprep.mubr.msk.f32.mxu0 %vm11905_vm15, %v11904_v8  ;;  %11453 = vmatpush3.msra.mxu0 %v10028_v36  ;;  %v10051_v36 = vld [vmem:[%s12131_s8 + $0x880] sm:$0xff] }
0x4ff2   : > { %11454 = vmatprep.subr.mxu0 %v11904_v8 }
0x4ff3   : > { %11455 = vmatpush3.msra.mxu0 %v10027_v37 }
0x4ff4   : > { %11456 = vmatprep.subr.mxu0 %v11904_v8 }
0x50b0   : > { %v8949_v20 = vpop.f32.mrf.mxu0 }
0x50b1   : > { %11450 = vmatmul.mubr.msk.f32.vlgmr.msra.gmra.mxu1 %vm1057_vm0, %v8949_v20 }
0x50b2   : > { %v11444_v21 = vpop.f32.mrf.mxu0  ;;  %11487 = vmatprep.mubr.msk.f32.mxu1 %vm11905_vm15, %v11904_v8  ;;  %11472 = vmatpush3.msra.mxu1 %v10039_v44 }
0x50b3   : > { %11473 = vmatprep.subr.mxu1 %v11904_v8 }
0x50b4   : > { %11474 = vmatpush3.msra.mxu1 %v10038_v46 }
0x50b5   : > { %11475 = vmatprep.subr.mxu1 %v11904_v8 }
0x50b6   : > { %11476 = vmatpush3.msra.mxu1 %v10037_v34  ;;  %v10060_v34 = vld [vmem:[%s12133_s5 + $0x3a] ss:$0 sm:$0xff] }
0x50b7   : > { %11477 = vmatprep.subr.mxu1 %v11904_v8 }
0x50b8   : > { %11478 = vmatpush3.msra.mxu1 %v10036_v48 }
0x50b9   : > { %11479 = vmatprep.subr.mxu1 %v11904_v8 }
0x50ba   : > { %11480 = vmatpush3.msra.mxu1 %v10035_v45 }
0x50bb   : > { %11481 = vmatprep.subr.mxu1 %v11904_v8 }
0x50bc   : > { %11482 = vmatpush3.msra.mxu1 %v10034_v62 }
0x50bd   : > { %11483 = vmatprep.subr.mxu1 %v11904_v8 }
0x50be   : > { %11484 = vmatpush3.msra.mxu1 %v10033_v63 }
0x50bf   : > { %11485 = vmatprep.subr.mxu1 %v11904_v8 }
0x50c0   : > { %11486 = vmatpush3.msra.mxu1 %v10032_v0 }
0x5171   : > { %v9022_v22 = vpop.f32.mrf.mxu1 }
0x5172   : > { %v9026_v24 = vadd.f32 %v9022_v22, %v8786_v3 }
0x5173   : > { %v11451_v26 = vpop.f32.mrf.mxu1 }
0x5174   : > { %v9035_v28 = vadd.f32 %v10016_v15, %v9026_v24 }
0x5176   : > { %v9036_v53 = vadd.f32 %v9035_v28, %v13352_v52  ;;  %v10026_v52 = vld [vmem:[%s12131_s8 + $0x828] sm:$0xff] }
0x5177   : > { %11457 = vmatpush3.msra.mxu0 %v10026_v52 }
0x5178   : > { %v9041_v41 = vsel %vm800_vm14, %v9036_v53, 0.0  ;;  %11458 = vmatprep.subr.mxu0 %v11904_v8 }
0x5179   : > { %9042 = vadd.xlane.f32.xlu1 %v9041_v41  ;;  %11459 = vmatpush3.msra.mxu0 %v10025_v39  ;;  %v10057_v41 = vld [vmem:[%s12131_s8 + $0x8b0] sm:$0xff] }
0x517a   : > { %11460 = vmatprep.subr.mxu0 %v11904_v8 }
0x517b   : > { %11461 = vmatpush3.msra.mxu0 %v10024_v29 }
0x517c   : > { %11462 = vmatprep.subr.mxu0 %v11904_v8 }
0x517d   : > { %11463 = vmatpush3.msra.mxu0 %v10023_v40  ;;  %v10049_v40 = vld [vmem:[%s12133_s5 + $0x38] ss:$0 sm:$0xff] }
0x517e   : > { %11464 = vmatprep.subr.mxu0 %v11904_v8 }
0x517f   : > { %11465 = vmatpush3.msra.mxu0 %v10022_v42 }
0x5180   : > { %11466 = vmatprep.subr.mxu0 %v11904_v8 }
0x5181   : > { %11467 = vmatpush3.msra.mxu0 %v10021_v43  ;;  %v10050_v43 = vld [vmem:[%s12133_s5 + $0x39] ss:$0 sm:$0xff] }
0x5182   : > { %11490 = vmatprep.subr.mxu0 %v11904_v8 }
0x5202   : > { %v9043_v32 = vpop.xlane.xlu1 %9042 }
0x5203   : > { %v9044_v30 = vmul.f32 0.015625, %v9043_v32  ;;  %v10056_v32 = vld [vmem:[%s12131_s8 + $0x8a8] sm:$0xff] }
0x5205   : > { %v9045_v25 = vsub.f32 %v9036_v53, %v9044_v30  ;;  %v10058_v53 = vld [vmem:[%s12131_s8 + $0x8b8] sm:$0xff]  ;;  %v10055_v30 = vld [vmem:[%s12131_s8 + $0x8a0] sm:$0xff] }
0x5207   : > { %v9046_v33 = vmul.f32 %v9045_v25, %v9045_v25 }
0x5209   : > { %v9047_v35 = vsel %vm800_vm14, %v9046_v33, 0.0  ;;  %v10053_v33 = vld [vmem:[%s12131_s8 + $0x890] sm:$0xff] }
0x520a   : > { %9048 = vadd.xlane.f32.xlu1 %v9047_v35  ;;  %v10052_v35 = vld [vmem:[%s12131_s8 + $0x888] sm:$0xff] }
0x5293   : > { %v9049_v47 = vpop.xlane.xlu1 %9048 }
0x5294   : > { %v9050_v49 = vmul.f32 0.015625, %v9049_v47 }
0x5296   : > { %v9051_v54 = vadd.f32 1e-05, %v9050_v49 }
0x5298   : > { %11718 = vrsqrt.f32 %v9051_v54 }
0x52a5   : > { %v11719_v31 = vpop.eup %11718 }
0x52a6   : > { %v9053_v56 = vmul.f32 %v11719_v31, %v9045_v25  ;;  %v10054_v25 = vld [vmem:[%s12131_s8 + $0x898] sm:$0xff] }
0x52a8   : > { %v9060_v60 = vmul.f32 %v10019_v55, %v9053_v56 }
0x52aa   : > { %v9067_v61 = vadd.f32 %v10020_v59, %v9060_v60 }
0x52ac   : > { %11469 = vmatmul.mubr.msk.f32.vlgmr.msra.gmra.mxu0 %vm800_vm14, %v9067_v61 }
0x52ad   : > { %11506 = vmatprep.mubr.msk.f32.mxu0 %vm11905_vm15, %v11904_v8  ;;  %11491 = vmatpush3.msra.mxu0 %v10058_v53 }
0x52ae   : > { %11492 = vmatprep.subr.mxu0 %v11904_v8 }
0x52af   : > { %11493 = vmatpush3.msra.mxu0 %v10057_v41 }
0x52b0   : > { %11494 = vmatprep.subr.mxu0 %v11904_v8 }
0x52b1   : > { %11495 = vmatpush3.msra.mxu0 %v10056_v32 }
0x52b2   : > { %11496 = vmatprep.subr.mxu0 %v11904_v8 }
0x52b3   : > { %11497 = vmatpush3.msra.mxu0 %v10055_v30 }
0x52b4   : > { %11498 = vmatprep.subr.mxu0 %v11904_v8 }
0x52b5   : > { %11499 = vmatpush3.msra.mxu0 %v10054_v25 }
0x52b6   : > { %11500 = vmatprep.subr.mxu0 %v11904_v8 }
0x52b7   : > { %11501 = vmatpush3.msra.mxu0 %v10053_v33 }
0x52b8   : > { %11502 = vmatprep.subr.mxu0 %v11904_v8 }
0x52b9   : > { %11503 = vmatpush3.msra.mxu0 %v10052_v35 }
0x52ba   : > { %11504 = vmatprep.subr.mxu0 %v11904_v8 }
0x52bb   : > { %11505 = vmatpush3.msra.mxu0 %v10051_v36 }
0x536c   : > { %v9154_v27 = vpop.f32.mrf.mxu0 }
0x536d   : > { %v9155_v58 = vadd.f32 %v10030_v1, %v9154_v27 }
0x536e   : > { %v11470_v14 = vpop.f32.mrf.mxu0 }
0x536f   : > { %v9158_v2 = vmax.f32 %v9155_v58, 0.0 }
0x5371   : > { %11488 = vmatmul.mubr.msk.f32.vlgmr.msra.gmra.mxu1 %vm800_vm14, %v9158_v2 }
0x5431   : > { %v9245_v57 = vpop.f32.mrf.mxu1 }
0x5432   : > { %v9246_v4 = vadd.f32 %v10041_v23, %v9245_v57 }
0x5433   : > { %v11489_v50 = vpop.f32.mrf.mxu1 }
0x5434   : > { %v9249_v5 = vadd.f32 %v9246_v4, %v9067_v61 }
0x5436   : > { %v9254_v51 = vsel %vm800_vm14, %v9249_v5, 0.0 }
0x5437   : > { %9255 = vadd.xlane.f32.xlu1 %v9254_v51 }
0x54c0   : > { %v9256_v6 = vpop.xlane.xlu1 %9255 }
0x54c1   : > { %v9257_v7 = vmul.f32 0.015625, %v9256_v6 }
0x54c3   : > { %v9258_v9 = vsub.f32 %v9249_v5, %v9257_v7 }
0x54c5   : > { %v9259_v10 = vmul.f32 %v9258_v9, %v9258_v9 }
0x54c7   : > { %v9260_v11 = vsel %vm800_vm14, %v9259_v10, 0.0 }
0x54c8   : > { %9261 = vadd.xlane.f32.xlu1 %v9260_v11 }
0x5551   : > { %v9262_v12 = vpop.xlane.xlu1 %9261 }
0x5552   : > { %v9263_v13 = vmul.f32 0.015625, %v9262_v12 }
0x5554   : > { %v9264_v3 = vadd.f32 1e-05, %v9263_v13 }
0x5556   : > { %11720 = vrsqrt.f32 %v9264_v3 }
0x5563   : > { %v11721_v38 = vpop.eup %11720 }
0x5564   : > { %v9266_v17 = vmul.f32 %v11721_v38, %v9258_v9 }
0x5566   : > { %v9273_v19 = vmul.f32 %v10045_v16, %v9266_v17 }
0x5568   : > { %v9280_v20 = vadd.f32 %v10046_v18, %v9273_v19 }
0x556a   : > { %v9285_v21 = vsel %vm800_vm14, %v9280_v20, 0.0 }
0x556b   : > { %9286 = vadd.xlane.f32.xlu0 %v9285_v21 }
0x55f4   : > { %v9287_v22 = vpop.xlane.xlu0 %9286 }
0x55f5   : > { %v9288_v15 = vmul.f32 0.015625, %v9287_v22 }
0x55f7   : > { %v9289_v24 = vsub.f32 %v9280_v20, %v9288_v15 }
0x55f9   : > { %v9290_v26 = vmul.f32 %v9289_v24, %v9289_v24 }
0x55fb   : > { %v9291_v28 = vsel %vm800_vm14, %v9290_v26, 0.0 }
0x55fc   : > { %9292 = vadd.xlane.f32.xlu1 %v9291_v28 }
0x5685   : > { %v9293_v37 = vpop.xlane.xlu1 %9292 }
0x5686   : > { %v9294_v52 = vmul.f32 0.015625, %v9293_v37 }
0x5688   : > { %v9295_v39 = vadd.f32 1e-05, %v9294_v52 }
0x568a   : > { %11722 = vrsqrt.f32 %v9295_v39 }
0x5697   : > { %v11723_v29 = vpop.eup %11722 }
0x5698   : > { %v9297_v42 = vmul.f32 %v11723_v29, %v9289_v24 }
0x569a   : > { %v9304_v44 = vmul.f32 %v10049_v40, %v9297_v42 }
0x569c   : > { %v9311_v46 = vadd.f32 %v10050_v43, %v9304_v44 }
0x569e   : > { %11507 = vmatmul.mubr.msk.f32.vlgmr.msra.gmra.mxu0 %vm800_vm14, %v9311_v46 }
0x575e   : > { %v9398_v48 = vpop.f32.mrf.mxu0 }
0x575f   : > { %v9399_v45 = vadd.f32 %v10060_v34, %v9398_v48 }
0x5760   : > { %v11508_v47 = vpop.f32.mrf.mxu0 }
0x5761   : > { %9402 = vst.msk [vmem:[%s12144_s21] sm:$0xff] %vm800_vm14, %v9399_v45 }
0x5762 PF: > { %p18_p3 = scmp.ge.s32.totalorder %s11955_s19, 5   ;;  %s13580_s15 = smov %s11868_s16 }
0x5763   : > { %s13581_s16 = smov %s11872_s17  ;;  %s13582_s17 = smov %s11965_s22 }
0x5764   : > { %s13583_s18 = smov %s11955_s19  ;;  %20 = sbr.rel (!%p18_p3) target bundleno = 6 (0x6), region = 206 }
0x5769   :  { %9422 = vsyncpa [#allocation5], 1 }
0x576a   :  { %9424 = vsyncpa [#allocation5 + $0x1], 1 }
0x576b   :  { %9425 = vsyncpa [#allocation7], 1 }
0x576c   :  { %9427 = vsyncpa [#allocation7 + $0x1], 1 }
0x576d   :  { %9428 = vsyncpa [#allocation10], 1 }
0x576e   :  { %9430 = vsyncpa [#allocation10 + $0x1], 1 }

</bundles_post_ra>
